<compile_context>
chip_gen: v6e
topology: v6e:2x2x1
jax: 0.10.0
libtpu: 0.0.40
codegen_flags: <defaults>
</compile_context>

<pallas_src>
import functools

import jax
import jax.numpy as jnp
from jax.experimental import pallas as pl
from jax.experimental.pallas import tpu as pltpu


# -----------------------------------------------------------------------------
# Small helpers
# -----------------------------------------------------------------------------
def _round_up(x, m):
    return ((x + m - 1) // m) * m


def _pick_tile(total, candidates=(1024, 512, 256, 128, 64, 32, 16, 8)):
    """Largest tile dividing `total`, preferring >= 2 grid tiles (v7x: 2 TCs)."""
    for c in candidates:
        if total % c == 0 and total // c >= 2:
            return c
    for c in candidates:
        if total % c == 0:
            return c
    return total


# -----------------------------------------------------------------------------
# Pallas kernels
# -----------------------------------------------------------------------------
def _mm_fused_kernel(x_ref, w_ref, scale_ref, bias_ref, o_ref, *, act):
    """o = act((x @ w) * scale + bias).  Single K step, bf16 operands, f32 accum."""
    y = jnp.dot(x_ref[...], w_ref[...], preferred_element_type=jnp.float32)
    y = y * scale_ref[...] + bias_ref[...]
    if act:
        y = jnp.maximum(y, 0.0)
    o_ref[...] = y.astype(o_ref.dtype)


def fused_matmul(x, w, scale, bias, *, act, out_dtype=jnp.bfloat16):
    """y = act((x @ w) * scale + bias).

    x: (M, K).  w: (Kp, Np) pre-padded, Np % 128 == 0, Kp % 8 == 0, Kp >= K.
    scale/bias: (1, Np) f32.  Returns (M, Np) in `out_dtype`.
    """
    M, K = x.shape
    Kp, Np = w.shape
    if K != Kp:                                   # zero-pad contraction dim (conv1: 27 -> 32)
        x = jnp.pad(x, ((0, 0), (0, Kp - K)))
    Mp = _round_up(M, 8)
    if Mp != M:                                   # tiny-batch FC-style inputs
        x = jnp.pad(x, ((0, Mp - M), (0, 0)))
    x = x.astype(jnp.bfloat16)

    tm = _pick_tile(Mp)
    kernel = functools.partial(_mm_fused_kernel, act=act)
    y = pl.pallas_call(
        kernel,
        out_shape=jax.ShapeDtypeStruct((Mp, Np), out_dtype),
        grid=(Mp // tm,),
        in_specs=[
            pl.BlockSpec((tm, Kp), lambda i: (i, 0)),
            pl.BlockSpec((Kp, Np), lambda i: (0, 0)),
            pl.BlockSpec((1, Np), lambda i: (0, 0)),
            pl.BlockSpec((1, Np), lambda i: (0, 0)),
        ],
        out_specs=pl.BlockSpec((tm, Np), lambda i: (i, 0)),
        compiler_params=pltpu.CompilerParams(dimension_semantics=("parallel",)),
    )(x, w, scale, bias)
    return y[:M] if Mp != M else y


def _maxpool_kernel(x_ref, o_ref, *, C):
    # x_ref: (tr, 2, Wo, 2*C) — a free view of NHWC rows; 2x2 window = (dim1, lane-halves).
    v = jnp.maximum(x_ref[:, 0, :, :], x_ref[:, 1, :, :])   # vertical max   (tr, Wo, 2C)
    o_ref[...] = jnp.maximum(v[:, :, :C], v[:, :, C:])       # horizontal max (tr, Wo, C)


def maxpool2x2(x_nhwc):
    N, H, W, C = x_nhwc.shape
    Ho, Wo = H // 2, W // 2
    R = N * Ho
    xr = x_nhwc.reshape(R, 2, Wo, 2 * C)          # free (contiguous) view — no stacked copy
    tr = _pick_tile(R, candidates=(512, 256, 128, 64, 32, 16, 8, 4, 2, 1))
    out = pl.pallas_call(
        functools.partial(_maxpool_kernel, C=C),
        out_shape=jax.ShapeDtypeStruct((R, Wo, C), x_nhwc.dtype),
        grid=(R // tr,),
        in_specs=[pl.BlockSpec((tr, 2, Wo, 2 * C), lambda i: (i, 0, 0, 0))],
        out_specs=pl.BlockSpec((tr, Wo, C), lambda i: (i, 0, 0)),
        compiler_params=pltpu.CompilerParams(dimension_semantics=("parallel",)),
    )(xr)
    return out.reshape(N, Ho, Wo, C)


def _fc_head_kernel(x_ref, w1_ref, b1_ref, w2_ref, b2_ref, o_ref):
    """Fused fc1 -> ReLU -> (Dropout: identity in eval) -> fc2."""
    h = jnp.dot(x_ref[...], w1_ref[...], preferred_element_type=jnp.float32)
    h = jnp.maximum(h + b1_ref[...], 0.0).astype(jnp.bfloat16)
    y = jnp.dot(h, w2_ref[...], preferred_element_type=jnp.float32) + b2_ref[...]
    o_ref[...] = y


def fc_head(x_flat, w1, b1, w2, b2, n_out):
    M, K = x_flat.shape
    Kp, H1 = w1.shape                 # (4096, 512)
    Np = w2.shape[1]                  # 128 (padded 10)
    Mp = _round_up(M, 8)
    x = x_flat
    if Mp != M:
        x = jnp.pad(x, ((0, Mp - M), (0, 0)))
    x = x.astype(jnp.bfloat16)
    tm = _pick_tile(Mp, candidates=(256, 128, 64, 32, 16, 8))   # keep VMEM modest (v5e)
    y = pl.pallas_call(
        _fc_head_kernel,
        out_shape=jax.ShapeDtypeStruct((Mp, Np), jnp.float32),
        grid=(Mp // tm,),
        in_specs=[
            pl.BlockSpec((tm, Kp), lambda i: (i, 0)),
            pl.BlockSpec((Kp, H1), lambda i: (0, 0)),
            pl.BlockSpec((1, H1), lambda i: (0, 0)),
            pl.BlockSpec((H1, Np), lambda i: (0, 0)),
            pl.BlockSpec((1, Np), lambda i: (0, 0)),
        ],
        out_specs=pl.BlockSpec((tm, Np), lambda i: (i, 0)),
        compiler_params=pltpu.CompilerParams(dimension_semantics=("parallel",)),
    )(x, w1, b1, w2, b2)
    return y[:M, :n_out]


# -----------------------------------------------------------------------------
# Glue: im2col, conv+bn+relu block, full forward
# -----------------------------------------------------------------------------
def im2col_3x3(x_nhwc):
    N, H, W, C = x_nhwc.shape
    xp = jnp.pad(x_nhwc, ((0, 0), (1, 1), (1, 1), (0, 0)))
    taps = [xp[:, dy:dy + H, dx:dx + W, :] for dy in range(3) for dx in range(3)]
    patches = jnp.concatenate(taps, axis=-1)       # (N, H, W, 9*C), order (dy, dx, c)
    return patches.reshape(N * H * W, 9 * C)


def conv3x3_bn_relu(x_nhwc, block):
    w2, scale, bias, cout = block
    N, H, W, _ = x_nhwc.shape
    patches = im2col_3x3(x_nhwc)                                 # (N*H*W, 9*Cin) bf16
    y = fused_matmul(patches, w2, scale, bias, act=True)         # (N*H*W, 128) bf16, lane-dense
    return y[:, :cout].reshape(N, H, W, cout)


def maxpool_cnn_forward(x_nchw, p):
    x = jnp.transpose(x_nchw, (0, 2, 3, 1)).astype(jnp.bfloat16)   # NCHW -> NHWC
    x = conv3x3_bn_relu(x, p["conv1"])       # (N, 32, 32, 32)
    x = conv3x3_bn_relu(x, p["conv2"])       # (N, 32, 32, 32)
    x = maxpool2x2(x)                        # (N, 16, 16, 32)
    x = conv3x3_bn_relu(x, p["conv3"])       # (N, 16, 16, 64)
    x = conv3x3_bn_relu(x, p["conv4"])       # (N, 16, 16, 64)
    x = maxpool2x2(x)                        # (N, 8, 8, 64)

    n = x.shape[0]
    x = x.reshape(n, -1)                     # NHWC flatten; fc1 rows pre-permuted to match
    w1p, b1p, w2p, b2p, nout = p["fc"]
    return fc_head(x, w1p, b1p, w2p, b2p, nout)   # (n, 10) f32


# -----------------------------------------------------------------------------
# Parameter init (PyTorch-like shapes) and one-time kernel-layout preparation
# -----------------------------------------------------------------------------
def init_params(key):
    ks = iter(jax.random.split(key, 16))

    def nrm(shape, s=0.05):
        return (jax.random.normal(next(ks), shape) * s).astype(jnp.float32)

    def conv_block(cout, cin):
        w = nrm((cout, cin, 3, 3))
        b = nrm((cout,))
        gamma = jnp.ones((cout,), jnp.float32)
        beta = jnp.zeros((cout,), jnp.float32)
        rmean = jnp.zeros((cout,), jnp.float32)
        rvar = jnp.ones((cout,), jnp.float32)
        return (w, b, gamma, beta, rmean, rvar)

    return {
        "conv1": conv_block(32, 3),
        "conv2": conv_block(32, 32),
        "conv3": conv_block(64, 32),
        "conv4": conv_block(64, 64),
        "fc1": (nrm((512, 64 * 8 * 8)), nrm((512,))),
        "fc2": (nrm((10, 512)), nrm((10,))),
    }


def prepare_params(params, eps=1e-5):
    """One-time layout plumbing: BN fold, transpose, K/Cout padding, bf16 casts."""
    prepped = {}
    for name in ("conv1", "conv2", "conv3", "conv4"):
        w, b, gamma, beta, rmean, rvar = params[name]
        cout, cin = int(w.shape[0]), int(w.shape[1])
        k, kp, np_ = 9 * cin, _round_up(9 * cin, 8), _round_up(cout, 128)
        # (Cout, Cin, kh, kw) -> (kh, kw, Cin, Cout) -> (9*Cin, Cout) matches im2col order.
        w2 = jnp.transpose(w, (2, 3, 1, 0)).reshape(k, cout)
        w2 = jnp.pad(w2, ((0, kp - k), (0, np_ - cout))).astype(jnp.bfloat16)
        scale = gamma / jnp.sqrt(rvar + eps)
        bias = beta + (b - rmean) * scale
        scale = jnp.pad(scale, (0, np_ - cout)).reshape(1, np_).astype(jnp.float32)
        bias = jnp.pad(bias, (0, np_ - cout)).reshape(1, np_).astype(jnp.float32)
        prepped[name] = (w2, scale, bias, cout)

    w1, b1 = params["fc1"]                         # (512, 4096=C*H*W NCHW order), (512,)
    hdim = int(w1.shape[0])
    # Fold the PyTorch NCHW flatten into the weight rows -> forward flattens NHWC directly.
    w1_nhwc = w1.reshape(hdim, 64, 8, 8).transpose(0, 2, 3, 1).reshape(hdim, 8 * 8 * 64)
    w1p = jnp.transpose(w1_nhwc).astype(jnp.bfloat16)            # (4096, 512)
    b1p = b1.reshape(1, hdim).astype(jnp.float32)

    w2, b2 = params["fc2"]                         # (10, 512), (10,)
    nout = int(w2.shape[0])
    np2 = _round_up(nout, 128)
    w2p = jnp.pad(jnp.transpose(w2), ((0, 0), (0, np2 - nout))).astype(jnp.bfloat16)  # (512, 128)
    b2p = jnp.pad(b2, (0, np2 - nout)).reshape(1, np2).astype(jnp.float32)
    prepped["fc"] = (w1p, b1p, w2p, b2p, nout)
    return prepped


if __name__ == "__main__":
    key = jax.random.PRNGKey(0)
    pkey, xkey = jax.random.split(key)
    params = prepare_params(init_params(pkey))
    x = jax.random.normal(xkey, (2, 3, 32, 32), dtype=jnp.float32)

    # Close over params so the static ints (true Cout / n_out) stay Python ints under jit.
    fwd = jax.jit(lambda xx: maxpool_cnn_forward(xx, params))
    out = jax.block_until_ready(fwd(x))

    assert out.shape == (2, 10), out.shape
    assert bool(jnp.all(jnp.isfinite(out)))
    print("KERNEL_OK")
</pallas_src>

<mosaic_0001>
module attributes {stable_mosaic.version = 11 : i64} {
  func.func @_mm_fused_kernel(%arg0: i32, %arg1: memref<1024x32xbf16, #tpu.memory_space<vmem>>, %arg2: memref<32x128xbf16, #tpu.memory_space<vmem>>, %arg3: memref<1x128xf32, #tpu.memory_space<vmem>>, %arg4: memref<1x128xf32, #tpu.memory_space<vmem>>, %arg5: memref<1024x128xbf16, #tpu.memory_space<vmem>>) attributes {dimension_semantics = [#tpu.dimension_semantics<parallel>], iteration_bounds = array<i64: 2>, scalar_prefetch = 0 : i64, scratch_operands = 0 : i64, tpu.core_type = #tpu.core_type<tc>, window_params = [{transform_indices = @transform_0, window_bounds = array<i64: 1024, 32>}, {pipeline_mode = #tpu.pipeline_mode<synchronous>, transform_indices = @transform_1, window_bounds = array<i64: 32, 128>}, {pipeline_mode = #tpu.pipeline_mode<synchronous>, transform_indices = @transform_2, window_bounds = array<i64: 1, 128>}, {pipeline_mode = #tpu.pipeline_mode<synchronous>, transform_indices = @transform_3, window_bounds = array<i64: 1, 128>}, {transform_indices = @transform_4, window_bounds = array<i64: 1024, 128>}]} {
    %c0 = arith.constant 0 : index
    %c0_0 = arith.constant 0 : index
    %0 = vector.load %arg1[%c0, %c0_0] : memref<1024x32xbf16, #tpu.memory_space<vmem>>, vector<1024x32xbf16>
    %c0_1 = arith.constant 0 : index
    %c0_2 = arith.constant 0 : index
    %1 = vector.load %arg2[%c0_1, %c0_2] : memref<32x128xbf16, #tpu.memory_space<vmem>>, vector<32x128xbf16>
    %cst = arith.constant dense<0.000000e+00> : vector<1024x128xf32>
    %2 = tpu.matmul %0, %1, %cst {dimension_numbers = #tpu.dot_dimension_numbers<[1], [0], [0], [1], [0, 0, 1, 1], [], []>} : vector<1024x32xbf16>, vector<32x128xbf16>, vector<1024x128xf32> -> vector<1024x128xf32>
    %c0_3 = arith.constant 0 : index
    %c0_4 = arith.constant 0 : index
    %3 = vector.load %arg3[%c0_3, %c0_4] : memref<1x128xf32, #tpu.memory_space<vmem>>, vector<1x128xf32>
    %4 = vector.broadcast %3 : vector<1x128xf32> to vector<1024x128xf32>
    %5 = arith.mulf %2, %4 : vector<1024x128xf32>
    %c0_5 = arith.constant 0 : index
    %c0_6 = arith.constant 0 : index
    %6 = vector.load %arg4[%c0_5, %c0_6] : memref<1x128xf32, #tpu.memory_space<vmem>>, vector<1x128xf32>
    %7 = vector.broadcast %6 : vector<1x128xf32> to vector<1024x128xf32>
    %8 = arith.addf %5, %7 : vector<1024x128xf32>
    %cst_7 = arith.constant 0.000000e+00 : f32
    %9 = vector.broadcast %cst_7 : f32 to vector<1024x128xf32>
    %10 = arith.maximumf %8, %9 : vector<1024x128xf32>
    %11 = arith.truncf %10 : vector<1024x128xf32> to vector<1024x128xbf16>
    %c0_8 = arith.constant 0 : index
    %c0_9 = arith.constant 0 : index
    %12 = vector.load %arg5[%c0_8, %c0_9] : memref<1024x128xbf16, #tpu.memory_space<vmem>>, vector<1024x128xbf16>
    tpu.vector_store %arg5[%c0_8, %c0_9], %11 {strides = array<i32>} : memref<1024x128xbf16, #tpu.memory_space<vmem>>, vector<1024x128xbf16>,
    return
  }
  func.func @transform_0(%arg0: i32) -> (i32, i32) {
    %c0_i32 = arith.constant 0 : i32
    %c0_i32_0 = arith.constant 0 : i32
    return %arg0, %c0_i32 : i32, i32
  }
  func.func @transform_1(%arg0: i32) -> (i32, i32) {
    %c0_i32 = arith.constant 0 : i32
    %c0_i32_0 = arith.constant 0 : i32
    %c0_i32_1 = arith.constant 0 : i32
    return %c0_i32, %c0_i32_0 : i32, i32
  }
  func.func @transform_2(%arg0: i32) -> (i32, i32) {
    %c0_i32 = arith.constant 0 : i32
    %c0_i32_0 = arith.constant 0 : i32
    %c0_i32_1 = arith.constant 0 : i32
    return %c0_i32, %c0_i32_0 : i32, i32
  }
  func.func @transform_3(%arg0: i32) -> (i32, i32) {
    %c0_i32 = arith.constant 0 : i32
    %c0_i32_0 = arith.constant 0 : i32
    %c0_i32_1 = arith.constant 0 : i32
    return %c0_i32, %c0_i32_0 : i32, i32
  }
  func.func @transform_4(%arg0: i32) -> (i32, i32) {
    %c0_i32 = arith.constant 0 : i32
    %c0_i32_0 = arith.constant 0 : i32
    return %arg0, %c0_i32 : i32, i32
  }
}

module attributes {stable_mosaic.version = 11 : i64} {
  func.func @_mm_fused_kernel(%arg0: i32, %arg1: memref<1024x288xbf16, #tpu.memory_space<vmem>>, %arg2: memref<288x128xbf16, #tpu.memory_space<vmem>>, %arg3: memref<1x128xf32, #tpu.memory_space<vmem>>, %arg4: memref<1x128xf32, #tpu.memory_space<vmem>>, %arg5: memref<1024x128xbf16, #tpu.memory_space<vmem>>) attributes {dimension_semantics = [#tpu.dimension_semantics<parallel>], iteration_bounds = array<i64: 2>, scalar_prefetch = 0 : i64, scratch_operands = 0 : i64, tpu.core_type = #tpu.core_type<tc>, window_params = [{transform_indices = @transform_0, window_bounds = array<i64: 1024, 288>}, {pipeline_mode = #tpu.pipeline_mode<synchronous>, transform_indices = @transform_1, window_bounds = array<i64: 288, 128>}, {pipeline_mode = #tpu.pipeline_mode<synchronous>, transform_indices = @transform_2, window_bounds = array<i64: 1, 128>}, {pipeline_mode = #tpu.pipeline_mode<synchronous>, transform_indices = @transform_3, window_bounds = array<i64: 1, 128>}, {transform_indices = @transform_4, window_bounds = array<i64: 1024, 128>}]} {
    %c0 = arith.constant 0 : index
    %c0_0 = arith.constant 0 : index
    %0 = vector.load %arg1[%c0, %c0_0] : memref<1024x288xbf16, #tpu.memory_space<vmem>>, vector<1024x288xbf16>
    %c0_1 = arith.constant 0 : index
    %c0_2 = arith.constant 0 : index
    %1 = vector.load %arg2[%c0_1, %c0_2] : memref<288x128xbf16, #tpu.memory_space<vmem>>, vector<288x128xbf16>
    %cst = arith.constant dense<0.000000e+00> : vector<1024x128xf32>
    %2 = tpu.matmul %0, %1, %cst {dimension_numbers = #tpu.dot_dimension_numbers<[1], [0], [0], [1], [0, 0, 1, 1], [], []>} : vector<1024x288xbf16>, vector<288x128xbf16>, vector<1024x128xf32> -> vector<1024x128xf32>
    %c0_3 = arith.constant 0 : index
    %c0_4 = arith.constant 0 : index
    %3 = vector.load %arg3[%c0_3, %c0_4] : memref<1x128xf32, #tpu.memory_space<vmem>>, vector<1x128xf32>
    %4 = vector.broadcast %3 : vector<1x128xf32> to vector<1024x128xf32>
    %5 = arith.mulf %2, %4 : vector<1024x128xf32>
    %c0_5 = arith.constant 0 : index
    %c0_6 = arith.constant 0 : index
    %6 = vector.load %arg4[%c0_5, %c0_6] : memref<1x128xf32, #tpu.memory_space<vmem>>, vector<1x128xf32>
    %7 = vector.broadcast %6 : vector<1x128xf32> to vector<1024x128xf32>
    %8 = arith.addf %5, %7 : vector<1024x128xf32>
    %cst_7 = arith.constant 0.000000e+00 : f32
    %9 = vector.broadcast %cst_7 : f32 to vector<1024x128xf32>
    %10 = arith.maximumf %8, %9 : vector<1024x128xf32>
    %11 = arith.truncf %10 : vector<1024x128xf32> to vector<1024x128xbf16>
    %c0_8 = arith.constant 0 : index
    %c0_9 = arith.constant 0 : index
    %12 = vector.load %arg5[%c0_8, %c0_9] : memref<1024x128xbf16, #tpu.memory_space<vmem>>, vector<1024x128xbf16>
    tpu.vector_store %arg5[%c0_8, %c0_9], %11 {strides = array<i32>} : memref<1024x128xbf16, #tpu.memory_space<vmem>>, vector<1024x128xbf16>,
    return
  }
  func.func @transform_0(%arg0: i32) -> (i32, i32) {
    %c0_i32 = arith.constant 0 : i32
    %c0_i32_0 = arith.constant 0 : i32
    return %arg0, %c0_i32 : i32, i32
  }
  func.func @transform_1(%arg0: i32) -> (i32, i32) {
    %c0_i32 = arith.constant 0 : i32
    %c0_i32_0 = arith.constant 0 : i32
    %c0_i32_1 = arith.constant 0 : i32
    return %c0_i32, %c0_i32_0 : i32, i32
  }
  func.func @transform_2(%arg0: i32) -> (i32, i32) {
    %c0_i32 = arith.constant 0 : i32
    %c0_i32_0 = arith.constant 0 : i32
    %c0_i32_1 = arith.constant 0 : i32
    return %c0_i32, %c0_i32_0 : i32, i32
  }
  func.func @transform_3(%arg0: i32) -> (i32, i32) {
    %c0_i32 = arith.constant 0 : i32
    %c0_i32_0 = arith.constant 0 : i32
    %c0_i32_1 = arith.constant 0 : i32
    return %c0_i32, %c0_i32_0 : i32, i32
  }
  func.func @transform_4(%arg0: i32) -> (i32, i32) {
    %c0_i32 = arith.constant 0 : i32
    %c0_i32_0 = arith.constant 0 : i32
    return %arg0, %c0_i32 : i32, i32
  }
}

module attributes {stable_mosaic.version = 11 : i64} {
  func.func @_maxpool_kernel(%arg0: i32, %arg1: memref<16x2x16x64xbf16, #tpu.memory_space<vmem>>, %arg2: memref<16x16x32xbf16, #tpu.memory_space<vmem>>) attributes {dimension_semantics = [#tpu.dimension_semantics<parallel>], iteration_bounds = array<i64: 2>, scalar_prefetch = 0 : i64, scratch_operands = 0 : i64, tpu.core_type = #tpu.core_type<tc>, window_params = [{transform_indices = @transform_0, window_bounds = array<i64: 16, 2, 16, 64>}, {transform_indices = @transform_1, window_bounds = array<i64: 16, 16, 32>}]} {
    %c0 = arith.constant 0 : index
    %c0_0 = arith.constant 0 : index
    %c0_1 = arith.constant 0 : index
    %c0_2 = arith.constant 0 : index
    %0 = vector.load %arg1[%c0, %c0_0, %c0_1, %c0_2] : memref<16x2x16x64xbf16, #tpu.memory_space<vmem>>, vector<16x1x16x64xbf16>
    %1 = vector.shape_cast %0 : vector<16x1x16x64xbf16> to vector<16x16x64xbf16>
    %c0_3 = arith.constant 0 : index
    %c1 = arith.constant 1 : index
    %c0_4 = arith.constant 0 : index
    %c0_5 = arith.constant 0 : index
    %2 = vector.load %arg1[%c0_3, %c1, %c0_4, %c0_5] : memref<16x2x16x64xbf16, #tpu.memory_space<vmem>>, vector<16x1x16x64xbf16>
    %3 = vector.shape_cast %2 : vector<16x1x16x64xbf16> to vector<16x16x64xbf16>
    %4 = arith.maximumf %1, %3 : vector<16x16x64xbf16>
    %5 = vector.extract_strided_slice %4 {offsets = [0, 0, 0], sizes = [16, 16, 32], strides = [1, 1, 1]} : vector<16x16x64xbf16> to vector<16x16x32xbf16>
    %6 = vector.extract_strided_slice %4 {offsets = [0, 0, 32], sizes = [16, 16, 32], strides = [1, 1, 1]} : vector<16x16x64xbf16> to vector<16x16x32xbf16>
    %7 = arith.maximumf %5, %6 : vector<16x16x32xbf16>
    %c0_6 = arith.constant 0 : index
    %c0_7 = arith.constant 0 : index
    %c0_8 = arith.constant 0 : index
    %8 = vector.load %arg2[%c0_6, %c0_7, %c0_8] : memref<16x16x32xbf16, #tpu.memory_space<vmem>>, vector<16x16x32xbf16>
    tpu.vector_store %arg2[%c0_6, %c0_7, %c0_8], %7 {strides = array<i32>} : memref<16x16x32xbf16, #tpu.memory_space<vmem>>, vector<16x16x32xbf16>,
    return
  }
  func.func @transform_0(%arg0: i32) -> (i32, i32, i32, i32) {
    %c0_i32 = arith.constant 0 : i32
    %c0_i32_0 = arith.constant 0 : i32
    %c0_i32_1 = arith.constant 0 : i32
    %c0_i32_2 = arith.constant 0 : i32
    return %arg0, %c0_i32, %c0_i32_0, %c0_i32_1 : i32, i32, i32, i32
  }
  func.func @transform_1(%arg0: i32) -> (i32, i32, i32) {
    %c0_i32 = arith.constant 0 : i32
    %c0_i32_0 = arith.constant 0 : i32
    %c0_i32_1 = arith.constant 0 : i32
    return %arg0, %c0_i32, %c0_i32_0 : i32, i32, i32
  }
}

module attributes {stable_mosaic.version = 11 : i64} {
  func.func @_mm_fused_kernel(%arg0: i32, %arg1: memref<256x288xbf16, #tpu.memory_space<vmem>>, %arg2: memref<288x128xbf16, #tpu.memory_space<vmem>>, %arg3: memref<1x128xf32, #tpu.memory_space<vmem>>, %arg4: memref<1x128xf32, #tpu.memory_space<vmem>>, %arg5: memref<256x128xbf16, #tpu.memory_space<vmem>>) attributes {dimension_semantics = [#tpu.dimension_semantics<parallel>], iteration_bounds = array<i64: 2>, scalar_prefetch = 0 : i64, scratch_operands = 0 : i64, tpu.core_type = #tpu.core_type<tc>, window_params = [{transform_indices = @transform_0, window_bounds = array<i64: 256, 288>}, {pipeline_mode = #tpu.pipeline_mode<synchronous>, transform_indices = @transform_1, window_bounds = array<i64: 288, 128>}, {pipeline_mode = #tpu.pipeline_mode<synchronous>, transform_indices = @transform_2, window_bounds = array<i64: 1, 128>}, {pipeline_mode = #tpu.pipeline_mode<synchronous>, transform_indices = @transform_3, window_bounds = array<i64: 1, 128>}, {transform_indices = @transform_4, window_bounds = array<i64: 256, 128>}]} {
    %c0 = arith.constant 0 : index
    %c0_0 = arith.constant 0 : index
    %0 = vector.load %arg1[%c0, %c0_0] : memref<256x288xbf16, #tpu.memory_space<vmem>>, vector<256x288xbf16>
    %c0_1 = arith.constant 0 : index
    %c0_2 = arith.constant 0 : index
    %1 = vector.load %arg2[%c0_1, %c0_2] : memref<288x128xbf16, #tpu.memory_space<vmem>>, vector<288x128xbf16>
    %cst = arith.constant dense<0.000000e+00> : vector<256x128xf32>
    %2 = tpu.matmul %0, %1, %cst {dimension_numbers = #tpu.dot_dimension_numbers<[1], [0], [0], [1], [0, 0, 1, 1], [], []>} : vector<256x288xbf16>, vector<288x128xbf16>, vector<256x128xf32> -> vector<256x128xf32>
    %c0_3 = arith.constant 0 : index
    %c0_4 = arith.constant 0 : index
    %3 = vector.load %arg3[%c0_3, %c0_4] : memref<1x128xf32, #tpu.memory_space<vmem>>, vector<1x128xf32>
    %4 = vector.broadcast %3 : vector<1x128xf32> to vector<256x128xf32>
    %5 = arith.mulf %2, %4 : vector<256x128xf32>
    %c0_5 = arith.constant 0 : index
    %c0_6 = arith.constant 0 : index
    %6 = vector.load %arg4[%c0_5, %c0_6] : memref<1x128xf32, #tpu.memory_space<vmem>>, vector<1x128xf32>
    %7 = vector.broadcast %6 : vector<1x128xf32> to vector<256x128xf32>
    %8 = arith.addf %5, %7 : vector<256x128xf32>
    %cst_7 = arith.constant 0.000000e+00 : f32
    %9 = vector.broadcast %cst_7 : f32 to vector<256x128xf32>
    %10 = arith.maximumf %8, %9 : vector<256x128xf32>
    %11 = arith.truncf %10 : vector<256x128xf32> to vector<256x128xbf16>
    %c0_8 = arith.constant 0 : index
    %c0_9 = arith.constant 0 : index
    %12 = vector.load %arg5[%c0_8, %c0_9] : memref<256x128xbf16, #tpu.memory_space<vmem>>, vector<256x128xbf16>
    tpu.vector_store %arg5[%c0_8, %c0_9], %11 {strides = array<i32>} : memref<256x128xbf16, #tpu.memory_space<vmem>>, vector<256x128xbf16>,
    return
  }
  func.func @transform_0(%arg0: i32) -> (i32, i32) {
    %c0_i32 = arith.constant 0 : i32
    %c0_i32_0 = arith.constant 0 : i32
    return %arg0, %c0_i32 : i32, i32
  }
  func.func @transform_1(%arg0: i32) -> (i32, i32) {
    %c0_i32 = arith.constant 0 : i32
    %c0_i32_0 = arith.constant 0 : i32
    %c0_i32_1 = arith.constant 0 : i32
    return %c0_i32, %c0_i32_0 : i32, i32
  }
  func.func @transform_2(%arg0: i32) -> (i32, i32) {
    %c0_i32 = arith.constant 0 : i32
    %c0_i32_0 = arith.constant 0 : i32
    %c0_i32_1 = arith.constant 0 : i32
    return %c0_i32, %c0_i32_0 : i32, i32
  }
  func.func @transform_3(%arg0: i32) -> (i32, i32) {
    %c0_i32 = arith.constant 0 : i32
    %c0_i32_0 = arith.constant 0 : i32
    %c0_i32_1 = arith.constant 0 : i32
    return %c0_i32, %c0_i32_0 : i32, i32
  }
  func.func @transform_4(%arg0: i32) -> (i32, i32) {
    %c0_i32 = arith.constant 0 : i32
    %c0_i32_0 = arith.constant 0 : i32
    return %arg0, %c0_i32 : i32, i32
  }
}

module attributes {stable_mosaic.version = 11 : i64} {
  func.func @_mm_fused_kernel(%arg0: i32, %arg1: memref<256x576xbf16, #tpu.memory_space<vmem>>, %arg2: memref<576x128xbf16, #tpu.memory_space<vmem>>, %arg3: memref<1x128xf32, #tpu.memory_space<vmem>>, %arg4: memref<1x128xf32, #tpu.memory_space<vmem>>, %arg5: memref<256x128xbf16, #tpu.memory_space<vmem>>) attributes {dimension_semantics = [#tpu.dimension_semantics<parallel>], iteration_bounds = array<i64: 2>, scalar_prefetch = 0 : i64, scratch_operands = 0 : i64, tpu.core_type = #tpu.core_type<tc>, window_params = [{transform_indices = @transform_0, window_bounds = array<i64: 256, 576>}, {pipeline_mode = #tpu.pipeline_mode<synchronous>, transform_indices = @transform_1, window_bounds = array<i64: 576, 128>}, {pipeline_mode = #tpu.pipeline_mode<synchronous>, transform_indices = @transform_2, window_bounds = array<i64: 1, 128>}, {pipeline_mode = #tpu.pipeline_mode<synchronous>, transform_indices = @transform_3, window_bounds = array<i64: 1, 128>}, {transform_indices = @transform_4, window_bounds = array<i64: 256, 128>}]} {
    %c0 = arith.constant 0 : index
    %c0_0 = arith.constant 0 : index
    %0 = vector.load %arg1[%c0, %c0_0] : memref<256x576xbf16, #tpu.memory_space<vmem>>, vector<256x576xbf16>
    %c0_1 = arith.constant 0 : index
    %c0_2 = arith.constant 0 : index
    %1 = vector.load %arg2[%c0_1, %c0_2] : memref<576x128xbf16, #tpu.memory_space<vmem>>, vector<576x128xbf16>
    %cst = arith.constant dense<0.000000e+00> : vector<256x128xf32>
    %2 = tpu.matmul %0, %1, %cst {dimension_numbers = #tpu.dot_dimension_numbers<[1], [0], [0], [1], [0, 0, 1, 1], [], []>} : vector<256x576xbf16>, vector<576x128xbf16>, vector<256x128xf32> -> vector<256x128xf32>
    %c0_3 = arith.constant 0 : index
    %c0_4 = arith.constant 0 : index
    %3 = vector.load %arg3[%c0_3, %c0_4] : memref<1x128xf32, #tpu.memory_space<vmem>>, vector<1x128xf32>
    %4 = vector.broadcast %3 : vector<1x128xf32> to vector<256x128xf32>
    %5 = arith.mulf %2, %4 : vector<256x128xf32>
    %c0_5 = arith.constant 0 : index
    %c0_6 = arith.constant 0 : index
    %6 = vector.load %arg4[%c0_5, %c0_6] : memref<1x128xf32, #tpu.memory_space<vmem>>, vector<1x128xf32>
    %7 = vector.broadcast %6 : vector<1x128xf32> to vector<256x128xf32>
    %8 = arith.addf %5, %7 : vector<256x128xf32>
    %cst_7 = arith.constant 0.000000e+00 : f32
    %9 = vector.broadcast %cst_7 : f32 to vector<256x128xf32>
    %10 = arith.maximumf %8, %9 : vector<256x128xf32>
    %11 = arith.truncf %10 : vector<256x128xf32> to vector<256x128xbf16>
    %c0_8 = arith.constant 0 : index
    %c0_9 = arith.constant 0 : index
    %12 = vector.load %arg5[%c0_8, %c0_9] : memref<256x128xbf16, #tpu.memory_space<vmem>>, vector<256x128xbf16>
    tpu.vector_store %arg5[%c0_8, %c0_9], %11 {strides = array<i32>} : memref<256x128xbf16, #tpu.memory_space<vmem>>, vector<256x128xbf16>,
    return
  }
  func.func @transform_0(%arg0: i32) -> (i32, i32) {
    %c0_i32 = arith.constant 0 : i32
    %c0_i32_0 = arith.constant 0 : i32
    return %arg0, %c0_i32 : i32, i32
  }
  func.func @transform_1(%arg0: i32) -> (i32, i32) {
    %c0_i32 = arith.constant 0 : i32
    %c0_i32_0 = arith.constant 0 : i32
    %c0_i32_1 = arith.constant 0 : i32
    return %c0_i32, %c0_i32_0 : i32, i32
  }
  func.func @transform_2(%arg0: i32) -> (i32, i32) {
    %c0_i32 = arith.constant 0 : i32
    %c0_i32_0 = arith.constant 0 : i32
    %c0_i32_1 = arith.constant 0 : i32
    return %c0_i32, %c0_i32_0 : i32, i32
  }
  func.func @transform_3(%arg0: i32) -> (i32, i32) {
    %c0_i32 = arith.constant 0 : i32
    %c0_i32_0 = arith.constant 0 : i32
    %c0_i32_1 = arith.constant 0 : i32
    return %c0_i32, %c0_i32_0 : i32, i32
  }
  func.func @transform_4(%arg0: i32) -> (i32, i32) {
    %c0_i32 = arith.constant 0 : i32
    %c0_i32_0 = arith.constant 0 : i32
    return %arg0, %c0_i32 : i32, i32
  }
}

module attributes {stable_mosaic.version = 11 : i64} {
  func.func @_maxpool_kernel(%arg0: i32, %arg1: memref<8x2x8x128xbf16, #tpu.memory_space<vmem>>, %arg2: memref<8x8x64xbf16, #tpu.memory_space<vmem>>) attributes {dimension_semantics = [#tpu.dimension_semantics<parallel>], iteration_bounds = array<i64: 2>, scalar_prefetch = 0 : i64, scratch_operands = 0 : i64, tpu.core_type = #tpu.core_type<tc>, window_params = [{transform_indices = @transform_0, window_bounds = array<i64: 8, 2, 8, 128>}, {transform_indices = @transform_1, window_bounds = array<i64: 8, 8, 64>}]} {
    %c0 = arith.constant 0 : index
    %c0_0 = arith.constant 0 : index
    %c0_1 = arith.constant 0 : index
    %c0_2 = arith.constant 0 : index
    %0 = vector.load %arg1[%c0, %c0_0, %c0_1, %c0_2] : memref<8x2x8x128xbf16, #tpu.memory_space<vmem>>, vector<8x1x8x128xbf16>
    %1 = vector.shape_cast %0 : vector<8x1x8x128xbf16> to vector<8x8x128xbf16>
    %c0_3 = arith.constant 0 : index
    %c1 = arith.constant 1 : index
    %c0_4 = arith.constant 0 : index
    %c0_5 = arith.constant 0 : index
    %2 = vector.load %arg1[%c0_3, %c1, %c0_4, %c0_5] : memref<8x2x8x128xbf16, #tpu.memory_space<vmem>>, vector<8x1x8x128xbf16>
    %3 = vector.shape_cast %2 : vector<8x1x8x128xbf16> to vector<8x8x128xbf16>
    %4 = arith.maximumf %1, %3 : vector<8x8x128xbf16>
    %5 = vector.extract_strided_slice %4 {offsets = [0, 0, 0], sizes = [8, 8, 64], strides = [1, 1, 1]} : vector<8x8x128xbf16> to vector<8x8x64xbf16>
    %6 = vector.extract_strided_slice %4 {offsets = [0, 0, 64], sizes = [8, 8, 64], strides = [1, 1, 1]} : vector<8x8x128xbf16> to vector<8x8x64xbf16>
    %7 = arith.maximumf %5, %6 : vector<8x8x64xbf16>
    %c0_6 = arith.constant 0 : index
    %c0_7 = arith.constant 0 : index
    %c0_8 = arith.constant 0 : index
    %8 = vector.load %arg2[%c0_6, %c0_7, %c0_8] : memref<8x8x64xbf16, #tpu.memory_space<vmem>>, vector<8x8x64xbf16>
    tpu.vector_store %arg2[%c0_6, %c0_7, %c0_8], %7 {strides = array<i32>} : memref<8x8x64xbf16, #tpu.memory_space<vmem>>, vector<8x8x64xbf16>,
    return
  }
  func.func @transform_0(%arg0: i32) -> (i32, i32, i32, i32) {
    %c0_i32 = arith.constant 0 : i32
    %c0_i32_0 = arith.constant 0 : i32
    %c0_i32_1 = arith.constant 0 : i32
    %c0_i32_2 = arith.constant 0 : i32
    return %arg0, %c0_i32, %c0_i32_0, %c0_i32_1 : i32, i32, i32, i32
  }
  func.func @transform_1(%arg0: i32) -> (i32, i32, i32) {
    %c0_i32 = arith.constant 0 : i32
    %c0_i32_0 = arith.constant 0 : i32
    %c0_i32_1 = arith.constant 0 : i32
    return %arg0, %c0_i32, %c0_i32_0 : i32, i32, i32
  }
}

module attributes {stable_mosaic.version = 11 : i64} {
  func.func @_fc_head_kernel(%arg0: i32, %arg1: memref<8x4096xbf16, #tpu.memory_space<vmem>>, %arg2: memref<4096x512xbf16, #tpu.memory_space<vmem>>, %arg3: memref<1x512xf32, #tpu.memory_space<vmem>>, %arg4: memref<512x128xbf16, #tpu.memory_space<vmem>>, %arg5: memref<1x128xf32, #tpu.memory_space<vmem>>, %arg6: memref<8x128xf32, #tpu.memory_space<vmem>>) attributes {dimension_semantics = [#tpu.dimension_semantics<parallel>], iteration_bounds = array<i64: 1>, scalar_prefetch = 0 : i64, scratch_operands = 0 : i64, tpu.core_type = #tpu.core_type<tc>, window_params = [{transform_indices = @transform_0, window_bounds = array<i64: 8, 4096>}, {pipeline_mode = #tpu.pipeline_mode<synchronous>, transform_indices = @transform_1, window_bounds = array<i64: 4096, 512>}, {pipeline_mode = #tpu.pipeline_mode<synchronous>, transform_indices = @transform_2, window_bounds = array<i64: 1, 512>}, {pipeline_mode = #tpu.pipeline_mode<synchronous>, transform_indices = @transform_3, window_bounds = array<i64: 512, 128>}, {pipeline_mode = #tpu.pipeline_mode<synchronous>, transform_indices = @transform_4, window_bounds = array<i64: 1, 128>}, {transform_indices = @transform_5, window_bounds = array<i64: 8, 128>}]} {
    %c0 = arith.constant 0 : index
    %c0_0 = arith.constant 0 : index
    %0 = vector.load %arg1[%c0, %c0_0] : memref<8x4096xbf16, #tpu.memory_space<vmem>>, vector<8x4096xbf16>
    %c0_1 = arith.constant 0 : index
    %c0_2 = arith.constant 0 : index
    %1 = vector.load %arg2[%c0_1, %c0_2] : memref<4096x512xbf16, #tpu.memory_space<vmem>>, vector<4096x512xbf16>
    %cst = arith.constant dense<0.000000e+00> : vector<8x512xf32>
    %2 = tpu.matmul %0, %1, %cst {dimension_numbers = #tpu.dot_dimension_numbers<[1], [0], [0], [1], [0, 0, 1, 1], [], []>} : vector<8x4096xbf16>, vector<4096x512xbf16>, vector<8x512xf32> -> vector<8x512xf32>
    %c0_3 = arith.constant 0 : index
    %c0_4 = arith.constant 0 : index
    %3 = vector.load %arg3[%c0_3, %c0_4] : memref<1x512xf32, #tpu.memory_space<vmem>>, vector<1x512xf32>
    %4 = vector.broadcast %3 : vector<1x512xf32> to vector<8x512xf32>
    %5 = arith.addf %2, %4 : vector<8x512xf32>
    %cst_5 = arith.constant 0.000000e+00 : f32
    %6 = vector.broadcast %cst_5 : f32 to vector<8x512xf32>
    %7 = arith.maximumf %5, %6 : vector<8x512xf32>
    %8 = arith.truncf %7 : vector<8x512xf32> to vector<8x512xbf16>
    %c0_6 = arith.constant 0 : index
    %c0_7 = arith.constant 0 : index
    %9 = vector.load %arg4[%c0_6, %c0_7] : memref<512x128xbf16, #tpu.memory_space<vmem>>, vector<512x128xbf16>
    %cst_8 = arith.constant dense<0.000000e+00> : vector<8x128xf32>
    %10 = tpu.matmul %8, %9, %cst_8 {dimension_numbers = #tpu.dot_dimension_numbers<[1], [0], [0], [1], [0, 0, 1, 1], [], []>} : vector<8x512xbf16>, vector<512x128xbf16>, vector<8x128xf32> -> vector<8x128xf32>
    %c0_9 = arith.constant 0 : index
    %c0_10 = arith.constant 0 : index
    %11 = vector.load %arg5[%c0_9, %c0_10] : memref<1x128xf32, #tpu.memory_space<vmem>>, vector<1x128xf32>
    %12 = vector.broadcast %11 : vector<1x128xf32> to vector<8x128xf32>
    %13 = arith.addf %10, %12 : vector<8x128xf32>
    %c0_11 = arith.constant 0 : index
    %c0_12 = arith.constant 0 : index
    %14 = vector.load %arg6[%c0_11, %c0_12] : memref<8x128xf32, #tpu.memory_space<vmem>>, vector<8x128xf32>
    tpu.vector_store %arg6[%c0_11, %c0_12], %13 {strides = array<i32>} : memref<8x128xf32, #tpu.memory_space<vmem>>, vector<8x128xf32>,
    return
  }
  func.func @transform_0(%arg0: i32) -> (i32, i32) {
    %c0_i32 = arith.constant 0 : i32
    %c0_i32_0 = arith.constant 0 : i32
    return %arg0, %c0_i32 : i32, i32
  }
  func.func @transform_1(%arg0: i32) -> (i32, i32) {
    %c0_i32 = arith.constant 0 : i32
    %c0_i32_0 = arith.constant 0 : i32
    %c0_i32_1 = arith.constant 0 : i32
    return %c0_i32, %c0_i32_0 : i32, i32
  }
  func.func @transform_2(%arg0: i32) -> (i32, i32) {
    %c0_i32 = arith.constant 0 : i32
    %c0_i32_0 = arith.constant 0 : i32
    %c0_i32_1 = arith.constant 0 : i32
    return %c0_i32, %c0_i32_0 : i32, i32
  }
  func.func @transform_3(%arg0: i32) -> (i32, i32) {
    %c0_i32 = arith.constant 0 : i32
    %c0_i32_0 = arith.constant 0 : i32
    %c0_i32_1 = arith.constant 0 : i32
    return %c0_i32, %c0_i32_0 : i32, i32
  }
  func.func @transform_4(%arg0: i32) -> (i32, i32) {
    %c0_i32 = arith.constant 0 : i32
    %c0_i32_0 = arith.constant 0 : i32
    %c0_i32_1 = arith.constant 0 : i32
    return %c0_i32, %c0_i32_0 : i32, i32
  }
  func.func @transform_5(%arg0: i32) -> (i32, i32) {
    %c0_i32 = arith.constant 0 : i32
    %c0_i32_0 = arith.constant 0 : i32
    return %arg0, %c0_i32 : i32, i32
  }
}

</mosaic_0001>

<bundles_post_ra>
// kernel: _lambda_.7
= control target key start
LH: loop header
LB: loop body
LE: loop exit
PB: predicated region body
PF: predicated region fallthrough
CT: control target
= control target key end

     0   :  { %9 = vsyncpa [#allocation3], 0  ;;  %s4340_s0 = inlined_call_operand.vmem [shape: bf16[2048,32], index: 0, kind: input, shape index: {}]   ;;  %s4341_s1 = inlined_call_operand.hbm [shape: bf16[32,128], index: 1, kind: input, shape index: {}]   ;;  %s4342_s2 = inlined_call_operand.hbm [shape: f32[1,128], index: 2, kind: input, shape index: {}]   ;;  %s4343_s3 = inlined_call_operand.hbm [shape: f32[1,128], index: 3, kind: input, shape index: {}]   ;;  %s4344_s4 = inlined_call_operand.vmem [shape: bf16[2048,128], index: 4, kind: output, shape index: {}]  }
   0x1   :  { %10 = vsyncpa [#allocation5], 0  ;;  %s3792_s15 = smov 0  }
   0x2 LB: > { %s3762_s16 = smov [#allocation4]   ;;  %s2569_s18 = sadd.s32 4294967295, %s3760_s15   ;;  %s3760_s15 = sphi %s3792_s15, %s16_s15  }
   0x3   : > { %s162_s17 = sshll.u32 %s3762_s16, 4  ;;  %p2571_p0 = scmp.ge.s32.totalorder %s3760_s15, 1  ;;  %s163_s17 = int_to_ptr.vmem [resolvable:$true] %s162_s17 }
   0x4   : > { %p136_p1 = scmp.lt.s32.totalorder %s3760_s15, 3  ;;  %p3802_p2 = scmp.eq.s32.totalorder %s2569_s18, 0 }
   0x5   : > { %s3763_s21 = smov [#allocation2]   ;;  %s3764_s24 = smov [#allocation6]  }
   0x6   : > { %s4348_s19 = scalar_select %p3802_p2, 1, 0 }
   0x7   : > { %p3806_p3 = pnand %p2571_p0, %p136_p1  ;;  %s148_s22 = sshll.u32 %s3763_s21, 4  ;;  %s149_s22 = int_to_ptr.vmem [resolvable:$true] %s148_s22 }
   0x8   : > { %s173_s25 = sshll.u32 %s3764_s24, 4  ;;  %s3679_s26 = scalar_lea.vmem %s163_s17, 16  ;;  %s3818_s25 = int_to_ptr.vmem [resolvable:$true] %s173_s25 }
   0x9   : > { %s4349_s20 = scalar_select %p3806_p3, 1, 0 }
   0xa   : > { %p3571_p4 = pneg %p3806_p3  ;;  %p3680_p7 = scmp.ne.s32.totalorder %s163_s17, %s3679_s26 }
   0xb   : > { %s3686_s27 = scalar_lea.vmem %s163_s17, 32  ;;  %p3687_p10 = scmp.lt.s32.totalorder %s163_s17, %s163_s17 }
   0xc   : > { %p3814_p5 = pnand %p3802_p2, %p3571_p4  ;;  %p3688_p11 = scmp.lt.s32.totalorder %s3686_s27, %s3679_s26 }
   0xe   : > { %p3670_p6 = pneg %p3814_p5  ;;  %p3689_p12 = por %p3688_p11, %p3687_p10 }
  0x10   : > { %p3682_p8 = pnand %p3680_p7, %p3670_p6 }
  0x12   : > { %p3683_p9 = pneg %p3682_p8 }
  0x14   : > { %p3690_p13 = pnand %p3689_p12, %p3683_p9 }
  0x16   : > { %3693 = shalt.err (!%p3690_p13)
}
  0x17   : > { %3577 = dma.hbm_to_vmem [thread:$0]  (!%p3814_p5), %s4342_s2, 16, %s163_s17, [#allocation5]  }
  0x18   : > { %s3705_s30 = scalar_lea.vmem %s149_s22, 256  ;;  %p3713_p7 = scmp.lt.s32.totalorder %s149_s22, %s149_s22 }
  0x19   : > { %p3706_p0 = scmp.ne.s32.totalorder %s149_s22, %s3705_s30  ;;  %p3714_p8 = scmp.lt.s32.totalorder %s3705_s30, %s3705_s30 }
  0x1b   : > { %p3708_p1 = pnand %p3706_p0, %p3670_p6  ;;  %p3715_p2 = por %p3714_p8, %p3713_p7 }
  0x1d   : > { %p3709_p4 = pneg %p3708_p1 }
  0x1f   : > { %p3716_p3 = pnand %p3715_p2, %p3709_p4 }
  0x21   : > { %3719 = shalt.err (!%p3716_p3)
}
  0x22   : > { %s3765_s5 = smov 64   ;;  %s3766_s6 = smov 4  }
  0x23   : > { %3574 = dma.hbm_to_vmem [thread:$0]  (!%p3814_p5), %s4341_s1, 256, %s149_s22, [#allocation3], %s3765_s5, %s3765_s5, %s3766_s6  }
  0x24   : > { %s3731_s9 = scalar_lea.vmem %s3818_s25, 16  ;;  %s3738_s10 = scalar_lea.vmem %s3818_s25, 32 }
  0x25   : > { %p3732_p9 = scmp.ne.s32.totalorder %s3818_s25, %s3731_s9  ;;  %p3739_p3 = scmp.lt.s32.totalorder %s3818_s25, %s3818_s25 }
  0x26   : > { %p3740_p11 = scmp.lt.s32.totalorder %s3738_s10, %s3731_s9 }
  0x27   : > { %p3734_p10 = pnand %p3732_p9, %p3670_p6 }
  0x28   : > { %p3741_p12 = por %p3740_p11, %p3739_p3 }
  0x29   : > { %p3735_p2 = pneg %p3734_p10 }
  0x2b   : > { %p3742_p13 = pnand %p3741_p12, %p3735_p2 }
  0x2d   : > { %3745 = shalt.err (!%p3742_p13)
}
  0x2e   : > { %3580 = dma.hbm_to_vmem [thread:$0]  (!%p3814_p5), %s4343_s3, 16, %s3818_s25, [#allocation5]  }
  0x2f   : > { %p4351_p0 = scmp.ne.s32.totalorder %s4349_s20, 0 }
  0x30   : > { %p4352_p6 = scmp.ne.s32.totalorder (!%p4351_p0), %s4348_s19, 0 }
  0x31   : > { %195 = sbr.rel (%p4351_p0) target bundleno = 394 (0x18a), region = 36 }
  0x36   : > { %3751 = dma.done.wait (%p4352_p6), [#allocation3], 256  }
  0x37   : > { %3753 = vsyncadd (%p4352_p6), [#allocation3], 4294967040 }
  0x38   : > { %3755 = dma.done.wait (%p4352_p6), [#allocation5], 32  }
  0x39   : > { %3757 = vsyncadd (%p4352_p6), [#allocation5], 4294967264  ;;  %s2580_s13 = sshll.u32 %s2569_s18, 7  ;;  %v3600_v0 = vld [vmem:[#allocation2 + $0x8] sm:$0xff]   ;;  %v3601_v1 = vld [vmem:[#allocation2] sm:$0xff]   ;;  %vm706_vm0 = vcmask 261120  }
  0x3a   : > { %p230_p1 = scmp.lt.s32.totalorder %s2580_s13, 255  ;;  %3423 = vmatprep.subr.bf16.mxu0 %v3600_v0  ;;  %3555 = vmatprep.subr.bf16.mxu1 %v3600_v0 }
  0x3b   : > { %3424 = vmatpush3.bf16.msra.mxu0 %v3600_v0  ;;  %3557 = vmatpush3.bf16.msra.mxu1 %v3600_v0 }
  0x3c   : > { %s4354_s13 = smov (!%p230_p1, %s2580_s13), 255  ;;  %3425 = vmatprep.subr.bf16.mxu0 %v3601_v1  ;;  %3556 = vmatprep.subr.bf16.mxu1 %v3601_v1 }
  0x3d   : > { %s2581_s14 = sshll.u32 %s4354_s13, 2 }
  0x3e   : > { %s3872_s20 = scalar_lea.vmem %s4340_s0, %s2581_s14  ;;  %s4029_s21 = scalar_lea.vmem %s4344_s4, %s2581_s14 }
  0x3f   : > { %v3602_v2 = vld [vmem:[%s3872_s20] sm:$0xff]   ;;  %v3604_v4 = vld [vmem:[%s3872_s20 + $0x8] sm:$0xff]   ;;  %v3606_v6 = vld [vmem:[%s3872_s20 + $0x10] sm:$0xff]   ;;  %3426 = vmatpush3.bf16.msra.mxu0 %v3601_v1  ;;  %3558 = vmatpush3.bf16.msra.mxu1 %v3601_v1 }
  0x40   : > { %v3603_v3 = vld [vmem:[%s3872_s20 + $0x100] sm:$0xff]   ;;  %3427 = vmatprep.mubr.msk.bf16.mxu0 %vm706_vm0, %v3602_v2  ;;  %v3605_v5 = vld [vmem:[%s3872_s20 + $0x108] sm:$0xff]   ;;  %v3607_v7 = vld [vmem:[%s3872_s20 + $0x110] sm:$0xff]  }
  0x41   : > { %3491 = vmatprep.mubr.msk.bf16.mxu1 %vm706_vm0, %v3603_v3  ;;  %v3608_v8 = vld [vmem:[%s3872_s20 + $0x18] sm:$0xff]   ;;  %v3610_v10 = vld [vmem:[%s3872_s20 + $0x20] sm:$0xff]   ;;  %v3612_v12 = vld [vmem:[%s3872_s20 + $0x28] sm:$0xff]  }
  0x42   : > { %3428 = vmatmul.mubr.msk.bf16.vlgmr.msra.gmra.mxu0 %vm706_vm0, %v3604_v4  ;;  %3492 = vmatmul.mubr.msk.bf16.vlgmr.msra.gmra.mxu1 %vm706_vm0, %v3605_v5  ;;  %v3609_v9 = vld [vmem:[%s3872_s20 + $0x118] sm:$0xff]   ;;  %v3611_v11 = vld [vmem:[%s3872_s20 + $0x120] sm:$0xff]   ;;  %v3613_v13 = vld [vmem:[%s3872_s20 + $0x128] sm:$0xff]  }
  0x43   : > { %3431 = vmatprep.mubr.msk.bf16.mxu0 %vm706_vm0, %v3606_v6  ;;  %3495 = vmatprep.mubr.msk.bf16.mxu1 %vm706_vm0, %v3607_v7  ;;  %v3614_v14 = vld [vmem:[%s3872_s20 + $0x30] sm:$0xff]   ;;  %v3616_v16 = vld [vmem:[%s3872_s20 + $0x38] sm:$0xff]   ;;  %v3618_v18 = vld [vmem:[%s3872_s20 + $0x40] sm:$0xff]  }
  0x44   : > { %v3615_v15 = vld [vmem:[%s3872_s20 + $0x130] sm:$0xff]   ;;  %v3617_v17 = vld [vmem:[%s3872_s20 + $0x138] sm:$0xff]   ;;  %v3619_v19 = vld [vmem:[%s3872_s20 + $0x140] sm:$0xff]  }
  0x45   : > { %v3620_v20 = vld [vmem:[%s3872_s20 + $0x48] sm:$0xff]   ;;  %v3622_v22 = vld [vmem:[%s3872_s20 + $0x50] sm:$0xff]   ;;  %v3624_v24 = vld [vmem:[%s3872_s20 + $0x58] sm:$0xff]  }
  0x46   : > { %v3621_v21 = vld [vmem:[%s3872_s20 + $0x148] sm:$0xff]   ;;  %v3623_v23 = vld [vmem:[%s3872_s20 + $0x150] sm:$0xff]   ;;  %v3625_v25 = vld [vmem:[%s3872_s20 + $0x158] sm:$0xff]  }
  0x47   : > { %v3626_v26 = vld [vmem:[%s3872_s20 + $0x60] sm:$0xff]   ;;  %v3628_v28 = vld [vmem:[%s3872_s20 + $0x68] sm:$0xff]   ;;  %v3630_v30 = vld [vmem:[%s3872_s20 + $0x70] sm:$0xff]  }
  0x48   : > { %v3627_v27 = vld [vmem:[%s3872_s20 + $0x160] sm:$0xff]   ;;  %v3629_v29 = vld [vmem:[%s3872_s20 + $0x168] sm:$0xff]   ;;  %v3631_v31 = vld [vmem:[%s3872_s20 + $0x170] sm:$0xff]  }
  0x49   : > { %v3632_v32 = vld [vmem:[%s3872_s20 + $0x78] sm:$0xff]   ;;  %v3634_v34 = vld [vmem:[%s3872_s20 + $0x80] sm:$0xff]   ;;  %v3636_v36 = vld [vmem:[%s3872_s20 + $0x88] sm:$0xff]  }
  0x4a   : > { %3432 = vmatmul.mubr.msk.bf16.gmra.mxu0 %vm706_vm0, %v3608_v8  ;;  %3496 = vmatmul.mubr.msk.bf16.gmra.mxu1 %vm706_vm0, %v3609_v9  ;;  %v3633_v33 = vld [vmem:[%s3872_s20 + $0x178] sm:$0xff]   ;;  %v3635_v35 = vld [vmem:[%s3872_s20 + $0x180] sm:$0xff]   ;;  %v3637_v37 = vld [vmem:[%s3872_s20 + $0x188] sm:$0xff]  }
  0x4b   : > { %3435 = vmatprep.mubr.msk.bf16.mxu0 %vm706_vm0, %v3610_v10  ;;  %3499 = vmatprep.mubr.msk.bf16.mxu1 %vm706_vm0, %v3611_v11  ;;  %v3638_v38 = vld [vmem:[%s3872_s20 + $0x90] sm:$0xff]   ;;  %v3640_v40 = vld [vmem:[%s3872_s20 + $0x98] sm:$0xff]   ;;  %v3642_v42 = vld [vmem:[%s3872_s20 + $0xa0] sm:$0xff]  }
  0x4c   : > { %v3639_v39 = vld [vmem:[%s3872_s20 + $0x190] sm:$0xff]   ;;  %v3641_v41 = vld [vmem:[%s3872_s20 + $0x198] sm:$0xff]   ;;  %v3643_v43 = vld [vmem:[%s3872_s20 + $0x1a0] sm:$0xff]  }
  0x4d   : > { %v3644_v44 = vld [vmem:[%s3872_s20 + $0xa8] sm:$0xff]   ;;  %v3646_v46 = vld [vmem:[%s3872_s20 + $0xb0] sm:$0xff]   ;;  %v3648_v48 = vld [vmem:[%s3872_s20 + $0xb8] sm:$0xff]  }
  0x4e   : > { %v3645_v45 = vld [vmem:[%s3872_s20 + $0x1a8] sm:$0xff]   ;;  %v3647_v47 = vld [vmem:[%s3872_s20 + $0x1b0] sm:$0xff]   ;;  %v3649_v49 = vld [vmem:[%s3872_s20 + $0x1b8] sm:$0xff]  }
  0x4f   : > { %v3650_v50 = vld [vmem:[%s3872_s20 + $0xc0] sm:$0xff]   ;;  %v3652_v52 = vld [vmem:[%s3872_s20 + $0xc8] sm:$0xff]   ;;  %v3654_v54 = vld [vmem:[%s3872_s20 + $0xd0] sm:$0xff]  }
  0x50   : > { %v3651_v51 = vld [vmem:[%s3872_s20 + $0x1c0] sm:$0xff]   ;;  %v3653_v53 = vld [vmem:[%s3872_s20 + $0x1c8] sm:$0xff]   ;;  %v3655_v55 = vld [vmem:[%s3872_s20 + $0x1d0] sm:$0xff]  }
  0x51   : > { %v3656_v56 = vld [vmem:[%s3872_s20 + $0xd8] sm:$0xff]   ;;  %v3658_v58 = vld [vmem:[%s3872_s20 + $0xe0] sm:$0xff]   ;;  %v3660_v60 = vld [vmem:[%s3872_s20 + $0xe8] sm:$0xff]  }
  0x52   : > { %3436 = vmatmul.mubr.msk.bf16.gmra.mxu0 %vm706_vm0, %v3612_v12  ;;  %3500 = vmatmul.mubr.msk.bf16.gmra.mxu1 %vm706_vm0, %v3613_v13  ;;  %v3657_v57 = vld [vmem:[%s3872_s20 + $0x1d8] sm:$0xff]   ;;  %v3659_v59 = vld [vmem:[%s3872_s20 + $0x1e0] sm:$0xff]   ;;  %v3661_v61 = vld [vmem:[%s3872_s20 + $0x1e8] sm:$0xff]  }
  0x53   : > { %3439 = vmatprep.mubr.msk.bf16.mxu0 %vm706_vm0, %v3614_v14  ;;  %3503 = vmatprep.mubr.msk.bf16.mxu1 %vm706_vm0, %v3615_v15  ;;  %v3662_v62 = vld [vmem:[%s3872_s20 + $0xf0] sm:$0xff]   ;;  %v3664_v0 = vld [vmem:[%s3872_s20 + $0xf8] sm:$0xff]  }
  0x54   : > { %v3663_v63 = vld [vmem:[%s3872_s20 + $0x1f0] sm:$0xff]   ;;  %v3665_v1 = vld [vmem:[%s3872_s20 + $0x1f8] sm:$0xff]  }
  0x55   : > { %v4002_v2 = vld [vmem:[#allocation4] ss:$0 sm:$0xff]  ;;  %v4006_v7 = vld [vmem:[#allocation6] ss:$0 sm:$0xff] }
  0x5a   : > { %3440 = vmatmul.mubr.msk.bf16.gmra.mxu0 %vm706_vm0, %v3616_v16  ;;  %3504 = vmatmul.mubr.msk.bf16.gmra.mxu1 %vm706_vm0, %v3617_v17 }
  0x5b   : > { %3443 = vmatprep.mubr.msk.bf16.mxu0 %vm706_vm0, %v3618_v18  ;;  %3507 = vmatprep.mubr.msk.bf16.mxu1 %vm706_vm0, %v3619_v19 }
  0x62   : > { %3444 = vmatmul.mubr.msk.bf16.gmra.mxu0 %vm706_vm0, %v3620_v20  ;;  %3508 = vmatmul.mubr.msk.bf16.gmra.mxu1 %vm706_vm0, %v3621_v21 }
  0x63   : > { %3447 = vmatprep.mubr.msk.bf16.mxu0 %vm706_vm0, %v3622_v22  ;;  %3511 = vmatprep.mubr.msk.bf16.mxu1 %vm706_vm0, %v3623_v23 }
  0x6a   : > { %3448 = vmatmul.mubr.msk.bf16.gmra.mxu0 %vm706_vm0, %v3624_v24  ;;  %3512 = vmatmul.mubr.msk.bf16.gmra.mxu1 %vm706_vm0, %v3625_v25 }
  0x6b   : > { %3451 = vmatprep.mubr.msk.bf16.mxu0 %vm706_vm0, %v3626_v26  ;;  %3515 = vmatprep.mubr.msk.bf16.mxu1 %vm706_vm0, %v3627_v27 }
  0x72   : > { %3452 = vmatmul.mubr.msk.bf16.gmra.mxu0 %vm706_vm0, %v3628_v28  ;;  %3516 = vmatmul.mubr.msk.bf16.gmra.mxu1 %vm706_vm0, %v3629_v29 }
  0x73   : > { %3455 = vmatprep.mubr.msk.bf16.mxu0 %vm706_vm0, %v3630_v30  ;;  %3519 = vmatprep.mubr.msk.bf16.mxu1 %vm706_vm0, %v3631_v31 }
  0x7a   : > { %3456 = vmatmul.mubr.msk.bf16.gmra.mxu0 %vm706_vm0, %v3632_v32  ;;  %3520 = vmatmul.mubr.msk.bf16.gmra.mxu1 %vm706_vm0, %v3633_v33 }
  0x7b   : > { %3459 = vmatprep.mubr.msk.bf16.mxu0 %vm706_vm0, %v3634_v34  ;;  %3523 = vmatprep.mubr.msk.bf16.mxu1 %vm706_vm0, %v3635_v35 }
  0x82   : > { %3460 = vmatmul.mubr.msk.bf16.gmra.mxu0 %vm706_vm0, %v3636_v36  ;;  %3524 = vmatmul.mubr.msk.bf16.gmra.mxu1 %vm706_vm0, %v3637_v37 }
  0x83   : > { %3463 = vmatprep.mubr.msk.bf16.mxu0 %vm706_vm0, %v3638_v38  ;;  %3527 = vmatprep.mubr.msk.bf16.mxu1 %vm706_vm0, %v3639_v39 }
  0x8a   : > { %3464 = vmatmul.mubr.msk.bf16.gmra.mxu0 %vm706_vm0, %v3640_v40  ;;  %3528 = vmatmul.mubr.msk.bf16.gmra.mxu1 %vm706_vm0, %v3641_v41 }
  0x8b   : > { %3467 = vmatprep.mubr.msk.bf16.mxu0 %vm706_vm0, %v3642_v42  ;;  %3531 = vmatprep.mubr.msk.bf16.mxu1 %vm706_vm0, %v3643_v43 }
  0x92   : > { %3468 = vmatmul.mubr.msk.bf16.gmra.mxu0 %vm706_vm0, %v3644_v44  ;;  %3532 = vmatmul.mubr.msk.bf16.gmra.mxu1 %vm706_vm0, %v3645_v45 }
  0x93   : > { %3471 = vmatprep.mubr.msk.bf16.mxu0 %vm706_vm0, %v3646_v46  ;;  %3535 = vmatprep.mubr.msk.bf16.mxu1 %vm706_vm0, %v3647_v47 }
  0x9a   : > { %3472 = vmatmul.mubr.msk.bf16.gmra.mxu0 %vm706_vm0, %v3648_v48  ;;  %3536 = vmatmul.mubr.msk.bf16.gmra.mxu1 %vm706_vm0, %v3649_v49 }
  0x9b   : > { %3475 = vmatprep.mubr.msk.bf16.mxu0 %vm706_vm0, %v3650_v50  ;;  %3539 = vmatprep.mubr.msk.bf16.mxu1 %vm706_vm0, %v3651_v51 }
  0xa2   : > { %3476 = vmatmul.mubr.msk.bf16.gmra.mxu0 %vm706_vm0, %v3652_v52  ;;  %3540 = vmatmul.mubr.msk.bf16.gmra.mxu1 %vm706_vm0, %v3653_v53 }
  0xa3   : > { %3479 = vmatprep.mubr.msk.bf16.mxu0 %vm706_vm0, %v3654_v54  ;;  %3543 = vmatprep.mubr.msk.bf16.mxu1 %vm706_vm0, %v3655_v55 }
  0xaa   : > { %3480 = vmatmul.mubr.msk.bf16.gmra.mxu0 %vm706_vm0, %v3656_v56  ;;  %3544 = vmatmul.mubr.msk.bf16.gmra.mxu1 %vm706_vm0, %v3657_v57 }
  0xab   : > { %3483 = vmatprep.mubr.msk.bf16.mxu0 %vm706_vm0, %v3658_v58  ;;  %3547 = vmatprep.mubr.msk.bf16.mxu1 %vm706_vm0, %v3659_v59 }
  0xb2   : > { %3484 = vmatmul.mubr.msk.bf16.gmra.mxu0 %vm706_vm0, %v3660_v60  ;;  %3548 = vmatmul.mubr.msk.bf16.gmra.mxu1 %vm706_vm0, %v3661_v61 }
  0xb3   : > { %3487 = vmatprep.mubr.msk.bf16.mxu0 %vm706_vm0, %v3662_v62  ;;  %3551 = vmatprep.mubr.msk.bf16.mxu1 %vm706_vm0, %v3663_v63 }
  0xba   : > { %3488 = vmatmul.mubr.msk.bf16.gmra.mxu0 %vm706_vm0, %v3664_v0  ;;  %3552 = vmatmul.mubr.msk.bf16.gmra.mxu1 %vm706_vm0, %v3665_v1 }
 0x102   : > { %v3429_v3 = vpop.f32.mrf.mxu0  ;;  %v3493_v4 = vpop.f32.mrf.mxu1 }
 0x103   : > { %v1453_v5 = vmul.f32 %v3429_v3, %v4002_v2  ;;  %v1517_v6 = vmul.f32 %v3493_v4, %v4002_v2 }
 0x104   : > { %v933_v8 = vpop.f32.mrf.mxu0  ;;  %v1189_v9 = vpop.f32.mrf.mxu1 }
 0x105   : > { %v1451_v10 = vmul.f32 %v4002_v2, %v933_v8  ;;  %v1515_v11 = vmul.f32 %v4002_v2, %v1189_v9  ;;  %v1588_v14 = vadd.f32 %v4006_v7, %v1453_v5  ;;  %v1652_v15 = vadd.f32 %v4006_v7, %v1517_v6 }
 0x106   : > { %v3430_v12 = vpop.f32.mrf.mxu0  ;;  %v3494_v13 = vpop.f32.mrf.mxu1 }
 0x107   : > { %v1454_v16 = vmul.f32 %v3430_v12, %v4002_v2  ;;  %v1518_v17 = vmul.f32 %v3494_v13, %v4002_v2  ;;  %v1586_v20 = vadd.f32 %v4006_v7, %v1451_v10  ;;  %v1650_v21 = vadd.f32 %v4006_v7, %v1515_v11 }
 0x108   : > { %v936_v18 = vpop.f32.mrf.mxu0  ;;  %v1192_v19 = vpop.f32.mrf.mxu1  ;;  %v1716_v28 = vmax.f32 %v1588_v14, 0.0  ;;  %v1780_v29 = vmax.f32 %v1652_v15, 0.0 }
 0x109   : > { %v1452_v22 = vmul.f32 %v4002_v2, %v936_v18  ;;  %v1516_v23 = vmul.f32 %v4002_v2, %v1192_v19  ;;  %v1589_v24 = vadd.f32 %v4006_v7, %v1454_v16  ;;  %v1653_v25 = vadd.f32 %v4006_v7, %v1518_v17 }
 0x10a   : > { %v3433_v26 = vpop.f32.mrf.mxu0  ;;  %v3497_v27 = vpop.f32.mrf.mxu1  ;;  %v1714_v38 = vmax.f32 %v1586_v20, 0.0  ;;  %v1778_v39 = vmax.f32 %v1650_v21, 0.0 }
 0x10b   : > { %v1587_v30 = vadd.f32 %v4006_v7, %v1452_v22  ;;  %v1651_v31 = vadd.f32 %v4006_v7, %v1516_v23  ;;  %v1717_v32 = vmax.f32 %v1589_v24, 0.0  ;;  %v1781_v33 = vmax.f32 %v1653_v25, 0.0 }
 0x10c   : > { %v1457_v34 = vmul.f32 %v3433_v26, %v4002_v2  ;;  %v1521_v35 = vmul.f32 %v3497_v27, %v4002_v2  ;;  %v949_v36 = vpop.f32.mrf.mxu0  ;;  %v1205_v37 = vpop.f32.mrf.mxu1 }
 0x10d   : > { %v1715_v40 = vmax.f32 %v1587_v30, 0.0  ;;  %v1779_v41 = vmax.f32 %v1651_v31, 0.0  ;;  %v2982_v42 = vpack.c.bf16 %v1717_v32, %v1716_v28  ;;  %v3142_v43 = vpack.c.bf16 %v1781_v33, %v1780_v29 }
 0x10e   : > { %v1455_v44 = vmul.f32 %v4002_v2, %v949_v36  ;;  %v1519_v45 = vmul.f32 %v4002_v2, %v1205_v37  ;;  %v3434_v46 = vpop.f32.mrf.mxu0  ;;  %v3498_v47 = vpop.f32.mrf.mxu1  ;;  %v1592_v50 = vadd.f32 %v4006_v7, %v1457_v34  ;;  %v1656_v51 = vadd.f32 %v4006_v7, %v1521_v35 }
 0x10f   : > { %v2977_v48 = vpack.c.bf16 %v1715_v40, %v1714_v38  ;;  %v3137_v49 = vpack.c.bf16 %v1779_v41, %v1778_v39  ;;  %3294 = vst [vmem:[%s4029_s21 + $0x8] sm:$0xff] %v2982_v42   ;;  %3326 = vst [vmem:[%s4029_s21 + $0x108] sm:$0xff] %v3142_v43   ;;  %v1458_v52 = vmul.f32 %v3434_v46, %v4002_v2 }
 0x110   : > { %v1522_v53 = vmul.f32 %v3498_v47, %v4002_v2  ;;  %v952_v54 = vpop.f32.mrf.mxu0  ;;  %v1208_v55 = vpop.f32.mrf.mxu1  ;;  %v1590_v56 = vadd.f32 %v4006_v7, %v1455_v44  ;;  %v1654_v57 = vadd.f32 %v4006_v7, %v1519_v45  ;;  %v1720_v5 = vmax.f32 %v1592_v50, 0.0 }
 0x111   : > { %2978 = vst [vmem:[%s4029_s21] sm:$0xff] %v2977_v48   ;;  %3325 = vst [vmem:[%s4029_s21 + $0x100] sm:$0xff] %v3137_v49   ;;  %v1456_v58 = vmul.f32 %v4002_v2, %v952_v54  ;;  %v1520_v59 = vmul.f32 %v4002_v2, %v1208_v55  ;;  %v1593_v60 = vadd.f32 %v4006_v7, %v1458_v52  ;;  %v1784_v6 = vmax.f32 %v1656_v51, 0.0 }
 0x112   : > { %v1657_v61 = vadd.f32 %v4006_v7, %v1522_v53  ;;  %v3437_v62 = vpop.f32.mrf.mxu0  ;;  %v3501_v63 = vpop.f32.mrf.mxu1  ;;  %v1718_v12 = vmax.f32 %v1590_v56, 0.0  ;;  %v1782_v13 = vmax.f32 %v1654_v57, 0.0 }
 0x113   : > { %v1591_v0 = vadd.f32 %v4006_v7, %v1456_v58  ;;  %v1655_v1 = vadd.f32 %v4006_v7, %v1520_v59  ;;  %v1461_v3 = vmul.f32 %v3437_v62, %v4002_v2  ;;  %v1525_v4 = vmul.f32 %v3501_v63, %v4002_v2 }
 0x114   : > { %v1721_v8 = vmax.f32 %v1593_v60, 0.0  ;;  %v1785_v9 = vmax.f32 %v1657_v61, 0.0  ;;  %v965_v10 = vpop.f32.mrf.mxu0  ;;  %v1221_v11 = vpop.f32.mrf.mxu1 }
 0x115   : > { %v1719_v14 = vmax.f32 %v1591_v0, 0.0  ;;  %v1783_v15 = vmax.f32 %v1655_v1, 0.0  ;;  %v1459_v18 = vmul.f32 %v4002_v2, %v965_v10  ;;  %v1523_v19 = vmul.f32 %v4002_v2, %v1221_v11 }
 0x116   : > { %v2992_v16 = vpack.c.bf16 %v1721_v8, %v1720_v5  ;;  %v3152_v17 = vpack.c.bf16 %v1785_v9, %v1784_v6  ;;  %v3438_v20 = vpop.f32.mrf.mxu0  ;;  %v3502_v21 = vpop.f32.mrf.mxu1  ;;  %v1596_v24 = vadd.f32 %v4006_v7, %v1461_v3  ;;  %v1660_v25 = vadd.f32 %v4006_v7, %v1525_v4 }
 0x117   : > { %v2987_v22 = vpack.c.bf16 %v1719_v14, %v1718_v12  ;;  %v3147_v23 = vpack.c.bf16 %v1783_v15, %v1782_v13  ;;  %v1462_v26 = vmul.f32 %v3438_v20, %v4002_v2  ;;  %v1526_v27 = vmul.f32 %v3502_v21, %v4002_v2 }
 0x118   : > { %3296 = vst [vmem:[%s4029_s21 + $0x18] sm:$0xff] %v2992_v16   ;;  %3328 = vst [vmem:[%s4029_s21 + $0x118] sm:$0xff] %v3152_v17   ;;  %v968_v28 = vpop.f32.mrf.mxu0  ;;  %v1224_v29 = vpop.f32.mrf.mxu1  ;;  %v1594_v30 = vadd.f32 %v4006_v7, %v1459_v18  ;;  %v1658_v31 = vadd.f32 %v4006_v7, %v1523_v19  ;;  %v1724_v38 = vmax.f32 %v1596_v24, 0.0  ;;  %v1788_v39 = vmax.f32 %v1660_v25, 0.0 }
 0x119   : > { %3295 = vst [vmem:[%s4029_s21 + $0x10] sm:$0xff] %v2987_v22   ;;  %3327 = vst [vmem:[%s4029_s21 + $0x110] sm:$0xff] %v3147_v23   ;;  %v1460_v32 = vmul.f32 %v4002_v2, %v968_v28  ;;  %v1524_v33 = vmul.f32 %v4002_v2, %v1224_v29  ;;  %v1597_v34 = vadd.f32 %v4006_v7, %v1462_v26 }
 0x11a   : > { %v1661_v35 = vadd.f32 %v4006_v7, %v1526_v27  ;;  %v3441_v36 = vpop.f32.mrf.mxu0  ;;  %v3505_v37 = vpop.f32.mrf.mxu1  ;;  %v1722_v48 = vmax.f32 %v1594_v30, 0.0  ;;  %v1786_v49 = vmax.f32 %v1658_v31, 0.0 }
 0x11b   : > { %v1595_v40 = vadd.f32 %v4006_v7, %v1460_v32  ;;  %v1659_v41 = vadd.f32 %v4006_v7, %v1524_v33  ;;  %v1725_v42 = vmax.f32 %v1597_v34, 0.0  ;;  %v1465_v44 = vmul.f32 %v3441_v36, %v4002_v2 }
 0x11c   : > { %v1789_v43 = vmax.f32 %v1661_v35, 0.0  ;;  %v1529_v45 = vmul.f32 %v3505_v37, %v4002_v2  ;;  %v981_v46 = vpop.f32.mrf.mxu0  ;;  %v1237_v47 = vpop.f32.mrf.mxu1 }
 0x11d   : > { %v1723_v50 = vmax.f32 %v1595_v40, 0.0  ;;  %v1787_v51 = vmax.f32 %v1659_v41, 0.0  ;;  %v3002_v52 = vpack.c.bf16 %v1725_v42, %v1724_v38  ;;  %v1463_v54 = vmul.f32 %v4002_v2, %v981_v46 }
 0x11e   : > { %v3162_v53 = vpack.c.bf16 %v1789_v43, %v1788_v39  ;;  %v1527_v55 = vmul.f32 %v4002_v2, %v1237_v47  ;;  %v3442_v56 = vpop.f32.mrf.mxu0  ;;  %v3506_v57 = vpop.f32.mrf.mxu1  ;;  %v1600_v60 = vadd.f32 %v4006_v7, %v1465_v44  ;;  %v1664_v61 = vadd.f32 %v4006_v7, %v1529_v45 }
 0x11f   : > { %v2997_v58 = vpack.c.bf16 %v1723_v50, %v1722_v48  ;;  %v3157_v59 = vpack.c.bf16 %v1787_v51, %v1786_v49  ;;  %3298 = vst [vmem:[%s4029_s21 + $0x28] sm:$0xff] %v3002_v52   ;;  %v1466_v62 = vmul.f32 %v3442_v56, %v4002_v2  ;;  %v1530_v63 = vmul.f32 %v3506_v57, %v4002_v2 }
 0x120   : > { %3330 = vst [vmem:[%s4029_s21 + $0x128] sm:$0xff] %v3162_v53   ;;  %v984_v0 = vpop.f32.mrf.mxu0  ;;  %v1240_v1 = vpop.f32.mrf.mxu1  ;;  %v1598_v3 = vadd.f32 %v4006_v7, %v1463_v54  ;;  %v1662_v4 = vadd.f32 %v4006_v7, %v1527_v55  ;;  %v1728_v16 = vmax.f32 %v1600_v60, 0.0  ;;  %v1792_v17 = vmax.f32 %v1664_v61, 0.0 }
 0x121   : > { %3297 = vst [vmem:[%s4029_s21 + $0x20] sm:$0xff] %v2997_v58   ;;  %3329 = vst [vmem:[%s4029_s21 + $0x120] sm:$0xff] %v3157_v59   ;;  %v1464_v5 = vmul.f32 %v4002_v2, %v984_v0  ;;  %v1528_v6 = vmul.f32 %v4002_v2, %v1240_v1  ;;  %v1601_v8 = vadd.f32 %v4006_v7, %v1466_v62 }
 0x122   : > { %v1665_v9 = vadd.f32 %v4006_v7, %v1530_v63  ;;  %v3445_v10 = vpop.f32.mrf.mxu0  ;;  %v3509_v11 = vpop.f32.mrf.mxu1  ;;  %v1726_v22 = vmax.f32 %v1598_v3, 0.0  ;;  %v1790_v23 = vmax.f32 %v1662_v4, 0.0 }
 0x123   : > { %v1599_v12 = vadd.f32 %v4006_v7, %v1464_v5  ;;  %v1663_v13 = vadd.f32 %v4006_v7, %v1528_v6  ;;  %v1469_v14 = vmul.f32 %v3445_v10, %v4002_v2  ;;  %v1533_v15 = vmul.f32 %v3509_v11, %v4002_v2 }
 0x124   : > { %v1729_v18 = vmax.f32 %v1601_v8, 0.0  ;;  %v1793_v19 = vmax.f32 %v1665_v9, 0.0  ;;  %v997_v20 = vpop.f32.mrf.mxu0  ;;  %v1253_v21 = vpop.f32.mrf.mxu1 }
 0x125   : > { %v1727_v24 = vmax.f32 %v1599_v12, 0.0  ;;  %v1791_v25 = vmax.f32 %v1663_v13, 0.0  ;;  %v1467_v28 = vmul.f32 %v4002_v2, %v997_v20  ;;  %v1531_v29 = vmul.f32 %v4002_v2, %v1253_v21 }
 0x126   : > { %v3012_v26 = vpack.c.bf16 %v1729_v18, %v1728_v16  ;;  %v3172_v27 = vpack.c.bf16 %v1793_v19, %v1792_v17  ;;  %v3446_v30 = vpop.f32.mrf.mxu0  ;;  %v3510_v31 = vpop.f32.mrf.mxu1  ;;  %v1604_v34 = vadd.f32 %v4006_v7, %v1469_v14  ;;  %v1668_v35 = vadd.f32 %v4006_v7, %v1533_v15 }
 0x127   : > { %v3007_v32 = vpack.c.bf16 %v1727_v24, %v1726_v22  ;;  %v3167_v33 = vpack.c.bf16 %v1791_v25, %v1790_v23  ;;  %v1470_v36 = vmul.f32 %v3446_v30, %v4002_v2  ;;  %v1534_v37 = vmul.f32 %v3510_v31, %v4002_v2 }
 0x128   : > { %3300 = vst [vmem:[%s4029_s21 + $0x38] sm:$0xff] %v3012_v26   ;;  %3332 = vst [vmem:[%s4029_s21 + $0x138] sm:$0xff] %v3172_v27   ;;  %v1000_v38 = vpop.f32.mrf.mxu0  ;;  %v1256_v39 = vpop.f32.mrf.mxu1  ;;  %v1602_v40 = vadd.f32 %v4006_v7, %v1467_v28  ;;  %v1666_v41 = vadd.f32 %v4006_v7, %v1531_v29  ;;  %v1732_v48 = vmax.f32 %v1604_v34, 0.0  ;;  %v1796_v49 = vmax.f32 %v1668_v35, 0.0 }
 0x129   : > { %3299 = vst [vmem:[%s4029_s21 + $0x30] sm:$0xff] %v3007_v32   ;;  %3331 = vst [vmem:[%s4029_s21 + $0x130] sm:$0xff] %v3167_v33   ;;  %v1468_v42 = vmul.f32 %v4002_v2, %v1000_v38  ;;  %v1532_v43 = vmul.f32 %v4002_v2, %v1256_v39  ;;  %v1605_v44 = vadd.f32 %v4006_v7, %v1470_v36 }
 0x12a   : > { %v1669_v45 = vadd.f32 %v4006_v7, %v1534_v37  ;;  %v3449_v46 = vpop.f32.mrf.mxu0  ;;  %v3513_v47 = vpop.f32.mrf.mxu1  ;;  %v1730_v58 = vmax.f32 %v1602_v40, 0.0  ;;  %v1794_v59 = vmax.f32 %v1666_v41, 0.0 }
 0x12b   : > { %v1603_v50 = vadd.f32 %v4006_v7, %v1468_v42  ;;  %v1667_v51 = vadd.f32 %v4006_v7, %v1532_v43  ;;  %v1733_v52 = vmax.f32 %v1605_v44, 0.0  ;;  %v1473_v54 = vmul.f32 %v3449_v46, %v4002_v2 }
 0x12c   : > { %v1797_v53 = vmax.f32 %v1669_v45, 0.0  ;;  %v1537_v55 = vmul.f32 %v3513_v47, %v4002_v2  ;;  %v1013_v56 = vpop.f32.mrf.mxu0  ;;  %v1269_v57 = vpop.f32.mrf.mxu1 }
 0x12d   : > { %v1731_v60 = vmax.f32 %v1603_v50, 0.0  ;;  %v1795_v61 = vmax.f32 %v1667_v51, 0.0  ;;  %v3022_v62 = vpack.c.bf16 %v1733_v52, %v1732_v48  ;;  %v1471_v0 = vmul.f32 %v4002_v2, %v1013_v56 }
 0x12e   : > { %v3182_v63 = vpack.c.bf16 %v1797_v53, %v1796_v49  ;;  %v1535_v1 = vmul.f32 %v4002_v2, %v1269_v57  ;;  %v3450_v3 = vpop.f32.mrf.mxu0  ;;  %v3514_v4 = vpop.f32.mrf.mxu1  ;;  %v1608_v8 = vadd.f32 %v4006_v7, %v1473_v54  ;;  %v1672_v9 = vadd.f32 %v4006_v7, %v1537_v55 }
 0x12f   : > { %v3017_v5 = vpack.c.bf16 %v1731_v60, %v1730_v58  ;;  %v3177_v6 = vpack.c.bf16 %v1795_v61, %v1794_v59  ;;  %3302 = vst [vmem:[%s4029_s21 + $0x48] sm:$0xff] %v3022_v62   ;;  %v1474_v10 = vmul.f32 %v3450_v3, %v4002_v2  ;;  %v1538_v11 = vmul.f32 %v3514_v4, %v4002_v2 }
 0x130   : > { %3334 = vst [vmem:[%s4029_s21 + $0x148] sm:$0xff] %v3182_v63   ;;  %v1016_v12 = vpop.f32.mrf.mxu0  ;;  %v1272_v13 = vpop.f32.mrf.mxu1  ;;  %v1606_v14 = vadd.f32 %v4006_v7, %v1471_v0  ;;  %v1670_v15 = vadd.f32 %v4006_v7, %v1535_v1  ;;  %v1736_v26 = vmax.f32 %v1608_v8, 0.0  ;;  %v1800_v27 = vmax.f32 %v1672_v9, 0.0 }
 0x131   : > { %3301 = vst [vmem:[%s4029_s21 + $0x40] sm:$0xff] %v3017_v5   ;;  %3333 = vst [vmem:[%s4029_s21 + $0x140] sm:$0xff] %v3177_v6   ;;  %v1472_v16 = vmul.f32 %v4002_v2, %v1016_v12  ;;  %v1536_v17 = vmul.f32 %v4002_v2, %v1272_v13  ;;  %v1609_v18 = vadd.f32 %v4006_v7, %v1474_v10 }
 0x132   : > { %v1673_v19 = vadd.f32 %v4006_v7, %v1538_v11  ;;  %v3453_v20 = vpop.f32.mrf.mxu0  ;;  %v3517_v21 = vpop.f32.mrf.mxu1  ;;  %v1734_v32 = vmax.f32 %v1606_v14, 0.0  ;;  %v1798_v33 = vmax.f32 %v1670_v15, 0.0 }
 0x133   : > { %v1607_v22 = vadd.f32 %v4006_v7, %v1472_v16  ;;  %v1671_v23 = vadd.f32 %v4006_v7, %v1536_v17  ;;  %v1477_v24 = vmul.f32 %v3453_v20, %v4002_v2  ;;  %v1541_v25 = vmul.f32 %v3517_v21, %v4002_v2 }
 0x134   : > { %v1737_v28 = vmax.f32 %v1609_v18, 0.0  ;;  %v1801_v29 = vmax.f32 %v1673_v19, 0.0  ;;  %v1029_v30 = vpop.f32.mrf.mxu0  ;;  %v1285_v31 = vpop.f32.mrf.mxu1 }
 0x135   : > { %v1735_v34 = vmax.f32 %v1607_v22, 0.0  ;;  %v1799_v35 = vmax.f32 %v1671_v23, 0.0  ;;  %v1475_v38 = vmul.f32 %v4002_v2, %v1029_v30  ;;  %v1539_v39 = vmul.f32 %v4002_v2, %v1285_v31 }
 0x136   : > { %v3032_v36 = vpack.c.bf16 %v1737_v28, %v1736_v26  ;;  %v3192_v37 = vpack.c.bf16 %v1801_v29, %v1800_v27  ;;  %v3454_v40 = vpop.f32.mrf.mxu0  ;;  %v3518_v41 = vpop.f32.mrf.mxu1  ;;  %v1612_v44 = vadd.f32 %v4006_v7, %v1477_v24  ;;  %v1676_v45 = vadd.f32 %v4006_v7, %v1541_v25 }
 0x137   : > { %v3027_v42 = vpack.c.bf16 %v1735_v34, %v1734_v32  ;;  %v3187_v43 = vpack.c.bf16 %v1799_v35, %v1798_v33  ;;  %v1478_v46 = vmul.f32 %v3454_v40, %v4002_v2  ;;  %v1542_v47 = vmul.f32 %v3518_v41, %v4002_v2 }
 0x138   : > { %3304 = vst [vmem:[%s4029_s21 + $0x58] sm:$0xff] %v3032_v36   ;;  %3336 = vst [vmem:[%s4029_s21 + $0x158] sm:$0xff] %v3192_v37   ;;  %v1032_v48 = vpop.f32.mrf.mxu0  ;;  %v1288_v49 = vpop.f32.mrf.mxu1  ;;  %v1610_v50 = vadd.f32 %v4006_v7, %v1475_v38  ;;  %v1674_v51 = vadd.f32 %v4006_v7, %v1539_v39  ;;  %v1740_v58 = vmax.f32 %v1612_v44, 0.0  ;;  %v1804_v59 = vmax.f32 %v1676_v45, 0.0 }
 0x139   : > { %3303 = vst [vmem:[%s4029_s21 + $0x50] sm:$0xff] %v3027_v42   ;;  %3335 = vst [vmem:[%s4029_s21 + $0x150] sm:$0xff] %v3187_v43   ;;  %v1476_v52 = vmul.f32 %v4002_v2, %v1032_v48  ;;  %v1540_v53 = vmul.f32 %v4002_v2, %v1288_v49  ;;  %v1613_v54 = vadd.f32 %v4006_v7, %v1478_v46 }
 0x13a   : > { %v1677_v55 = vadd.f32 %v4006_v7, %v1542_v47  ;;  %v3457_v56 = vpop.f32.mrf.mxu0  ;;  %v3521_v57 = vpop.f32.mrf.mxu1  ;;  %v1738_v5 = vmax.f32 %v1610_v50, 0.0  ;;  %v1802_v6 = vmax.f32 %v1674_v51, 0.0 }
 0x13b   : > { %v1611_v60 = vadd.f32 %v4006_v7, %v1476_v52  ;;  %v1675_v61 = vadd.f32 %v4006_v7, %v1540_v53  ;;  %v1741_v62 = vmax.f32 %v1613_v54, 0.0  ;;  %v1481_v0 = vmul.f32 %v3457_v56, %v4002_v2 }
 0x13c   : > { %v1805_v63 = vmax.f32 %v1677_v55, 0.0  ;;  %v1545_v1 = vmul.f32 %v3521_v57, %v4002_v2  ;;  %v1045_v3 = vpop.f32.mrf.mxu0  ;;  %v1301_v4 = vpop.f32.mrf.mxu1 }
 0x13d   : > { %v1739_v8 = vmax.f32 %v1611_v60, 0.0  ;;  %v1803_v9 = vmax.f32 %v1675_v61, 0.0  ;;  %v3042_v10 = vpack.c.bf16 %v1741_v62, %v1740_v58  ;;  %v1479_v12 = vmul.f32 %v4002_v2, %v1045_v3 }
 0x13e   : > { %v3202_v11 = vpack.c.bf16 %v1805_v63, %v1804_v59  ;;  %v1543_v13 = vmul.f32 %v4002_v2, %v1301_v4  ;;  %v3458_v14 = vpop.f32.mrf.mxu0  ;;  %v3522_v15 = vpop.f32.mrf.mxu1  ;;  %v1616_v18 = vadd.f32 %v4006_v7, %v1481_v0  ;;  %v1680_v19 = vadd.f32 %v4006_v7, %v1545_v1 }
 0x13f   : > { %v3037_v16 = vpack.c.bf16 %v1739_v8, %v1738_v5  ;;  %v3197_v17 = vpack.c.bf16 %v1803_v9, %v1802_v6  ;;  %3306 = vst [vmem:[%s4029_s21 + $0x68] sm:$0xff] %v3042_v10   ;;  %v1482_v20 = vmul.f32 %v3458_v14, %v4002_v2  ;;  %v1546_v21 = vmul.f32 %v3522_v15, %v4002_v2 }
 0x140   : > { %3338 = vst [vmem:[%s4029_s21 + $0x168] sm:$0xff] %v3202_v11   ;;  %v1048_v22 = vpop.f32.mrf.mxu0  ;;  %v1304_v23 = vpop.f32.mrf.mxu1  ;;  %v1614_v24 = vadd.f32 %v4006_v7, %v1479_v12  ;;  %v1678_v25 = vadd.f32 %v4006_v7, %v1543_v13  ;;  %v1744_v36 = vmax.f32 %v1616_v18, 0.0  ;;  %v1808_v37 = vmax.f32 %v1680_v19, 0.0 }
 0x141   : > { %3305 = vst [vmem:[%s4029_s21 + $0x60] sm:$0xff] %v3037_v16   ;;  %3337 = vst [vmem:[%s4029_s21 + $0x160] sm:$0xff] %v3197_v17   ;;  %v1480_v26 = vmul.f32 %v4002_v2, %v1048_v22  ;;  %v1544_v27 = vmul.f32 %v4002_v2, %v1304_v23  ;;  %v1617_v28 = vadd.f32 %v4006_v7, %v1482_v20 }
 0x142   : > { %v1681_v29 = vadd.f32 %v4006_v7, %v1546_v21  ;;  %v3461_v30 = vpop.f32.mrf.mxu0  ;;  %v3525_v31 = vpop.f32.mrf.mxu1  ;;  %v1742_v42 = vmax.f32 %v1614_v24, 0.0  ;;  %v1806_v43 = vmax.f32 %v1678_v25, 0.0 }
 0x143   : > { %v1615_v32 = vadd.f32 %v4006_v7, %v1480_v26  ;;  %v1679_v33 = vadd.f32 %v4006_v7, %v1544_v27  ;;  %v1485_v34 = vmul.f32 %v3461_v30, %v4002_v2  ;;  %v1549_v35 = vmul.f32 %v3525_v31, %v4002_v2 }
 0x144   : > { %v1745_v38 = vmax.f32 %v1617_v28, 0.0  ;;  %v1809_v39 = vmax.f32 %v1681_v29, 0.0  ;;  %v1061_v40 = vpop.f32.mrf.mxu0  ;;  %v1317_v41 = vpop.f32.mrf.mxu1 }
 0x145   : > { %v1743_v44 = vmax.f32 %v1615_v32, 0.0  ;;  %v1807_v45 = vmax.f32 %v1679_v33, 0.0  ;;  %v1483_v48 = vmul.f32 %v4002_v2, %v1061_v40  ;;  %v1547_v49 = vmul.f32 %v4002_v2, %v1317_v41 }
 0x146   : > { %v3052_v46 = vpack.c.bf16 %v1745_v38, %v1744_v36  ;;  %v3212_v47 = vpack.c.bf16 %v1809_v39, %v1808_v37  ;;  %v3462_v50 = vpop.f32.mrf.mxu0  ;;  %v3526_v51 = vpop.f32.mrf.mxu1  ;;  %v1620_v54 = vadd.f32 %v4006_v7, %v1485_v34  ;;  %v1684_v55 = vadd.f32 %v4006_v7, %v1549_v35 }
 0x147   : > { %v3047_v52 = vpack.c.bf16 %v1743_v44, %v1742_v42  ;;  %v3207_v53 = vpack.c.bf16 %v1807_v45, %v1806_v43  ;;  %v1486_v56 = vmul.f32 %v3462_v50, %v4002_v2  ;;  %v1550_v57 = vmul.f32 %v3526_v51, %v4002_v2 }
 0x148   : > { %3308 = vst [vmem:[%s4029_s21 + $0x78] sm:$0xff] %v3052_v46   ;;  %3340 = vst [vmem:[%s4029_s21 + $0x178] sm:$0xff] %v3212_v47   ;;  %v1064_v58 = vpop.f32.mrf.mxu0  ;;  %v1320_v59 = vpop.f32.mrf.mxu1  ;;  %v1618_v60 = vadd.f32 %v4006_v7, %v1483_v48  ;;  %v1682_v61 = vadd.f32 %v4006_v7, %v1547_v49  ;;  %v1748_v5 = vmax.f32 %v1620_v54, 0.0  ;;  %v1812_v6 = vmax.f32 %v1684_v55, 0.0 }
 0x149   : > { %3307 = vst [vmem:[%s4029_s21 + $0x70] sm:$0xff] %v3047_v52   ;;  %3339 = vst [vmem:[%s4029_s21 + $0x170] sm:$0xff] %v3207_v53   ;;  %v1484_v62 = vmul.f32 %v4002_v2, %v1064_v58  ;;  %v1548_v63 = vmul.f32 %v4002_v2, %v1320_v59  ;;  %v1621_v0 = vadd.f32 %v4006_v7, %v1486_v56 }
 0x14a   : > { %v1685_v1 = vadd.f32 %v4006_v7, %v1550_v57  ;;  %v3465_v3 = vpop.f32.mrf.mxu0  ;;  %v3529_v4 = vpop.f32.mrf.mxu1  ;;  %v1746_v16 = vmax.f32 %v1618_v60, 0.0  ;;  %v1810_v17 = vmax.f32 %v1682_v61, 0.0 }
 0x14b   : > { %v1619_v8 = vadd.f32 %v4006_v7, %v1484_v62  ;;  %v1683_v9 = vadd.f32 %v4006_v7, %v1548_v63  ;;  %v1749_v10 = vmax.f32 %v1621_v0, 0.0  ;;  %v1489_v12 = vmul.f32 %v3465_v3, %v4002_v2 }
 0x14c   : > { %v1813_v11 = vmax.f32 %v1685_v1, 0.0  ;;  %v1553_v13 = vmul.f32 %v3529_v4, %v4002_v2  ;;  %v1077_v14 = vpop.f32.mrf.mxu0  ;;  %v1333_v15 = vpop.f32.mrf.mxu1 }
 0x14d   : > { %v1747_v18 = vmax.f32 %v1619_v8, 0.0  ;;  %v1811_v19 = vmax.f32 %v1683_v9, 0.0  ;;  %v3062_v20 = vpack.c.bf16 %v1749_v10, %v1748_v5  ;;  %v1487_v22 = vmul.f32 %v4002_v2, %v1077_v14 }
 0x14e   : > { %v3222_v21 = vpack.c.bf16 %v1813_v11, %v1812_v6  ;;  %v1551_v23 = vmul.f32 %v4002_v2, %v1333_v15  ;;  %v3466_v24 = vpop.f32.mrf.mxu0  ;;  %v3530_v25 = vpop.f32.mrf.mxu1  ;;  %v1624_v28 = vadd.f32 %v4006_v7, %v1489_v12  ;;  %v1688_v29 = vadd.f32 %v4006_v7, %v1553_v13 }
 0x14f   : > { %v3057_v26 = vpack.c.bf16 %v1747_v18, %v1746_v16  ;;  %v3217_v27 = vpack.c.bf16 %v1811_v19, %v1810_v17  ;;  %3310 = vst [vmem:[%s4029_s21 + $0x88] sm:$0xff] %v3062_v20   ;;  %v1490_v30 = vmul.f32 %v3466_v24, %v4002_v2  ;;  %v1554_v31 = vmul.f32 %v3530_v25, %v4002_v2 }
 0x150   : > { %3342 = vst [vmem:[%s4029_s21 + $0x188] sm:$0xff] %v3222_v21   ;;  %v1080_v32 = vpop.f32.mrf.mxu0  ;;  %v1336_v33 = vpop.f32.mrf.mxu1  ;;  %v1622_v34 = vadd.f32 %v4006_v7, %v1487_v22  ;;  %v1686_v35 = vadd.f32 %v4006_v7, %v1551_v23  ;;  %v1752_v46 = vmax.f32 %v1624_v28, 0.0  ;;  %v1816_v47 = vmax.f32 %v1688_v29, 0.0 }
 0x151   : > { %3309 = vst [vmem:[%s4029_s21 + $0x80] sm:$0xff] %v3057_v26   ;;  %3341 = vst [vmem:[%s4029_s21 + $0x180] sm:$0xff] %v3217_v27   ;;  %v1488_v36 = vmul.f32 %v4002_v2, %v1080_v32  ;;  %v1552_v37 = vmul.f32 %v4002_v2, %v1336_v33  ;;  %v1625_v38 = vadd.f32 %v4006_v7, %v1490_v30 }
 0x152   : > { %v1689_v39 = vadd.f32 %v4006_v7, %v1554_v31  ;;  %v3469_v40 = vpop.f32.mrf.mxu0  ;;  %v3533_v41 = vpop.f32.mrf.mxu1  ;;  %v1750_v52 = vmax.f32 %v1622_v34, 0.0  ;;  %v1814_v53 = vmax.f32 %v1686_v35, 0.0 }
 0x153   : > { %v1623_v42 = vadd.f32 %v4006_v7, %v1488_v36  ;;  %v1687_v43 = vadd.f32 %v4006_v7, %v1552_v37  ;;  %v1493_v44 = vmul.f32 %v3469_v40, %v4002_v2  ;;  %v1557_v45 = vmul.f32 %v3533_v41, %v4002_v2 }
 0x154   : > { %v1753_v48 = vmax.f32 %v1625_v38, 0.0  ;;  %v1817_v49 = vmax.f32 %v1689_v39, 0.0  ;;  %v1093_v50 = vpop.f32.mrf.mxu0  ;;  %v1349_v51 = vpop.f32.mrf.mxu1 }
 0x155   : > { %v1751_v54 = vmax.f32 %v1623_v42, 0.0  ;;  %v1815_v55 = vmax.f32 %v1687_v43, 0.0  ;;  %v1491_v58 = vmul.f32 %v4002_v2, %v1093_v50  ;;  %v1555_v59 = vmul.f32 %v4002_v2, %v1349_v51 }
 0x156   : > { %v3072_v56 = vpack.c.bf16 %v1753_v48, %v1752_v46  ;;  %v3232_v57 = vpack.c.bf16 %v1817_v49, %v1816_v47  ;;  %v3470_v60 = vpop.f32.mrf.mxu0  ;;  %v3534_v61 = vpop.f32.mrf.mxu1  ;;  %v1628_v0 = vadd.f32 %v4006_v7, %v1493_v44  ;;  %v1692_v1 = vadd.f32 %v4006_v7, %v1557_v45 }
 0x157   : > { %v3067_v62 = vpack.c.bf16 %v1751_v54, %v1750_v52  ;;  %v3227_v63 = vpack.c.bf16 %v1815_v55, %v1814_v53  ;;  %v1494_v3 = vmul.f32 %v3470_v60, %v4002_v2  ;;  %v1558_v4 = vmul.f32 %v3534_v61, %v4002_v2 }
 0x158   : > { %3312 = vst [vmem:[%s4029_s21 + $0x98] sm:$0xff] %v3072_v56   ;;  %3344 = vst [vmem:[%s4029_s21 + $0x198] sm:$0xff] %v3232_v57   ;;  %v1096_v5 = vpop.f32.mrf.mxu0  ;;  %v1352_v6 = vpop.f32.mrf.mxu1  ;;  %v1626_v8 = vadd.f32 %v4006_v7, %v1491_v58  ;;  %v1690_v9 = vadd.f32 %v4006_v7, %v1555_v59  ;;  %v1756_v16 = vmax.f32 %v1628_v0, 0.0  ;;  %v1820_v17 = vmax.f32 %v1692_v1, 0.0 }
 0x159   : > { %3311 = vst [vmem:[%s4029_s21 + $0x90] sm:$0xff] %v3067_v62   ;;  %3343 = vst [vmem:[%s4029_s21 + $0x190] sm:$0xff] %v3227_v63   ;;  %v1492_v10 = vmul.f32 %v4002_v2, %v1096_v5  ;;  %v1556_v11 = vmul.f32 %v4002_v2, %v1352_v6  ;;  %v1629_v12 = vadd.f32 %v4006_v7, %v1494_v3 }
 0x15a   : > { %v1693_v13 = vadd.f32 %v4006_v7, %v1558_v4  ;;  %v3473_v14 = vpop.f32.mrf.mxu0  ;;  %v3537_v15 = vpop.f32.mrf.mxu1  ;;  %v1754_v26 = vmax.f32 %v1626_v8, 0.0  ;;  %v1818_v27 = vmax.f32 %v1690_v9, 0.0 }
 0x15b   : > { %v1627_v18 = vadd.f32 %v4006_v7, %v1492_v10  ;;  %v1691_v19 = vadd.f32 %v4006_v7, %v1556_v11  ;;  %v1757_v20 = vmax.f32 %v1629_v12, 0.0  ;;  %v1497_v22 = vmul.f32 %v3473_v14, %v4002_v2 }
 0x15c   : > { %v1821_v21 = vmax.f32 %v1693_v13, 0.0  ;;  %v1561_v23 = vmul.f32 %v3537_v15, %v4002_v2  ;;  %v1109_v24 = vpop.f32.mrf.mxu0  ;;  %v1365_v25 = vpop.f32.mrf.mxu1 }
 0x15d   : > { %v1755_v28 = vmax.f32 %v1627_v18, 0.0  ;;  %v1819_v29 = vmax.f32 %v1691_v19, 0.0  ;;  %v3082_v30 = vpack.c.bf16 %v1757_v20, %v1756_v16  ;;  %v1495_v32 = vmul.f32 %v4002_v2, %v1109_v24 }
 0x15e   : > { %v3242_v31 = vpack.c.bf16 %v1821_v21, %v1820_v17  ;;  %v1559_v33 = vmul.f32 %v4002_v2, %v1365_v25  ;;  %v3474_v34 = vpop.f32.mrf.mxu0  ;;  %v3538_v35 = vpop.f32.mrf.mxu1  ;;  %v1632_v38 = vadd.f32 %v4006_v7, %v1497_v22  ;;  %v1696_v39 = vadd.f32 %v4006_v7, %v1561_v23 }
 0x15f   : > { %v3077_v36 = vpack.c.bf16 %v1755_v28, %v1754_v26  ;;  %v3237_v37 = vpack.c.bf16 %v1819_v29, %v1818_v27  ;;  %3314 = vst [vmem:[%s4029_s21 + $0xa8] sm:$0xff] %v3082_v30   ;;  %v1498_v40 = vmul.f32 %v3474_v34, %v4002_v2  ;;  %v1562_v41 = vmul.f32 %v3538_v35, %v4002_v2 }
 0x160   : > { %3346 = vst [vmem:[%s4029_s21 + $0x1a8] sm:$0xff] %v3242_v31   ;;  %v1112_v42 = vpop.f32.mrf.mxu0  ;;  %v1368_v43 = vpop.f32.mrf.mxu1  ;;  %v1630_v44 = vadd.f32 %v4006_v7, %v1495_v32  ;;  %v1694_v45 = vadd.f32 %v4006_v7, %v1559_v33  ;;  %v1760_v56 = vmax.f32 %v1632_v38, 0.0  ;;  %v1824_v57 = vmax.f32 %v1696_v39, 0.0  ;;  %v4269_v32 = vld [vmem:[#allocation4] ss:$0 sm:$0xff] }
 0x161   : > { %3313 = vst [vmem:[%s4029_s21 + $0xa0] sm:$0xff] %v3077_v36   ;;  %3345 = vst [vmem:[%s4029_s21 + $0x1a0] sm:$0xff] %v3237_v37   ;;  %v1496_v46 = vmul.f32 %v4002_v2, %v1112_v42  ;;  %v1560_v47 = vmul.f32 %v4002_v2, %v1368_v43  ;;  %v1633_v48 = vadd.f32 %v4006_v7, %v1498_v40 }
 0x162   : > { %v1697_v49 = vadd.f32 %v4006_v7, %v1562_v41  ;;  %v3477_v50 = vpop.f32.mrf.mxu0  ;;  %v3541_v51 = vpop.f32.mrf.mxu1  ;;  %v1758_v62 = vmax.f32 %v1630_v44, 0.0  ;;  %v1822_v63 = vmax.f32 %v1694_v45, 0.0 }
 0x163   : > { %v1631_v52 = vadd.f32 %v4006_v7, %v1496_v46  ;;  %v1695_v53 = vadd.f32 %v4006_v7, %v1560_v47  ;;  %v1501_v54 = vmul.f32 %v3477_v50, %v4002_v2  ;;  %v1565_v55 = vmul.f32 %v3541_v51, %v4002_v2  ;;  %v4277_v47 = vld [vmem:[#allocation6] ss:$0 sm:$0xff] }
 0x164   : > { %v1761_v58 = vmax.f32 %v1633_v48, 0.0  ;;  %v1825_v59 = vmax.f32 %v1697_v49, 0.0  ;;  %v1125_v60 = vpop.f32.mrf.mxu0  ;;  %v1381_v61 = vpop.f32.mrf.mxu1 }
 0x165   : > { %v1759_v0 = vmax.f32 %v1631_v52, 0.0  ;;  %v1823_v1 = vmax.f32 %v1695_v53, 0.0  ;;  %v1499_v5 = vmul.f32 %v4002_v2, %v1125_v60  ;;  %v1563_v6 = vmul.f32 %v4002_v2, %v1381_v61 }
 0x166   : > { %v3092_v3 = vpack.c.bf16 %v1761_v58, %v1760_v56  ;;  %v3252_v4 = vpack.c.bf16 %v1825_v59, %v1824_v57  ;;  %v3478_v8 = vpop.f32.mrf.mxu0  ;;  %v3542_v9 = vpop.f32.mrf.mxu1  ;;  %v1636_v12 = vadd.f32 %v4006_v7, %v1501_v54  ;;  %v1700_v13 = vadd.f32 %v4006_v7, %v1565_v55 }
 0x167   : > { %v3087_v10 = vpack.c.bf16 %v1759_v0, %v1758_v62  ;;  %v3247_v11 = vpack.c.bf16 %v1823_v1, %v1822_v63  ;;  %v1502_v14 = vmul.f32 %v3478_v8, %v4002_v2  ;;  %v1566_v15 = vmul.f32 %v3542_v9, %v4002_v2 }
 0x168   : > { %3316 = vst [vmem:[%s4029_s21 + $0xb8] sm:$0xff] %v3092_v3   ;;  %3348 = vst [vmem:[%s4029_s21 + $0x1b8] sm:$0xff] %v3252_v4   ;;  %v1128_v16 = vpop.f32.mrf.mxu0  ;;  %v1384_v17 = vpop.f32.mrf.mxu1  ;;  %v1634_v18 = vadd.f32 %v4006_v7, %v1499_v5  ;;  %v1698_v19 = vadd.f32 %v4006_v7, %v1563_v6  ;;  %v1764_v26 = vmax.f32 %v1636_v12, 0.0  ;;  %v1828_v27 = vmax.f32 %v1700_v13, 0.0 }
 0x169   : > { %3315 = vst [vmem:[%s4029_s21 + $0xb0] sm:$0xff] %v3087_v10   ;;  %3347 = vst [vmem:[%s4029_s21 + $0x1b0] sm:$0xff] %v3247_v11   ;;  %v1500_v20 = vmul.f32 %v4002_v2, %v1128_v16  ;;  %v1564_v21 = vmul.f32 %v4002_v2, %v1384_v17  ;;  %v1637_v22 = vadd.f32 %v4006_v7, %v1502_v14 }
 0x16a   : > { %v1701_v23 = vadd.f32 %v4006_v7, %v1566_v15  ;;  %v3481_v24 = vpop.f32.mrf.mxu0  ;;  %v3545_v25 = vpop.f32.mrf.mxu1  ;;  %v1762_v36 = vmax.f32 %v1634_v18, 0.0  ;;  %v1826_v37 = vmax.f32 %v1698_v19, 0.0 }
 0x16b   : > { %v1635_v28 = vadd.f32 %v4006_v7, %v1500_v20  ;;  %v1699_v29 = vadd.f32 %v4006_v7, %v1564_v21  ;;  %v1765_v30 = vmax.f32 %v1637_v22, 0.0  ;;  %v1505_v33 = vmul.f32 %v4269_v32, %v3481_v24 }
 0x16c   : > { %v1829_v31 = vmax.f32 %v1701_v23, 0.0  ;;  %v1569_v2 = vmul.f32 %v4269_v32, %v3545_v25  ;;  %v1141_v34 = vpop.f32.mrf.mxu0  ;;  %v1397_v35 = vpop.f32.mrf.mxu1 }
 0x16d   : > { %v1763_v38 = vmax.f32 %v1635_v28, 0.0  ;;  %v1827_v39 = vmax.f32 %v1699_v29, 0.0  ;;  %v3102_v40 = vpack.c.bf16 %v1765_v30, %v1764_v26  ;;  %v1503_v7 = vmul.f32 %v4269_v32, %v1141_v34 }
 0x16e   : > { %v3262_v41 = vpack.c.bf16 %v1829_v31, %v1828_v27  ;;  %v1567_v42 = vmul.f32 %v4269_v32, %v1397_v35  ;;  %v3482_v43 = vpop.f32.mrf.mxu0  ;;  %v3546_v44 = vpop.f32.mrf.mxu1  ;;  %v1640_v48 = vadd.f32 %v4277_v47, %v1505_v33  ;;  %v1704_v49 = vadd.f32 %v4277_v47, %v1569_v2 }
 0x16f   : > { %v3097_v45 = vpack.c.bf16 %v1763_v38, %v1762_v36  ;;  %v3257_v46 = vpack.c.bf16 %v1827_v39, %v1826_v37  ;;  %3318 = vst [vmem:[%s4029_s21 + $0xc8] sm:$0xff] %v3102_v40   ;;  %v1506_v50 = vmul.f32 %v4269_v32, %v3482_v43  ;;  %v1570_v51 = vmul.f32 %v4269_v32, %v3546_v44 }
 0x170   : > { %3350 = vst [vmem:[%s4029_s21 + $0x1c8] sm:$0xff] %v3262_v41   ;;  %v1144_v52 = vpop.f32.mrf.mxu0  ;;  %v1400_v53 = vpop.f32.mrf.mxu1  ;;  %v1638_v54 = vadd.f32 %v4277_v47, %v1503_v7  ;;  %v1702_v55 = vadd.f32 %v4277_v47, %v1567_v42  ;;  %v1768_v3 = vmax.f32 %v1640_v48, 0.0  ;;  %v1832_v4 = vmax.f32 %v1704_v49, 0.0 }
 0x171   : > { %3317 = vst [vmem:[%s4029_s21 + $0xc0] sm:$0xff] %v3097_v45   ;;  %3349 = vst [vmem:[%s4029_s21 + $0x1c0] sm:$0xff] %v3257_v46   ;;  %v1504_v56 = vmul.f32 %v4269_v32, %v1144_v52  ;;  %v1568_v57 = vmul.f32 %v4269_v32, %v1400_v53  ;;  %v1641_v58 = vadd.f32 %v4277_v47, %v1506_v50 }
 0x172   : > { %v1705_v59 = vadd.f32 %v4277_v47, %v1570_v51  ;;  %v3485_v60 = vpop.f32.mrf.mxu0  ;;  %v3549_v61 = vpop.f32.mrf.mxu1  ;;  %v1766_v10 = vmax.f32 %v1638_v54, 0.0  ;;  %v1830_v11 = vmax.f32 %v1702_v55, 0.0 }
 0x173   : > { %v1639_v62 = vadd.f32 %v4277_v47, %v1504_v56  ;;  %v1703_v63 = vadd.f32 %v4277_v47, %v1568_v57  ;;  %v1509_v0 = vmul.f32 %v4269_v32, %v3485_v60  ;;  %v1573_v1 = vmul.f32 %v4269_v32, %v3549_v61 }
 0x174   : > { %v1769_v5 = vmax.f32 %v1641_v58, 0.0  ;;  %v1833_v6 = vmax.f32 %v1705_v59, 0.0  ;;  %v1157_v8 = vpop.f32.mrf.mxu0  ;;  %v1413_v9 = vpop.f32.mrf.mxu1 }
 0x175   : > { %v1767_v12 = vmax.f32 %v1639_v62, 0.0  ;;  %v1831_v13 = vmax.f32 %v1703_v63, 0.0  ;;  %v1507_v16 = vmul.f32 %v4269_v32, %v1157_v8  ;;  %v1571_v17 = vmul.f32 %v4269_v32, %v1413_v9 }
 0x176   : > { %v3112_v14 = vpack.c.bf16 %v1769_v5, %v1768_v3  ;;  %v3272_v15 = vpack.c.bf16 %v1833_v6, %v1832_v4  ;;  %v3486_v18 = vpop.f32.mrf.mxu0  ;;  %v3550_v19 = vpop.f32.mrf.mxu1  ;;  %v1644_v22 = vadd.f32 %v4277_v47, %v1509_v0  ;;  %v1708_v23 = vadd.f32 %v4277_v47, %v1573_v1 }
 0x177   : > { %v3107_v20 = vpack.c.bf16 %v1767_v12, %v1766_v10  ;;  %v3267_v21 = vpack.c.bf16 %v1831_v13, %v1830_v11  ;;  %v1510_v24 = vmul.f32 %v4269_v32, %v3486_v18  ;;  %v1574_v25 = vmul.f32 %v4269_v32, %v3550_v19 }
 0x178   : > { %3320 = vst [vmem:[%s4029_s21 + $0xd8] sm:$0xff] %v3112_v14   ;;  %3352 = vst [vmem:[%s4029_s21 + $0x1d8] sm:$0xff] %v3272_v15   ;;  %v1160_v26 = vpop.f32.mrf.mxu0  ;;  %v1416_v27 = vpop.f32.mrf.mxu1  ;;  %v1642_v28 = vadd.f32 %v4277_v47, %v1507_v16  ;;  %v1706_v29 = vadd.f32 %v4277_v47, %v1571_v17  ;;  %v1772_v36 = vmax.f32 %v1644_v22, 0.0  ;;  %v1836_v37 = vmax.f32 %v1708_v23, 0.0 }
 0x179   : > { %3319 = vst [vmem:[%s4029_s21 + $0xd0] sm:$0xff] %v3107_v20   ;;  %3351 = vst [vmem:[%s4029_s21 + $0x1d0] sm:$0xff] %v3267_v21   ;;  %v1508_v30 = vmul.f32 %v4269_v32, %v1160_v26  ;;  %v1572_v31 = vmul.f32 %v4269_v32, %v1416_v27  ;;  %v1645_v33 = vadd.f32 %v4277_v47, %v1510_v24 }
 0x17a   : > { %v1709_v2 = vadd.f32 %v4277_v47, %v1574_v25  ;;  %v3489_v34 = vpop.f32.mrf.mxu0  ;;  %v3553_v35 = vpop.f32.mrf.mxu1  ;;  %v1770_v45 = vmax.f32 %v1642_v28, 0.0  ;;  %v1834_v46 = vmax.f32 %v1706_v29, 0.0 }
 0x17b   : > { %v1643_v38 = vadd.f32 %v4277_v47, %v1508_v30  ;;  %v1707_v39 = vadd.f32 %v4277_v47, %v1572_v31  ;;  %v1773_v40 = vmax.f32 %v1645_v33, 0.0  ;;  %v1513_v7 = vmul.f32 %v4269_v32, %v3489_v34 }
 0x17c   : > { %v1837_v41 = vmax.f32 %v1709_v2, 0.0  ;;  %v1577_v42 = vmul.f32 %v4269_v32, %v3553_v35  ;;  %v1173_v43 = vpop.f32.mrf.mxu0  ;;  %v1429_v44 = vpop.f32.mrf.mxu1 }
 0x17d   : > { %v1771_v48 = vmax.f32 %v1643_v38, 0.0  ;;  %v1835_v49 = vmax.f32 %v1707_v39, 0.0  ;;  %v3122_v50 = vpack.c.bf16 %v1773_v40, %v1772_v36  ;;  %v1511_v52 = vmul.f32 %v4269_v32, %v1173_v43 }
 0x17e   : > { %v3282_v51 = vpack.c.bf16 %v1837_v41, %v1836_v37  ;;  %v1575_v53 = vmul.f32 %v4269_v32, %v1429_v44  ;;  %v3490_v54 = vpop.f32.mrf.mxu0  ;;  %v3554_v55 = vpop.f32.mrf.mxu1  ;;  %v1648_v58 = vadd.f32 %v4277_v47, %v1513_v7  ;;  %v1712_v59 = vadd.f32 %v4277_v47, %v1577_v42 }
 0x17f   : > { %v3117_v56 = vpack.c.bf16 %v1771_v48, %v1770_v45  ;;  %v3277_v57 = vpack.c.bf16 %v1835_v49, %v1834_v46  ;;  %3322 = vst [vmem:[%s4029_s21 + $0xe8] sm:$0xff] %v3122_v50   ;;  %v1514_v60 = vmul.f32 %v4269_v32, %v3490_v54  ;;  %v1578_v61 = vmul.f32 %v4269_v32, %v3554_v55 }
 0x180   : > { %3354 = vst [vmem:[%s4029_s21 + $0x1e8] sm:$0xff] %v3282_v51   ;;  %v1176_v62 = vpop.f32.mrf.mxu0  ;;  %v1432_v63 = vpop.f32.mrf.mxu1  ;;  %v1646_v0 = vadd.f32 %v4277_v47, %v1511_v52  ;;  %v1710_v1 = vadd.f32 %v4277_v47, %v1575_v53  ;;  %v1776_v10 = vmax.f32 %v1648_v58, 0.0  ;;  %v1840_v11 = vmax.f32 %v1712_v59, 0.0 }
 0x181   : > { %3321 = vst [vmem:[%s4029_s21 + $0xe0] sm:$0xff] %v3117_v56   ;;  %3353 = vst [vmem:[%s4029_s21 + $0x1e0] sm:$0xff] %v3277_v57   ;;  %v1512_v3 = vmul.f32 %v4269_v32, %v1176_v62  ;;  %v1576_v4 = vmul.f32 %v4269_v32, %v1432_v63  ;;  %v1649_v5 = vadd.f32 %v4277_v47, %v1514_v60 }
 0x182   : > { %v1713_v6 = vadd.f32 %v4277_v47, %v1578_v61  ;;  %v1774_v14 = vmax.f32 %v1646_v0, 0.0  ;;  %v1838_v15 = vmax.f32 %v1710_v1, 0.0 }
 0x183   : > { %v1647_v8 = vadd.f32 %v4277_v47, %v1512_v3  ;;  %v1711_v9 = vadd.f32 %v4277_v47, %v1576_v4  ;;  %v1777_v12 = vmax.f32 %v1649_v5, 0.0 }
 0x184   : > { %v1841_v13 = vmax.f32 %v1713_v6, 0.0 }
 0x185   : > { %v1775_v16 = vmax.f32 %v1647_v8, 0.0  ;;  %v1839_v32 = vmax.f32 %v1711_v9, 0.0  ;;  %v3132_v17 = vpack.c.bf16 %v1777_v12, %v1776_v10 }
 0x186   : > { %v3292_v18 = vpack.c.bf16 %v1841_v13, %v1840_v11 }
 0x187   : > { %v3127_v19 = vpack.c.bf16 %v1775_v16, %v1774_v14  ;;  %v3287_v20 = vpack.c.bf16 %v1839_v32, %v1838_v15  ;;  %3324 = vst [vmem:[%s4029_s21 + $0xf8] sm:$0xff] %v3132_v17  }
 0x188   : > { %3356 = vst [vmem:[%s4029_s21 + $0x1f8] sm:$0xff] %v3292_v18  }
 0x189   : > { %3323 = vst [vmem:[%s4029_s21 + $0xf0] sm:$0xff] %v3127_v19   ;;  %3355 = vst [vmem:[%s4029_s21 + $0x1f0] sm:$0xff] %v3287_v20  }
 0x18a PF: > { %s16_s15 = sadd.s32 1, %s3760_s15  }
 0x18b   : > { %p13_p5 = scmp.ge.s32.totalorder %s16_s15, 4  }
 0x18d   :  { %15 = sbr.rel (!%p13_p5) target bundleno = 2 (0x2), region = 79 }
 0x192   :  { %2504 = vsyncpa [#allocation3], 1 }
 0x193   :  { %2506 = vsyncpa [#allocation3 + $0x1], 1 }
 0x194   :  { %2507 = vsyncpa [#allocation5], 1 }

// kernel: _lambda_.8
= control target key start
LH: loop header
LB: loop body
LE: loop exit
PB: predicated region body
PF: predicated region fallthrough
CT: control target
= control target key end

     0   :  { %s5418_s15 = smov 0   ;;  %s6443_s0 = inlined_call_operand.vmem [shape: bf16[2048,288], index: 0, kind: input, shape index: {}]   ;;  %s6444_s1 = inlined_call_operand.vmem [shape: bf16[288,128], index: 1, kind: input, shape index: {}]   ;;  %s6445_s2 = inlined_call_operand.vmem [shape: f32[1,128], index: 2, kind: input, shape index: {}]   ;;  %s6446_s3 = inlined_call_operand.vmem [shape: f32[1,128], index: 3, kind: input, shape index: {}]   ;;  %s6447_s4 = inlined_call_operand.vmem [shape: bf16[2048,128], index: 4, kind: output, shape index: {}]  }
   0x1 LB: > { %s3942_s16 = sadd.s32 4294967295, %s5390_s15   ;;  %p3946_p0 = scmp.ge.s32.totalorder %s5390_s15, 1  ;;  %s5390_s15 = sphi %s5418_s15, %s14_s15  }
   0x2   : > { %p164_p1 = scmp.lt.s32.totalorder %s5390_s15, 3 }
   0x4   : > { %p165_p2 = pnand %p3946_p0, %p164_p1 }
   0x6   : > { %168 = sbr.rel (%p165_p2) target bundleno = 662 (0x296), region = 36 }
   0xb   : > { %v5108_v0 = vld [vmem:[%s6444_s1 + $0x38] sm:$0xff]   ;;  %v5392_v1 = vmov 0   ;;  %s3947_s19 = sshll.u32 %s3942_s16, 7  ;;  %v5109_v2 = vld [vmem:[%s6444_s1 + $0x30] sm:$0xff]   ;;  %v5110_v3 = vld [vmem:[%s6444_s1 + $0x28] sm:$0xff]   ;;  %vm1565_vm0 = vcmask 261120  }
   0xc   : > { %1758 = vmatprep.subr.bf16.mxu0 %v5392_v1  ;;  %5066 = vmatprep.subr.bf16.mxu1 %v5392_v1  ;;  %p192_p3 = scmp.lt.s32.totalorder %s3947_s19, 255  ;;  %v5111_v4 = vld [vmem:[%s6444_s1 + $0x20] sm:$0xff]   ;;  %v5112_v5 = vld [vmem:[%s6444_s1 + $0x18] sm:$0xff]   ;;  %v5113_v7 = vld [vmem:[%s6444_s1 + $0x10] sm:$0xff]  }
   0xd   : > { %1759 = vmatpush1.bf16.msra.mxu0 %v5108_v0  ;;  %5082 = vmatpush1.bf16.msra.mxu1 %v5108_v0  ;;  %v5114_v9 = vld [vmem:[%s6444_s1 + $0x8] sm:$0xff]   ;;  %v5115_v10 = vld [vmem:[%s6444_s1] sm:$0xff]   ;;  %v5116_v11 = vld [vmem:[%s6444_s1 + $0x78] sm:$0xff]  }
   0xe   : > { %1760 = vmatprep.subr.bf16.mxu0 %v5392_v1  ;;  %5067 = vmatprep.subr.bf16.mxu1 %v5392_v1  ;;  %s6493_s19 = smov (!%p192_p3, %s3947_s19), 255  ;;  %v5117_v12 = vld [vmem:[%s6444_s1 + $0x70] sm:$0xff]   ;;  %v5118_v13 = vld [vmem:[%s6444_s1 + $0x68] sm:$0xff]   ;;  %v5119_v14 = vld [vmem:[%s6444_s1 + $0x60] sm:$0xff]  }
   0xf   : > { %s5098_s26 = smul.u32 12, %s6493_s19  ;;  %v5120_v15 = vld [vmem:[%s6444_s1 + $0x58] sm:$0xff]   ;;  %v5121_v16 = vld [vmem:[%s6444_s1 + $0x50] sm:$0xff]   ;;  %v5122_v17 = vld [vmem:[%s6444_s1 + $0x48] sm:$0xff]   ;;  %s3950_s13 = sshll.u32 %s6493_s19, 2 }
  0x10   : > { %v5123_v18 = vld [vmem:[%s6444_s1 + $0x40] sm:$0xff]   ;;  %v5130_v19 = vld [vmem:[%s6444_s1 + $0x88] sm:$0xff]   ;;  %s5905_s16 = scalar_lea.vmem %s6447_s4, %s3950_s13 }
  0x11   : > { %1761 = vmatpush1.bf16.msra.mxu0 %v5109_v2  ;;  %5083 = vmatpush1.bf16.msra.mxu1 %v5109_v2  ;;  %s5455_s5 = scalar_lea.vmem %s6443_s0, %s5098_s26  ;;  %v5179_v24 = vld [vmem:[%s6444_s1 + $0x80] sm:$0xff]  }
  0x12   : > { %1762 = vmatprep.subr.bf16.mxu0 %v5392_v1  ;;  %5068 = vmatprep.subr.bf16.mxu1 %v5392_v1  ;;  %v5126_v6 = vld [vmem:[%s5455_s5 + $0x4] ss:$12 sps:$4 sm:$0xff]   ;;  %v5124_v20 = vld [vmem:[%s5455_s5] ss:$12 sps:$4 sm:$0xff]   ;;  %v5131_v22 = vld [vmem:[%s5455_s5 + $0x1c] ss:$12 sps:$4 sm:$0xff]  }
  0x13   : > { %v5129_v8 = vld [vmem:[%s5455_s5 + $0x484] ss:$12 sps:$4 sm:$0xff]   ;;  %1790 = vmatprep.mubr.bf16.mxu0 %v5126_v6  ;;  %v5127_v21 = vld [vmem:[%s5455_s5 + $0x480] ss:$12 sps:$4 sm:$0xff]   ;;  %v5133_v23 = vld [vmem:[%s5455_s5 + $0x49c] ss:$12 sps:$4 sm:$0xff]  }
  0x14   : > { %2174 = vmatprep.mubr.bf16.mxu1 %v5129_v8  ;;  %v5135_v25 = vld [vmem:[%s5455_s5 + $0x18] ss:$12 sps:$4 sm:$0xff]   ;;  %v5137_v27 = vld [vmem:[%s5455_s5 + $0x34] ss:$12 sps:$4 sm:$0xff]   ;;  %v5141_v29 = vld [vmem:[%s5455_s5 + $0x30] ss:$12 sps:$4 sm:$0xff]  }
  0x15   : > { %1763 = vmatpush1.bf16.msra.mxu0 %v5110_v3  ;;  %5084 = vmatpush1.bf16.msra.mxu1 %v5110_v3  ;;  %v5136_v26 = vld [vmem:[%s5455_s5 + $0x498] ss:$12 sps:$4 sm:$0xff]   ;;  %v5139_v28 = vld [vmem:[%s5455_s5 + $0x4b4] ss:$12 sps:$4 sm:$0xff]   ;;  %v5142_v30 = vld [vmem:[%s5455_s5 + $0x4b0] ss:$12 sps:$4 sm:$0xff]  }
  0x16   : > { %1764 = vmatprep.subr.bf16.mxu0 %v5392_v1  ;;  %5069 = vmatprep.subr.bf16.mxu1 %v5392_v1  ;;  %v5143_v31 = vld [vmem:[%s5455_s5 + $0x4c] ss:$12 sps:$4 sm:$0xff]   ;;  %v5147_v33 = vld [vmem:[%s5455_s5 + $0x48] ss:$12 sps:$4 sm:$0xff]   ;;  %v5149_v35 = vld [vmem:[%s5455_s5 + $0x64] ss:$12 sps:$4 sm:$0xff]  }
  0x17   : > { %v5145_v32 = vld [vmem:[%s5455_s5 + $0x4cc] ss:$12 sps:$4 sm:$0xff]   ;;  %v5148_v34 = vld [vmem:[%s5455_s5 + $0x4c8] ss:$12 sps:$4 sm:$0xff]   ;;  %v5151_v36 = vld [vmem:[%s5455_s5 + $0x4e4] ss:$12 sps:$4 sm:$0xff]  }
  0x18   : > { %v5153_v37 = vld [vmem:[%s5455_s5 + $0x60] ss:$12 sps:$4 sm:$0xff]   ;;  %v5155_v39 = vld [vmem:[%s5455_s5 + $0x7c] ss:$12 sps:$4 sm:$0xff]   ;;  %v5159_v41 = vld [vmem:[%s5455_s5 + $0x78] ss:$12 sps:$4 sm:$0xff]  }
  0x19   : > { %1765 = vmatpush1.bf16.msra.mxu0 %v5111_v4  ;;  %5085 = vmatpush1.bf16.msra.mxu1 %v5111_v4  ;;  %v5154_v38 = vld [vmem:[%s5455_s5 + $0x4e0] ss:$12 sps:$4 sm:$0xff]   ;;  %v5157_v40 = vld [vmem:[%s5455_s5 + $0x4fc] ss:$12 sps:$4 sm:$0xff]   ;;  %v5160_v42 = vld [vmem:[%s5455_s5 + $0x4f8] ss:$12 sps:$4 sm:$0xff]  }
  0x1a   : > { %1766 = vmatprep.subr.bf16.mxu0 %v5392_v1  ;;  %5070 = vmatprep.subr.bf16.mxu1 %v5392_v1  ;;  %v5161_v43 = vld [vmem:[%s5455_s5 + $0x94] ss:$12 sps:$4 sm:$0xff]   ;;  %v5165_v45 = vld [vmem:[%s5455_s5 + $0x90] ss:$12 sps:$4 sm:$0xff]   ;;  %v5167_v47 = vld [vmem:[%s5455_s5 + $0xac] ss:$12 sps:$4 sm:$0xff]  }
  0x1b   : > { %v5163_v44 = vld [vmem:[%s5455_s5 + $0x514] ss:$12 sps:$4 sm:$0xff]   ;;  %v5166_v46 = vld [vmem:[%s5455_s5 + $0x510] ss:$12 sps:$4 sm:$0xff]   ;;  %v5169_v48 = vld [vmem:[%s5455_s5 + $0x52c] ss:$12 sps:$4 sm:$0xff]  }
  0x1c   : > { %v5171_v49 = vld [vmem:[%s5455_s5 + $0xa8] ss:$12 sps:$4 sm:$0xff]   ;;  %v5173_v51 = vld [vmem:[%s5455_s5 + $0xc4] ss:$12 sps:$4 sm:$0xff]   ;;  %v5177_v53 = vld [vmem:[%s5455_s5 + $0xc0] ss:$12 sps:$4 sm:$0xff]  }
  0x1d   : > { %1767 = vmatpush1.bf16.msra.mxu0 %v5112_v5  ;;  %5086 = vmatpush1.bf16.msra.mxu1 %v5112_v5  ;;  %v5172_v50 = vld [vmem:[%s5455_s5 + $0x528] ss:$12 sps:$4 sm:$0xff]   ;;  %v5175_v52 = vld [vmem:[%s5455_s5 + $0x544] ss:$12 sps:$4 sm:$0xff]   ;;  %v5178_v54 = vld [vmem:[%s5455_s5 + $0x540] ss:$12 sps:$4 sm:$0xff]  }
  0x1e   : > { %1768 = vmatprep.subr.bf16.mxu0 %v5392_v1  ;;  %5071 = vmatprep.subr.bf16.mxu1 %v5392_v1  ;;  %v5180_v55 = vld [vmem:[%s5455_s5 + $0xdc] ss:$12 sps:$4 sm:$0xff]   ;;  %v5184_v57 = vld [vmem:[%s5455_s5 + $0xd8] ss:$12 sps:$4 sm:$0xff]   ;;  %v5186_v59 = vld [vmem:[%s5455_s5 + $0xf4] ss:$12 sps:$4 sm:$0xff]  }
  0x1f   : > { %v5182_v56 = vld [vmem:[%s5455_s5 + $0x55c] ss:$12 sps:$4 sm:$0xff]   ;;  %v5185_v58 = vld [vmem:[%s5455_s5 + $0x558] ss:$12 sps:$4 sm:$0xff]   ;;  %v5188_v60 = vld [vmem:[%s5455_s5 + $0x574] ss:$12 sps:$4 sm:$0xff]  }
  0x20   : > { %v5190_v61 = vld [vmem:[%s5455_s5 + $0xf0] ss:$12 sps:$4 sm:$0xff]   ;;  %v5192_v63 = vld [vmem:[%s5455_s5 + $0x10c] ss:$12 sps:$4 sm:$0xff]   ;;  %v5197_v2 = vld [vmem:[%s5455_s5 + $0x588] ss:$12 sps:$4 sm:$0xff]  }
  0x21   : > { %1769 = vmatpush1.bf16.msra.mxu0 %v5113_v7  ;;  %5087 = vmatpush1.bf16.msra.mxu1 %v5113_v7  ;;  %v5191_v62 = vld [vmem:[%s5455_s5 + $0x570] ss:$12 sps:$4 sm:$0xff]   ;;  %v5194_v0 = vld [vmem:[%s5455_s5 + $0x58c] ss:$12 sps:$4 sm:$0xff]  }
  0x22   : > { %1770 = vmatprep.subr.bf16.mxu0 %v5392_v1  ;;  %5072 = vmatprep.subr.bf16.mxu1 %v5392_v1  ;;  %v5198_v3 = vld [vmem:[%s5455_s5 + $0x124] ss:$12 sps:$4 sm:$0xff]   ;;  %v5202_v5 = vld [vmem:[%s5455_s5 + $0x120] ss:$12 sps:$4 sm:$0xff]   ;;  %v5204_v7 = vld [vmem:[%s5455_s5 + $0x13c] ss:$12 sps:$4 sm:$0xff]  }
  0x23   : > { %v5200_v4 = vld [vmem:[%s5455_s5 + $0x5a4] ss:$12 sps:$4 sm:$0xff]   ;;  %v5203_v6 = vld [vmem:[%s5455_s5 + $0x5a0] ss:$12 sps:$4 sm:$0xff]   ;;  %v5206_v8 = vld [vmem:[%s5455_s5 + $0x5bc] ss:$12 sps:$4 sm:$0xff]  }
  0x25   : > { %1771 = vmatpush1.bf16.msra.mxu0 %v5114_v9  ;;  %5088 = vmatpush1.bf16.msra.mxu1 %v5114_v9  ;;  %v5208_v9 = vld [vmem:[%s5455_s5 + $0x138] ss:$12 sps:$4 sm:$0xff]  }
  0x26   : > { %1772 = vmatprep.subr.bf16.mxu0 %v5392_v1  ;;  %5073 = vmatprep.subr.bf16.mxu1 %v5392_v1 }
  0x29   : > { %1773 = vmatpush1.bf16.msra.mxu0 %v5115_v10  ;;  %5089 = vmatpush1.bf16.msra.mxu1 %v5115_v10  ;;  %v5209_v10 = vld [vmem:[%s5455_s5 + $0x5b8] ss:$12 sps:$4 sm:$0xff]  }
  0x2a   : > { %1774 = vmatprep.subr.bf16.mxu0 %v5392_v1  ;;  %5074 = vmatprep.subr.bf16.mxu1 %v5392_v1 }
  0x2d   : > { %1775 = vmatpush2.bf16.msra.mxu0 %v5116_v11  ;;  %5090 = vmatpush2.bf16.msra.mxu1 %v5116_v11  ;;  %v5210_v11 = vld [vmem:[%s5455_s5 + $0x154] ss:$12 sps:$4 sm:$0xff]  }
  0x2e   : > { %1776 = vmatprep.subr.bf16.mxu0 %v5392_v1  ;;  %5075 = vmatprep.subr.bf16.mxu1 %v5392_v1 }
  0x31   : > { %1777 = vmatpush2.bf16.msra.mxu0 %v5117_v12  ;;  %5091 = vmatpush2.bf16.msra.mxu1 %v5117_v12  ;;  %v5212_v12 = vld [vmem:[%s5455_s5 + $0x5d4] ss:$12 sps:$4 sm:$0xff]  }
  0x32   : > { %1778 = vmatprep.subr.bf16.mxu0 %v5392_v1  ;;  %5076 = vmatprep.subr.bf16.mxu1 %v5392_v1 }
  0x35   : > { %1779 = vmatpush2.bf16.msra.mxu0 %v5118_v13  ;;  %5092 = vmatpush2.bf16.msra.mxu1 %v5118_v13  ;;  %v5214_v13 = vld [vmem:[%s5455_s5 + $0x150] ss:$12 sps:$4 sm:$0xff]  }
  0x36   : > { %1780 = vmatprep.subr.bf16.mxu0 %v5392_v1  ;;  %5077 = vmatprep.subr.bf16.mxu1 %v5392_v1 }
  0x39   : > { %1781 = vmatpush2.bf16.msra.mxu0 %v5119_v14  ;;  %5093 = vmatpush2.bf16.msra.mxu1 %v5119_v14  ;;  %v5215_v14 = vld [vmem:[%s5455_s5 + $0x5d0] ss:$12 sps:$4 sm:$0xff]  }
  0x3a   : > { %1782 = vmatprep.subr.bf16.mxu0 %v5392_v1  ;;  %5078 = vmatprep.subr.bf16.mxu1 %v5392_v1 }
  0x3d   : > { %1783 = vmatpush2.bf16.msra.mxu0 %v5120_v15  ;;  %5094 = vmatpush2.bf16.msra.mxu1 %v5120_v15  ;;  %v5216_v15 = vld [vmem:[%s5455_s5 + $0x16c] ss:$12 sps:$4 sm:$0xff]  }
  0x3e   : > { %1784 = vmatprep.subr.bf16.mxu0 %v5392_v1  ;;  %5079 = vmatprep.subr.bf16.mxu1 %v5392_v1 }
  0x41   : > { %1785 = vmatpush2.bf16.msra.mxu0 %v5121_v16  ;;  %5095 = vmatpush2.bf16.msra.mxu1 %v5121_v16  ;;  %v5218_v16 = vld [vmem:[%s5455_s5 + $0x5ec] ss:$12 sps:$4 sm:$0xff]  }
  0x42   : > { %1786 = vmatprep.subr.bf16.mxu0 %v5392_v1  ;;  %5080 = vmatprep.subr.bf16.mxu1 %v5392_v1 }
  0x45   : > { %1787 = vmatpush2.bf16.msra.mxu0 %v5122_v17  ;;  %5096 = vmatpush2.bf16.msra.mxu1 %v5122_v17  ;;  %v5220_v17 = vld [vmem:[%s5455_s5 + $0x168] ss:$12 sps:$4 sm:$0xff]  }
  0x46   : > { %1788 = vmatprep.subr.bf16.mxu0 %v5392_v1  ;;  %5081 = vmatprep.subr.bf16.mxu1 %v5392_v1  ;;  %v5196_v1 = vld [vmem:[%s5455_s5 + $0x108] ss:$12 sps:$4 sm:$0xff]  }
  0x49   : > { %1789 = vmatpush2.bf16.msra.mxu0 %v5123_v18  ;;  %5097 = vmatpush2.bf16.msra.mxu1 %v5123_v18  ;;  %v5221_v18 = vld [vmem:[%s5455_s5 + $0x5e8] ss:$12 sps:$4 sm:$0xff]  }
  0x4a   : > { %4934 = vmatprep.subr.bf16.mxu1 %v5130_v19 }
  0x4c   : > { %1791 = vmatmul.mubr.bf16.vlgmr.msra.gmra.mxu0 %v5124_v20  ;;  %2175 = vmatmul.mubr.bf16.vlgmr.msra.gmra.mxu1 %v5127_v21  ;;  %v5224_v20 = vld [vmem:[%s5455_s5 + $0x8] ss:$12 sps:$4 sm:$0xff]   ;;  %v5225_v21 = vld [vmem:[%s5455_s5 + $0x180] ss:$12 sps:$4 sm:$0xff]  }
  0x4d   : > { %4935 = vmatpush3.bf16.msra.mxu1 %v5130_v19  ;;  %1798 = vmatprep.mubr.bf16.mxu0 %v5131_v22  ;;  %v5222_v19 = vld [vmem:[%s5455_s5 + $0x184] ss:$12 sps:$4 sm:$0xff]   ;;  %v5226_v22 = vld [vmem:[%s5455_s5 + $0x20] ss:$12 sps:$4 sm:$0xff]  }
  0x4e   : > { %2182 = vmatprep.mubr.bf16.mxu1 %v5133_v23  ;;  %4936 = vmatprep.subr.bf16.mxu1 %v5179_v24  ;;  %v5227_v23 = vld [vmem:[%s5455_s5 + $0x19c] ss:$12 sps:$4 sm:$0xff]  }
  0x51   : > { %4937 = vmatpush3.bf16.msra.mxu1 %v5179_v24  ;;  %v5229_v24 = vld [vmem:[%s5455_s5 + $0x38] ss:$12 sps:$4 sm:$0xff]  }
  0x54   : > { %1799 = vmatmul.mubr.bf16.gmra.mxu0 %v5135_v25  ;;  %2183 = vmatmul.mubr.bf16.gmra.mxu1 %v5136_v26  ;;  %v5230_v25 = vld [vmem:[%s5455_s5 + $0x198] ss:$12 sps:$4 sm:$0xff]   ;;  %v5231_v26 = vld [vmem:[%s5455_s5 + $0x50] ss:$12 sps:$4 sm:$0xff]  }
  0x55   : > { %1806 = vmatprep.mubr.bf16.mxu0 %v5137_v27  ;;  %2190 = vmatprep.mubr.bf16.mxu1 %v5139_v28  ;;  %v5232_v27 = vld [vmem:[%s5455_s5 + $0x1b4] ss:$12 sps:$4 sm:$0xff]  }
  0x56   : > { %v5234_v28 = vld [vmem:[%s5455_s5 + $0x68] ss:$12 sps:$4 sm:$0xff]  }
  0x5c   : > { %1807 = vmatmul.mubr.bf16.gmra.mxu0 %v5141_v29  ;;  %2191 = vmatmul.mubr.bf16.gmra.mxu1 %v5142_v30  ;;  %v5235_v29 = vld [vmem:[%s5455_s5 + $0x1b0] ss:$12 sps:$4 sm:$0xff]   ;;  %v5236_v30 = vld [vmem:[%s5455_s5 + $0x80] ss:$12 sps:$4 sm:$0xff]  }
  0x5d   : > { %1814 = vmatprep.mubr.bf16.mxu0 %v5143_v31  ;;  %2198 = vmatprep.mubr.bf16.mxu1 %v5145_v32  ;;  %v5237_v31 = vld [vmem:[%s5455_s5 + $0x1cc] ss:$12 sps:$4 sm:$0xff]  }
  0x5e   : > { %v5239_v32 = vld [vmem:[%s5455_s5 + $0x98] ss:$12 sps:$4 sm:$0xff]  }
  0x64   : > { %1815 = vmatmul.mubr.bf16.gmra.mxu0 %v5147_v33  ;;  %2199 = vmatmul.mubr.bf16.gmra.mxu1 %v5148_v34  ;;  %v5240_v33 = vld [vmem:[%s5455_s5 + $0x1c8] ss:$12 sps:$4 sm:$0xff]   ;;  %v5241_v34 = vld [vmem:[%s5455_s5 + $0xb0] ss:$12 sps:$4 sm:$0xff]  }
  0x65   : > { %1822 = vmatprep.mubr.bf16.mxu0 %v5149_v35  ;;  %2206 = vmatprep.mubr.bf16.mxu1 %v5151_v36  ;;  %v5242_v35 = vld [vmem:[%s5455_s5 + $0x1e4] ss:$12 sps:$4 sm:$0xff]   ;;  %v5244_v36 = vld [vmem:[%s5455_s5 + $0xc8] ss:$12 sps:$4 sm:$0xff]  }
  0x6c   : > { %1823 = vmatmul.mubr.bf16.gmra.mxu0 %v5153_v37  ;;  %2207 = vmatmul.mubr.bf16.gmra.mxu1 %v5154_v38  ;;  %v5245_v37 = vld [vmem:[%s5455_s5 + $0x1e0] ss:$12 sps:$4 sm:$0xff]  }
  0x6d   : > { %1830 = vmatprep.mubr.bf16.mxu0 %v5155_v39  ;;  %2214 = vmatprep.mubr.bf16.mxu1 %v5157_v40  ;;  %v5246_v38 = vld [vmem:[%s5455_s5 + $0xe0] ss:$12 sps:$4 sm:$0xff]   ;;  %v5247_v39 = vld [vmem:[%s5455_s5 + $0x1fc] ss:$12 sps:$4 sm:$0xff]   ;;  %v5249_v40 = vld [vmem:[%s5455_s5 + $0xf8] ss:$12 sps:$4 sm:$0xff]  }
  0x74   : > { %1831 = vmatmul.mubr.bf16.gmra.mxu0 %v5159_v41  ;;  %2215 = vmatmul.mubr.bf16.gmra.mxu1 %v5160_v42  ;;  %v5250_v41 = vld [vmem:[%s5455_s5 + $0x1f8] ss:$12 sps:$4 sm:$0xff]   ;;  %v5251_v42 = vld [vmem:[%s5455_s5 + $0x110] ss:$12 sps:$4 sm:$0xff]  }
  0x75   : > { %1838 = vmatprep.mubr.bf16.mxu0 %v5161_v43  ;;  %2222 = vmatprep.mubr.bf16.mxu1 %v5163_v44  ;;  %v5252_v43 = vld [vmem:[%s5455_s5 + $0x214] ss:$12 sps:$4 sm:$0xff]  }
  0x76   : > { %v5254_v44 = vld [vmem:[%s5455_s5 + $0x128] ss:$12 sps:$4 sm:$0xff]  }
  0x7c   : > { %1839 = vmatmul.mubr.bf16.gmra.mxu0 %v5165_v45  ;;  %2223 = vmatmul.mubr.bf16.gmra.mxu1 %v5166_v46  ;;  %v5255_v45 = vld [vmem:[%s5455_s5 + $0x210] ss:$12 sps:$4 sm:$0xff]   ;;  %v5256_v46 = vld [vmem:[%s5455_s5 + $0x140] ss:$12 sps:$4 sm:$0xff]  }
  0x7d   : > { %1846 = vmatprep.mubr.bf16.mxu0 %v5167_v47  ;;  %2230 = vmatprep.mubr.bf16.mxu1 %v5169_v48  ;;  %v5257_v47 = vld [vmem:[%s5455_s5 + $0x22c] ss:$12 sps:$4 sm:$0xff]  }
  0x7e   : > { %v5259_v48 = vld [vmem:[%s5455_s5 + $0x158] ss:$12 sps:$4 sm:$0xff]  }
  0x84   : > { %1847 = vmatmul.mubr.bf16.gmra.mxu0 %v5171_v49  ;;  %2231 = vmatmul.mubr.bf16.gmra.mxu1 %v5172_v50  ;;  %v5260_v49 = vld [vmem:[%s5455_s5 + $0x228] ss:$12 sps:$4 sm:$0xff]   ;;  %v5261_v50 = vld [vmem:[%s5455_s5 + $0x170] ss:$12 sps:$4 sm:$0xff]  }
  0x85   : > { %1854 = vmatprep.mubr.bf16.mxu0 %v5173_v51  ;;  %2238 = vmatprep.mubr.bf16.mxu1 %v5175_v52  ;;  %v5262_v51 = vld [vmem:[%s5455_s5 + $0x244] ss:$12 sps:$4 sm:$0xff]   ;;  %v5264_v52 = vld [vmem:[%s5455_s5 + $0x188] ss:$12 sps:$4 sm:$0xff]  }
  0x8c   : > { %1855 = vmatmul.mubr.bf16.gmra.mxu0 %v5177_v53  ;;  %2239 = vmatmul.mubr.bf16.gmra.mxu1 %v5178_v54  ;;  %v5265_v53 = vld [vmem:[%s5455_s5 + $0x240] ss:$12 sps:$4 sm:$0xff]  }
  0x8d   : > { %1862 = vmatprep.mubr.bf16.mxu0 %v5180_v55  ;;  %2246 = vmatprep.mubr.bf16.mxu1 %v5182_v56  ;;  %v5266_v54 = vld [vmem:[%s5455_s5 + $0x1a0] ss:$12 sps:$4 sm:$0xff]   ;;  %v5267_v55 = vld [vmem:[%s5455_s5 + $0x25c] ss:$12 sps:$4 sm:$0xff]   ;;  %v5269_v56 = vld [vmem:[%s5455_s5 + $0x1b8] ss:$12 sps:$4 sm:$0xff]  }
  0x94   : > { %1863 = vmatmul.mubr.bf16.gmra.mxu0 %v5184_v57  ;;  %2247 = vmatmul.mubr.bf16.gmra.mxu1 %v5185_v58 }
  0x95   : > { %1870 = vmatprep.mubr.bf16.mxu0 %v5186_v59  ;;  %2254 = vmatprep.mubr.bf16.mxu1 %v5188_v60 }
  0x9c   : > { %1871 = vmatmul.mubr.bf16.gmra.mxu0 %v5190_v61  ;;  %2255 = vmatmul.mubr.bf16.gmra.mxu1 %v5191_v62 }
  0x9d   : > { %1878 = vmatprep.mubr.bf16.mxu0 %v5192_v63  ;;  %2262 = vmatprep.mubr.bf16.mxu1 %v5194_v0  ;;  %v5270_v63 = vld [vmem:[%s5455_s5 + $0x258] ss:$12 sps:$4 sm:$0xff]   ;;  %v5271_v0 = vld [vmem:[%s5455_s5 + $0x1d0] ss:$12 sps:$4 sm:$0xff]  }
  0xa4   : > { %1879 = vmatmul.mubr.bf16.gmra.mxu0 %v5196_v1  ;;  %2263 = vmatmul.mubr.bf16.gmra.mxu1 %v5197_v2  ;;  %v5272_v1 = vld [vmem:[%s5455_s5 + $0x274] ss:$12 sps:$4 sm:$0xff]  }
  0xa5   : > { %1886 = vmatprep.mubr.bf16.mxu0 %v5198_v3  ;;  %2270 = vmatprep.mubr.bf16.mxu1 %v5200_v4  ;;  %v5274_v2 = vld [vmem:[%s5455_s5 + $0x1e8] ss:$12 sps:$4 sm:$0xff]  }
  0xac   : > { %1887 = vmatmul.mubr.bf16.gmra.mxu0 %v5202_v5  ;;  %2271 = vmatmul.mubr.bf16.gmra.mxu1 %v5203_v6 }
  0xad   : > { %1894 = vmatprep.mubr.bf16.mxu0 %v5204_v7  ;;  %2278 = vmatprep.mubr.bf16.mxu1 %v5206_v8 }
  0xb4   : > { %1895 = vmatmul.mubr.bf16.gmra.mxu0 %v5208_v9  ;;  %2279 = vmatmul.mubr.bf16.gmra.mxu1 %v5209_v10 }
  0xb5   : > { %1902 = vmatprep.mubr.bf16.mxu0 %v5210_v11  ;;  %2286 = vmatprep.mubr.bf16.mxu1 %v5212_v12  ;;  %v5275_v11 = vld [vmem:[%s5455_s5 + $0x270] ss:$12 sps:$4 sm:$0xff]   ;;  %v5276_v12 = vld [vmem:[%s5455_s5 + $0x200] ss:$12 sps:$4 sm:$0xff]  }
  0xbc   : > { %1903 = vmatmul.mubr.bf16.gmra.mxu0 %v5214_v13  ;;  %2287 = vmatmul.mubr.bf16.gmra.mxu1 %v5215_v14  ;;  %v5277_v13 = vld [vmem:[%s5455_s5 + $0x28c] ss:$12 sps:$4 sm:$0xff]  }
  0xbd   : > { %1910 = vmatprep.mubr.bf16.mxu0 %v5216_v15  ;;  %2294 = vmatprep.mubr.bf16.mxu1 %v5218_v16  ;;  %v5279_v14 = vld [vmem:[%s5455_s5 + $0x218] ss:$12 sps:$4 sm:$0xff]  }
  0xc4   : > { %1911 = vmatmul.mubr.bf16.gmra.mxu0 %v5220_v17  ;;  %2295 = vmatmul.mubr.bf16.gmra.mxu1 %v5221_v18 }
  0xc5   : > { %1918 = vmatprep.mubr.bf16.mxu0 %v5222_v19  ;;  %4938 = vmatprep.mubr.msk.bf16.mxu1 %vm1565_vm0, %v5224_v20 }
  0xcc   : > { %1919 = vmatmul.mubr.bf16.gmra.mxu0 %v5225_v21  ;;  %4939 = vmatmul.mubr.msk.bf16.vlgmr.msra.gmra.mxu1 %vm1565_vm0, %v5226_v22 }
  0xcd   : > { %1926 = vmatprep.mubr.bf16.mxu0 %v5227_v23  ;;  %4942 = vmatprep.mubr.msk.bf16.mxu1 %vm1565_vm0, %v5229_v24  ;;  %v5280_v23 = vld [vmem:[%s5455_s5 + $0x288] ss:$12 sps:$4 sm:$0xff]   ;;  %v5281_v24 = vld [vmem:[%s5455_s5 + $0x230] ss:$12 sps:$4 sm:$0xff]  }
  0xd4   : > { %1927 = vmatmul.mubr.bf16.gmra.mxu0 %v5230_v25  ;;  %4943 = vmatmul.mubr.msk.bf16.gmra.mxu1 %vm1565_vm0, %v5231_v26  ;;  %v5284_v25 = vld [vmem:[%s5455_s5 + $0x2a4] ss:$12 sps:$4 sm:$0xff]   ;;  %v5285_v26 = vld [vmem:[%s5455_s5 + $0x248] ss:$12 sps:$4 sm:$0xff]  }
  0xd5   : > { %1934 = vmatprep.mubr.bf16.mxu0 %v5232_v27  ;;  %4946 = vmatprep.mubr.msk.bf16.mxu1 %vm1565_vm0, %v5234_v28 }
  0xdc   : > { %1935 = vmatmul.mubr.bf16.gmra.mxu0 %v5235_v29  ;;  %4947 = vmatmul.mubr.msk.bf16.gmra.mxu1 %vm1565_vm0, %v5236_v30 }
  0xdd   : > { %1942 = vmatprep.mubr.bf16.mxu0 %v5237_v31  ;;  %4950 = vmatprep.mubr.msk.bf16.mxu1 %vm1565_vm0, %v5239_v32 }
  0xe4   : > { %1943 = vmatmul.mubr.bf16.gmra.mxu0 %v5240_v33  ;;  %4951 = vmatmul.mubr.msk.bf16.gmra.mxu1 %vm1565_vm0, %v5241_v34 }
  0xe5   : > { %1950 = vmatprep.mubr.bf16.mxu0 %v5242_v35  ;;  %4954 = vmatprep.mubr.msk.bf16.mxu1 %vm1565_vm0, %v5244_v36  ;;  %v5282_v35 = vld [vmem:[%s5455_s5 + $0x2a0] ss:$12 sps:$4 sm:$0xff]  }
  0xe6   : > { %v5286_v36 = vld [vmem:[%s5455_s5 + $0x260] ss:$12 sps:$4 sm:$0xff]  }
  0xec   : > { %1951 = vmatmul.mubr.bf16.gmra.mxu0 %v5245_v37  ;;  %4955 = vmatmul.mubr.msk.bf16.gmra.mxu1 %vm1565_vm0, %v5246_v38  ;;  %v5289_v37 = vld [vmem:[%s5455_s5 + $0x2bc] ss:$12 sps:$4 sm:$0xff]   ;;  %v5290_v38 = vld [vmem:[%s5455_s5 + $0x278] ss:$12 sps:$4 sm:$0xff]  }
  0xed   : > { %1958 = vmatprep.mubr.bf16.mxu0 %v5247_v39  ;;  %4958 = vmatprep.mubr.msk.bf16.mxu1 %vm1565_vm0, %v5249_v40 }
  0xf4   : > { %1959 = vmatmul.mubr.bf16.gmra.mxu0 %v5250_v41  ;;  %4959 = vmatmul.mubr.msk.bf16.gmra.mxu1 %vm1565_vm0, %v5251_v42 }
  0xf5   : > { %1966 = vmatprep.mubr.bf16.mxu0 %v5252_v43  ;;  %4962 = vmatprep.mubr.msk.bf16.mxu1 %vm1565_vm0, %v5254_v44 }
  0xfc   : > { %1967 = vmatmul.mubr.bf16.gmra.mxu0 %v5255_v45  ;;  %4963 = vmatmul.mubr.msk.bf16.gmra.mxu1 %vm1565_vm0, %v5256_v46 }
  0xfd   : > { %1974 = vmatprep.mubr.bf16.mxu0 %v5257_v47  ;;  %4966 = vmatprep.mubr.msk.bf16.mxu1 %vm1565_vm0, %v5259_v48  ;;  %v5287_v47 = vld [vmem:[%s5455_s5 + $0x2b8] ss:$12 sps:$4 sm:$0xff]   ;;  %v5291_v48 = vld [vmem:[%s5455_s5 + $0x290] ss:$12 sps:$4 sm:$0xff]  }
 0x104   : > { %1975 = vmatmul.mubr.bf16.gmra.mxu0 %v5260_v49  ;;  %4967 = vmatmul.mubr.msk.bf16.gmra.mxu1 %vm1565_vm0, %v5261_v50  ;;  %v5294_v49 = vld [vmem:[%s5455_s5 + $0x2d4] ss:$12 sps:$4 sm:$0xff]  }
 0x105   : > { %1982 = vmatprep.mubr.bf16.mxu0 %v5262_v51  ;;  %4970 = vmatprep.mubr.msk.bf16.mxu1 %vm1565_vm0, %v5264_v52  ;;  %v5295_v50 = vld [vmem:[%s5455_s5 + $0x2a8] ss:$12 sps:$4 sm:$0xff]  }
 0x10c   : > { %v5639_v57 = vpop.f32.mrf.mxu0  ;;  %1983 = vmatmul.mubr.bf16.gmra.mxu0 %v5265_v53  ;;  %v5641_v58 = vpop.f32.mrf.mxu1  ;;  %4971 = vmatmul.mubr.msk.bf16.gmra.mxu1 %vm1565_vm0, %v5266_v54 }
 0x10d   : > { %1990 = vmatprep.mubr.bf16.mxu0 %v5267_v55  ;;  %4974 = vmatprep.mubr.msk.bf16.mxu1 %vm1565_vm0, %v5269_v56 }
 0x10e   : > { %v1794_v59 = vpop.f32.mrf.mxu0  ;;  %v2178_v60 = vpop.f32.mrf.mxu1 }
 0x110   : > { %v5645_v61 = vpop.f32.mrf.mxu0  ;;  %v5647_v62 = vpop.f32.mrf.mxu1 }
 0x112   : > { %v1797_v3 = vpop.f32.mrf.mxu0  ;;  %v2181_v4 = vpop.f32.mrf.mxu1 }
 0x114   : > { %v5653_v5 = vpop.f32.mrf.mxu0  ;;  %1991 = vmatmul.mubr.bf16.gmra.mxu0 %v5270_v63  ;;  %v5655_v6 = vpop.f32.mrf.mxu1  ;;  %4975 = vmatmul.mubr.msk.bf16.gmra.mxu1 %vm1565_vm0, %v5271_v0  ;;  %v5292_v63 = vld [vmem:[%s5455_s5 + $0x2d0] ss:$12 sps:$4 sm:$0xff]   ;;  %v5296_v0 = vld [vmem:[%s5455_s5 + $0x2c0] ss:$12 sps:$4 sm:$0xff]  }
 0x115   : > { %1998 = vmatprep.mubr.bf16.mxu0 %v5272_v1  ;;  %4978 = vmatprep.mubr.msk.bf16.mxu1 %vm1565_vm0, %v5274_v2  ;;  %v5299_v1 = vld [vmem:[%s5455_s5 + $0x2ec] ss:$12 sps:$4 sm:$0xff]  }
 0x116   : > { %v1802_v7 = vpop.f32.mrf.mxu0  ;;  %v2186_v8 = vpop.f32.mrf.mxu1  ;;  %v5300_v2 = vld [vmem:[%s5455_s5 + $0x2d8] ss:$12 sps:$4 sm:$0xff]  }
 0x118   : > { %v5659_v9 = vpop.f32.mrf.mxu0  ;;  %v5661_v10 = vpop.f32.mrf.mxu1 }
 0x11a   : > { %v1805_v15 = vpop.f32.mrf.mxu0  ;;  %v2189_v16 = vpop.f32.mrf.mxu1 }
 0x11b   : > { %v5297_v15 = vld [vmem:[%s5455_s5 + $0x2e8] ss:$12 sps:$4 sm:$0xff]   ;;  %v5301_v16 = vld [vmem:[%s5455_s5 + $0x2f0] ss:$12 sps:$4 sm:$0xff]  }
 0x11c   : > { %v5667_v17 = vpop.f32.mrf.mxu0  ;;  %1999 = vmatmul.mubr.bf16.gmra.mxu0 %v5275_v11  ;;  %v5669_v18 = vpop.f32.mrf.mxu1  ;;  %4979 = vmatmul.mubr.msk.bf16.gmra.mxu1 %vm1565_vm0, %v5276_v12 }
 0x11d   : > { %2006 = vmatprep.mubr.bf16.mxu0 %v5277_v13  ;;  %4982 = vmatprep.mubr.msk.bf16.mxu1 %vm1565_vm0, %v5279_v14 }
 0x11e   : > { %v1810_v19 = vpop.f32.mrf.mxu0  ;;  %v2194_v20 = vpop.f32.mrf.mxu1 }
 0x11f   : > { %v5304_v19 = vld [vmem:[%s5455_s5 + $0x304] ss:$12 sps:$4 sm:$0xff]   ;;  %v5305_v20 = vld [vmem:[%s5455_s5 + $0x308] ss:$12 sps:$4 sm:$0xff]  }
 0x120   : > { %v5673_v21 = vpop.f32.mrf.mxu0  ;;  %v5675_v22 = vpop.f32.mrf.mxu1 }
 0x122   : > { %v1813_v27 = vpop.f32.mrf.mxu0  ;;  %v2197_v28 = vpop.f32.mrf.mxu1 }
 0x124   : > { %v5681_v29 = vpop.f32.mrf.mxu0  ;;  %2007 = vmatmul.mubr.bf16.gmra.mxu0 %v5280_v23  ;;  %v5683_v30 = vpop.f32.mrf.mxu1  ;;  %4983 = vmatmul.mubr.msk.bf16.gmra.mxu1 %vm1565_vm0, %v5281_v24 }
 0x125   : > { %2014 = vmatprep.mubr.bf16.mxu0 %v5284_v25  ;;  %4986 = vmatprep.mubr.msk.bf16.mxu1 %vm1565_vm0, %v5285_v26 }
 0x126   : > { %v1818_v31 = vpop.f32.mrf.mxu0  ;;  %v2202_v32 = vpop.f32.mrf.mxu1 }
 0x128   : > { %v5687_v33 = vpop.f32.mrf.mxu0  ;;  %v5689_v34 = vpop.f32.mrf.mxu1 }
 0x12a   : > { %v1821_v39 = vpop.f32.mrf.mxu0  ;;  %v2205_v40 = vpop.f32.mrf.mxu1 }
 0x12c   : > { %v5695_v41 = vpop.f32.mrf.mxu0  ;;  %2015 = vmatmul.mubr.bf16.gmra.mxu0 %v5282_v35  ;;  %v5697_v42 = vpop.f32.mrf.mxu1  ;;  %4987 = vmatmul.mubr.msk.bf16.gmra.mxu1 %vm1565_vm0, %v5286_v36  ;;  %v5302_v35 = vld [vmem:[%s5455_s5 + $0x300] ss:$12 sps:$4 sm:$0xff]  }
 0x12d   : > { %2022 = vmatprep.mubr.bf16.mxu0 %v5289_v37  ;;  %4990 = vmatprep.mubr.msk.bf16.mxu1 %vm1565_vm0, %v5290_v38  ;;  %v5306_v36 = vld [vmem:[%s5455_s5 + $0x320] ss:$12 sps:$4 sm:$0xff]   ;;  %v5309_v37 = vld [vmem:[%s5455_s5 + $0x31c] ss:$12 sps:$4 sm:$0xff]   ;;  %v5310_v38 = vld [vmem:[%s5455_s5 + $0x338] ss:$12 sps:$4 sm:$0xff]  }
 0x12e   : > { %v1826_v43 = vpop.f32.mrf.mxu0  ;;  %v2210_v44 = vpop.f32.mrf.mxu1 }
 0x130   : > { %v5701_v45 = vpop.f32.mrf.mxu0  ;;  %v5703_v46 = vpop.f32.mrf.mxu1 }
 0x131   : > { %6448 = vst [vmem:[#allocation2_spill] sm:$0xff] %v5703_v46 }
 0x132   : > { %v1829_v51 = vpop.f32.mrf.mxu0  ;;  %v2213_v52 = vpop.f32.mrf.mxu1 }
 0x133   : > { %v5307_v51 = vld [vmem:[%s5455_s5 + $0x318] ss:$12 sps:$4 sm:$0xff]   ;;  %v5311_v52 = vld [vmem:[%s5455_s5 + $0x350] ss:$12 sps:$4 sm:$0xff]  }
 0x134   : > { %v5709_v53 = vpop.f32.mrf.mxu0  ;;  %2023 = vmatmul.mubr.bf16.gmra.mxu0 %v5287_v47  ;;  %v5711_v54 = vpop.f32.mrf.mxu1  ;;  %4991 = vmatmul.mubr.msk.bf16.gmra.mxu1 %vm1565_vm0, %v5291_v48 }
 0x135   : > { %2030 = vmatprep.mubr.bf16.mxu0 %v5294_v49  ;;  %4994 = vmatprep.mubr.msk.bf16.mxu1 %vm1565_vm0, %v5295_v50 }
 0x136   : > { %v1834_v55 = vpop.f32.mrf.mxu0  ;;  %v2218_v56 = vpop.f32.mrf.mxu1 }
 0x137   : > { %v5314_v55 = vld [vmem:[%s5455_s5 + $0x334] ss:$12 sps:$4 sm:$0xff]  }
 0x138   : > { %v5715_v59 = vpop.f32.mrf.mxu0  ;;  %v5717_v60 = vpop.f32.mrf.mxu1  ;;  %v5315_v56 = vld [vmem:[%s5455_s5 + $0x368] ss:$12 sps:$4 sm:$0xff]  }
 0x139   : > { %6449 = vst [vmem:[#allocation3_spill] sm:$0xff] %v5717_v60 }
 0x13a   : > { %v1837_v3 = vpop.f32.mrf.mxu0  ;;  %v2221_v4 = vpop.f32.mrf.mxu1 }
 0x13c   : > { %v5723_v7 = vpop.f32.mrf.mxu0  ;;  %2031 = vmatmul.mubr.bf16.gmra.mxu0 %v5292_v63  ;;  %v5725_v8 = vpop.f32.mrf.mxu1  ;;  %4995 = vmatmul.mubr.msk.bf16.gmra.mxu1 %vm1565_vm0, %v5296_v0 }
 0x13d   : > { %6450 = vst [vmem:[#allocation4_spill] sm:$0xff] %v5725_v8  ;;  %2038 = vmatprep.mubr.bf16.mxu0 %v5299_v1  ;;  %4998 = vmatprep.mubr.msk.bf16.mxu1 %vm1565_vm0, %v5300_v2 }
 0x13e   : > { %v1842_v11 = vpop.f32.mrf.mxu0  ;;  %v2226_v12 = vpop.f32.mrf.mxu1 }
 0x140   : > { %v5729_v13 = vpop.f32.mrf.mxu0  ;;  %v5731_v14 = vpop.f32.mrf.mxu1 }
 0x141   : > { %6451 = vst [vmem:[#allocation5_spill] sm:$0xff] %v5731_v14 }
 0x142   : > { %v1845_v23 = vpop.f32.mrf.mxu0  ;;  %v2229_v24 = vpop.f32.mrf.mxu1 }
 0x144   : > { %v5737_v25 = vpop.f32.mrf.mxu0  ;;  %2039 = vmatmul.mubr.bf16.gmra.mxu0 %v5297_v15  ;;  %v5739_v26 = vpop.f32.mrf.mxu1  ;;  %4999 = vmatmul.mubr.msk.bf16.gmra.mxu1 %vm1565_vm0, %v5301_v16  ;;  %v5312_v15 = vld [vmem:[%s5455_s5 + $0x330] ss:$12 sps:$4 sm:$0xff]   ;;  %v5316_v16 = vld [vmem:[%s5455_s5 + $0x380] ss:$12 sps:$4 sm:$0xff]  }
 0x145   : > { %6452 = vst [vmem:[#allocation6_spill] sm:$0xff] %v5739_v26  ;;  %2046 = vmatprep.mubr.bf16.mxu0 %v5304_v19  ;;  %5002 = vmatprep.mubr.msk.bf16.mxu1 %vm1565_vm0, %v5305_v20  ;;  %v5319_v19 = vld [vmem:[%s5455_s5 + $0x34c] ss:$12 sps:$4 sm:$0xff]  }
 0x146   : > { %v1850_v27 = vpop.f32.mrf.mxu0  ;;  %v2234_v28 = vpop.f32.mrf.mxu1  ;;  %v5320_v20 = vld [vmem:[%s5455_s5 + $0x398] ss:$12 sps:$4 sm:$0xff]  }
 0x148   : > { %v5743_v31 = vpop.f32.mrf.mxu0  ;;  %v5745_v32 = vpop.f32.mrf.mxu1 }
 0x149   : > { %6453 = vst [vmem:[#allocation7_spill] sm:$0xff] %v5745_v32 }
 0x14a   : > { %v1853_v39 = vpop.f32.mrf.mxu0  ;;  %v2237_v40 = vpop.f32.mrf.mxu1 }
 0x14b   : > { %v5317_v39 = vld [vmem:[%s5455_s5 + $0x348] ss:$12 sps:$4 sm:$0xff]   ;;  %v5321_v40 = vld [vmem:[%s5455_s5 + $0x3b0] ss:$12 sps:$4 sm:$0xff]  }
 0x14c   : > { %v5751_v43 = vpop.f32.mrf.mxu0  ;;  %2047 = vmatmul.mubr.bf16.gmra.mxu0 %v5302_v35  ;;  %v5753_v44 = vpop.f32.mrf.mxu1  ;;  %5003 = vmatmul.mubr.msk.bf16.gmra.mxu1 %vm1565_vm0, %v5306_v36 }
 0x14d   : > { %6454 = vst [vmem:[#allocation8_spill] sm:$0xff] %v5753_v44  ;;  %2054 = vmatprep.mubr.bf16.mxu0 %v5309_v37  ;;  %5006 = vmatprep.mubr.msk.bf16.mxu1 %vm1565_vm0, %v5310_v38 }
 0x14e   : > { %v1858_v47 = vpop.f32.mrf.mxu0  ;;  %v2242_v48 = vpop.f32.mrf.mxu1 }
 0x14f   : > { %v5324_v47 = vld [vmem:[%s5455_s5 + $0x364] ss:$12 sps:$4 sm:$0xff]   ;;  %v5325_v48 = vld [vmem:[%s5455_s5 + $0x3c8] ss:$12 sps:$4 sm:$0xff]  }
 0x150   : > { %v5757_v49 = vpop.f32.mrf.mxu0  ;;  %v5759_v50 = vpop.f32.mrf.mxu1 }
 0x151   : > { %6455 = vst [vmem:[#allocation9_spill] sm:$0xff] %v5759_v50 }
 0x152   : > { %v1861_v63 = vpop.f32.mrf.mxu0  ;;  %v2245_v0 = vpop.f32.mrf.mxu1 }
 0x154   : > { %v5765_v1 = vpop.f32.mrf.mxu0  ;;  %2055 = vmatmul.mubr.bf16.gmra.mxu0 %v5307_v51  ;;  %v5767_v2 = vpop.f32.mrf.mxu1  ;;  %5007 = vmatmul.mubr.msk.bf16.gmra.mxu1 %vm1565_vm0, %v5311_v52 }
 0x155   : > { %6456 = vst [vmem:[#allocation10_spill] sm:$0xff] %v5767_v2  ;;  %2062 = vmatprep.mubr.bf16.mxu0 %v5314_v55  ;;  %5010 = vmatprep.mubr.msk.bf16.mxu1 %vm1565_vm0, %v5315_v56 }
 0x156   : > { %v1866_v3 = vpop.f32.mrf.mxu0  ;;  %v2250_v4 = vpop.f32.mrf.mxu1 }
 0x158   : > { %v5771_v11 = vpop.f32.mrf.mxu0  ;;  %v5773_v12 = vpop.f32.mrf.mxu1 }
 0x159   : > { %6457 = vst [vmem:[#allocation11_spill] sm:$0xff] %v5773_v12 }
 0x15a   : > { %v1869_v23 = vpop.f32.mrf.mxu0  ;;  %v2253_v24 = vpop.f32.mrf.mxu1 }
 0x15c   : > { %v5779_v27 = vpop.f32.mrf.mxu0  ;;  %2063 = vmatmul.mubr.bf16.gmra.mxu0 %v5312_v15  ;;  %v5781_v28 = vpop.f32.mrf.mxu1  ;;  %5011 = vmatmul.mubr.msk.bf16.gmra.mxu1 %vm1565_vm0, %v5316_v16  ;;  %v5322_v15 = vld [vmem:[%s5455_s5 + $0x360] ss:$12 sps:$4 sm:$0xff]  }
 0x15d   : > { %6458 = vst [vmem:[#allocation12_spill] sm:$0xff] %v5781_v28  ;;  %2070 = vmatprep.mubr.bf16.mxu0 %v5319_v19  ;;  %5014 = vmatprep.mubr.msk.bf16.mxu1 %vm1565_vm0, %v5320_v20  ;;  %v5326_v16 = vld [vmem:[%s5455_s5 + $0x3e0] ss:$12 sps:$4 sm:$0xff]   ;;  %v5329_v19 = vld [vmem:[%s5455_s5 + $0x37c] ss:$12 sps:$4 sm:$0xff]  }
 0x15e   : > { %v1874_v35 = vpop.f32.mrf.mxu0  ;;  %v2258_v36 = vpop.f32.mrf.mxu1  ;;  %v5330_v20 = vld [vmem:[%s5455_s5 + $0x3f8] ss:$12 sps:$4 sm:$0xff]   ;;  %v5342_v28 = vld [vmem:[%s5455_s5 + $0x3c0] ss:$12 sps:$4 sm:$0xff]  }
 0x160   : > { %v5785_v37 = vpop.f32.mrf.mxu0  ;;  %v5787_v38 = vpop.f32.mrf.mxu1 }
 0x161   : > { %6459 = vst [vmem:[#allocation13_spill] sm:$0xff] %v5787_v38  ;;  %v5337_v38 = vld [vmem:[%s5455_s5 + $0x3a8] ss:$12 sps:$4 sm:$0xff]  }
 0x162   : > { %v1877_v51 = vpop.f32.mrf.mxu0  ;;  %v2261_v52 = vpop.f32.mrf.mxu1 }
 0x163   : > { %v5327_v51 = vld [vmem:[%s5455_s5 + $0x378] ss:$12 sps:$4 sm:$0xff]   ;;  %v5331_v52 = vld [vmem:[%s5455_s5 + $0x410] ss:$12 sps:$4 sm:$0xff]  }
 0x164   : > { %v5793_v55 = vpop.f32.mrf.mxu0  ;;  %2071 = vmatmul.mubr.bf16.gmra.mxu0 %v5317_v39  ;;  %v5795_v56 = vpop.f32.mrf.mxu1  ;;  %5015 = vmatmul.mubr.msk.bf16.gmra.mxu1 %vm1565_vm0, %v5321_v40 }
 0x165   : > { %6460 = vst [vmem:[#allocation14_spill] sm:$0xff] %v5795_v56  ;;  %2078 = vmatprep.mubr.bf16.mxu0 %v5324_v47  ;;  %5018 = vmatprep.mubr.msk.bf16.mxu1 %vm1565_vm0, %v5325_v48  ;;  %v5346_v56 = vld [vmem:[%s5455_s5 + $0x4a0] ss:$12 sps:$4 sm:$0xff]  }
 0x166   : > { %v1882_v63 = vpop.f32.mrf.mxu0  ;;  %v2266_v0 = vpop.f32.mrf.mxu1 }
 0x167   : > { %v5334_v63 = vld [vmem:[%s5455_s5 + $0x394] ss:$12 sps:$4 sm:$0xff]  }
 0x168   : > { %v5799_v3 = vpop.f32.mrf.mxu0  ;;  %v5801_v4 = vpop.f32.mrf.mxu1  ;;  %v5335_v0 = vld [vmem:[%s5455_s5 + $0x428] ss:$12 sps:$4 sm:$0xff]  }
 0x169   : > { %6461 = vst [vmem:[#allocation15_spill] sm:$0xff] %v5801_v4 }
 0x16a   : > { %v1885_v23 = vpop.f32.mrf.mxu0  ;;  %v2269_v24 = vpop.f32.mrf.mxu1 }
 0x16c   : > { %v5807_v35 = vpop.f32.mrf.mxu0  ;;  %2079 = vmatmul.mubr.bf16.gmra.mxu0 %v5322_v15  ;;  %v5809_v36 = vpop.f32.mrf.mxu1  ;;  %5019 = vmatmul.mubr.msk.bf16.gmra.mxu1 %vm1565_vm0, %v5326_v16 }
 0x16d   : > { %6462 = vst [vmem:[#allocation16_spill] sm:$0xff] %v5809_v36  ;;  %2086 = vmatprep.mubr.bf16.mxu0 %v5329_v19  ;;  %5022 = vmatprep.mubr.msk.bf16.mxu1 %vm1565_vm0, %v5330_v20 }
 0x16e   : > { %v1890_v39 = vpop.f32.mrf.mxu0  ;;  %v2274_v40 = vpop.f32.mrf.mxu1 }
 0x170   : > { %v5813_v47 = vpop.f32.mrf.mxu0  ;;  %v5815_v48 = vpop.f32.mrf.mxu1 }
 0x171   : > { %6463 = vst [vmem:[#allocation17_spill] sm:$0xff] %v5815_v48  ;;  %v5332_v48 = vld [vmem:[%s5455_s5 + $0x390] ss:$12 sps:$4 sm:$0xff]  }
 0x172   : > { %v1893_v15 = vpop.f32.mrf.mxu0  ;;  %v2277_v23 = vpop.f32.mrf.mxu1 }
 0x173   : > { %v5336_v15 = vld [vmem:[%s5455_s5 + $0x440] ss:$12 sps:$4 sm:$0xff]  }
 0x174   : > { %v5821_v16 = vpop.f32.mrf.mxu0  ;;  %2087 = vmatmul.mubr.bf16.gmra.mxu0 %v5327_v51  ;;  %v5823_v19 = vpop.f32.mrf.mxu1  ;;  %5023 = vmatmul.mubr.msk.bf16.gmra.mxu1 %vm1565_vm0, %v5331_v52  ;;  %v5339_v23 = vld [vmem:[%s5455_s5 + $0x3ac] ss:$12 sps:$4 sm:$0xff]  }
 0x175   : > { %6464 = vst [vmem:[#allocation18_spill] sm:$0xff] %v5823_v19  ;;  %2094 = vmatprep.mubr.bf16.mxu0 %v5334_v63  ;;  %5026 = vmatprep.mubr.msk.bf16.mxu1 %vm1565_vm0, %v5335_v0  ;;  %v5340_v51 = vld [vmem:[%s5455_s5 + $0x458] ss:$12 sps:$4 sm:$0xff]  }
 0x176   : > { %v1898_v20 = vpop.f32.mrf.mxu0  ;;  %v2282_v24 = vpop.f32.mrf.mxu1 }
 0x178   : > { %v5827_v39 = vpop.f32.mrf.mxu0  ;;  %v5829_v40 = vpop.f32.mrf.mxu1 }
 0x179   : > { %6465 = vst [vmem:[#allocation19_spill] sm:$0xff] %v5829_v40 }
 0x17a   : > { %v1901_v36 = vpop.f32.mrf.mxu0  ;;  %v2285_v19 = vpop.f32.mrf.mxu1 }
 0x17b   : > { %v5341_v36 = vld [vmem:[%s5455_s5 + $0x470] ss:$12 sps:$4 sm:$0xff]  }
 0x17c   : > { %v5835_v52 = vpop.f32.mrf.mxu0  ;;  %2095 = vmatmul.mubr.bf16.gmra.mxu0 %v5332_v48  ;;  %v5837_v63 = vpop.f32.mrf.mxu1  ;;  %5027 = vmatmul.mubr.msk.bf16.gmra.mxu1 %vm1565_vm0, %v5336_v15  ;;  %v5344_v19 = vld [vmem:[%s5455_s5 + $0x3c4] ss:$12 sps:$4 sm:$0xff]   ;;  %v5345_v48 = vld [vmem:[%s5455_s5 + $0x488] ss:$12 sps:$4 sm:$0xff]  }
 0x17d   : > { %6466 = vst [vmem:[#allocation20_spill] sm:$0xff] %v5837_v63  ;;  %2102 = vmatprep.mubr.bf16.mxu0 %v5339_v23  ;;  %5030 = vmatprep.mubr.msk.bf16.mxu1 %vm1565_vm0, %v5340_v51 }
 0x17e   : > { %v1906_v0 = vpop.f32.mrf.mxu0  ;;  %v2290_v20 = vpop.f32.mrf.mxu1 }
 0x180   : > { %v5841_v24 = vpop.f32.mrf.mxu0  ;;  %v5843_v40 = vpop.f32.mrf.mxu1 }
 0x181   : > { %6467 = vst [vmem:[#allocation21_spill] sm:$0xff] %v5843_v40 }
 0x182   : > { %v1909_v63 = vpop.f32.mrf.mxu0  ;;  %v2293_v4 = vpop.f32.mrf.mxu1 }
 0x183   : > { %v5349_v63 = vld [vmem:[%s5455_s5 + $0x3dc] ss:$12 sps:$4 sm:$0xff]   ;;  %v5350_v4 = vld [vmem:[%s5455_s5 + $0x4b8] ss:$12 sps:$4 sm:$0xff]  }
 0x184   : > { %v5849_v15 = vpop.f32.mrf.mxu0  ;;  %2103 = vmatmul.mubr.bf16.gmra.mxu0 %v5337_v38  ;;  %v5851_v23 = vpop.f32.mrf.mxu1  ;;  %5031 = vmatmul.mubr.msk.bf16.gmra.mxu1 %vm1565_vm0, %v5341_v36 }
 0x185   : > { %6468 = vst [vmem:[#allocation22_spill] sm:$0xff] %v5851_v23  ;;  %2110 = vmatprep.mubr.bf16.mxu0 %v5344_v19  ;;  %5034 = vmatprep.mubr.msk.bf16.mxu1 %vm1565_vm0, %v5345_v48  ;;  %v5868_v19 = vld [vmem:[%s6445_s2] ss:$0 sm:$0xff]  ;;  %v5347_v23 = vld [vmem:[%s5455_s5 + $0x3d8] ss:$12 sps:$4 sm:$0xff]  }
 0x186   : > { %v1914_v51 = vpop.f32.mrf.mxu0  ;;  %v2298_v0 = vpop.f32.mrf.mxu1 }
 0x187   : > { %v5878_v0 = vld [vmem:[%s6446_s3] ss:$0 sm:$0xff] }
 0x188   : > { %v5855_v20 = vpop.f32.mrf.mxu0  ;;  %v5857_v40 = vpop.f32.mrf.mxu1 }
 0x189   : > { %6469 = vst [vmem:[#allocation23_spill] sm:$0xff] %v5857_v40 }
 0x18a   : > { %v1917_v50 = vpop.f32.mrf.mxu0  ;;  %v2301_v12 = vpop.f32.mrf.mxu1 }
 0x18c   : > { %v5863_v38 = vpop.f32.mrf.mxu0  ;;  %2111 = vmatmul.mubr.bf16.gmra.mxu0 %v5342_v28  ;;  %v4940_v36 = vpop.f32.mrf.mxu1  ;;  %5035 = vmatmul.mubr.msk.bf16.gmra.mxu1 %vm1565_vm0, %v5346_v56 }
 0x18d   : > { %v2346_v48 = vadd.f32 %v4940_v36, %v5653_v5  ;;  %2118 = vmatprep.mubr.bf16.mxu0 %v5349_v63  ;;  %5038 = vmatprep.mubr.msk.bf16.mxu1 %vm1565_vm0, %v5350_v4  ;;  %v5351_v5 = vld [vmem:[%s5455_s5 + $0x4d0] ss:$12 sps:$4 sm:$0xff]   ;;  %v5354_v36 = vld [vmem:[%s5455_s5 + $0x3f4] ss:$12 sps:$4 sm:$0xff]  }
 0x18e   : > { %v1922_v50 = vpop.f32.mrf.mxu0  ;;  %v2337_v12 = vpop.f32.mrf.mxu1 }
 0x18f   : > { %v2857_v51 = vmul.f32 %v5868_v19, %v2346_v48  ;;  %v2338_v28 = vadd.f32 %v2337_v12, %v5639_v57  ;;  %v5355_v50 = vld [vmem:[%s5455_s5 + $0x4e8] ss:$12 sps:$4 sm:$0xff]  }
 0x190   : > { %v5880_v40 = vpop.f32.mrf.mxu0  ;;  %v4941_v56 = vpop.f32.mrf.mxu1 }
 0x191   : > { %v2855_v63 = vmul.f32 %v5868_v19, %v2338_v28  ;;  %v2349_v4 = vadd.f32 %v4941_v56, %v5659_v9  ;;  %v2992_v57 = vadd.f32 %v5878_v0, %v2857_v51 }
 0x192   : > { %v1925_v48 = vpop.f32.mrf.mxu0  ;;  %v2340_v44 = vpop.f32.mrf.mxu1 }
 0x193   : > { %v2858_v12 = vmul.f32 %v5868_v19, %v2349_v4  ;;  %v2341_v2 = vadd.f32 %v2340_v44, %v5645_v61  ;;  %v2990_v14 = vadd.f32 %v5878_v0, %v2855_v63  ;;  %v5352_v4 = vld [vmem:[%s5455_s5 + $0x3f0] ss:$12 sps:$4 sm:$0xff]  }
 0x194   : > { %v5892_v32 = vpop.f32.mrf.mxu0  ;;  %2119 = vmatmul.mubr.bf16.gmra.mxu0 %v5347_v23  ;;  %v4944_v8 = vpop.f32.mrf.mxu1  ;;  %5039 = vmatmul.mubr.msk.bf16.gmra.mxu1 %vm1565_vm0, %v5351_v5  ;;  %v3120_v23 = vmax.f32 %v2992_v57, 0.0 }
 0x195   : > { %v2993_v9 = vadd.f32 %v5878_v0, %v2858_v12  ;;  %v2856_v28 = vmul.f32 %v5868_v19, %v2341_v2  ;;  %v2362_v51 = vadd.f32 %v4944_v8, %v5681_v29  ;;  %2126 = vmatprep.mubr.bf16.mxu0 %v5354_v36  ;;  %5042 = vmatprep.mubr.msk.bf16.mxu1 %vm1565_vm0, %v5355_v50  ;;  %v5356_v36 = vld [vmem:[%s5455_s5 + $0x500] ss:$12 sps:$4 sm:$0xff]   ;;  %v3118_v50 = vmax.f32 %v2990_v14, 0.0 }
 0x196   : > { %v1930_v61 = vpop.f32.mrf.mxu0  ;;  %v2353_v44 = vpop.f32.mrf.mxu1 }
 0x197   : > { %v3121_v56 = vmax.f32 %v2993_v9, 0.0  ;;  %v2991_v5 = vadd.f32 %v5878_v0, %v2856_v28  ;;  %v2354_v63 = vadd.f32 %v2353_v44, %v5667_v17  ;;  %v2861_v29 = vmul.f32 %v5868_v19, %v2362_v51  ;;  %v5359_v17 = vld [vmem:[%s5455_s5 + $0x40c] ss:$12 sps:$4 sm:$0xff]  }
 0x198   : > { %v5908_v8 = vpop.f32.mrf.mxu0  ;;  %v4945_v2 = vpop.f32.mrf.mxu1  ;;  %v5360_v9 = vld [vmem:[%s5455_s5 + $0x518] ss:$12 sps:$4 sm:$0xff]  }
 0x199   : > { %v4493_v48 = vpack.c.bf16 %v3121_v56, %v3120_v23  ;;  %v3119_v57 = vmax.f32 %v2991_v5, 0.0  ;;  %v2859_v12 = vmul.f32 %v5868_v19, %v2354_v63  ;;  %v2365_v28 = vadd.f32 %v4945_v2, %v5687_v33 }
 0x19a   : > { %v1933_v61 = vpop.f32.mrf.mxu0  ;;  %v2356_v44 = vpop.f32.mrf.mxu1  ;;  %v2996_v46 = vadd.f32 %v5878_v0, %v2861_v29 }
 0x19b   : > { %4805 = vst [vmem:[%s5905_s16 + $0x8] sm:$0xff] %v4493_v48   ;;  %v4488_v26 = vpack.c.bf16 %v3119_v57, %v3118_v50  ;;  %v2357_v51 = vadd.f32 %v2356_v44, %v5673_v21  ;;  %v2862_v60 = vmul.f32 %v5868_v19, %v2365_v28  ;;  %v2994_v33 = vadd.f32 %v5878_v0, %v2859_v12  ;;  %v5357_v57 = vld [vmem:[%s5455_s5 + $0x408] ss:$12 sps:$4 sm:$0xff]   ;;  %v5361_v12 = vld [vmem:[%s5455_s5 + $0x530] ss:$12 sps:$4 sm:$0xff]  }
 0x19c   : > { %v5920_v14 = vpop.f32.mrf.mxu0  ;;  %2127 = vmatmul.mubr.bf16.gmra.mxu0 %v5352_v4  ;;  %v4948_v23 = vpop.f32.mrf.mxu1  ;;  %5043 = vmatmul.mubr.msk.bf16.gmra.mxu1 %vm1565_vm0, %v5356_v36  ;;  %v3124_v36 = vmax.f32 %v2996_v46, 0.0  ;;  %v5364_v28 = vld [vmem:[%s5455_s5 + $0x424] ss:$12 sps:$4 sm:$0xff]   ;;  %v5365_v61 = vld [vmem:[%s5455_s5 + $0x548] ss:$12 sps:$4 sm:$0xff]  }
 0x19d   : > { %4489 = vst [vmem:[%s5905_s16] sm:$0xff] %v4488_v26   ;;  %v2860_v56 = vmul.f32 %v5868_v19, %v2357_v51  ;;  %v2378_v5 = vadd.f32 %v4948_v23, %v5709_v53  ;;  %2134 = vmatprep.mubr.bf16.mxu0 %v5359_v17  ;;  %5046 = vmatprep.mubr.msk.bf16.mxu1 %vm1565_vm0, %v5360_v9  ;;  %v3122_v17 = vmax.f32 %v2994_v33, 0.0 }
 0x19e   : > { %v2997_v21 = vadd.f32 %v5878_v0, %v2862_v60  ;;  %v1938_v63 = vpop.f32.mrf.mxu0  ;;  %v2369_v29 = vpop.f32.mrf.mxu1 }
 0x19f   : > { %v2995_v2 = vadd.f32 %v5878_v0, %v2860_v56  ;;  %v2865_v26 = vmul.f32 %v5868_v19, %v2378_v5  ;;  %v2370_v4 = vadd.f32 %v2369_v29, %v5695_v41 }
 0x1a0   : > { %v3125_v50 = vmax.f32 %v2997_v21, 0.0  ;;  %v5932_v48 = vpop.f32.mrf.mxu0  ;;  %v4949_v53 = vpop.f32.mrf.mxu1 }
 0x1a1   : > { %v3123_v9 = vmax.f32 %v2995_v2, 0.0  ;;  %v2381_v60 = vadd.f32 %v4949_v53, %v5715_v59  ;;  %v2863_v51 = vmul.f32 %v5868_v19, %v2370_v4  ;;  %v3000_v56 = vadd.f32 %v5878_v0, %v2865_v26 }
 0x1a2   : > { %v4503_v44 = vpack.c.bf16 %v3125_v50, %v3124_v36  ;;  %v1941_v23 = vpop.f32.mrf.mxu0  ;;  %v2372_v41 = vpop.f32.mrf.mxu1 }
 0x1a3   : > { %v4498_v46 = vpack.c.bf16 %v3123_v9, %v3122_v17  ;;  %v2866_v5 = vmul.f32 %v5868_v19, %v2381_v60  ;;  %v2373_v21 = vadd.f32 %v2372_v41, %v5701_v45  ;;  %v2998_v2 = vadd.f32 %v5878_v0, %v2863_v51  ;;  %v5362_v9 = vld [vmem:[%s5455_s5 + $0x420] ss:$12 sps:$4 sm:$0xff]   ;;  %v5369_v51 = vld [vmem:[%s5455_s5 + $0x43c] ss:$12 sps:$4 sm:$0xff]   ;;  %v5370_v23 = vld [vmem:[%s5455_s5 + $0x578] ss:$12 sps:$4 sm:$0xff]  }
 0x1a4   : > { %4807 = vst [vmem:[%s5905_s16 + $0x18] sm:$0xff] %v4503_v44   ;;  %v5944_v33 = vpop.f32.mrf.mxu0  ;;  %2135 = vmatmul.mubr.bf16.gmra.mxu0 %v5357_v57  ;;  %v4952_v59 = vpop.f32.mrf.mxu1  ;;  %5047 = vmatmul.mubr.msk.bf16.gmra.mxu1 %vm1565_vm0, %v5361_v12  ;;  %v3128_v36 = vmax.f32 %v3000_v56, 0.0  ;;  %v5366_v60 = vld [vmem:[%s5455_s5 + $0x560] ss:$12 sps:$4 sm:$0xff]  }
 0x1a5   : > { %4806 = vst [vmem:[%s5905_s16 + $0x10] sm:$0xff] %v4498_v46   ;;  %v3001_v63 = vadd.f32 %v5878_v0, %v2866_v5  ;;  %v2394_v29 = vadd.f32 %v4952_v59, %v5737_v25  ;;  %2142 = vmatprep.mubr.bf16.mxu0 %v5364_v28  ;;  %5050 = vmatprep.mubr.msk.bf16.mxu1 %vm1565_vm0, %v5365_v61  ;;  %v3126_v41 = vmax.f32 %v2998_v2, 0.0 }
 0x1a6   : > { %v2864_v45 = vmul.f32 %v5868_v19, %v2373_v21  ;;  %v1946_v26 = vpop.f32.mrf.mxu0  ;;  %v2385_v4 = vpop.f32.mrf.mxu1 }
 0x1a7   : > { %v3129_v50 = vmax.f32 %v3001_v63, 0.0  ;;  %v2869_v53 = vmul.f32 %v5868_v19, %v2394_v29  ;;  %v2386_v57 = vadd.f32 %v2385_v4, %v5723_v7 }
 0x1a8   : > { %v2999_v25 = vadd.f32 %v5878_v0, %v2864_v45  ;;  %v5956_v12 = vpop.f32.mrf.mxu0  ;;  %v4953_v17 = vpop.f32.mrf.mxu1 }
 0x1a9   : > { %v4513_v28 = vpack.c.bf16 %v3129_v50, %v3128_v36  ;;  %v2867_v61 = vmul.f32 %v5868_v19, %v2386_v57  ;;  %v2397_v44 = vadd.f32 %v4953_v17, %v5743_v31  ;;  %v3004_v7 = vadd.f32 %v5878_v0, %v2869_v53 }
 0x1aa   : > { %v3127_v46 = vmax.f32 %v2999_v25, 0.0  ;;  %v1949_v56 = vpop.f32.mrf.mxu0  ;;  %v2388_v5 = vpop.f32.mrf.mxu1 }
 0x1ab   : > { %4809 = vst [vmem:[%s5905_s16 + $0x28] sm:$0xff] %v4513_v28   ;;  %v2870_v21 = vmul.f32 %v5868_v19, %v2397_v44  ;;  %v2389_v59 = vadd.f32 %v2388_v5, %v5729_v13  ;;  %v3002_v29 = vadd.f32 %v5878_v0, %v2867_v61  ;;  %v3132_v50 = vmax.f32 %v3004_v7, 0.0  ;;  %v5371_v28 = vld [vmem:[%s5455_s5 + $0x590] ss:$12 sps:$4 sm:$0xff]  }
 0x1ac   : > { %v4508_v63 = vpack.c.bf16 %v3127_v46, %v3126_v41  ;;  %v5969_v45 = vpop.f32.mrf.mxu0  ;;  %2143 = vmatmul.mubr.bf16.gmra.mxu0 %v5362_v9  ;;  %v4956_v31 = vpop.f32.mrf.mxu1  ;;  %5051 = vmatmul.mubr.msk.bf16.gmra.mxu1 %vm1565_vm0, %v5366_v60  ;;  %v5367_v60 = vld [vmem:[%s5455_s5 + $0x438] ss:$12 sps:$4 sm:$0xff]   ;;  %v5374_v41 = vld [vmem:[%s5455_s5 + $0x454] ss:$12 sps:$4 sm:$0xff]  }
 0x1ad   : > { %v3005_v2 = vadd.f32 %v5878_v0, %v2870_v21  ;;  %v2868_v26 = vmul.f32 %v5868_v19, %v2389_v59  ;;  %v2410_v4 = vadd.f32 %v4956_v31, %v5765_v1  ;;  %2150 = vmatprep.mubr.bf16.mxu0 %v5369_v51  ;;  %5054 = vmatprep.mubr.msk.bf16.mxu1 %vm1565_vm0, %v5370_v23  ;;  %v3130_v61 = vmax.f32 %v3002_v29, 0.0  ;;  %v5375_v46 = vld [vmem:[%s5455_s5 + $0x5a8] ss:$12 sps:$4 sm:$0xff]  }
 0x1ae   : > { %4808 = vst [vmem:[%s5905_s16 + $0x20] sm:$0xff] %v4508_v63   ;;  %v1954_v13 = vpop.f32.mrf.mxu0  ;;  %v2401_v36 = vpop.f32.mrf.mxu1 }
 0x1af   : > { %v3133_v53 = vmax.f32 %v3005_v2, 0.0  ;;  %v3003_v57 = vadd.f32 %v5878_v0, %v2868_v26  ;;  %v2402_v25 = vadd.f32 %v2401_v36, %v5751_v43  ;;  %v2873_v17 = vmul.f32 %v5868_v19, %v2410_v4 }
 0x1b0   : > { %v5980_v9 = vpop.f32.mrf.mxu0  ;;  %v4957_v1 = vpop.f32.mrf.mxu1 }
 0x1b1   : > { %v4523_v44 = vpack.c.bf16 %v3133_v53, %v3132_v50  ;;  %v3131_v51 = vmax.f32 %v3003_v57, 0.0  ;;  %v2871_v23 = vmul.f32 %v5868_v19, %v2402_v25  ;;  %v2413_v56 = vadd.f32 %v4957_v1, %v5771_v11  ;;  %v5372_v1 = vld [vmem:[%s5455_s5 + $0x450] ss:$12 sps:$4 sm:$0xff]  }
 0x1b2   : > { %v1957_v5 = vpop.f32.mrf.mxu0  ;;  %v2404_v7 = vpop.f32.mrf.mxu1  ;;  %v3008_v59 = vadd.f32 %v5878_v0, %v2873_v17 }
 0x1b3   : > { %4811 = vst [vmem:[%s5905_s16 + $0x38] sm:$0xff] %v4523_v44   ;;  %v4518_v43 = vpack.c.bf16 %v3131_v51, %v3130_v61  ;;  %v2405_v21 = vadd.f32 %v2404_v7, %v5757_v49  ;;  %v2874_v63 = vmul.f32 %v5868_v19, %v2413_v56  ;;  %v3006_v11 = vadd.f32 %v5878_v0, %v2871_v23  ;;  %v5379_v51 = vld [vmem:[%s5455_s5 + $0x46c] ss:$12 sps:$4 sm:$0xff]  }
 0x1b4   : > { %v5992_v29 = vpop.f32.mrf.mxu0  ;;  %2151 = vmatmul.mubr.bf16.gmra.mxu0 %v5367_v60  ;;  %v4960_v31 = vpop.f32.mrf.mxu1  ;;  %5055 = vmatmul.mubr.msk.bf16.gmra.mxu1 %vm1565_vm0, %v5371_v28  ;;  %v3136_v57 = vmax.f32 %v3008_v59, 0.0  ;;  %v5376_v60 = vld [vmem:[%s5455_s5 + $0x5c0] ss:$12 sps:$4 sm:$0xff]   ;;  %v5380_v23 = vld [vmem:[%s5455_s5 + $0x5d8] ss:$12 sps:$4 sm:$0xff]  }
 0x1b5   : > { %4810 = vst [vmem:[%s5905_s16 + $0x30] sm:$0xff] %v4518_v43   ;;  %v2872_v2 = vmul.f32 %v5868_v19, %v2405_v21  ;;  %v2426_v26 = vadd.f32 %v4960_v31, %v5793_v55  ;;  %2158 = vmatprep.mubr.bf16.mxu0 %v5374_v41  ;;  %5058 = vmatprep.mubr.msk.bf16.mxu1 %vm1565_vm0, %v5375_v46  ;;  %v3134_v28 = vmax.f32 %v3006_v11, 0.0 }
 0x1b6   : > { %v3009_v49 = vadd.f32 %v5878_v0, %v2874_v63  ;;  %v1962_v4 = vpop.f32.mrf.mxu0  ;;  %v2417_v13 = vpop.f32.mrf.mxu1 }
 0x1b7   : > { %v3007_v36 = vadd.f32 %v5878_v0, %v2872_v2  ;;  %v2877_v50 = vmul.f32 %v5868_v19, %v2426_v26  ;;  %v2418_v53 = vadd.f32 %v2417_v13, %v5779_v27 }
 0x1b8   : > { %v3137_v25 = vmax.f32 %v3009_v49, 0.0  ;;  %v6004_v17 = vpop.f32.mrf.mxu0  ;;  %v4961_v55 = vpop.f32.mrf.mxu1 }
 0x1b9   : > { %v3135_v61 = vmax.f32 %v3007_v36, 0.0  ;;  %v2429_v44 = vadd.f32 %v4961_v55, %v5799_v3  ;;  %v2875_v46 = vmul.f32 %v5868_v19, %v2418_v53  ;;  %v3012_v7 = vadd.f32 %v5878_v0, %v2877_v50 }
 0x1ba   : > { %v4533_v41 = vpack.c.bf16 %v3137_v25, %v3136_v57  ;;  %v1965_v56 = vpop.f32.mrf.mxu0  ;;  %v2420_v27 = vpop.f32.mrf.mxu1  ;;  %v5377_v57 = vld [vmem:[%s5455_s5 + $0x468] ss:$12 sps:$4 sm:$0xff]   ;;  %v5381_v25 = vld [vmem:[%s5455_s5 + $0x5f0] ss:$12 sps:$4 sm:$0xff]  }
 0x1bb   : > { %v4528_v5 = vpack.c.bf16 %v3135_v61, %v3134_v28  ;;  %v2878_v43 = vmul.f32 %v5868_v19, %v2429_v44  ;;  %v2421_v21 = vadd.f32 %v2420_v27, %v5785_v37  ;;  %v3010_v11 = vadd.f32 %v5878_v0, %v2875_v46 }
 0x1bc   : > { %4813 = vst [vmem:[%s5905_s16 + $0x48] sm:$0xff] %v4533_v41   ;;  %v6016_v59 = vpop.f32.mrf.mxu0  ;;  %2159 = vmatmul.mubr.bf16.gmra.mxu0 %v5372_v1  ;;  %v4964_v3 = vpop.f32.mrf.mxu1  ;;  %5059 = vmatmul.mubr.msk.bf16.gmra.mxu1 %vm1565_vm0, %v5376_v60  ;;  %v3140_v49 = vmax.f32 %v3012_v7, 0.0 }
 0x1bd   : > { %4812 = vst [vmem:[%s5905_s16 + $0x40] sm:$0xff] %v4528_v5   ;;  %v3013_v63 = vadd.f32 %v5878_v0, %v2878_v43  ;;  %v2442_v31 = vadd.f32 %v4964_v3, %v5821_v16  ;;  %2166 = vmatprep.mubr.bf16.mxu0 %v5379_v51  ;;  %5062 = vmatprep.mubr.msk.bf16.mxu1 %vm1565_vm0, %v5380_v23  ;;  %v3138_v28 = vmax.f32 %v3010_v11, 0.0 }
 0x1be   : > { %v2876_v37 = vmul.f32 %v5868_v19, %v2421_v21  ;;  %v1970_v2 = vpop.f32.mrf.mxu0  ;;  %v2433_v26 = vpop.f32.mrf.mxu1 }
 0x1bf   : > { %v3141_v4 = vmax.f32 %v3013_v63, 0.0  ;;  %v2881_v13 = vmul.f32 %v5868_v19, %v2442_v31  ;;  %v2434_v36 = vadd.f32 %v2433_v26, %v5807_v35 }
 0x1c0   : > { %v3011_v50 = vadd.f32 %v5878_v0, %v2876_v37  ;;  %v6028_v53 = vpop.f32.mrf.mxu0  ;;  %v4965_v16 = vpop.f32.mrf.mxu1 }
 0x1c1   : > { %v4543_v55 = vpack.c.bf16 %v3141_v4, %v3140_v49  ;;  %v2879_v1 = vmul.f32 %v5868_v19, %v2434_v36  ;;  %v2445_v60 = vadd.f32 %v4965_v16, %v5827_v39  ;;  %v3016_v35 = vadd.f32 %v5878_v0, %v2881_v13 }
 0x1c2   : > { %v3139_v61 = vmax.f32 %v3011_v50, 0.0  ;;  %v1973_v44 = vpop.f32.mrf.mxu0  ;;  %v2436_v51 = vpop.f32.mrf.mxu1 }
 0x1c3   : > { %4815 = vst [vmem:[%s5905_s16 + $0x58] sm:$0xff] %v4543_v55   ;;  %v2882_v23 = vmul.f32 %v5868_v19, %v2445_v60  ;;  %v2437_v41 = vadd.f32 %v2436_v51, %v5813_v47  ;;  %v3014_v39 = vadd.f32 %v5878_v0, %v2879_v1  ;;  %v3144_v47 = vmax.f32 %v3016_v35, 0.0 }
 0x1c4   : > { %v4538_v46 = vpack.c.bf16 %v3139_v61, %v3138_v28  ;;  %v6038_v56 = vpop.f32.mrf.mxu0  ;;  %2167 = vmatmul.mubr.bf16.gmra.mxu0 %v5377_v57  ;;  %v4968_v27 = vpop.f32.mrf.mxu1  ;;  %5063 = vmatmul.mubr.msk.bf16.gmra.mxu1 %vm1565_vm0, %v5381_v25 }
 0x1c5   : > { %v3017_v5 = vadd.f32 %v5878_v0, %v2882_v23  ;;  %v2880_v7 = vmul.f32 %v5868_v19, %v2437_v41  ;;  %v2458_v43 = vadd.f32 %v4968_v27, %v5849_v15  ;;  %v3142_v49 = vmax.f32 %v3014_v39, 0.0 }
 0x1c6   : > { %4814 = vst [vmem:[%s5905_s16 + $0x50] sm:$0xff] %v4538_v46   ;;  %v1978_v21 = vpop.f32.mrf.mxu0  ;;  %v2449_v3 = vpop.f32.mrf.mxu1 }
 0x1c7   : > { %v3145_v63 = vmax.f32 %v3017_v5, 0.0  ;;  %v3015_v31 = vadd.f32 %v5878_v0, %v2880_v7  ;;  %v2450_v11 = vadd.f32 %v2449_v3, %v5835_v52  ;;  %v2885_v37 = vmul.f32 %v5868_v19, %v2458_v43 }
 0x1c8   : > { %v6049_v2 = vpop.f32.mrf.mxu0  ;;  %v4969_v26 = vpop.f32.mrf.mxu1 }
 0x1c9   : > { %v4553_v4 = vpack.c.bf16 %v3145_v63, %v3144_v47  ;;  %v3143_v13 = vmax.f32 %v3015_v31, 0.0  ;;  %v2883_v15 = vmul.f32 %v5868_v19, %v2450_v11  ;;  %v2461_v36 = vadd.f32 %v4969_v26, %v5855_v20 }
 0x1ca   : > { %v1981_v50 = vpop.f32.mrf.mxu0  ;;  %v2452_v16 = vpop.f32.mrf.mxu1  ;;  %v3020_v52 = vadd.f32 %v5878_v0, %v2885_v37 }
 0x1cb   : > { %4817 = vst [vmem:[%s5905_s16 + $0x68] sm:$0xff] %v4553_v4   ;;  %v4548_v57 = vpack.c.bf16 %v3143_v13, %v3142_v49  ;;  %v2453_v25 = vadd.f32 %v2452_v16, %v5841_v24  ;;  %v2886_v55 = vmul.f32 %v5868_v19, %v2461_v36  ;;  %v3018_v28 = vadd.f32 %v5878_v0, %v2883_v15 }
 0x1cc   : > { %v6057_v1 = vpop.f32.mrf.mxu0  ;;  %v4972_v60 = vpop.f32.mrf.mxu1  ;;  %v3148_v46 = vmax.f32 %v3020_v52, 0.0 }
 0x1cd   : > { %4816 = vst [vmem:[%s5905_s16 + $0x60] sm:$0xff] %v4548_v57   ;;  %v2884_v61 = vmul.f32 %v5868_v19, %v2453_v25  ;;  %v2474_v20 = vadd.f32 %v4972_v60, %v5892_v32  ;;  %v3021_v44 = vadd.f32 %v5878_v0, %v2886_v55  ;;  %v3146_v7 = vmax.f32 %v3018_v28, 0.0 }
 0x1ce   : > { %v1986_v51 = vpop.f32.mrf.mxu0  ;;  %v2465_v35 = vpop.f32.mrf.mxu1 }
 0x1cf   : > { %v3019_v24 = vadd.f32 %v5878_v0, %v2884_v61  ;;  %v2889_v23 = vmul.f32 %v5868_v19, %v2474_v20  ;;  %v2466_v41 = vadd.f32 %v2465_v35, %v5863_v38  ;;  %v3149_v27 = vmax.f32 %v3021_v44, 0.0 }
 0x1d0   : > { %v6067_v39 = vpop.f32.mrf.mxu0  ;;  %v4973_v5 = vpop.f32.mrf.mxu1 }
 0x1d1   : > { %v3147_v43 = vmax.f32 %v3019_v24, 0.0  ;;  %v2477_v32 = vadd.f32 %v4973_v5, %v5908_v8  ;;  %v4563_v21 = vpack.c.bf16 %v3149_v27, %v3148_v46  ;;  %v2887_v3 = vmul.f32 %v5868_v19, %v2466_v41 }
 0x1d2   : > { %v1989_v47 = vpop.f32.mrf.mxu0  ;;  %v2468_v63 = vpop.f32.mrf.mxu1  ;;  %v3024_v11 = vadd.f32 %v5878_v0, %v2889_v23 }
 0x1d3   : > { %v4558_v31 = vpack.c.bf16 %v3147_v43, %v3146_v7  ;;  %v2890_v38 = vmul.f32 %v5868_v19, %v2477_v32  ;;  %4819 = vst [vmem:[%s5905_s16 + $0x78] sm:$0xff] %v4563_v21   ;;  %v2469_v37 = vadd.f32 %v2468_v63, %v5880_v40  ;;  %v3022_v13 = vadd.f32 %v5878_v0, %v2887_v3 }
 0x1d4   : > { %v6075_v26 = vpop.f32.mrf.mxu0  ;;  %v4976_v49 = vpop.f32.mrf.mxu1  ;;  %v3152_v16 = vmax.f32 %v3024_v11, 0.0 }
 0x1d5   : > { %4818 = vst [vmem:[%s5905_s16 + $0x70] sm:$0xff] %v4558_v31   ;;  %v3025_v4 = vadd.f32 %v5878_v0, %v2890_v38  ;;  %v2490_v8 = vadd.f32 %v4976_v49, %v5944_v33  ;;  %v2888_v15 = vmul.f32 %v5868_v19, %v2469_v37  ;;  %v3150_v20 = vmax.f32 %v3022_v13, 0.0 }
 0x1d6   : > { %v1994_v36 = vpop.f32.mrf.mxu0  ;;  %v2481_v50 = vpop.f32.mrf.mxu1 }
 0x1d7   : > { %v3153_v57 = vmax.f32 %v3025_v4, 0.0  ;;  %v2893_v25 = vmul.f32 %v5868_v19, %v2490_v8  ;;  %v2482_v40 = vadd.f32 %v2481_v50, %v5920_v14  ;;  %v3023_v52 = vadd.f32 %v5878_v0, %v2888_v15 }
 0x1d8   : > { %v6085_v55 = vpop.f32.mrf.mxu0  ;;  %v4977_v60 = vpop.f32.mrf.mxu1 }
 0x1d9   : > { %v4573_v28 = vpack.c.bf16 %v3153_v57, %v3152_v16  ;;  %v2891_v33 = vmul.f32 %v5868_v19, %v2482_v40  ;;  %v2493_v61 = vadd.f32 %v4977_v60, %v5956_v12  ;;  %v3151_v44 = vmax.f32 %v3023_v52, 0.0 }
 0x1da   : > { %v1997_v51 = vpop.f32.mrf.mxu0  ;;  %v2484_v35 = vpop.f32.mrf.mxu1  ;;  %v3028_v24 = vadd.f32 %v5878_v0, %v2893_v25 }
 0x1db   : > { %4821 = vst [vmem:[%s5905_s16 + $0x88] sm:$0xff] %v4573_v28   ;;  %v2894_v14 = vmul.f32 %v5868_v19, %v2493_v61  ;;  %v2485_v23 = vadd.f32 %v2484_v35, %v5932_v48  ;;  %v4568_v41 = vpack.c.bf16 %v3151_v44, %v3150_v20  ;;  %v3026_v5 = vadd.f32 %v5878_v0, %v2891_v33 }
 0x1dc   : > { %v6093_v46 = vpop.f32.mrf.mxu0  ;;  %v4980_v27 = vpop.f32.mrf.mxu1  ;;  %v3156_v3 = vmax.f32 %v3028_v24, 0.0 }
 0x1dd   : > { %v3029_v12 = vadd.f32 %v5878_v0, %v2894_v14  ;;  %v2892_v7 = vmul.f32 %v5868_v19, %v2485_v23  ;;  %v2506_v43 = vadd.f32 %v4980_v27, %v5992_v29  ;;  %4820 = vst [vmem:[%s5905_s16 + $0x80] sm:$0xff] %v4568_v41   ;;  %v3154_v37 = vmax.f32 %v3026_v5, 0.0 }
 0x1de   : > { %v2002_v32 = vpop.f32.mrf.mxu0  ;;  %v2497_v21 = vpop.f32.mrf.mxu1 }
 0x1df   : > { %v3157_v47 = vmax.f32 %v3029_v12, 0.0  ;;  %v3027_v48 = vadd.f32 %v5878_v0, %v2892_v7  ;;  %v2498_v63 = vadd.f32 %v2497_v21, %v5969_v45  ;;  %v2897_v31 = vmul.f32 %v5868_v19, %v2506_v43 }
 0x1e0   : > { %v6103_v11 = vpop.f32.mrf.mxu0  ;;  %v4981_v38 = vpop.f32.mrf.mxu1 }
 0x1e1   : > { %v4583_v49 = vpack.c.bf16 %v3157_v47, %v3156_v3  ;;  %v3155_v4 = vmax.f32 %v3027_v48, 0.0  ;;  %v2895_v29 = vmul.f32 %v5868_v19, %v2498_v63  ;;  %v2509_v8 = vadd.f32 %v4981_v38, %v6004_v17 }
 0x1e2   : > { %v2005_v13 = vpop.f32.mrf.mxu0  ;;  %v2500_v15 = vpop.f32.mrf.mxu1  ;;  %v3032_v45 = vadd.f32 %v5878_v0, %v2897_v31 }
 0x1e3   : > { %4823 = vst [vmem:[%s5905_s16 + $0x98] sm:$0xff] %v4583_v49   ;;  %v4578_v36 = vpack.c.bf16 %v3155_v4, %v3154_v37  ;;  %v2501_v50 = vadd.f32 %v2500_v15, %v5980_v9  ;;  %v2898_v16 = vmul.f32 %v5868_v19, %v2509_v8  ;;  %v3030_v40 = vadd.f32 %v5878_v0, %v2895_v29 }
 0x1e4   : > { %v2008_v57 = vpop.f32.mrf.mxu0  ;;  %v4984_v25 = vpop.f32.mrf.mxu1  ;;  %v3160_v44 = vmax.f32 %v3032_v45, 0.0 }
 0x1e5   : > { %4822 = vst [vmem:[%s5905_s16 + $0x90] sm:$0xff] %v4578_v36   ;;  %v2896_v52 = vmul.f32 %v5868_v19, %v2501_v50  ;;  %v2522_v60 = vadd.f32 %v4984_v25, %v6038_v56  ;;  %v3033_v17 = vadd.f32 %v5878_v0, %v2898_v16  ;;  %v3158_v14 = vmax.f32 %v3030_v40, 0.0 }
 0x1e6   : > { %v2010_v28 = vpop.f32.mrf.mxu0  ;;  %v2513_v33 = vpop.f32.mrf.mxu1 }
 0x1e7   : > { %v3031_v61 = vadd.f32 %v5878_v0, %v2896_v52  ;;  %v2901_v9 = vmul.f32 %v5868_v19, %v2522_v60  ;;  %v2514_v20 = vadd.f32 %v2513_v33, %v6016_v59  ;;  %v3161_v51 = vmax.f32 %v3033_v17, 0.0 }
 0x1e8   : > { %v2011_v35 = vpop.f32.mrf.mxu0  ;;  %v4985_v24 = vpop.f32.mrf.mxu1 }
 0x1e9   : > { %v3159_v23 = vmax.f32 %v3031_v61, 0.0  ;;  %v2525_v56 = vadd.f32 %v4985_v24, %v6049_v2  ;;  %v4593_v41 = vpack.c.bf16 %v3161_v51, %v3160_v44  ;;  %v2899_v27 = vmul.f32 %v5868_v19, %v2514_v20 }
 0x1ea   : > { %v2013_v5 = vpop.f32.mrf.mxu0  ;;  %v2516_v12 = vpop.f32.mrf.mxu1  ;;  %v3036_v43 = vadd.f32 %v5878_v0, %v2901_v9 }
 0x1eb   : > { %v4588_v7 = vpack.c.bf16 %v3159_v23, %v3158_v14  ;;  %v2902_v32 = vmul.f32 %v5868_v19, %v2525_v56  ;;  %4825 = vst [vmem:[%s5905_s16 + $0xa8] sm:$0xff] %v4593_v41   ;;  %v2517_v59 = vadd.f32 %v2516_v12, %v6028_v53  ;;  %v3034_v48 = vadd.f32 %v5878_v0, %v2899_v27 }
 0x1ec   : > { %v6125_v21 = vpop.f32.mrf.mxu0  ;;  %v4988_v3 = vpop.f32.mrf.mxu1  ;;  %v3164_v37 = vmax.f32 %v3036_v43, 0.0 }
 0x1ed   : > { %4824 = vst [vmem:[%s5905_s16 + $0xa0] sm:$0xff] %v4588_v7   ;;  %v3037_v47 = vadd.f32 %v5878_v0, %v2902_v32  ;;  %v2538_v2 = vadd.f32 %v4988_v3, %v6075_v26  ;;  %v2900_v63 = vmul.f32 %v5868_v19, %v2517_v59  ;;  %v3162_v50 = vmax.f32 %v3034_v48, 0.0 }
 0x1ee   : > { %v2018_v31 = vpop.f32.mrf.mxu0  ;;  %v2529_v38 = vpop.f32.mrf.mxu1 }
 0x1ef   : > { %v3165_v49 = vmax.f32 %v3037_v47, 0.0  ;;  %v2905_v4 = vmul.f32 %v5868_v19, %v2538_v2  ;;  %v2530_v53 = vadd.f32 %v2529_v38, %v6057_v1  ;;  %v3035_v29 = vadd.f32 %v5878_v0, %v2900_v63 }
 0x1f0   : > { %v6135_v8 = vpop.f32.mrf.mxu0  ;;  %v4989_v13 = vpop.f32.mrf.mxu1 }
 0x1f1   : > { %v4603_v15 = vpack.c.bf16 %v3165_v49, %v3164_v37  ;;  %v2903_v26 = vmul.f32 %v5868_v19, %v2530_v53  ;;  %v2541_v36 = vadd.f32 %v4989_v13, %v6085_v55  ;;  %v3163_v45 = vmax.f32 %v3035_v29, 0.0 }
 0x1f2   : > { %v2021_v16 = vpop.f32.mrf.mxu0  ;;  %v2532_v25 = vpop.f32.mrf.mxu1  ;;  %v3040_v40 = vadd.f32 %v5878_v0, %v2905_v4 }
 0x1f3   : > { %4827 = vst [vmem:[%s5905_s16 + $0xb8] sm:$0xff] %v4603_v15   ;;  %v2906_v1 = vmul.f32 %v5868_v19, %v2541_v36  ;;  %v2533_v52 = vadd.f32 %v2532_v25, %v6067_v39  ;;  %v4598_v60 = vpack.c.bf16 %v3163_v45, %v3162_v50  ;;  %v3038_v33 = vadd.f32 %v5878_v0, %v2903_v26 }
 0x1f4   : > { %v2024_v17 = vpop.f32.mrf.mxu0  ;;  %v4992_v28 = vpop.f32.mrf.mxu1  ;;  %v3168_v51 = vmax.f32 %v3040_v40, 0.0 }
 0x1f5   : > { %v3041_v61 = vadd.f32 %v5878_v0, %v2906_v1  ;;  %v2904_v55 = vmul.f32 %v5868_v19, %v2533_v52  ;;  %v2554_v9 = vadd.f32 %v4992_v28, %v2008_v57  ;;  %4826 = vst [vmem:[%s5905_s16 + $0xb0] sm:$0xff] %v4598_v60   ;;  %v3166_v27 = vmax.f32 %v3038_v33, 0.0 }
 0x1f6   : > { %v2026_v20 = vpop.f32.mrf.mxu0  ;;  %v2545_v44 = vpop.f32.mrf.mxu1 }
 0x1f7   : > { %v3169_v24 = vmax.f32 %v3041_v61, 0.0  ;;  %v3039_v14 = vadd.f32 %v5878_v0, %v2904_v55  ;;  %v2546_v39 = vadd.f32 %v2545_v44, %v6093_v46  ;;  %v2909_v23 = vmul.f32 %v5868_v19, %v2554_v9 }
 0x1f8   : > { %v2027_v56 = vpop.f32.mrf.mxu0  ;;  %v4993_v41 = vpop.f32.mrf.mxu1 }
 0x1f9   : > { %v4613_v5 = vpack.c.bf16 %v3169_v24, %v3168_v51  ;;  %v3167_v12 = vmax.f32 %v3039_v14, 0.0  ;;  %v2907_v57 = vmul.f32 %v5868_v19, %v2546_v39  ;;  %v2557_v7 = vadd.f32 %v4993_v41, %v2011_v35 }
 0x1fa   : > { %v2029_v43 = vpop.f32.mrf.mxu0  ;;  %v2548_v32 = vpop.f32.mrf.mxu1  ;;  %v3044_v47 = vadd.f32 %v5878_v0, %v2909_v23 }
 0x1fb   : > { %4829 = vst [vmem:[%s5905_s16 + $0xc8] sm:$0xff] %v4613_v5   ;;  %v4608_v59 = vpack.c.bf16 %v3167_v12, %v3166_v27  ;;  %v2549_v3 = vadd.f32 %v2548_v32, %v6103_v11  ;;  %v2910_v46 = vmul.f32 %v5868_v19, %v2557_v7  ;;  %v3042_v63 = vadd.f32 %v5878_v0, %v2907_v57 }
 0x1fc   : > { %v2032_v2 = vpop.f32.mrf.mxu0  ;;  %v4996_v48 = vpop.f32.mrf.mxu1  ;;  %v3172_v29 = vmax.f32 %v3044_v47, 0.0 }
 0x1fd   : > { %4828 = vst [vmem:[%s5905_s16 + $0xc0] sm:$0xff] %v4608_v59   ;;  %v2908_v31 = vmul.f32 %v5868_v19, %v2549_v3  ;;  %v2570_v38 = vadd.f32 %v4996_v48, %v2024_v17  ;;  %v3045_v35 = vadd.f32 %v5878_v0, %v2910_v46  ;;  %v3170_v36 = vmax.f32 %v3042_v63, 0.0 }
 0x1fe   : > { %v2034_v37 = vpop.f32.mrf.mxu0  ;;  %v2561_v49 = vpop.f32.mrf.mxu1 }
 0x1ff   : > { %v3043_v4 = vadd.f32 %v5878_v0, %v2908_v31  ;;  %v2913_v11 = vmul.f32 %v5868_v19, %v2570_v38  ;;  %v2562_v53 = vadd.f32 %v2561_v49, %v6125_v21  ;;  %v3173_v13 = vmax.f32 %v3045_v35, 0.0 }
 0x200   : > { %v2035_v15 = vpop.f32.mrf.mxu0  ;;  %v4997_v26 = vpop.f32.mrf.mxu1 }
 0x201   : > { %v3171_v50 = vmax.f32 %v3043_v4, 0.0  ;;  %v2573_v45 = vadd.f32 %v4997_v26, %v2027_v56  ;;  %v4623_v16 = vpack.c.bf16 %v3173_v13, %v3172_v29  ;;  %v2911_v25 = vmul.f32 %v5868_v19, %v2562_v53 }
 0x202   : > { %v2037_v40 = vpop.f32.mrf.mxu0  ;;  %v2564_v1 = vpop.f32.mrf.mxu1  ;;  %v3048_v60 = vadd.f32 %v5878_v0, %v2913_v11 }
 0x203   : > { %v4618_v52 = vpack.c.bf16 %v3171_v50, %v3170_v36  ;;  %v2914_v17 = vmul.f32 %v5868_v19, %v2573_v45  ;;  %4831 = vst [vmem:[%s5905_s16 + $0xd8] sm:$0xff] %v4623_v16   ;;  %v2565_v21 = vadd.f32 %v2564_v1, %v6135_v8  ;;  %v3046_v9 = vadd.f32 %v5878_v0, %v2911_v25 }
 0x204   : > { %v2040_v28 = vpop.f32.mrf.mxu0  ;;  %v5000_v33 = vpop.f32.mrf.mxu1  ;;  %v3176_v24 = vmax.f32 %v3048_v60, 0.0 }
 0x205   : > { %4830 = vst [vmem:[%s5905_s16 + $0xd0] sm:$0xff] %v4618_v52   ;;  %v3049_v61 = vadd.f32 %v5878_v0, %v2914_v17  ;;  %v2586_v55 = vadd.f32 %v5000_v33, %v2040_v28  ;;  %v2912_v20 = vmul.f32 %v5868_v19, %v2565_v21  ;;  %v3174_v57 = vmax.f32 %v3046_v9, 0.0  ;;  %v6189_v17 = vld [vmem:[%s6445_s2] ss:$0 sm:$0xff] }
 0x206   : > { %v2042_v44 = vpop.f32.mrf.mxu0  ;;  %v2577_v51 = vpop.f32.mrf.mxu1 }
 0x207   : > { %v3177_v14 = vmax.f32 %v3049_v61, 0.0  ;;  %v2917_v39 = vmul.f32 %v5868_v19, %v2586_v55  ;;  %v2578_v23 = vadd.f32 %v2577_v51, %v2032_v2  ;;  %v3047_v8 = vadd.f32 %v5878_v0, %v2912_v20  ;;  %v6195_v61 = vld [vmem:[%s6446_s3] ss:$0 sm:$0xff] }
 0x208   : > { %v2043_v56 = vpop.f32.mrf.mxu0  ;;  %v5001_v41 = vpop.f32.mrf.mxu1 }
 0x209   : > { %v4633_v27 = vpack.c.bf16 %v3177_v14, %v3176_v24  ;;  %v2915_v5 = vmul.f32 %v5868_v19, %v2578_v23  ;;  %v2589_v12 = vadd.f32 %v5001_v41, %v2043_v56  ;;  %v3175_v7 = vmax.f32 %v3047_v8, 0.0 }
 0x20a   : > { %v2045_v43 = vpop.f32.mrf.mxu0  ;;  %v2580_v32 = vpop.f32.mrf.mxu1  ;;  %v3052_v59 = vadd.f32 %v5878_v0, %v2917_v39 }
 0x20b   : > { %4833 = vst [vmem:[%s5905_s16 + $0xe8] sm:$0xff] %v4633_v27   ;;  %v2918_v3 = vmul.f32 %v5868_v19, %v2589_v12  ;;  %v2581_v47 = vadd.f32 %v2580_v32, %v2035_v15  ;;  %v4628_v46 = vpack.c.bf16 %v3175_v7, %v3174_v57  ;;  %v3050_v63 = vadd.f32 %v5878_v0, %v2915_v5 }
 0x20c   : > { %v2048_v2 = vpop.f32.mrf.mxu0  ;;  %v5004_v48 = vpop.f32.mrf.mxu1  ;;  %v3180_v49 = vmax.f32 %v3052_v59, 0.0 }
 0x20d   : > { %v3053_v31 = vadd.f32 %v5878_v0, %v2918_v3  ;;  %v2916_v38 = vmul.f32 %v5868_v19, %v2581_v47  ;;  %4832 = vst [vmem:[%s5905_s16 + $0xe0] sm:$0xff] %v4628_v46   ;;  %v3178_v15 = vmax.f32 %v3050_v63, 0.0 }
 0x20e   : > { %v2050_v35 = vpop.f32.mrf.mxu0  ;;  %v2593_v37 = vpop.f32.mrf.mxu1 }
 0x20f   : > { %v3181_v4 = vmax.f32 %v3053_v31, 0.0  ;;  %v3051_v11 = vadd.f32 %v5878_v0, %v2916_v38  ;;  %v2594_v53 = vadd.f32 %v2593_v37, %v2048_v2 }
 0x210   : > { %v2051_v29 = vpop.f32.mrf.mxu0  ;;  %v5005_v13 = vpop.f32.mrf.mxu1 }
 0x211   : > { %v4643_v26 = vpack.c.bf16 %v3181_v4, %v3180_v49  ;;  %v3179_v36 = vmax.f32 %v3051_v11, 0.0  ;;  %v2919_v50 = vmul.f32 %v5868_v19, %v2594_v53 }
 0x212   : > { %v2053_v45 = vpop.f32.mrf.mxu0  ;;  %v2596_v16 = vpop.f32.mrf.mxu1 }
 0x213   : > { %4835 = vst [vmem:[%s5905_s16 + $0xf8] sm:$0xff] %v4643_v26   ;;  %v4638_v25 = vpack.c.bf16 %v3179_v36, %v3178_v15  ;;  %v2597_v40 = vadd.f32 %v2596_v16, %v2051_v29  ;;  %v3054_v60 = vadd.f32 %v5878_v0, %v2919_v50 }
 0x214   : > { %v2056_v1 = vpop.f32.mrf.mxu0  ;;  %v5008_v52 = vpop.f32.mrf.mxu1 }
 0x215   : > { %4834 = vst [vmem:[%s5905_s16 + $0xf0] sm:$0xff] %v4638_v25   ;;  %v2920_v21 = vmul.f32 %v6189_v17, %v2597_v40  ;;  %v2602_v28 = vadd.f32 %v5004_v48, %v2056_v1  ;;  %v3182_v44 = vmax.f32 %v3054_v60, 0.0 }
 0x216   : > { %v2058_v33 = vpop.f32.mrf.mxu0  ;;  %v2609_v19 = vpop.f32.mrf.mxu1 }
 0x217   : > { %v3055_v55 = vadd.f32 %v6195_v61, %v2920_v21  ;;  %v2921_v0 = vmul.f32 %v6189_v17, %v2602_v28 }
 0x218   : > { %v2059_v9 = vpop.f32.mrf.mxu0  ;;  %v5009_v20 = vpop.f32.mrf.mxu1 }
 0x219   : > { %v3183_v51 = vmax.f32 %v3055_v55, 0.0  ;;  %v2605_v24 = vadd.f32 %v5005_v13, %v2059_v9  ;;  %v3056_v8 = vadd.f32 %v6195_v61, %v2921_v0 }
 0x21a   : > { %v2061_v14 = vpop.f32.mrf.mxu0  ;;  %v2612_v39 = vpop.f32.mrf.mxu1 }
 0x21b   : > { %v4648_v23 = vpack.c.bf16 %v3183_v51, %v3182_v44  ;;  %v2922_v56 = vmul.f32 %v6189_v17, %v2605_v24  ;;  %v3184_v43 = vmax.f32 %v3056_v8, 0.0 }
 0x21c   : > { %v2064_v41 = vpop.f32.mrf.mxu0  ;;  %v5012_v27 = vpop.f32.mrf.mxu1 }
 0x21d   : > { %4836 = vst [vmem:[%s5905_s16 + $0x100] sm:$0xff] %v4648_v23   ;;  %v3057_v5 = vadd.f32 %v6195_v61, %v2922_v56  ;;  %v2610_v12 = vadd.f32 %v2609_v19, %v2064_v41 }
 0x21e   : > { %v2066_v57 = vpop.f32.mrf.mxu0  ;;  %v2625_v7 = vpop.f32.mrf.mxu1 }
 0x21f   : > { %v3185_v32 = vmax.f32 %v3057_v5, 0.0  ;;  %v2923_v59 = vmul.f32 %v6189_v17, %v2610_v12 }
 0x220   : > { %v2067_v3 = vpop.f32.mrf.mxu0  ;;  %v5013_v47 = vpop.f32.mrf.mxu1 }
 0x221   : > { %v4653_v46 = vpack.c.bf16 %v3185_v32, %v3184_v43  ;;  %v2613_v2 = vadd.f32 %v2612_v39, %v2067_v3  ;;  %v3058_v31 = vadd.f32 %v6195_v61, %v2923_v59 }
 0x222   : > { %v2069_v48 = vpop.f32.mrf.mxu0  ;;  %v2628_v63 = vpop.f32.mrf.mxu1 }
 0x223   : > { %4837 = vst [vmem:[%s5905_s16 + $0x108] sm:$0xff] %v4653_v46   ;;  %v2924_v38 = vmul.f32 %v6189_v17, %v2613_v2  ;;  %v3186_v29 = vmax.f32 %v3058_v31, 0.0 }
 0x224   : > { %v2072_v35 = vpop.f32.mrf.mxu0  ;;  %v6207_v37 = vpop.f32.mrf.mxu1 }
 0x225   : > { %v3059_v49 = vadd.f32 %v6195_v61, %v2924_v38  ;;  %v2618_v4 = vadd.f32 %v5008_v52, %v2072_v35 }
 0x226   : > { %v2074_v11 = vpop.f32.mrf.mxu0  ;;  %v2641_v53 = vpop.f32.mrf.mxu1 }
 0x227   : > { %v3187_v13 = vmax.f32 %v3059_v49, 0.0  ;;  %v2925_v15 = vmul.f32 %v6189_v17, %v2618_v4 }
 0x228   : > { %v2075_v26 = vpop.f32.mrf.mxu0  ;;  %v6211_v36 = vpop.f32.mrf.mxu1 }
 0x229   : > { %v4658_v50 = vpack.c.bf16 %v3187_v13, %v3186_v29  ;;  %v2621_v45 = vadd.f32 %v5009_v20, %v2075_v26  ;;  %v3060_v40 = vadd.f32 %v6195_v61, %v2925_v15 }
 0x22a   : > { %v2077_v16 = vpop.f32.mrf.mxu0  ;;  %v2644_v25 = vpop.f32.mrf.mxu1 }
 0x22b   : > { %4838 = vst [vmem:[%s5905_s16 + $0x110] sm:$0xff] %v4658_v50   ;;  %v2926_v1 = vmul.f32 %v6189_v17, %v2621_v45  ;;  %v3188_v55 = vmax.f32 %v3060_v40, 0.0 }
 0x22c   : > { %v2080_v52 = vpop.f32.mrf.mxu0  ;;  %v6216_v60 = vpop.f32.mrf.mxu1 }
 0x22d   : > { %v3061_v21 = vadd.f32 %v6195_v61, %v2926_v1  ;;  %v2626_v28 = vadd.f32 %v2625_v7, %v2080_v52 }
 0x22e   : > { %v2082_v33 = vpop.f32.mrf.mxu0  ;;  %v6219_v19 = vpop.f32.mrf.mxu1 }
 0x22f   : > { %v3189_v0 = vmax.f32 %v3061_v21, 0.0  ;;  %v2927_v9 = vmul.f32 %v6189_v17, %v2626_v28 }
 0x230   : > { %v2083_v20 = vpop.f32.mrf.mxu0  ;;  %v6222_v44 = vpop.f32.mrf.mxu1 }
 0x231   : > { %v4663_v51 = vpack.c.bf16 %v3189_v0, %v3188_v55  ;;  %v2629_v24 = vadd.f32 %v2628_v63, %v2083_v20  ;;  %v3062_v23 = vadd.f32 %v6195_v61, %v2927_v9 }
 0x232   : > { %v2085_v14 = vpop.f32.mrf.mxu0  ;;  %v6224_v39 = vpop.f32.mrf.mxu1 }
 0x233   : > { %4839 = vst [vmem:[%s5905_s16 + $0x118] sm:$0xff] %v4663_v51   ;;  %v2928_v8 = vmul.f32 %v6189_v17, %v2629_v24  ;;  %v3190_v43 = vmax.f32 %v3062_v23, 0.0 }
 0x234   : > { %v2088_v56 = vpop.f32.mrf.mxu0  ;;  %v6229_v41 = vpop.f32.mrf.mxu1 }
 0x235   : > { %v3063_v5 = vadd.f32 %v6195_v61, %v2928_v8  ;;  %v2634_v12 = vadd.f32 %v5012_v27, %v2088_v56 }
 0x236   : > { %v2090_v57 = vpop.f32.mrf.mxu0  ;;  %v6232_v7 = vpop.f32.mrf.mxu1 }
 0x237   : > { %v3191_v32 = vmax.f32 %v3063_v5, 0.0  ;;  %v2929_v59 = vmul.f32 %v6189_v17, %v2634_v12 }
 0x238   : > { %v2091_v3 = vpop.f32.mrf.mxu0  ;;  %v6235_v46 = vpop.f32.mrf.mxu1 }
 0x239   : > { %v4668_v2 = vpack.c.bf16 %v3191_v32, %v3190_v43  ;;  %v2637_v48 = vadd.f32 %v5013_v47, %v2091_v3  ;;  %v3064_v38 = vadd.f32 %v6195_v61, %v2929_v59 }
 0x23a   : > { %v2093_v63 = vpop.f32.mrf.mxu0  ;;  %v6237_v31 = vpop.f32.mrf.mxu1 }
 0x23b   : > { %4840 = vst [vmem:[%s5905_s16 + $0x120] sm:$0xff] %v4668_v2   ;;  %v2930_v27 = vmul.f32 %v6189_v17, %v2637_v48  ;;  %v3192_v15 = vmax.f32 %v3064_v38, 0.0 }
 0x23c   : > { %v2096_v35 = vpop.f32.mrf.mxu0  ;;  %v6242_v49 = vpop.f32.mrf.mxu1 }
 0x23d   : > { %v3065_v4 = vadd.f32 %v6195_v61, %v2930_v27  ;;  %v2642_v11 = vadd.f32 %v2641_v53, %v2096_v35 }
 0x23e   : > { %v2098_v29 = vpop.f32.mrf.mxu0  ;;  %v6245_v13 = vpop.f32.mrf.mxu1 }
 0x23f   : > { %v3193_v47 = vmax.f32 %v3065_v4, 0.0  ;;  %v2931_v26 = vmul.f32 %v6189_v17, %v2642_v11 }
 0x240   : > { %v2099_v50 = vpop.f32.mrf.mxu0  ;;  %v6248_v45 = vpop.f32.mrf.mxu1 }
 0x241   : > { %v4673_v16 = vpack.c.bf16 %v3193_v47, %v3192_v15  ;;  %v2645_v40 = vadd.f32 %v2644_v25, %v2099_v50  ;;  %v3066_v21 = vadd.f32 %v6195_v61, %v2931_v26 }
 0x242   : > { %v2101_v1 = vpop.f32.mrf.mxu0  ;;  %v6250_v52 = vpop.f32.mrf.mxu1 }
 0x243   : > { %4841 = vst [vmem:[%s5905_s16 + $0x128] sm:$0xff] %v4673_v16   ;;  %v2932_v53 = vmul.f32 %v6189_v17, %v2645_v40  ;;  %v3194_v25 = vmax.f32 %v3066_v21, 0.0 }
 0x244   : > { %v2104_v28 = vpop.f32.mrf.mxu0  ;;  %v6255_v33 = vpop.f32.mrf.mxu1 }
 0x245   : > { %v3067_v55 = vadd.f32 %v6195_v61, %v2932_v53  ;;  %v2650_v0 = vadd.f32 %v6207_v37, %v2104_v28 }
 0x246   : > { %v2106_v9 = vpop.f32.mrf.mxu0  ;;  %v6259_v20 = vpop.f32.mrf.mxu1 }
 0x247   : > { %v3195_v51 = vmax.f32 %v3067_v55, 0.0  ;;  %v2933_v24 = vmul.f32 %v6189_v17, %v2650_v0 }
 0x248   : > { %v2107_v14 = vpop.f32.mrf.mxu0  ;;  %v6262_v23 = vpop.f32.mrf.mxu1 }
 0x249   : > { %v4678_v8 = vpack.c.bf16 %v3195_v51, %v3194_v25  ;;  %v2653_v56 = vadd.f32 %v6211_v36, %v2107_v14  ;;  %v3068_v57 = vadd.f32 %v6195_v61, %v2933_v24 }
 0x24a   : > { %v2109_v5 = vpop.f32.mrf.mxu0  ;;  %v6265_v12 = vpop.f32.mrf.mxu1 }
 0x24b   : > { %4842 = vst [vmem:[%s5905_s16 + $0x130] sm:$0xff] %v4678_v8   ;;  %v2934_v37 = vmul.f32 %v6189_v17, %v2653_v56  ;;  %v3196_v36 = vmax.f32 %v3068_v57, 0.0 }
 0x24c   : > { %v2112_v43 = vpop.f32.mrf.mxu0  ;;  %v5036_v32 = vpop.f32.mrf.mxu1 }
 0x24d   : > { %v3069_v59 = vadd.f32 %v6195_v61, %v2934_v37  ;;  %v2658_v3 = vadd.f32 %v6219_v19, %v2112_v43  ;;  %v2730_v2 = vadd.f32 %v5036_v32, %v5655_v6 }
 0x24e   : > { %v2114_v48 = vpop.f32.mrf.mxu0  ;;  %v2721_v63 = vpop.f32.mrf.mxu1 }
 0x24f   : > { %v3197_v38 = vmax.f32 %v3069_v59, 0.0  ;;  %v2722_v27 = vadd.f32 %v2721_v63, %v5641_v58  ;;  %v2935_v35 = vmul.f32 %v6189_v17, %v2658_v3  ;;  %v2953_v4 = vmul.f32 %v6189_v17, %v2730_v2 }
 0x250   : > { %v2115_v11 = vpop.f32.mrf.mxu0  ;;  %v5037_v29 = vpop.f32.mrf.mxu1 }
 0x251   : > { %v4683_v15 = vpack.c.bf16 %v3197_v38, %v3196_v36  ;;  %v2951_v47 = vmul.f32 %v6189_v17, %v2722_v27  ;;  %v2661_v19 = vadd.f32 %v6224_v39, %v2115_v11  ;;  %v2733_v6 = vadd.f32 %v5037_v29, %v5661_v10 }
 0x252   : > { %v2117_v26 = vpop.f32.mrf.mxu0  ;;  %v2724_v50 = vpop.f32.mrf.mxu1  ;;  %v3070_v58 = vadd.f32 %v6195_v61, %v2935_v35  ;;  %v3088_v40 = vadd.f32 %v6195_v61, %v2953_v4 }
 0x253   : > { %4843 = vst [vmem:[%s5905_s16 + $0x138] sm:$0xff] %v4683_v15   ;;  %v2725_v16 = vadd.f32 %v2724_v50, %v5647_v62  ;;  %v2936_v1 = vmul.f32 %v6189_v17, %v2661_v19  ;;  %v2954_v21 = vmul.f32 %v6189_v17, %v2733_v6  ;;  %v3086_v55 = vadd.f32 %v6195_v61, %v2951_v47 }
 0x254   : > { %v2120_v53 = vpop.f32.mrf.mxu0  ;;  %v5040_v28 = vpop.f32.mrf.mxu1  ;;  %v3198_v5 = vmax.f32 %v3070_v58, 0.0  ;;  %v3216_v57 = vmax.f32 %v3088_v40, 0.0 }
 0x255   : > { %v2952_v39 = vmul.f32 %v6189_v17, %v2725_v16  ;;  %v2666_v10 = vadd.f32 %v6216_v60, %v2120_v53  ;;  %v2746_v0 = vadd.f32 %v5040_v28, %v5683_v30  ;;  %v3071_v62 = vadd.f32 %v6195_v61, %v2936_v1 }
 0x256   : > { %v3089_v9 = vadd.f32 %v6195_v61, %v2954_v21  ;;  %v2122_v25 = vpop.f32.mrf.mxu0  ;;  %v2737_v51 = vpop.f32.mrf.mxu1  ;;  %v3214_v32 = vmax.f32 %v3086_v55, 0.0 }
 0x257   : > { %v3087_v24 = vadd.f32 %v6195_v61, %v2952_v39  ;;  %v2937_v14 = vmul.f32 %v6189_v17, %v2666_v10  ;;  %v2957_v8 = vmul.f32 %v6189_v17, %v2746_v0  ;;  %v2738_v56 = vadd.f32 %v2737_v51, %v5669_v18 }
 0x258   : > { %v3199_v37 = vmax.f32 %v3071_v62, 0.0  ;;  %v3217_v60 = vmax.f32 %v3089_v9, 0.0  ;;  %v2123_v30 = vpop.f32.mrf.mxu0  ;;  %v5041_v43 = vpop.f32.mrf.mxu1 }
 0x259   : > { %v3215_v59 = vmax.f32 %v3087_v24, 0.0  ;;  %v2955_v3 = vmul.f32 %v6189_v17, %v2738_v56  ;;  %v2669_v63 = vadd.f32 %v6222_v44, %v2123_v30  ;;  %v2749_v36 = vadd.f32 %v5041_v43, %v5689_v34 }
 0x25a   : > { %v4688_v2 = vpack.c.bf16 %v3199_v37, %v3198_v5  ;;  %v4733_v48 = vpack.c.bf16 %v3217_v60, %v3216_v57  ;;  %v2125_v18 = vpop.f32.mrf.mxu0  ;;  %v2740_v38 = vpop.f32.mrf.mxu1  ;;  %v3072_v35 = vadd.f32 %v6195_v61, %v2937_v14  ;;  %v3092_v4 = vadd.f32 %v6195_v61, %v2957_v8  ;;  %v6470_v14 = vld [vmem:[#allocation3_spill] sm:$0xff] }
 0x25b   : > { %v4728_v27 = vpack.c.bf16 %v3215_v59, %v3214_v32  ;;  %v2938_v11 = vmul.f32 %v6189_v17, %v2669_v63  ;;  %v2958_v29 = vmul.f32 %v6189_v17, %v2749_v36  ;;  %v2741_v15 = vadd.f32 %v2740_v38, %v5675_v22  ;;  %v6472_v63 = vld [vmem:[#allocation6_spill] sm:$0xff] }
 0x25c   : > { %4844 = vst [vmem:[%s5905_s16 + $0x140] sm:$0xff] %v4688_v2   ;;  %4853 = vst [vmem:[%s5905_s16 + $0x188] sm:$0xff] %v4733_v48   ;;  %v2128_v47 = vpop.f32.mrf.mxu0  ;;  %v5044_v19 = vpop.f32.mrf.mxu1  ;;  %v3090_v34 = vadd.f32 %v6195_v61, %v2955_v3  ;;  %v3200_v1 = vmax.f32 %v3072_v35, 0.0  ;;  %v3220_v21 = vmax.f32 %v3092_v4, 0.0 }
 0x25d   : > { %4852 = vst [vmem:[%s5905_s16 + $0x180] sm:$0xff] %v4728_v27   ;;  %v2674_v44 = vadd.f32 %v6232_v7, %v2128_v47  ;;  %v2762_v6 = vadd.f32 %v5044_v19, %v5711_v54  ;;  %v3073_v26 = vadd.f32 %v6195_v61, %v2938_v11  ;;  %v3093_v50 = vadd.f32 %v6195_v61, %v2958_v29 }
 0x25e   : > { %v2956_v16 = vmul.f32 %v6189_v17, %v2741_v15  ;;  %v2130_v58 = vpop.f32.mrf.mxu0  ;;  %v2753_v40 = vpop.f32.mrf.mxu1  ;;  %v3218_v0 = vmax.f32 %v3090_v34, 0.0  ;;  %v6473_v15 = vld [vmem:[#allocation4_spill] sm:$0xff] }
 0x25f   : > { %v2939_v22 = vmul.f32 %v6189_v17, %v2674_v44  ;;  %v2754_v53 = vadd.f32 %v2753_v40, %v5697_v42  ;;  %v3201_v28 = vmax.f32 %v3073_v26, 0.0  ;;  %v3221_v55 = vmax.f32 %v3093_v50, 0.0 }
 0x260   : > { %v3091_v7 = vadd.f32 %v6195_v61, %v2956_v16  ;;  %v2961_v54 = vmul.f32 %v6189_v17, %v2762_v6  ;;  %v2131_v39 = vpop.f32.mrf.mxu0  ;;  %v5045_v10 = vpop.f32.mrf.mxu1 }
 0x261   : > { %v2959_v62 = vmul.f32 %v6189_v17, %v2754_v53  ;;  %v2677_v9 = vadd.f32 %v6237_v31, %v2131_v39  ;;  %v4693_v25 = vpack.c.bf16 %v3201_v28, %v3200_v1  ;;  %v4743_v51 = vpack.c.bf16 %v3221_v55, %v3220_v21  ;;  %v6471_v31 = vld [vmem:[#allocation2_spill] sm:$0xff] }
 0x262   : > { %v3219_v24 = vmax.f32 %v3091_v7, 0.0  ;;  %v2765_v42 = vadd.f32 %v5045_v10, %v6470_v14  ;;  %v2133_v8 = vpop.f32.mrf.mxu0  ;;  %v2756_v56 = vpop.f32.mrf.mxu1  ;;  %v3074_v5 = vadd.f32 %v6195_v61, %v2939_v22  ;;  %v3096_v60 = vadd.f32 %v6195_v61, %v2961_v54  ;;  %v6474_v22 = vld [vmem:[#allocation7_spill] sm:$0xff]  ;;  %v6475_v54 = vld [vmem:[#allocation5_spill] sm:$0xff] }
 0x263   : > { %v2940_v57 = vmul.f32 %v6189_v17, %v2677_v9  ;;  %4845 = vst [vmem:[%s5905_s16 + $0x148] sm:$0xff] %v4693_v25   ;;  %4855 = vst [vmem:[%s5905_s16 + $0x198] sm:$0xff] %v4743_v51   ;;  %v2757_v43 = vadd.f32 %v2756_v56, %v6471_v31  ;;  %v3094_v3 = vadd.f32 %v6195_v61, %v2959_v62 }
 0x264   : > { %v4738_v37 = vpack.c.bf16 %v3219_v24, %v3218_v0  ;;  %v2962_v30 = vmul.f32 %v6189_v17, %v2765_v42  ;;  %v2136_v32 = vpop.f32.mrf.mxu0  ;;  %v5048_v59 = vpop.f32.mrf.mxu1  ;;  %v3202_v4 = vmax.f32 %v3074_v5, 0.0  ;;  %v3224_v19 = vmax.f32 %v3096_v60, 0.0  ;;  %v6476_v42 = vld [vmem:[#allocation10_spill] sm:$0xff] }
 0x265   : > { %v3075_v2 = vadd.f32 %v6195_v61, %v2940_v57  ;;  %v2682_v48 = vadd.f32 %v6229_v41, %v2136_v32  ;;  %v2778_v36 = vadd.f32 %v5048_v59, %v6472_v63  ;;  %v2960_v38 = vmul.f32 %v6189_v17, %v2757_v43  ;;  %v6477_v43 = vld [vmem:[#allocation8_spill] sm:$0xff] }
 0x266   : > { %4854 = vst [vmem:[%s5905_s16 + $0x190] sm:$0xff] %v4738_v37   ;;  %v3097_v18 = vadd.f32 %v6195_v61, %v2962_v30  ;;  %v2138_v27 = vpop.f32.mrf.mxu0  ;;  %v2769_v35 = vpop.f32.mrf.mxu1  ;;  %v3222_v50 = vmax.f32 %v3094_v3, 0.0 }
 0x267   : > { %v3203_v11 = vmax.f32 %v3075_v2, 0.0  ;;  %v2941_v29 = vmul.f32 %v6189_v17, %v2682_v48  ;;  %v2770_v47 = vadd.f32 %v2769_v35, %v6473_v15  ;;  %v3095_v41 = vadd.f32 %v6195_v61, %v2960_v38 }
 0x268   : > { %v3225_v34 = vmax.f32 %v3097_v18, 0.0  ;;  %v2965_v44 = vmul.f32 %v6189_v17, %v2778_v36  ;;  %v2139_v6 = vpop.f32.mrf.mxu0  ;;  %v5049_v26 = vpop.f32.mrf.mxu1 }
 0x269   : > { %v4698_v16 = vpack.c.bf16 %v3203_v11, %v3202_v4  ;;  %v2963_v58 = vmul.f32 %v6189_v17, %v2770_v47  ;;  %v3223_v1 = vmax.f32 %v3095_v41, 0.0  ;;  %v2685_v21 = vadd.f32 %v6235_v46, %v2139_v6  ;;  %v6478_v11 = vld [vmem:[#allocation11_spill] sm:$0xff] }
 0x26a   : > { %v4753_v40 = vpack.c.bf16 %v3225_v34, %v3224_v19  ;;  %v2781_v53 = vadd.f32 %v5049_v26, %v6474_v22  ;;  %v2141_v28 = vpop.f32.mrf.mxu0  ;;  %v2772_v55 = vpop.f32.mrf.mxu1  ;;  %v3076_v7 = vadd.f32 %v6195_v61, %v2941_v29  ;;  %v3100_v0 = vadd.f32 %v6195_v61, %v2965_v44  ;;  %v6479_v26 = vld [vmem:[#allocation9_spill] sm:$0xff] }
 0x26b   : > { %4846 = vst [vmem:[%s5905_s16 + $0x150] sm:$0xff] %v4698_v16   ;;  %v2773_v39 = vadd.f32 %v2772_v55, %v6475_v54  ;;  %v4748_v10 = vpack.c.bf16 %v3223_v1, %v3222_v50  ;;  %v2942_v62 = vmul.f32 %v6189_v17, %v2685_v21  ;;  %v3098_v51 = vadd.f32 %v6195_v61, %v2963_v58  ;;  %v6480_v1 = vld [vmem:[#allocation14_spill] sm:$0xff] }
 0x26c   : > { %4857 = vst [vmem:[%s5905_s16 + $0x1a8] sm:$0xff] %v4753_v40   ;;  %v2966_v9 = vmul.f32 %v6189_v17, %v2781_v53  ;;  %v2144_v25 = vpop.f32.mrf.mxu0  ;;  %v5052_v46 = vpop.f32.mrf.mxu1  ;;  %v3204_v59 = vmax.f32 %v3076_v7, 0.0  ;;  %v3228_v3 = vmax.f32 %v3100_v0, 0.0  ;;  %v6481_v0 = vld [vmem:[#allocation12_spill] sm:$0xff] }
 0x26d   : > { %v2964_v24 = vmul.f32 %v6189_v17, %v2773_v39  ;;  %v2690_v14 = vadd.f32 %v6245_v13, %v2144_v25  ;;  %v2794_v8 = vadd.f32 %v5052_v46, %v6476_v42  ;;  %4856 = vst [vmem:[%s5905_s16 + $0x1a0] sm:$0xff] %v4748_v10   ;;  %v3077_v56 = vadd.f32 %v6195_v61, %v2942_v62 }
 0x26e   : > { %v3101_v5 = vadd.f32 %v6195_v61, %v2966_v9  ;;  %v2146_v57 = vpop.f32.mrf.mxu0  ;;  %v2785_v37 = vpop.f32.mrf.mxu1  ;;  %v3226_v36 = vmax.f32 %v3098_v51, 0.0 }
 0x26f   : > { %v3099_v60 = vadd.f32 %v6195_v61, %v2964_v24  ;;  %v2943_v30 = vmul.f32 %v6189_v17, %v2690_v14  ;;  %v2969_v31 = vmul.f32 %v6189_v17, %v2794_v8  ;;  %v2786_v32 = vadd.f32 %v2785_v37, %v6477_v43  ;;  %v6482_v37 = vld [vmem:[#allocation15_spill] sm:$0xff] }
 0x270   : > { %v3205_v13 = vmax.f32 %v3077_v56, 0.0  ;;  %v3229_v2 = vmax.f32 %v3101_v5, 0.0  ;;  %v2147_v48 = vpop.f32.mrf.mxu0  ;;  %v5053_v63 = vpop.f32.mrf.mxu1 }
 0x271   : > { %v3227_v18 = vmax.f32 %v3099_v60, 0.0  ;;  %v2967_v38 = vmul.f32 %v6189_v17, %v2786_v32  ;;  %v2693_v4 = vadd.f32 %v6250_v52, %v2147_v48  ;;  %v2797_v29 = vadd.f32 %v5053_v63, %v6478_v11 }
 0x272   : > { %v4703_v27 = vpack.c.bf16 %v3205_v13, %v3204_v59  ;;  %v4763_v35 = vpack.c.bf16 %v3229_v2, %v3228_v3  ;;  %v2149_v15 = vpop.f32.mrf.mxu0  ;;  %v2788_v47 = vpop.f32.mrf.mxu1  ;;  %v3078_v34 = vadd.f32 %v6195_v61, %v2943_v30  ;;  %v3104_v41 = vadd.f32 %v6195_v61, %v2969_v31 }
 0x273   : > { %v4758_v19 = vpack.c.bf16 %v3227_v18, %v3226_v36  ;;  %v2944_v44 = vmul.f32 %v6189_v17, %v2693_v4  ;;  %v2970_v6 = vmul.f32 %v6189_v17, %v2797_v29  ;;  %v2789_v50 = vadd.f32 %v2788_v47, %v6479_v26 }
 0x274   : > { %4847 = vst [vmem:[%s5905_s16 + $0x158] sm:$0xff] %v4703_v27   ;;  %4859 = vst [vmem:[%s5905_s16 + $0x1b8] sm:$0xff] %v4763_v35   ;;  %v2152_v16 = vpop.f32.mrf.mxu0  ;;  %v5056_v58 = vpop.f32.mrf.mxu1  ;;  %v3102_v52 = vadd.f32 %v6195_v61, %v2967_v38  ;;  %v3206_v54 = vmax.f32 %v3078_v34, 0.0  ;;  %v3232_v39 = vmax.f32 %v3104_v41, 0.0  ;;  %v6484_v27 = vld [vmem:[#allocation18_spill] sm:$0xff]  ;;  %v6485_v41 = vld [vmem:[#allocation16_spill] sm:$0xff] }
 0x275   : > { %4858 = vst [vmem:[%s5905_s16 + $0x1b0] sm:$0xff] %v4758_v19   ;;  %v2698_v40 = vadd.f32 %v6242_v49, %v2152_v16  ;;  %v2810_v21 = vadd.f32 %v5056_v58, %v6480_v1  ;;  %v3079_v22 = vadd.f32 %v6195_v61, %v2944_v44  ;;  %v3105_v53 = vadd.f32 %v6195_v61, %v2970_v6 }
 0x276   : > { %v2968_v28 = vmul.f32 %v6189_v17, %v2789_v50  ;;  %v2154_v55 = vpop.f32.mrf.mxu0  ;;  %v2801_v7 = vpop.f32.mrf.mxu1  ;;  %v3230_v14 = vmax.f32 %v3102_v52, 0.0 }
 0x277   : > { %v2945_v10 = vmul.f32 %v6189_v17, %v2698_v40  ;;  %v2802_v62 = vadd.f32 %v2801_v7, %v6481_v0  ;;  %v3207_v9 = vmax.f32 %v3079_v22, 0.0  ;;  %v3233_v25 = vmax.f32 %v3105_v53, 0.0 }
 0x278   : > { %v3103_v49 = vadd.f32 %v6195_v61, %v2968_v28  ;;  %v2973_v46 = vmul.f32 %v6189_v17, %v2810_v21  ;;  %v2155_v51 = vpop.f32.mrf.mxu0  ;;  %v5057_v24 = vpop.f32.mrf.mxu1  ;;  %v6486_v28 = vld [vmem:[#allocation19_spill] sm:$0xff] }
 0x279   : > { %v2971_v42 = vmul.f32 %v6189_v17, %v2802_v62  ;;  %v2701_v8 = vadd.f32 %v6248_v45, %v2155_v51  ;;  %v4708_v56 = vpack.c.bf16 %v3207_v9, %v3206_v54  ;;  %v4773_v5 = vpack.c.bf16 %v3233_v25, %v3232_v39  ;;  %v6483_v45 = vld [vmem:[#allocation13_spill] sm:$0xff] }
 0x27a   : > { %v3231_v57 = vmax.f32 %v3103_v49, 0.0  ;;  %v2813_v60 = vadd.f32 %v5057_v24, %v6482_v37  ;;  %v2157_v30 = vpop.f32.mrf.mxu0  ;;  %v2804_v31 = vpop.f32.mrf.mxu1  ;;  %v3080_v43 = vadd.f32 %v6195_v61, %v2945_v10  ;;  %v3108_v3 = vadd.f32 %v6195_v61, %v2973_v46  ;;  %v6487_v10 = vld [vmem:[#allocation17_spill] sm:$0xff] }
 0x27b   : > { %v2946_v32 = vmul.f32 %v6189_v17, %v2701_v8  ;;  %4848 = vst [vmem:[%s5905_s16 + $0x160] sm:$0xff] %v4708_v56   ;;  %4861 = vst [vmem:[%s5905_s16 + $0x1c8] sm:$0xff] %v4773_v5   ;;  %v2805_v2 = vadd.f32 %v2804_v31, %v6483_v45  ;;  %v3106_v36 = vadd.f32 %v6195_v61, %v2971_v42  ;;  %v6488_v42 = vld [vmem:[#allocation22_spill] sm:$0xff] }
 0x27c   : > { %v4768_v59 = vpack.c.bf16 %v3231_v57, %v3230_v14  ;;  %v2974_v13 = vmul.f32 %v6189_v17, %v2813_v60  ;;  %v2160_v48 = vpop.f32.mrf.mxu0  ;;  %v5060_v63 = vpop.f32.mrf.mxu1  ;;  %v3208_v47 = vmax.f32 %v3080_v43, 0.0  ;;  %v3236_v6 = vmax.f32 %v3108_v3, 0.0  ;;  %v6489_v43 = vld [vmem:[#allocation20_spill] sm:$0xff] }
 0x27d   : > { %v3081_v18 = vadd.f32 %v6195_v61, %v2946_v32  ;;  %v2706_v38 = vadd.f32 %v6259_v20, %v2160_v48  ;;  %v2826_v35 = vadd.f32 %v5060_v63, %v6484_v27  ;;  %v2972_v11 = vmul.f32 %v6189_v17, %v2805_v2 }
 0x27e   : > { %4860 = vst [vmem:[%s5905_s16 + $0x1c0] sm:$0xff] %v4768_v59   ;;  %v3109_v4 = vadd.f32 %v6195_v61, %v2974_v13  ;;  %v2162_v29 = vpop.f32.mrf.mxu0  ;;  %v2817_v15 = vpop.f32.mrf.mxu1  ;;  %v3234_v52 = vmax.f32 %v3106_v36, 0.0 }
 0x27f   : > { %v3209_v19 = vmax.f32 %v3081_v18, 0.0  ;;  %v2947_v34 = vmul.f32 %v6189_v17, %v2706_v38  ;;  %v2818_v44 = vadd.f32 %v2817_v15, %v6485_v41  ;;  %v3107_v20 = vadd.f32 %v6195_v61, %v2972_v11 }
 0x280   : > { %v3237_v26 = vmax.f32 %v3109_v4, 0.0  ;;  %v2977_v50 = vmul.f32 %v6189_v17, %v2826_v35  ;;  %v2163_v16 = vpop.f32.mrf.mxu0  ;;  %v5061_v58 = vpop.f32.mrf.mxu1  ;;  %v6490_v35 = vld [vmem:[#allocation23_spill] sm:$0xff] }
 0x281   : > { %v4713_v40 = vpack.c.bf16 %v3209_v19, %v3208_v47  ;;  %v2975_v1 = vmul.f32 %v6189_v17, %v2818_v44  ;;  %v3235_v22 = vmax.f32 %v3107_v20, 0.0  ;;  %v2709_v53 = vadd.f32 %v6265_v12, %v2163_v16  ;;  %v6491_v44 = vld [vmem:[#allocation21_spill] sm:$0xff] }
 0x282   : > { %v4783_v21 = vpack.c.bf16 %v3237_v26, %v3236_v6  ;;  %v2829_v55 = vadd.f32 %v5061_v58, %v6486_v28  ;;  %v2165_v7 = vpop.f32.mrf.mxu0  ;;  %v2820_v54 = vpop.f32.mrf.mxu1  ;;  %v3082_v39 = vadd.f32 %v6195_v61, %v2947_v34  ;;  %v3112_v9 = vadd.f32 %v6195_v61, %v2977_v50 }
 0x283   : > { %4849 = vst [vmem:[%s5905_s16 + $0x168] sm:$0xff] %v4713_v40   ;;  %v2821_v0 = vadd.f32 %v2820_v54, %v6487_v10  ;;  %v4778_v62 = vpack.c.bf16 %v3235_v22, %v3234_v52  ;;  %v2948_v25 = vmul.f32 %v6189_v17, %v2709_v53  ;;  %v3110_v51 = vadd.f32 %v6195_v61, %v2975_v1 }
 0x284   : > { %4863 = vst [vmem:[%s5905_s16 + $0x1d8] sm:$0xff] %v4783_v21   ;;  %v2978_v49 = vmul.f32 %v6189_v17, %v2829_v55  ;;  %v2168_v46 = vpop.f32.mrf.mxu0  ;;  %v5064_v12 = vpop.f32.mrf.mxu1  ;;  %v3210_v60 = vmax.f32 %v3082_v39, 0.0  ;;  %v3240_v59 = vmax.f32 %v3112_v9, 0.0 }
 0x285   : > { %v2976_v24 = vmul.f32 %v6189_v17, %v2821_v0  ;;  %v2714_v14 = vadd.f32 %v6255_v33, %v2168_v46  ;;  %v2842_v8 = vadd.f32 %v5064_v12, %v6488_v42  ;;  %4862 = vst [vmem:[%s5905_s16 + $0x1d0] sm:$0xff] %v4778_v62   ;;  %v3083_v56 = vadd.f32 %v6195_v61, %v2948_v25 }
 0x286   : > { %v3113_v5 = vadd.f32 %v6195_v61, %v2978_v49  ;;  %v2170_v57 = vpop.f32.mrf.mxu0  ;;  %v2833_v37 = vpop.f32.mrf.mxu1  ;;  %v3238_v48 = vmax.f32 %v3110_v51, 0.0 }
 0x287   : > { %v3111_v30 = vadd.f32 %v6195_v61, %v2976_v24  ;;  %v2949_v31 = vmul.f32 %v6189_v17, %v2714_v14  ;;  %v2834_v32 = vadd.f32 %v2833_v37, %v6489_v43  ;;  %v3211_v3 = vmax.f32 %v3083_v56, 0.0 }
 0x288   : > { %v3241_v33 = vmax.f32 %v3113_v5, 0.0  ;;  %v2981_v13 = vmul.f32 %v6189_v17, %v2842_v8  ;;  %v2171_v45 = vpop.f32.mrf.mxu0  ;;  %v5065_v2 = vpop.f32.mrf.mxu1 }
 0x289   : > { %v3239_v63 = vmax.f32 %v3111_v30, 0.0  ;;  %v2979_v36 = vmul.f32 %v6189_v17, %v2834_v32  ;;  %v4718_v18 = vpack.c.bf16 %v3211_v3, %v3210_v60  ;;  %v2717_v27 = vadd.f32 %v6262_v23, %v2171_v45 }
 0x28a   : > { %v4793_v38 = vpack.c.bf16 %v3241_v33, %v3240_v59  ;;  %v2845_v4 = vadd.f32 %v5065_v2, %v6490_v35  ;;  %v2173_v11 = vpop.f32.mrf.mxu0  ;;  %v2836_v29 = vpop.f32.mrf.mxu1  ;;  %v3084_v47 = vadd.f32 %v6195_v61, %v2949_v31  ;;  %v3116_v19 = vadd.f32 %v6195_v61, %v2981_v13 }
 0x28b   : > { %v4788_v15 = vpack.c.bf16 %v3239_v63, %v3238_v48  ;;  %4850 = vst [vmem:[%s5905_s16 + $0x170] sm:$0xff] %v4718_v18   ;;  %v2950_v34 = vmul.f32 %v6189_v17, %v2717_v27  ;;  %v2837_v6 = vadd.f32 %v2836_v29, %v6491_v44  ;;  %v3114_v23 = vadd.f32 %v6195_v61, %v2979_v36 }
 0x28c   : > { %4865 = vst [vmem:[%s5905_s16 + $0x1e8] sm:$0xff] %v4793_v38   ;;  %v2982_v41 = vmul.f32 %v6189_v17, %v2845_v4  ;;  %v3212_v16 = vmax.f32 %v3084_v47, 0.0  ;;  %v3244_v58 = vmax.f32 %v3116_v19, 0.0 }
 0x28d   : > { %4864 = vst [vmem:[%s5905_s16 + $0x1e0] sm:$0xff] %v4788_v15   ;;  %v3085_v26 = vadd.f32 %v6195_v61, %v2950_v34  ;;  %v2980_v50 = vmul.f32 %v6189_v17, %v2837_v6  ;;  %v3242_v21 = vmax.f32 %v3114_v23, 0.0 }
 0x28e   : > { %v3117_v20 = vadd.f32 %v6195_v61, %v2982_v41 }
 0x28f   : > { %v3213_v52 = vmax.f32 %v3085_v26, 0.0  ;;  %v3115_v1 = vadd.f32 %v6195_v61, %v2980_v50 }
 0x290   : > { %v3245_v40 = vmax.f32 %v3117_v20, 0.0 }
 0x291   : > { %v4723_v22 = vpack.c.bf16 %v3213_v52, %v3212_v16  ;;  %v3243_v28 = vmax.f32 %v3115_v1, 0.0 }
 0x292   : > { %v4803_v53 = vpack.c.bf16 %v3245_v40, %v3244_v58 }
 0x293   : > { %4851 = vst [vmem:[%s5905_s16 + $0x178] sm:$0xff] %v4723_v22   ;;  %v4798_v55 = vpack.c.bf16 %v3243_v28, %v3242_v21 }
 0x294   : > { %4867 = vst [vmem:[%s5905_s16 + $0x1f8] sm:$0xff] %v4803_v53  }
 0x295   : > { %4866 = vst [vmem:[%s5905_s16 + $0x1f0] sm:$0xff] %v4798_v55  }
 0x296 PF: > { %s14_s15 = sadd.s32 1, %s5390_s15  }
 0x297   : > { %p11_p4 = scmp.ge.s32.totalorder %s14_s15, 4  }
 0x299   :  { %13 = sbr.rel (!%p11_p4) target bundleno = 1 (0x1), region = 66 }

// kernel: _lambda_.9
= control target key start
LH: loop header
LB: loop body
LE: loop exit
PB: predicated region body
PF: predicated region fallthrough
CT: control target
= control target key end

     0   :  { %s548_s6 = smov 0   ;;  %s861_s0 = inlined_call_operand.vmem [shape: bf16[32,2,16,64], index: 0, kind: input, shape index: {}]   ;;  %s862_s1 = inlined_call_operand.vmem [shape: bf16[32,16,32], index: 1, kind: output, shape index: {}]  }
   0x1 LB: > { %s473_s7 = sadd.s32 4294967295, %s535_s6   ;;  %p477_p0 = scmp.ge.s32.totalorder %s535_s6, 1  ;;  %s535_s6 = sphi %s548_s6, %s11_s6  }
   0x2   : > { %p89_p1 = scmp.lt.s32.totalorder %s535_s6, 3 }
   0x4   : > { %p90_p2 = pnand %p477_p0, %p89_p1 }
   0x5   : > { %s478_s8 = sshll.u32 (!%p90_p2), %s473_s7, 4  ;;  %s537_s13 = smov (!%p90_p2), 96  }
   0x6   : > { %93 = sbr.rel (%p90_p2) target bundleno = 196 (0xc4), region = 24  ;;  %p112_p3 = scmp.lt.s32.totalorder (!%p90_p2), %s478_s8, 31 }
   0xb   : > { %s864_s8 = smov (!%p112_p3, %s478_s8), 31  ;;  %vm382_vm0 = vcmask 257024  }
   0xc   : > { %s518_s9 = sshll.u32 %s864_s8, 4  ;;  %s519_s14 = sshll.u32 %s864_s8, 3 }
   0xd   : > { %s562_s12 = scalar_lea.vmem %s861_s0, %s518_s9  ;;  %s760_s17 = scalar_lea.vmem %s862_s1, %s519_s14 }
   0xe   : > { %v127_v0 = vld [vmem:[%s562_s12 + $0x10] sm:$0xf]  ;;  %v486_v1 = vld [vmem:[%s562_s12 + $0x18] sm:$0xf]  ;;  %v125_v2 = vld [vmem:[%s562_s12] sm:$0xf] }
   0xf   : > { %v567_v3 = vmax.bf16 %v486_v1, %v127_v0  ;;  %v484_v4 = vld [vmem:[%s562_s12 + $0x8] sm:$0xf]  ;;  %v128_v5 = vld [vmem:[%s562_s12 + $0x14] sm:$0xf]  ;;  %v487_v6 = vld [vmem:[%s562_s12 + $0x1c] sm:$0xf] }
  0x10   : > { %v572_v7 = vmax.bf16 %v484_v4, %v125_v2  ;;  %v126_v8 = vld [vmem:[%s562_s12 + $0x4] sm:$0xf]  ;;  %v485_v9 = vld [vmem:[%s562_s12 + $0xc] sm:$0xf]  ;;  %v578_v10 = vmax.bf16 %v487_v6, %v128_v5  ;;  %v129_v14 = vld [vmem:[%s562_s12 + $0x20] sm:$0xf] }
  0x11   : > { %258 = vrot.lane.b32.xlu1 %v567_v3, %s537_s13  ;;  %v582_v11 = vmax.bf16 %v485_v9, %v126_v8  ;;  %v130_v12 = vld [vmem:[%s562_s12 + $0x24] sm:$0xf]  ;;  %v489_v13 = vld [vmem:[%s562_s12 + $0x2c] sm:$0xf]  ;;  %v488_v15 = vld [vmem:[%s562_s12 + $0x28] sm:$0xf] }
  0x12   : > { %254 = vrot.lane.b32.xlu0 %v572_v7, %s537_s13  ;;  %v590_v16 = vmax.bf16 %v489_v13, %v130_v12  ;;  %v594_v17 = vmax.bf16 %v488_v15, %v129_v14  ;;  %v132_v18 = vld [vmem:[%s562_s12 + $0x34] sm:$0xf]  ;;  %v491_v19 = vld [vmem:[%s562_s12 + $0x3c] sm:$0xf]  ;;  %v131_v20 = vld [vmem:[%s562_s12 + $0x30] sm:$0xf] }
  0x13   : > { %v490_v21 = vld [vmem:[%s562_s12 + $0x38] sm:$0xf]  ;;  %v602_v22 = vmax.bf16 %v491_v19, %v132_v18  ;;  %v134_v24 = vld [vmem:[%s562_s12 + $0x44] sm:$0xf]  ;;  %v493_v25 = vld [vmem:[%s562_s12 + $0x4c] sm:$0xf] }
  0x14   : > { %v606_v23 = vmax.bf16 %v490_v21, %v131_v20  ;;  %v133_v26 = vld [vmem:[%s562_s12 + $0x40] sm:$0xf]  ;;  %v492_v27 = vld [vmem:[%s562_s12 + $0x48] sm:$0xf]  ;;  %v614_v28 = vmax.bf16 %v493_v25, %v134_v24  ;;  %v136_v30 = vld [vmem:[%s562_s12 + $0x54] sm:$0xf] }
  0x15   : > { %260 = vrot.lane.b32.xlu1 %v578_v10, %s537_s13  ;;  %v618_v29 = vmax.bf16 %v492_v27, %v133_v26  ;;  %v495_v31 = vld [vmem:[%s562_s12 + $0x5c] sm:$0xf]  ;;  %v135_v32 = vld [vmem:[%s562_s12 + $0x50] sm:$0xf]  ;;  %v494_v33 = vld [vmem:[%s562_s12 + $0x58] sm:$0xf] }
  0x16   : > { %256 = vrot.lane.b32.xlu0 %v582_v11, %s537_s13  ;;  %v626_v34 = vmax.bf16 %v495_v31, %v136_v30  ;;  %v630_v35 = vmax.bf16 %v494_v33, %v135_v32  ;;  %v138_v36 = vld [vmem:[%s562_s12 + $0x64] sm:$0xf]  ;;  %v497_v37 = vld [vmem:[%s562_s12 + $0x6c] sm:$0xf]  ;;  %v137_v38 = vld [vmem:[%s562_s12 + $0x60] sm:$0xf] }
  0x17   : > { %v496_v39 = vld [vmem:[%s562_s12 + $0x68] sm:$0xf]  ;;  %v638_v40 = vmax.bf16 %v497_v37, %v138_v36  ;;  %v140_v42 = vld [vmem:[%s562_s12 + $0x74] sm:$0xf]  ;;  %v499_v43 = vld [vmem:[%s562_s12 + $0x7c] sm:$0xf] }
  0x18   : > { %v642_v41 = vmax.bf16 %v496_v39, %v137_v38  ;;  %v139_v44 = vld [vmem:[%s562_s12 + $0x70] sm:$0xf]  ;;  %v498_v45 = vld [vmem:[%s562_s12 + $0x78] sm:$0xf]  ;;  %v650_v46 = vmax.bf16 %v499_v43, %v140_v42  ;;  %v142_v48 = vld [vmem:[%s562_s12 + $0x84] sm:$0xf] }
  0x19   : > { %264 = vrot.lane.b32.xlu1 %v590_v16, %s537_s13  ;;  %v654_v47 = vmax.bf16 %v498_v45, %v139_v44  ;;  %v501_v49 = vld [vmem:[%s562_s12 + $0x8c] sm:$0xf]  ;;  %v141_v50 = vld [vmem:[%s562_s12 + $0x80] sm:$0xf]  ;;  %v500_v51 = vld [vmem:[%s562_s12 + $0x88] sm:$0xf] }
  0x1a   : > { %262 = vrot.lane.b32.xlu0 %v594_v17, %s537_s13  ;;  %v662_v52 = vmax.bf16 %v501_v49, %v142_v48  ;;  %v666_v53 = vmax.bf16 %v500_v51, %v141_v50  ;;  %v144_v54 = vld [vmem:[%s562_s12 + $0x94] sm:$0xf]  ;;  %v503_v55 = vld [vmem:[%s562_s12 + $0x9c] sm:$0xf]  ;;  %v143_v56 = vld [vmem:[%s562_s12 + $0x90] sm:$0xf] }
  0x1b   : > { %v502_v57 = vld [vmem:[%s562_s12 + $0x98] sm:$0xf]  ;;  %v674_v58 = vmax.bf16 %v503_v55, %v144_v54  ;;  %v146_v60 = vld [vmem:[%s562_s12 + $0xa4] sm:$0xf]  ;;  %v505_v61 = vld [vmem:[%s562_s12 + $0xac] sm:$0xf] }
  0x1c   : > { %v678_v59 = vmax.bf16 %v502_v57, %v143_v56  ;;  %v145_v62 = vld [vmem:[%s562_s12 + $0xa0] sm:$0xf]  ;;  %v504_v63 = vld [vmem:[%s562_s12 + $0xa8] sm:$0xf]  ;;  %v686_v0 = vmax.bf16 %v505_v61, %v146_v60  ;;  %v148_v2 = vld [vmem:[%s562_s12 + $0xb4] sm:$0xf] }
  0x1d   : > { %268 = vrot.lane.b32.xlu1 %v602_v22, %s537_s13  ;;  %v690_v1 = vmax.bf16 %v504_v63, %v145_v62  ;;  %v507_v4 = vld [vmem:[%s562_s12 + $0xbc] sm:$0xf]  ;;  %v147_v5 = vld [vmem:[%s562_s12 + $0xb0] sm:$0xf]  ;;  %v506_v6 = vld [vmem:[%s562_s12 + $0xb8] sm:$0xf] }
  0x1e   : > { %266 = vrot.lane.b32.xlu0 %v606_v23, %s537_s13  ;;  %v698_v8 = vmax.bf16 %v507_v4, %v148_v2  ;;  %v702_v9 = vmax.bf16 %v506_v6, %v147_v5  ;;  %v150_v12 = vld [vmem:[%s562_s12 + $0xc4] sm:$0xf]  ;;  %v509_v13 = vld [vmem:[%s562_s12 + $0xcc] sm:$0xf]  ;;  %v149_v14 = vld [vmem:[%s562_s12 + $0xc0] sm:$0xf] }
  0x1f   : > { %v508_v15 = vld [vmem:[%s562_s12 + $0xc8] sm:$0xf]  ;;  %v710_v18 = vmax.bf16 %v509_v13, %v150_v12  ;;  %v152_v20 = vld [vmem:[%s562_s12 + $0xd4] sm:$0xf]  ;;  %v511_v21 = vld [vmem:[%s562_s12 + $0xdc] sm:$0xf] }
  0x20   : > { %v714_v19 = vmax.bf16 %v508_v15, %v149_v14  ;;  %v151_v24 = vld [vmem:[%s562_s12 + $0xd0] sm:$0xf]  ;;  %v510_v25 = vld [vmem:[%s562_s12 + $0xd8] sm:$0xf]  ;;  %v722_v26 = vmax.bf16 %v511_v21, %v152_v20  ;;  %v154_v30 = vld [vmem:[%s562_s12 + $0xe4] sm:$0xf] }
  0x21   : > { %272 = vrot.lane.b32.xlu1 %v614_v28, %s537_s13  ;;  %v726_v27 = vmax.bf16 %v510_v25, %v151_v24  ;;  %v513_v31 = vld [vmem:[%s562_s12 + $0xec] sm:$0xf]  ;;  %v153_v32 = vld [vmem:[%s562_s12 + $0xe0] sm:$0xf]  ;;  %v512_v33 = vld [vmem:[%s562_s12 + $0xe8] sm:$0xf] }
  0x22   : > { %270 = vrot.lane.b32.xlu0 %v618_v29, %s537_s13  ;;  %v734_v36 = vmax.bf16 %v513_v31, %v154_v30  ;;  %v738_v37 = vmax.bf16 %v512_v33, %v153_v32  ;;  %v156_v38 = vld [vmem:[%s562_s12 + $0xf4] sm:$0xf]  ;;  %v515_v39 = vld [vmem:[%s562_s12 + $0xfc] sm:$0xf]  ;;  %v155_v42 = vld [vmem:[%s562_s12 + $0xf0] sm:$0xf] }
  0x23   : > { %v514_v43 = vld [vmem:[%s562_s12 + $0xf8] sm:$0xf]  ;;  %v746_v44 = vmax.bf16 %v515_v39, %v156_v38 }
  0x24   : > { %v750_v45 = vmax.bf16 %v514_v43, %v155_v42 }
  0x25   : > { %276 = vrot.lane.b32.xlu1 %v626_v34, %s537_s13 }
  0x26   : > { %274 = vrot.lane.b32.xlu0 %v630_v35, %s537_s13 }
  0x29   : > { %280 = vrot.lane.b32.xlu1 %v638_v40, %s537_s13 }
  0x2a   : > { %278 = vrot.lane.b32.xlu0 %v642_v41, %s537_s13 }
  0x2d   : > { %284 = vrot.lane.b32.xlu1 %v650_v46, %s537_s13 }
  0x2e   : > { %282 = vrot.lane.b32.xlu0 %v654_v47, %s537_s13 }
  0x31   : > { %288 = vrot.lane.b32.xlu1 %v662_v52, %s537_s13 }
  0x32   : > { %286 = vrot.lane.b32.xlu0 %v666_v53, %s537_s13 }
  0x35   : > { %292 = vrot.lane.b32.xlu1 %v674_v58, %s537_s13 }
  0x36   : > { %290 = vrot.lane.b32.xlu0 %v678_v59, %s537_s13 }
  0x39   : > { %296 = vrot.lane.b32.xlu1 %v686_v0, %s537_s13 }
  0x3a   : > { %294 = vrot.lane.b32.xlu0 %v690_v1, %s537_s13 }
  0x3d   : > { %300 = vrot.lane.b32.xlu1 %v698_v8, %s537_s13 }
  0x3e   : > { %298 = vrot.lane.b32.xlu0 %v702_v9, %s537_s13 }
  0x41   : > { %304 = vrot.lane.b32.xlu1 %v710_v18, %s537_s13 }
  0x42   : > { %302 = vrot.lane.b32.xlu0 %v714_v19, %s537_s13 }
  0x45   : > { %308 = vrot.lane.b32.xlu1 %v722_v26, %s537_s13 }
  0x46   : > { %306 = vrot.lane.b32.xlu0 %v726_v27, %s537_s13 }
  0x49   : > { %312 = vrot.lane.b32.xlu1 %v734_v36, %s537_s13 }
  0x4a   : > { %310 = vrot.lane.b32.xlu0 %v738_v37, %s537_s13 }
  0x4d   : > { %316 = vrot.lane.b32.xlu1 %v746_v44, %s537_s13 }
  0x4e   : > { %314 = vrot.lane.b32.xlu0 %v750_v45, %s537_s13 }
  0x83   : > { %v259_v48 = vpop.permute.xlu1 %258 }
  0x84   : > { %v352_v49 = vmax.bf16 %v259_v48, %v567_v3  ;;  %v255_v50 = vpop.permute.xlu0 %254 }
  0x85   : > { %v350_v51 = vmax.bf16 %v255_v50, %v572_v7 }
  0x86   : > { %385 = vst.msk [vmem:[%s760_s17 + $0x8] sm:$0xf] %vm382_vm0, %v352_v49 }
  0x87   : > { %383 = vst.msk [vmem:[%s760_s17] sm:$0xf] %vm382_vm0, %v350_v51  ;;  %v261_v54 = vpop.permute.xlu1 %260 }
  0x88   : > { %v353_v55 = vmax.bf16 %v261_v54, %v578_v10  ;;  %v257_v56 = vpop.permute.xlu0 %256 }
  0x89   : > { %v351_v57 = vmax.bf16 %v257_v56, %v582_v11 }
  0x8a   : > { %386 = vst.msk [vmem:[%s760_s17 + $0xc] sm:$0xf] %vm382_vm0, %v353_v55 }
  0x8b   : > { %384 = vst.msk [vmem:[%s760_s17 + $0x4] sm:$0xf] %vm382_vm0, %v351_v57  ;;  %v265_v3 = vpop.permute.xlu1 %264 }
  0x8c   : > { %v355_v7 = vmax.bf16 %v265_v3, %v590_v16  ;;  %v263_v60 = vpop.permute.xlu0 %262 }
  0x8d   : > { %v354_v61 = vmax.bf16 %v263_v60, %v594_v17 }
  0x8e   : > { %388 = vst.msk [vmem:[%s760_s17 + $0x14] sm:$0xf] %vm382_vm0, %v355_v7 }
  0x8f   : > { %387 = vst.msk [vmem:[%s760_s17 + $0x10] sm:$0xf] %vm382_vm0, %v354_v61  ;;  %v269_v10 = vpop.permute.xlu1 %268 }
  0x90   : > { %v357_v11 = vmax.bf16 %v269_v10, %v602_v22  ;;  %v267_v62 = vpop.permute.xlu0 %266 }
  0x91   : > { %v356_v63 = vmax.bf16 %v267_v62, %v606_v23 }
  0x92   : > { %390 = vst.msk [vmem:[%s760_s17 + $0x1c] sm:$0xf] %vm382_vm0, %v357_v11 }
  0x93   : > { %389 = vst.msk [vmem:[%s760_s17 + $0x18] sm:$0xf] %vm382_vm0, %v356_v63  ;;  %v273_v16 = vpop.permute.xlu1 %272 }
  0x94   : > { %v359_v17 = vmax.bf16 %v273_v16, %v614_v28  ;;  %v271_v2 = vpop.permute.xlu0 %270 }
  0x95   : > { %v358_v4 = vmax.bf16 %v271_v2, %v618_v29 }
  0x96   : > { %392 = vst.msk [vmem:[%s760_s17 + $0x24] sm:$0xf] %vm382_vm0, %v359_v17 }
  0x97   : > { %391 = vst.msk [vmem:[%s760_s17 + $0x20] sm:$0xf] %vm382_vm0, %v358_v4  ;;  %v277_v22 = vpop.permute.xlu1 %276 }
  0x98   : > { %v361_v23 = vmax.bf16 %v277_v22, %v626_v34  ;;  %v275_v5 = vpop.permute.xlu0 %274 }
  0x99   : > { %v360_v6 = vmax.bf16 %v275_v5, %v630_v35 }
  0x9a   : > { %394 = vst.msk [vmem:[%s760_s17 + $0x2c] sm:$0xf] %vm382_vm0, %v361_v23 }
  0x9b   : > { %393 = vst.msk [vmem:[%s760_s17 + $0x28] sm:$0xf] %vm382_vm0, %v360_v6  ;;  %v281_v28 = vpop.permute.xlu1 %280 }
  0x9c   : > { %v363_v29 = vmax.bf16 %v281_v28, %v638_v40  ;;  %v279_v12 = vpop.permute.xlu0 %278 }
  0x9d   : > { %v362_v13 = vmax.bf16 %v279_v12, %v642_v41 }
  0x9e   : > { %396 = vst.msk [vmem:[%s760_s17 + $0x34] sm:$0xf] %vm382_vm0, %v363_v29 }
  0x9f   : > { %395 = vst.msk [vmem:[%s760_s17 + $0x30] sm:$0xf] %vm382_vm0, %v362_v13  ;;  %v285_v34 = vpop.permute.xlu1 %284 }
  0xa0   : > { %v365_v35 = vmax.bf16 %v285_v34, %v650_v46  ;;  %v283_v14 = vpop.permute.xlu0 %282 }
  0xa1   : > { %v364_v15 = vmax.bf16 %v283_v14, %v654_v47 }
  0xa2   : > { %398 = vst.msk [vmem:[%s760_s17 + $0x3c] sm:$0xf] %vm382_vm0, %v365_v35 }
  0xa3   : > { %397 = vst.msk [vmem:[%s760_s17 + $0x38] sm:$0xf] %vm382_vm0, %v364_v15  ;;  %v289_v40 = vpop.permute.xlu1 %288 }
  0xa4   : > { %v367_v41 = vmax.bf16 %v289_v40, %v662_v52  ;;  %v287_v20 = vpop.permute.xlu0 %286 }
  0xa5   : > { %v366_v21 = vmax.bf16 %v287_v20, %v666_v53 }
  0xa6   : > { %400 = vst.msk [vmem:[%s760_s17 + $0x44] sm:$0xf] %vm382_vm0, %v367_v41 }
  0xa7   : > { %399 = vst.msk [vmem:[%s760_s17 + $0x40] sm:$0xf] %vm382_vm0, %v366_v21  ;;  %v293_v46 = vpop.permute.xlu1 %292 }
  0xa8   : > { %v369_v47 = vmax.bf16 %v293_v46, %v674_v58  ;;  %v291_v24 = vpop.permute.xlu0 %290 }
  0xa9   : > { %v368_v25 = vmax.bf16 %v291_v24, %v678_v59 }
  0xaa   : > { %402 = vst.msk [vmem:[%s760_s17 + $0x4c] sm:$0xf] %vm382_vm0, %v369_v47 }
  0xab   : > { %401 = vst.msk [vmem:[%s760_s17 + $0x48] sm:$0xf] %vm382_vm0, %v368_v25  ;;  %v297_v52 = vpop.permute.xlu1 %296 }
  0xac   : > { %v371_v53 = vmax.bf16 %v297_v52, %v686_v0  ;;  %v295_v30 = vpop.permute.xlu0 %294 }
  0xad   : > { %v370_v31 = vmax.bf16 %v295_v30, %v690_v1 }
  0xae   : > { %404 = vst.msk [vmem:[%s760_s17 + $0x54] sm:$0xf] %vm382_vm0, %v371_v53 }
  0xaf   : > { %403 = vst.msk [vmem:[%s760_s17 + $0x50] sm:$0xf] %vm382_vm0, %v370_v31  ;;  %v301_v58 = vpop.permute.xlu1 %300 }
  0xb0   : > { %v373_v59 = vmax.bf16 %v301_v58, %v698_v8  ;;  %v299_v32 = vpop.permute.xlu0 %298 }
  0xb1   : > { %v372_v33 = vmax.bf16 %v299_v32, %v702_v9 }
  0xb2   : > { %406 = vst.msk [vmem:[%s760_s17 + $0x5c] sm:$0xf] %vm382_vm0, %v373_v59 }
  0xb3   : > { %405 = vst.msk [vmem:[%s760_s17 + $0x58] sm:$0xf] %vm382_vm0, %v372_v33  ;;  %v305_v0 = vpop.permute.xlu1 %304 }
  0xb4   : > { %v375_v1 = vmax.bf16 %v305_v0, %v710_v18  ;;  %v303_v38 = vpop.permute.xlu0 %302 }
  0xb5   : > { %v374_v39 = vmax.bf16 %v303_v38, %v714_v19 }
  0xb6   : > { %408 = vst.msk [vmem:[%s760_s17 + $0x64] sm:$0xf] %vm382_vm0, %v375_v1 }
  0xb7   : > { %407 = vst.msk [vmem:[%s760_s17 + $0x60] sm:$0xf] %vm382_vm0, %v374_v39  ;;  %v309_v8 = vpop.permute.xlu1 %308 }
  0xb8   : > { %v377_v9 = vmax.bf16 %v309_v8, %v722_v26  ;;  %v307_v42 = vpop.permute.xlu0 %306 }
  0xb9   : > { %v376_v43 = vmax.bf16 %v307_v42, %v726_v27 }
  0xba   : > { %410 = vst.msk [vmem:[%s760_s17 + $0x6c] sm:$0xf] %vm382_vm0, %v377_v9 }
  0xbb   : > { %409 = vst.msk [vmem:[%s760_s17 + $0x68] sm:$0xf] %vm382_vm0, %v376_v43  ;;  %v313_v18 = vpop.permute.xlu1 %312 }
  0xbc   : > { %v379_v48 = vmax.bf16 %v313_v18, %v734_v36  ;;  %v311_v19 = vpop.permute.xlu0 %310 }
  0xbd   : > { %v378_v49 = vmax.bf16 %v311_v19, %v738_v37 }
  0xbe   : > { %412 = vst.msk [vmem:[%s760_s17 + $0x74] sm:$0xf] %vm382_vm0, %v379_v48 }
  0xbf   : > { %411 = vst.msk [vmem:[%s760_s17 + $0x70] sm:$0xf] %vm382_vm0, %v378_v49  ;;  %v317_v50 = vpop.permute.xlu1 %316 }
  0xc0   : > { %v381_v26 = vmax.bf16 %v317_v50, %v746_v44  ;;  %v315_v51 = vpop.permute.xlu0 %314 }
  0xc1   : > { %v380_v27 = vmax.bf16 %v315_v51, %v750_v45 }
  0xc2   : > { %414 = vst.msk [vmem:[%s760_s17 + $0x7c] sm:$0xf] %vm382_vm0, %v381_v26 }
  0xc3   : > { %413 = vst.msk [vmem:[%s760_s17 + $0x78] sm:$0xf] %vm382_vm0, %v380_v27 }
  0xc4 PF: > { %s11_s6 = sadd.s32 1, %s535_s6  }
  0xc5   : > { %p8_p4 = scmp.ge.s32.totalorder %s11_s6, 4  }
  0xc7   :  { %10 = sbr.rel (!%p8_p4) target bundleno = 1 (0x1), region = 55 }

// kernel: _lambda_.10
= control target key start
LH: loop header
LB: loop body
LE: loop exit
PB: predicated region body
PF: predicated region fallthrough
CT: control target
= control target key end

     0   :  { %s1910_s15 = smov 0   ;;  %s2179_s0 = inlined_call_operand.vmem [shape: bf16[512,288], index: 0, kind: input, shape index: {}]   ;;  %s2180_s1 = inlined_call_operand.vmem [shape: bf16[288,128], index: 1, kind: input, shape index: {}]   ;;  %s2181_s2 = inlined_call_operand.vmem [shape: f32[1,128], index: 2, kind: input, shape index: {}]   ;;  %s2182_s3 = inlined_call_operand.vmem [shape: f32[1,128], index: 3, kind: input, shape index: {}]   ;;  %s2183_s4 = inlined_call_operand.vmem [shape: bf16[512,128], index: 4, kind: output, shape index: {}]  }
   0x1 LB: > { %s1350_s16 = sadd.s32 4294967295, %s1883_s15   ;;  %p1354_p0 = scmp.ge.s32.totalorder %s1883_s15, 1  ;;  %s1883_s15 = sphi %s1910_s15, %s14_s15  }
   0x2   : > { %p164_p1 = scmp.lt.s32.totalorder %s1883_s15, 3 }
   0x4   : > { %p165_p2 = pnand %p1354_p0, %p164_p1 }
   0x5   : > { %s1355_s19 = sshll.u32 (!%p165_p2), %s1350_s16, 5 }
   0x6   : > { %168 = sbr.rel (%p165_p2) target bundleno = 344 (0x158), region = 36  ;;  %p192_p3 = scmp.lt.s32.totalorder (!%p165_p2), %s1355_s19, 63 }
   0xb   : > { %v1795_v0 = vld [vmem:[%s2180_s1 + $0x78] sm:$0xff]   ;;  %v1797_v2 = vld [vmem:[%s2180_s1 + $0x70] sm:$0xff]   ;;  %v1799_v4 = vld [vmem:[%s2180_s1 + $0x68] sm:$0xff]   ;;  %s2185_s19 = smov (!%p192_p3, %s1355_s19), 63  ;;  %vm653_vm0 = vcmask 261120  }
   0xc   : > { %v1796_v1 = vld [vmem:[%s2180_s1 + $0x38] sm:$0xff]   ;;  %1604 = vmatprep.subr.bf16.mxu0 %v1795_v0  ;;  %1770 = vmatprep.subr.bf16.mxu1 %v1795_v0  ;;  %v1798_v3 = vld [vmem:[%s2180_s1 + $0x30] sm:$0xff]   ;;  %v1800_v5 = vld [vmem:[%s2180_s1 + $0x28] sm:$0xff]   ;;  %s1786_s6 = smul.u32 12, %s2185_s19  ;;  %s1358_s12 = sshll.u32 %s2185_s19, 2 }
   0xd   : > { %1605 = vmatpush3.bf16.msra.mxu0 %v1796_v1  ;;  %1778 = vmatpush3.bf16.msra.mxu1 %v1796_v1  ;;  %v1801_v6 = vld [vmem:[%s2180_s1 + $0x60] sm:$0xff]   ;;  %v1803_v8 = vld [vmem:[%s2180_s1 + $0x58] sm:$0xff]   ;;  %v1805_v10 = vld [vmem:[%s2180_s1 + $0x50] sm:$0xff]   ;;  %s2086_s16 = scalar_lea.vmem %s2183_s4, %s1358_s12 }
   0xe   : > { %1606 = vmatprep.subr.bf16.mxu0 %v1797_v2  ;;  %1771 = vmatprep.subr.bf16.mxu1 %v1797_v2  ;;  %v1802_v7 = vld [vmem:[%s2180_s1 + $0x20] sm:$0xff]   ;;  %s1951_s13 = scalar_lea.vmem %s2179_s0, %s1786_s6  ;;  %v1804_v9 = vld [vmem:[%s2180_s1 + $0x18] sm:$0xff]   ;;  %v1806_v13 = vld [vmem:[%s2180_s1 + $0x10] sm:$0xff]  }
   0xf   : > { %v1813_v11 = vld [vmem:[%s1951_s13 + $0x4] ss:$12 sps:$4 sm:$0xff]   ;;  %v1807_v14 = vld [vmem:[%s2180_s1 + $0x48] sm:$0xff]   ;;  %v1824_v26 = vld [vmem:[%s1951_s13 + $0x34] ss:$12 sps:$4 sm:$0xff]  }
  0x10   : > { %v1816_v12 = vld [vmem:[%s1951_s13 + $0x124] ss:$12 sps:$4 sm:$0xff]   ;;  %734 = vmatprep.mubr.bf16.mxu0 %v1813_v11  ;;  %v1808_v15 = vld [vmem:[%s2180_s1 + $0x8] sm:$0xff]   ;;  %v1826_v27 = vld [vmem:[%s1951_s13 + $0x154] ss:$12 sps:$4 sm:$0xff]  }
  0x11   : > { %1607 = vmatpush3.bf16.msra.mxu0 %v1798_v3  ;;  %1779 = vmatpush3.bf16.msra.mxu1 %v1798_v3  ;;  %v1809_v16 = vld [vmem:[%s2180_s1 + $0x40] sm:$0xff]   ;;  %v1817_v18 = vld [vmem:[%s2180_s1 + $0x88] sm:$0xff]   ;;  %v1828_v28 = vld [vmem:[%s1951_s13 + $0x30] ss:$12 sps:$4 sm:$0xff]  }
  0x12   : > { %1608 = vmatprep.subr.bf16.mxu0 %v1799_v4  ;;  %1772 = vmatprep.subr.bf16.mxu1 %v1799_v4  ;;  %v1810_v17 = vld [vmem:[%s2180_s1] sm:$0xff]   ;;  %v1818_v21 = vld [vmem:[%s1951_s13 + $0x1c] ss:$12 sps:$4 sm:$0xff]   ;;  %v1831_v30 = vld [vmem:[%s1951_s13 + $0x4c] ss:$12 sps:$4 sm:$0xff]  }
  0x13   : > { %830 = vmatprep.mubr.bf16.mxu1 %v1816_v12  ;;  %v1811_v19 = vld [vmem:[%s1951_s13] ss:$12 sps:$4 sm:$0xff]   ;;  %v1820_v22 = vld [vmem:[%s1951_s13 + $0x13c] ss:$12 sps:$4 sm:$0xff]   ;;  %v1822_v24 = vld [vmem:[%s1951_s13 + $0x18] ss:$12 sps:$4 sm:$0xff]  }
  0x14   : > { %v1814_v20 = vld [vmem:[%s1951_s13 + $0x120] ss:$12 sps:$4 sm:$0xff]   ;;  %v1823_v25 = vld [vmem:[%s1951_s13 + $0x138] ss:$12 sps:$4 sm:$0xff]   ;;  %v1829_v29 = vld [vmem:[%s1951_s13 + $0x150] ss:$12 sps:$4 sm:$0xff]  }
  0x15   : > { %1609 = vmatpush3.bf16.msra.mxu0 %v1800_v5  ;;  %1780 = vmatpush3.bf16.msra.mxu1 %v1800_v5  ;;  %v1830_v23 = vld [vmem:[%s2180_s1 + $0x80] sm:$0xff]   ;;  %v1833_v31 = vld [vmem:[%s1951_s13 + $0x16c] ss:$12 sps:$4 sm:$0xff]   ;;  %v1835_v32 = vld [vmem:[%s1951_s13 + $0x48] ss:$12 sps:$4 sm:$0xff]  }
  0x16   : > { %1610 = vmatprep.subr.bf16.mxu0 %v1801_v6  ;;  %1773 = vmatprep.subr.bf16.mxu1 %v1801_v6  ;;  %v1836_v33 = vld [vmem:[%s1951_s13 + $0x168] ss:$12 sps:$4 sm:$0xff]   ;;  %v1837_v34 = vld [vmem:[%s1951_s13 + $0x64] ss:$12 sps:$4 sm:$0xff]   ;;  %v1840_v36 = vld [vmem:[%s1951_s13 + $0x60] ss:$12 sps:$4 sm:$0xff]  }
  0x17   : > { %v1839_v35 = vld [vmem:[%s1951_s13 + $0x8] ss:$12 sps:$4 sm:$0xff]   ;;  %v1841_v37 = vld [vmem:[%s1951_s13 + $0x20] ss:$12 sps:$4 sm:$0xff]   ;;  %v1844_v39 = vld [vmem:[%s1951_s13 + $0x38] ss:$12 sps:$4 sm:$0xff]  }
  0x18   : > { %v1842_v38 = vld [vmem:[%s1951_s13 + $0x7c] ss:$12 sps:$4 sm:$0xff]   ;;  %v1845_v40 = vld [vmem:[%s1951_s13 + $0x78] ss:$12 sps:$4 sm:$0xff]   ;;  %v1847_v42 = vld [vmem:[%s1951_s13 + $0x94] ss:$12 sps:$4 sm:$0xff]  }
  0x19   : > { %1611 = vmatpush3.bf16.msra.mxu0 %v1802_v7  ;;  %1781 = vmatpush3.bf16.msra.mxu1 %v1802_v7  ;;  %v1846_v41 = vld [vmem:[%s1951_s13 + $0x50] ss:$12 sps:$4 sm:$0xff]   ;;  %v1849_v43 = vld [vmem:[%s1951_s13 + $0x68] ss:$12 sps:$4 sm:$0xff]   ;;  %v1851_v45 = vld [vmem:[%s1951_s13 + $0x80] ss:$12 sps:$4 sm:$0xff]  }
  0x1a   : > { %1612 = vmatprep.subr.bf16.mxu0 %v1803_v8  ;;  %1774 = vmatprep.subr.bf16.mxu1 %v1803_v8  ;;  %v1850_v44 = vld [vmem:[%s1951_s13 + $0x90] ss:$12 sps:$4 sm:$0xff]   ;;  %v1852_v46 = vld [vmem:[%s1951_s13 + $0xac] ss:$12 sps:$4 sm:$0xff]   ;;  %v1855_v48 = vld [vmem:[%s1951_s13 + $0xa8] ss:$12 sps:$4 sm:$0xff]  }
  0x1b   : > { %v1854_v47 = vld [vmem:[%s1951_s13 + $0x98] ss:$12 sps:$4 sm:$0xff]   ;;  %v1856_v49 = vld [vmem:[%s1951_s13 + $0xb0] ss:$12 sps:$4 sm:$0xff]   ;;  %v1859_v51 = vld [vmem:[%s1951_s13 + $0xc8] ss:$12 sps:$4 sm:$0xff]  }
  0x1c   : > { %v1857_v50 = vld [vmem:[%s1951_s13 + $0xc4] ss:$12 sps:$4 sm:$0xff]   ;;  %v1860_v52 = vld [vmem:[%s1951_s13 + $0xc0] ss:$12 sps:$4 sm:$0xff]   ;;  %v1862_v54 = vld [vmem:[%s1951_s13 + $0xdc] ss:$12 sps:$4 sm:$0xff]  }
  0x1d   : > { %1613 = vmatpush3.bf16.msra.mxu0 %v1804_v9  ;;  %1782 = vmatpush3.bf16.msra.mxu1 %v1804_v9  ;;  %v1861_v53 = vld [vmem:[%s1951_s13 + $0xe0] ss:$12 sps:$4 sm:$0xff]   ;;  %v1864_v55 = vld [vmem:[%s1951_s13 + $0xf8] ss:$12 sps:$4 sm:$0xff]   ;;  %v1866_v57 = vld [vmem:[%s1951_s13 + $0x110] ss:$12 sps:$4 sm:$0xff]  }
  0x1e   : > { %1614 = vmatprep.subr.bf16.mxu0 %v1805_v10  ;;  %1775 = vmatprep.subr.bf16.mxu1 %v1805_v10  ;;  %v1865_v56 = vld [vmem:[%s1951_s13 + $0xd8] ss:$12 sps:$4 sm:$0xff]   ;;  %v1867_v58 = vld [vmem:[%s1951_s13 + $0xf4] ss:$12 sps:$4 sm:$0xff]   ;;  %v1870_v60 = vld [vmem:[%s1951_s13 + $0xf0] ss:$12 sps:$4 sm:$0xff]  }
  0x1f   : > { %v1869_v59 = vld [vmem:[%s1951_s13 + $0x128] ss:$12 sps:$4 sm:$0xff]   ;;  %v1871_v61 = vld [vmem:[%s1951_s13 + $0x140] ss:$12 sps:$4 sm:$0xff]   ;;  %v1874_v63 = vld [vmem:[%s1951_s13 + $0x158] ss:$12 sps:$4 sm:$0xff]  }
  0x20   : > { %v1872_v62 = vld [vmem:[%s1951_s13 + $0x10c] ss:$12 sps:$4 sm:$0xff]   ;;  %v1875_v0 = vld [vmem:[%s1951_s13 + $0x108] ss:$12 sps:$4 sm:$0xff]   ;;  %v1876_v1 = vld [vmem:[%s1951_s13 + $0x170] ss:$12 sps:$4 sm:$0xff]  }
  0x21   : > { %1615 = vmatpush3.bf16.msra.mxu0 %v1806_v13  ;;  %1783 = vmatpush3.bf16.msra.mxu1 %v1806_v13 }
  0x22   : > { %1616 = vmatprep.subr.bf16.mxu0 %v1807_v14  ;;  %1776 = vmatprep.subr.bf16.mxu1 %v1807_v14 }
  0x25   : > { %1617 = vmatpush3.bf16.msra.mxu0 %v1808_v15  ;;  %1784 = vmatpush3.bf16.msra.mxu1 %v1808_v15 }
  0x26   : > { %1618 = vmatprep.subr.bf16.mxu0 %v1809_v16  ;;  %1777 = vmatprep.subr.bf16.mxu1 %v1809_v16 }
  0x29   : > { %1619 = vmatpush3.bf16.msra.mxu0 %v1810_v17  ;;  %1785 = vmatpush3.bf16.msra.mxu1 %v1810_v17 }
  0x2a   : > { %1734 = vmatprep.subr.bf16.mxu1 %v1817_v18 }
  0x2c   : > { %735 = vmatmul.mubr.bf16.vlgmr.msra.gmra.mxu0 %v1811_v19  ;;  %831 = vmatmul.mubr.bf16.vlgmr.msra.gmra.mxu1 %v1814_v20 }
  0x2d   : > { %1735 = vmatpush3.bf16.msra.mxu1 %v1817_v18  ;;  %742 = vmatprep.mubr.bf16.mxu0 %v1818_v21 }
  0x2e   : > { %838 = vmatprep.mubr.bf16.mxu1 %v1820_v22  ;;  %1736 = vmatprep.subr.bf16.mxu1 %v1830_v23 }
  0x31   : > { %1737 = vmatpush3.bf16.msra.mxu1 %v1830_v23 }
  0x34   : > { %743 = vmatmul.mubr.bf16.gmra.mxu0 %v1822_v24  ;;  %839 = vmatmul.mubr.bf16.gmra.mxu1 %v1823_v25 }
  0x35   : > { %750 = vmatprep.mubr.bf16.mxu0 %v1824_v26  ;;  %846 = vmatprep.mubr.bf16.mxu1 %v1826_v27 }
  0x3c   : > { %751 = vmatmul.mubr.bf16.gmra.mxu0 %v1828_v28  ;;  %847 = vmatmul.mubr.bf16.gmra.mxu1 %v1829_v29 }
  0x3d   : > { %758 = vmatprep.mubr.bf16.mxu0 %v1831_v30  ;;  %854 = vmatprep.mubr.bf16.mxu1 %v1833_v31 }
  0x44   : > { %759 = vmatmul.mubr.bf16.gmra.mxu0 %v1835_v32  ;;  %855 = vmatmul.mubr.bf16.gmra.mxu1 %v1836_v33 }
  0x45   : > { %766 = vmatprep.mubr.bf16.mxu0 %v1837_v34  ;;  %1738 = vmatprep.mubr.msk.bf16.mxu1 %vm653_vm0, %v1839_v35 }
  0x4c   : > { %767 = vmatmul.mubr.bf16.gmra.mxu0 %v1840_v36  ;;  %1739 = vmatmul.mubr.msk.bf16.vlgmr.msra.gmra.mxu1 %vm653_vm0, %v1841_v37 }
  0x4d   : > { %774 = vmatprep.mubr.bf16.mxu0 %v1842_v38  ;;  %1742 = vmatprep.mubr.msk.bf16.mxu1 %vm653_vm0, %v1844_v39 }
  0x54   : > { %775 = vmatmul.mubr.bf16.gmra.mxu0 %v1845_v40  ;;  %1743 = vmatmul.mubr.msk.bf16.gmra.mxu1 %vm653_vm0, %v1846_v41 }
  0x55   : > { %782 = vmatprep.mubr.bf16.mxu0 %v1847_v42  ;;  %1746 = vmatprep.mubr.msk.bf16.mxu1 %vm653_vm0, %v1849_v43 }
  0x5c   : > { %783 = vmatmul.mubr.bf16.gmra.mxu0 %v1850_v44  ;;  %1747 = vmatmul.mubr.msk.bf16.gmra.mxu1 %vm653_vm0, %v1851_v45  ;;  %v2065_v44 = vld [vmem:[%s2181_s2] ss:$0 sm:$0xff] }
  0x5d   : > { %790 = vmatprep.mubr.bf16.mxu0 %v1852_v46  ;;  %1750 = vmatprep.mubr.msk.bf16.mxu1 %vm653_vm0, %v1854_v47 }
  0x64   : > { %791 = vmatmul.mubr.bf16.gmra.mxu0 %v1855_v48  ;;  %1751 = vmatmul.mubr.msk.bf16.gmra.mxu1 %vm653_vm0, %v1856_v49 }
  0x65   : > { %798 = vmatprep.mubr.bf16.mxu0 %v1857_v50  ;;  %1754 = vmatprep.mubr.msk.bf16.mxu1 %vm653_vm0, %v1859_v51 }
  0x6c   : > { %799 = vmatmul.mubr.bf16.gmra.mxu0 %v1860_v52  ;;  %1755 = vmatmul.mubr.msk.bf16.gmra.mxu1 %vm653_vm0, %v1861_v53  ;;  %v2071_v52 = vld [vmem:[%s2182_s3] ss:$0 sm:$0xff] }
  0x6d   : > { %806 = vmatprep.mubr.bf16.mxu0 %v1862_v54  ;;  %1758 = vmatprep.mubr.msk.bf16.mxu1 %vm653_vm0, %v1864_v55 }
  0x74   : > { %807 = vmatmul.mubr.bf16.gmra.mxu0 %v1865_v56  ;;  %1759 = vmatmul.mubr.msk.bf16.gmra.mxu1 %vm653_vm0, %v1866_v57 }
  0x75   : > { %814 = vmatprep.mubr.bf16.mxu0 %v1867_v58  ;;  %1762 = vmatprep.mubr.msk.bf16.mxu1 %vm653_vm0, %v1869_v59 }
  0x7c   : > { %815 = vmatmul.mubr.bf16.gmra.mxu0 %v1870_v60  ;;  %1763 = vmatmul.mubr.msk.bf16.gmra.mxu1 %vm653_vm0, %v1871_v61 }
  0x7d   : > { %822 = vmatprep.mubr.bf16.mxu0 %v1872_v62  ;;  %1766 = vmatprep.mubr.msk.bf16.mxu1 %vm653_vm0, %v1874_v63 }
  0x84   : > { %823 = vmatmul.mubr.bf16.gmra.mxu0 %v1875_v0  ;;  %1767 = vmatmul.mubr.msk.bf16.gmra.mxu1 %vm653_vm0, %v1876_v1 }
  0xec   : > { %v1620_v2 = vpop.f32.mrf.mxu0  ;;  %v1692_v3 = vpop.f32.mrf.mxu1 }
  0xee   : > { %v1621_v4 = vpop.f32.mrf.mxu0  ;;  %v1693_v5 = vpop.f32.mrf.mxu1 }
  0xef   : > { %v2044_v6 = vadd.f32 %v1693_v5, %v1692_v3  ;;  %v1622_v45 = vadd.f32 %v1621_v4, %v1620_v2 }
  0xf0   : > { %v1623_v7 = vpop.f32.mrf.mxu0  ;;  %v1695_v8 = vpop.f32.mrf.mxu1 }
  0xf2   : > { %v1624_v9 = vpop.f32.mrf.mxu0  ;;  %v1696_v10 = vpop.f32.mrf.mxu1 }
  0xf3   : > { %v2046_v11 = vadd.f32 %v1696_v10, %v1695_v8  ;;  %v1625_v56 = vadd.f32 %v1624_v9, %v1623_v7 }
  0xf4   : > { %v1626_v12 = vpop.f32.mrf.mxu0  ;;  %v1698_v13 = vpop.f32.mrf.mxu1 }
  0xf6   : > { %v1627_v14 = vpop.f32.mrf.mxu0  ;;  %v1699_v15 = vpop.f32.mrf.mxu1 }
  0xf7   : > { %v2048_v16 = vadd.f32 %v1699_v15, %v1698_v13  ;;  %v1628_v41 = vadd.f32 %v1627_v14, %v1626_v12 }
  0xf8   : > { %v1629_v17 = vpop.f32.mrf.mxu0  ;;  %v1701_v18 = vpop.f32.mrf.mxu1 }
  0xfa   : > { %v1630_v19 = vpop.f32.mrf.mxu0  ;;  %v1702_v20 = vpop.f32.mrf.mxu1 }
  0xfb   : > { %v2050_v21 = vadd.f32 %v1702_v20, %v1701_v18  ;;  %v1631_v49 = vadd.f32 %v1630_v19, %v1629_v17 }
  0xfc   : > { %v1632_v22 = vpop.f32.mrf.mxu0  ;;  %v1704_v23 = vpop.f32.mrf.mxu1 }
  0xfe   : > { %v1633_v24 = vpop.f32.mrf.mxu0  ;;  %v1705_v25 = vpop.f32.mrf.mxu1 }
  0xff   : > { %v2052_v26 = vadd.f32 %v1705_v25, %v1704_v23  ;;  %v1634_v2 = vadd.f32 %v1633_v24, %v1632_v22 }
 0x100   : > { %v1635_v27 = vpop.f32.mrf.mxu0  ;;  %v1707_v28 = vpop.f32.mrf.mxu1 }
 0x102   : > { %v1636_v29 = vpop.f32.mrf.mxu0  ;;  %v1708_v30 = vpop.f32.mrf.mxu1 }
 0x103   : > { %v2054_v31 = vadd.f32 %v1708_v30, %v1707_v28  ;;  %v1637_v20 = vadd.f32 %v1636_v29, %v1635_v27 }
 0x104   : > { %v1638_v32 = vpop.f32.mrf.mxu0  ;;  %v1710_v33 = vpop.f32.mrf.mxu1 }
 0x106   : > { %v1639_v34 = vpop.f32.mrf.mxu0  ;;  %v1711_v35 = vpop.f32.mrf.mxu1 }
 0x107   : > { %v2056_v36 = vadd.f32 %v1711_v35, %v1710_v33  ;;  %v1640_v60 = vadd.f32 %v1639_v34, %v1638_v32 }
 0x108   : > { %v1641_v37 = vpop.f32.mrf.mxu0  ;;  %v2058_v38 = vpop.f32.mrf.mxu1 }
 0x10a   : > { %v1642_v39 = vpop.f32.mrf.mxu0  ;;  %v2060_v40 = vpop.f32.mrf.mxu1 }
 0x10b   : > { %v1643_v5 = vadd.f32 %v1642_v39, %v1641_v37 }
 0x10c   : > { %v1644_v42 = vpop.f32.mrf.mxu0  ;;  %v1740_v43 = vpop.f32.mrf.mxu1 }
 0x10d   : > { %v906_v46 = vadd.f32 %v1740_v43, %v1628_v41 }
 0x10e   : > { %v1645_v47 = vpop.f32.mrf.mxu0  ;;  %v897_v48 = vpop.f32.mrf.mxu1 }
 0x10f   : > { %v1033_v50 = vmul.f32 %v2065_v44, %v906_v46  ;;  %v898_v51 = vadd.f32 %v1622_v45, %v897_v48  ;;  %v1646_v27 = vadd.f32 %v1645_v47, %v1644_v42 }
 0x110   : > { %v2073_v53 = vpop.f32.mrf.mxu0  ;;  %v1741_v54 = vpop.f32.mrf.mxu1 }
 0x111   : > { %v909_v55 = vadd.f32 %v1741_v54, %v1631_v49  ;;  %v1031_v57 = vmul.f32 %v2065_v44, %v898_v51  ;;  %v1072_v61 = vadd.f32 %v2071_v52, %v1033_v50 }
 0x112   : > { %v1648_v58 = vpop.f32.mrf.mxu0  ;;  %v900_v59 = vpop.f32.mrf.mxu1 }
 0x113   : > { %v1034_v62 = vmul.f32 %v2065_v44, %v909_v55  ;;  %v901_v63 = vadd.f32 %v1625_v56, %v900_v59  ;;  %v1070_v7 = vadd.f32 %v2071_v52, %v1031_v57  ;;  %v1104_v12 = vmax.f32 %v1072_v61, 0.0 }
 0x114   : > { %v1650_v0 = vpop.f32.mrf.mxu0  ;;  %v1744_v1 = vpop.f32.mrf.mxu1 }
 0x115   : > { %v1073_v3 = vadd.f32 %v2071_v52, %v1034_v62  ;;  %v922_v4 = vadd.f32 %v1744_v1, %v1640_v60  ;;  %v1032_v8 = vmul.f32 %v2065_v44, %v901_v63  ;;  %v1102_v24 = vmax.f32 %v1070_v7, 0.0 }
 0x116   : > { %v1651_v9 = vpop.f32.mrf.mxu0  ;;  %v913_v10 = vpop.f32.mrf.mxu1  ;;  %v1649_v62 = vadd.f32 %v1648_v58, %v2073_v53 }
 0x117   : > { %v1105_v13 = vmax.f32 %v1073_v3, 0.0  ;;  %v1037_v14 = vmul.f32 %v2065_v44, %v922_v4  ;;  %v914_v15 = vadd.f32 %v1634_v2, %v913_v10  ;;  %v1071_v17 = vadd.f32 %v2071_v52, %v1032_v8 }
 0x118   : > { %v1653_v18 = vpop.f32.mrf.mxu0  ;;  %v1745_v19 = vpop.f32.mrf.mxu1  ;;  %v1652_v34 = vadd.f32 %v1651_v9, %v1650_v0 }
 0x119   : > { %v1517_v22 = vpack.c.bf16 %v1105_v13, %v1104_v12  ;;  %v925_v23 = vadd.f32 %v1745_v19, %v1643_v5  ;;  %v1103_v25 = vmax.f32 %v1071_v17, 0.0  ;;  %v1076_v28 = vadd.f32 %v2071_v52, %v1037_v14 }
 0x11a   : > { %v1035_v30 = vmul.f32 %v2065_v44, %v914_v15  ;;  %v1654_v32 = vpop.f32.mrf.mxu0  ;;  %v916_v33 = vpop.f32.mrf.mxu1 }
 0x11b   : > { %1589 = vst [vmem:[%s2086_s16 + $0x8] sm:$0xff] %v1517_v22   ;;  %v1038_v35 = vmul.f32 %v2065_v44, %v925_v23  ;;  %v1512_v37 = vpack.c.bf16 %v1103_v25, %v1102_v24  ;;  %v917_v39 = vadd.f32 %v1637_v20, %v916_v33  ;;  %v1108_v46 = vmax.f32 %v1076_v28, 0.0 }
 0x11c   : > { %v1656_v41 = vpop.f32.mrf.mxu0  ;;  %v1748_v43 = vpop.f32.mrf.mxu1  ;;  %v1074_v48 = vadd.f32 %v2071_v52, %v1035_v30  ;;  %v1655_v55 = vadd.f32 %v1654_v32, %v1653_v18 }
 0x11d   : > { %v1077_v29 = vadd.f32 %v2071_v52, %v1038_v35  ;;  %v938_v45 = vadd.f32 %v1748_v43, %v1652_v34  ;;  %1513 = vst [vmem:[%s2086_s16] sm:$0xff] %v1512_v37   ;;  %v1036_v49 = vmul.f32 %v2065_v44, %v917_v39 }
 0x11e   : > { %v1657_v50 = vpop.f32.mrf.mxu0  ;;  %v929_v51 = vpop.f32.mrf.mxu1  ;;  %v1106_v63 = vmax.f32 %v1074_v48, 0.0 }
 0x11f   : > { %v1109_v54 = vmax.f32 %v1077_v29, 0.0  ;;  %v1041_v56 = vmul.f32 %v2065_v44, %v938_v45  ;;  %v930_v57 = vadd.f32 %v1646_v27, %v929_v51  ;;  %v1075_v59 = vadd.f32 %v2071_v52, %v1036_v49 }
 0x120   : > { %v1659_v42 = vpop.f32.mrf.mxu0  ;;  %v1749_v47 = vpop.f32.mrf.mxu1  ;;  %v1658_v12 = vadd.f32 %v1657_v50, %v1656_v41 }
 0x121   : > { %v1527_v60 = vpack.c.bf16 %v1109_v54, %v1108_v46  ;;  %v941_v61 = vadd.f32 %v1749_v47, %v1655_v55  ;;  %v1107_v0 = vmax.f32 %v1075_v59, 0.0  ;;  %v1039_v1 = vmul.f32 %v2065_v44, %v930_v57 }
 0x122   : > { %v1660_v2 = vpop.f32.mrf.mxu0  ;;  %v932_v3 = vpop.f32.mrf.mxu1  ;;  %v1080_v4 = vadd.f32 %v2071_v52, %v1041_v56 }
 0x123   : > { %1591 = vst [vmem:[%s2086_s16 + $0x18] sm:$0xff] %v1527_v60   ;;  %v1042_v5 = vmul.f32 %v2065_v44, %v941_v61  ;;  %v1522_v7 = vpack.c.bf16 %v1107_v0, %v1106_v63  ;;  %v933_v8 = vadd.f32 %v1649_v62, %v932_v3  ;;  %v1078_v53 = vadd.f32 %v2071_v52, %v1039_v1 }
 0x124   : > { %v1662_v9 = vpop.f32.mrf.mxu0  ;;  %v1752_v10 = vpop.f32.mrf.mxu1  ;;  %v1112_v17 = vmax.f32 %v1080_v4, 0.0  ;;  %v1661_v28 = vadd.f32 %v1660_v2, %v1659_v42 }
 0x125   : > { %v1081_v13 = vadd.f32 %v2071_v52, %v1042_v5  ;;  %1590 = vst [vmem:[%s2086_s16 + $0x10] sm:$0xff] %v1522_v7   ;;  %v1040_v58 = vmul.f32 %v2065_v44, %v933_v8  ;;  %v1110_v33 = vmax.f32 %v1078_v53, 0.0 }
 0x126   : > { %v1663_v14 = vpop.f32.mrf.mxu0  ;;  %v945_v15 = vpop.f32.mrf.mxu1 }
 0x127   : > { %v1113_v18 = vmax.f32 %v1081_v13, 0.0  ;;  %v1664_v19 = vadd.f32 %v1663_v14, %v1662_v9  ;;  %v946_v20 = vadd.f32 %v1658_v12, %v945_v15  ;;  %v1079_v22 = vadd.f32 %v2071_v52, %v1040_v58 }
 0x128   : > { %v1665_v23 = vpop.f32.mrf.mxu0  ;;  %v1753_v24 = vpop.f32.mrf.mxu1 }
 0x129   : > { %v1537_v25 = vpack.c.bf16 %v1113_v18, %v1112_v17  ;;  %v954_v30 = vadd.f32 %v1752_v10, %v1664_v19  ;;  %v1043_v32 = vmul.f32 %v2065_v44, %v946_v20  ;;  %v1111_v34 = vmax.f32 %v1079_v22, 0.0 }
 0x12a   : > { %v1666_v35 = vpop.f32.mrf.mxu0  ;;  %v948_v37 = vpop.f32.mrf.mxu1 }
 0x12b   : > { %1593 = vst [vmem:[%s2086_s16 + $0x28] sm:$0xff] %v1537_v25   ;;  %v1045_v39 = vmul.f32 %v2065_v44, %v954_v30  ;;  %v1667_v41 = vadd.f32 %v1666_v35, %v1665_v23  ;;  %v949_v43 = vadd.f32 %v1661_v28, %v948_v37  ;;  %v1532_v27 = vpack.c.bf16 %v1111_v34, %v1110_v33 }
 0x12c   : > { %v1668_v29 = vpop.f32.mrf.mxu0  ;;  %v1756_v45 = vpop.f32.mrf.mxu1  ;;  %v1082_v46 = vadd.f32 %v2071_v52, %v1043_v32 }
 0x12d   : > { %v957_v48 = vadd.f32 %v1753_v24, %v1667_v41  ;;  %v1044_v49 = vmul.f32 %v2065_v44, %v949_v43  ;;  %1592 = vst [vmem:[%s2086_s16 + $0x20] sm:$0xff] %v1532_v27   ;;  %v1084_v50 = vadd.f32 %v2071_v52, %v1045_v39 }
 0x12e   : > { %v1669_v51 = vpop.f32.mrf.mxu0  ;;  %v961_v54 = vpop.f32.mrf.mxu1  ;;  %v1114_v47 = vmax.f32 %v1082_v46, 0.0 }
 0x12f   : > { %v1046_v55 = vmul.f32 %v2065_v44, %v957_v48  ;;  %v1083_v56 = vadd.f32 %v2071_v52, %v1044_v49  ;;  %v1670_v57 = vadd.f32 %v1669_v51, %v1668_v29  ;;  %v1116_v63 = vmax.f32 %v1084_v50, 0.0 }
 0x130   : > { %v1671_v59 = vpop.f32.mrf.mxu0  ;;  %v1757_v42 = vpop.f32.mrf.mxu1 }
 0x131   : > { %v1085_v60 = vadd.f32 %v2071_v52, %v1046_v55  ;;  %v1115_v61 = vmax.f32 %v1083_v56, 0.0  ;;  %v962_v62 = vadd.f32 %v1670_v57, %v961_v54 }
 0x132   : > { %v1672_v0 = vpop.f32.mrf.mxu0  ;;  %v964_v1 = vpop.f32.mrf.mxu1 }
 0x133   : > { %v1117_v2 = vmax.f32 %v1085_v60, 0.0  ;;  %v1542_v3 = vpack.c.bf16 %v1115_v61, %v1114_v47  ;;  %v1047_v4 = vmul.f32 %v2065_v44, %v962_v62  ;;  %v1673_v5 = vadd.f32 %v1672_v0, %v1671_v59 }
 0x134   : > { %v1674_v7 = vpop.f32.mrf.mxu0  ;;  %v2120_v8 = vpop.f32.mrf.mxu1 }
 0x135   : > { %v1547_v9 = vpack.c.bf16 %v1117_v2, %v1116_v63  ;;  %1594 = vst [vmem:[%s2086_s16 + $0x30] sm:$0xff] %v1542_v3   ;;  %v965_v10 = vadd.f32 %v1673_v5, %v964_v1  ;;  %v1086_v53 = vadd.f32 %v2071_v52, %v1047_v4  ;;  %v1715_v1 = vadd.f32 %v2060_v40, %v2058_v38 }
 0x136   : > { %v1675_v12 = vpop.f32.mrf.mxu0  ;;  %v977_v13 = vpop.f32.mrf.mxu1 }
 0x137   : > { %1595 = vst [vmem:[%s2086_s16 + $0x38] sm:$0xff] %v1547_v9   ;;  %v1048_v58 = vmul.f32 %v2065_v44, %v965_v10  ;;  %v1676_v14 = vadd.f32 %v1675_v12, %v1674_v7  ;;  %v1118_v23 = vmax.f32 %v1086_v53, 0.0 }
 0x138   : > { %v1677_v15 = vpop.f32.mrf.mxu0  ;;  %v2126_v17 = vpop.f32.mrf.mxu1 }
 0x139   : > { %v1087_v18 = vadd.f32 %v2071_v52, %v1048_v58  ;;  %v970_v19 = vadd.f32 %v1756_v45, %v1676_v14 }
 0x13a   : > { %v1678_v20 = vpop.f32.mrf.mxu0  ;;  %v980_v22 = vpop.f32.mrf.mxu1 }
 0x13b   : > { %v1119_v24 = vmax.f32 %v1087_v18, 0.0  ;;  %v1049_v25 = vmul.f32 %v2065_v44, %v970_v19  ;;  %v1679_v28 = vadd.f32 %v1678_v20, %v1677_v15 }
 0x13c   : > { %v1680_v30 = vpop.f32.mrf.mxu0  ;;  %v1764_v32 = vpop.f32.mrf.mxu1 }
 0x13d   : > { %v1552_v33 = vpack.c.bf16 %v1119_v24, %v1118_v23  ;;  %v973_v34 = vadd.f32 %v1757_v42, %v1679_v28  ;;  %v1002_v35 = vadd.f32 %v1764_v32, %v2048_v16  ;;  %v1088_v41 = vadd.f32 %v2071_v52, %v1049_v25 }
 0x13e   : > { %v1681_v37 = vpop.f32.mrf.mxu0  ;;  %v993_v39 = vpop.f32.mrf.mxu1 }
 0x13f   : > { %1596 = vst [vmem:[%s2086_s16 + $0x40] sm:$0xff] %v1552_v33   ;;  %v1050_v43 = vmul.f32 %v2065_v44, %v973_v34  ;;  %v1057_v27 = vmul.f32 %v2065_v44, %v1002_v35  ;;  %v1682_v29 = vadd.f32 %v1681_v37, %v1680_v30  ;;  %v994_v45 = vadd.f32 %v2044_v6, %v993_v39 }
 0x140   : > { %v1683_v46 = vpop.f32.mrf.mxu0  ;;  %v1765_v48 = vpop.f32.mrf.mxu1  ;;  %v1120_v56 = vmax.f32 %v1088_v41, 0.0 }
 0x141   : > { %v1089_v49 = vadd.f32 %v2071_v52, %v1050_v43  ;;  %v978_v50 = vadd.f32 %v1682_v29, %v977_v13  ;;  %v1005_v51 = vadd.f32 %v1765_v48, %v2050_v21  ;;  %v1055_v16 = vmul.f32 %v2065_v44, %v994_v45 }
 0x142   : > { %v1684_v54 = vpop.f32.mrf.mxu0  ;;  %v996_v55 = vpop.f32.mrf.mxu1  ;;  %v1096_v59 = vadd.f32 %v2071_v52, %v1057_v27 }
 0x143   : > { %v1121_v57 = vmax.f32 %v1089_v49, 0.0  ;;  %v1058_v42 = vmul.f32 %v2065_v44, %v1005_v51  ;;  %v1051_v6 = vmul.f32 %v2065_v44, %v978_v50  ;;  %v1685_v47 = vadd.f32 %v1684_v54, %v1683_v46 }
 0x144   : > { %v997_v60 = vadd.f32 %v2046_v11, %v996_v55  ;;  %v1686_v61 = vpop.f32.mrf.mxu0  ;;  %v1768_v62 = vpop.f32.mrf.mxu1  ;;  %v1094_v2 = vadd.f32 %v2071_v52, %v1055_v16  ;;  %v1128_v9 = vmax.f32 %v1096_v59, 0.0 }
 0x145   : > { %v1557_v63 = vpack.c.bf16 %v1121_v57, %v1120_v56  ;;  %v1097_v21 = vadd.f32 %v2071_v52, %v1058_v42  ;;  %v1018_v0 = vadd.f32 %v1768_v62, %v2056_v36  ;;  %v981_v3 = vadd.f32 %v1685_v47, %v980_v22 }
 0x146   : > { %v1056_v4 = vmul.f32 %v2065_v44, %v997_v60  ;;  %v1687_v5 = vpop.f32.mrf.mxu0  ;;  %v1009_v7 = vpop.f32.mrf.mxu1  ;;  %v1090_v13 = vadd.f32 %v2071_v52, %v1051_v6  ;;  %v1126_v19 = vmax.f32 %v1094_v2, 0.0 }
 0x147   : > { %1597 = vst [vmem:[%s2086_s16 + $0x48] sm:$0xff] %v1557_v63   ;;  %v1129_v11 = vmax.f32 %v1097_v21, 0.0  ;;  %v1061_v10 = vmul.f32 %v2065_v44, %v1018_v0  ;;  %v1688_v12 = vadd.f32 %v1687_v5, %v1686_v61  ;;  %v1052_v36 = vmul.f32 %v2065_v44, %v981_v3 }
 0x148   : > { %v1095_v38 = vadd.f32 %v2071_v52, %v1056_v4  ;;  %v1010_v40 = vadd.f32 %v2052_v26, %v1009_v7  ;;  %v1689_v53 = vpop.f32.mrf.mxu0  ;;  %v1769_v58 = vpop.f32.mrf.mxu1 }
 0x149   : > { %v1577_v14 = vpack.c.bf16 %v1129_v11, %v1128_v9  ;;  %v986_v15 = vadd.f32 %v2120_v8, %v1688_v12  ;;  %v1021_v18 = vadd.f32 %v1769_v58, %v1715_v1  ;;  %v1091_v20 = vadd.f32 %v2071_v52, %v1052_v36 }
 0x14a   : > { %v1127_v22 = vmax.f32 %v1095_v38, 0.0  ;;  %v1059_v23 = vmul.f32 %v2065_v44, %v1010_v40  ;;  %v1690_v24 = vpop.f32.mrf.mxu0  ;;  %v1012_v25 = vpop.f32.mrf.mxu1  ;;  %v1100_v28 = vadd.f32 %v2071_v52, %v1061_v10  ;;  %v1122_v8 = vmax.f32 %v1090_v13, 0.0 }
 0x14b   : > { %1601 = vst [vmem:[%s2086_s16 + $0x68] sm:$0xff] %v1577_v14   ;;  %v1053_v26 = vmul.f32 %v2065_v44, %v986_v15  ;;  %v1062_v30 = vmul.f32 %v2065_v44, %v1021_v18  ;;  %v1691_v32 = vadd.f32 %v1690_v24, %v1689_v53  ;;  %v1123_v33 = vmax.f32 %v1091_v20, 0.0 }
 0x14c   : > { %v1572_v34 = vpack.c.bf16 %v1127_v22, %v1126_v19  ;;  %v1013_v35 = vadd.f32 %v2054_v31, %v1012_v25  ;;  %v1098_v43 = vadd.f32 %v2071_v52, %v1059_v23  ;;  %v1132_v29 = vmax.f32 %v1100_v28, 0.0 }
 0x14d   : > { %v1101_v37 = vadd.f32 %v2071_v52, %v1062_v30  ;;  %v989_v39 = vadd.f32 %v2126_v17, %v1691_v32  ;;  %v1562_v41 = vpack.c.bf16 %v1123_v33, %v1122_v8  ;;  %v1092_v45 = vadd.f32 %v2071_v52, %v1053_v26 }
 0x14e   : > { %1600 = vst [vmem:[%s2086_s16 + $0x60] sm:$0xff] %v1572_v34   ;;  %v1060_v27 = vmul.f32 %v2065_v44, %v1013_v35  ;;  %v1130_v50 = vmax.f32 %v1098_v43, 0.0 }
 0x14f   : > { %v1133_v46 = vmax.f32 %v1101_v37, 0.0  ;;  %v1054_v48 = vmul.f32 %v2065_v44, %v989_v39  ;;  %1598 = vst [vmem:[%s2086_s16 + $0x50] sm:$0xff] %v1562_v41   ;;  %v1124_v16 = vmax.f32 %v1092_v45, 0.0 }
 0x150   : > { %v1099_v31 = vadd.f32 %v2071_v52, %v1060_v27 }
 0x151   : > { %v1587_v49 = vpack.c.bf16 %v1133_v46, %v1132_v29  ;;  %v1093_v17 = vadd.f32 %v2071_v52, %v1054_v48 }
 0x152   : > { %v1131_v51 = vmax.f32 %v1099_v31, 0.0 }
 0x153   : > { %1603 = vst [vmem:[%s2086_s16 + $0x78] sm:$0xff] %v1587_v49   ;;  %v1125_v54 = vmax.f32 %v1093_v17, 0.0 }
 0x154   : > { %v1582_v55 = vpack.c.bf16 %v1131_v51, %v1130_v50 }
 0x155   : > { %v1567_v56 = vpack.c.bf16 %v1125_v54, %v1124_v16 }
 0x156   : > { %1602 = vst [vmem:[%s2086_s16 + $0x70] sm:$0xff] %v1582_v55  }
 0x157   : > { %1599 = vst [vmem:[%s2086_s16 + $0x58] sm:$0xff] %v1567_v56  }
 0x158 PF: > { %s14_s15 = sadd.s32 1, %s1883_s15  }
 0x159   : > { %p11_p4 = scmp.ge.s32.totalorder %s14_s15, 4  }
 0x15b   :  { %13 = sbr.rel (!%p11_p4) target bundleno = 1 (0x1), region = 66 }

// kernel: _lambda_.11
= control target key start
LH: loop header
LB: loop body
LE: loop exit
PB: predicated region body
PF: predicated region fallthrough
CT: control target
= control target key end

     0   :  { %s2641_s15 = smov 0   ;;  %s3179_s0 = inlined_call_operand.vmem [shape: bf16[512,576], index: 0, kind: input, shape index: {}]   ;;  %s3180_s1 = inlined_call_operand.vmem [shape: bf16[576,128], index: 1, kind: input, shape index: {}]   ;;  %s3181_s2 = inlined_call_operand.vmem [shape: f32[1,128], index: 2, kind: input, shape index: {}]   ;;  %s3182_s3 = inlined_call_operand.vmem [shape: f32[1,128], index: 3, kind: input, shape index: {}]   ;;  %s3183_s4 = inlined_call_operand.vmem [shape: bf16[512,128], index: 4, kind: output, shape index: {}]  }
   0x1 LB: > { %s1847_s16 = sadd.s32 4294967295, %s2614_s15   ;;  %p1851_p0 = scmp.ge.s32.totalorder %s2614_s15, 1  ;;  %s2614_s15 = sphi %s2641_s15, %s14_s15  }
   0x2   : > { %p164_p1 = scmp.lt.s32.totalorder %s2614_s15, 3 }
   0x4   : > { %p165_p2 = pnand %p1851_p0, %p164_p1 }
   0x6   : > { %168 = sbr.rel (%p165_p2) target bundleno = 410 (0x19a), region = 36 }
   0xb   : > { %v2460_v0 = vld [vmem:[%s3180_s1 + $0x78] sm:$0xff]   ;;  %s1852_s19 = sshll.u32 %s1847_s16, 5  ;;  %v2462_v2 = vld [vmem:[%s3180_s1 + $0x70] sm:$0xff]   ;;  %v2464_v4 = vld [vmem:[%s3180_s1 + $0x68] sm:$0xff]   ;;  %vm989_vm0 = vcmask 523264  }
   0xc   : > { %v2461_v1 = vld [vmem:[%s3180_s1 + $0x38] sm:$0xff]   ;;  %2151 = vmatprep.subr.bf16.mxu0 %v2460_v0  ;;  %2435 = vmatprep.subr.bf16.mxu1 %v2460_v0  ;;  %p192_p3 = scmp.lt.s32.totalorder %s1852_s19, 63  ;;  %v2463_v3 = vld [vmem:[%s3180_s1 + $0x30] sm:$0xff]   ;;  %v2465_v5 = vld [vmem:[%s3180_s1 + $0x28] sm:$0xff]  }
   0xd   : > { %2152 = vmatpush3.bf16.msra.mxu0 %v2461_v1  ;;  %2443 = vmatpush3.bf16.msra.mxu1 %v2461_v1  ;;  %v2466_v6 = vld [vmem:[%s3180_s1 + $0x60] sm:$0xff]   ;;  %v2468_v8 = vld [vmem:[%s3180_s1 + $0x58] sm:$0xff]   ;;  %v2470_v10 = vld [vmem:[%s3180_s1 + $0x50] sm:$0xff]  }
   0xe   : > { %2153 = vmatprep.subr.bf16.mxu0 %v2462_v2  ;;  %2436 = vmatprep.subr.bf16.mxu1 %v2462_v2  ;;  %s3225_s19 = smov (!%p192_p3, %s1852_s19), 63  ;;  %v2467_v7 = vld [vmem:[%s3180_s1 + $0x20] sm:$0xff]   ;;  %v2469_v9 = vld [vmem:[%s3180_s1 + $0x18] sm:$0xff]   ;;  %v2471_v13 = vld [vmem:[%s3180_s1 + $0x10] sm:$0xff]  }
   0xf   : > { %s2451_s6 = smul.u32 20, %s3225_s19  ;;  %v2472_v14 = vld [vmem:[%s3180_s1 + $0x48] sm:$0xff]   ;;  %v2474_v16 = vld [vmem:[%s3180_s1 + $0x40] sm:$0xff]   ;;  %v2482_v18 = vld [vmem:[%s3180_s1 + $0xf8] sm:$0xff]   ;;  %s1855_s27 = sshll.u32 %s3225_s19, 2 }
  0x10   : > { %v2473_v15 = vld [vmem:[%s3180_s1 + $0x8] sm:$0xff]   ;;  %v2475_v17 = vld [vmem:[%s3180_s1] sm:$0xff]   ;;  %v2485_v19 = vld [vmem:[%s3180_s1 + $0x118] sm:$0xff]   ;;  %s3030_s29 = scalar_lea.vmem %s3183_s4, %s1855_s27 }
  0x11   : > { %2154 = vmatpush3.bf16.msra.mxu0 %v2463_v3  ;;  %2444 = vmatpush3.bf16.msra.mxu1 %v2463_v3  ;;  %s2682_s13 = scalar_lea.vmem %s3179_s0, %s2451_s6  ;;  %v2483_v22 = vld [vmem:[%s3180_s1 + $0xb8] sm:$0xff]   ;;  %v2484_v23 = vld [vmem:[%s3180_s1 + $0xf0] sm:$0xff]   ;;  %v2493_v28 = vld [vmem:[%s3180_s1 + $0xe8] sm:$0xff]  }
  0x12   : > { %2155 = vmatprep.subr.bf16.mxu0 %v2464_v4  ;;  %2437 = vmatprep.subr.bf16.mxu1 %v2464_v4  ;;  %v2478_v11 = vld [vmem:[%s2682_s13 + $0x4] ss:$20 sps:$4 sm:$0xff]   ;;  %v2476_v20 = vld [vmem:[%s2682_s13] ss:$20 sps:$4 sm:$0xff]   ;;  %v2491_v27 = vld [vmem:[%s2682_s13 + $0x28] ss:$20 sps:$4 sm:$0xff]  }
  0x13   : > { %v2481_v12 = vld [vmem:[%s2682_s13 + $0x1e4] ss:$20 sps:$4 sm:$0xff]   ;;  %1070 = vmatprep.mubr.bf16.mxu0 %v2478_v11  ;;  %v2479_v21 = vld [vmem:[%s2682_s13 + $0x1e0] ss:$20 sps:$4 sm:$0xff]   ;;  %v2492_v29 = vld [vmem:[%s2682_s13 + $0x208] ss:$20 sps:$4 sm:$0xff]  }
  0x14   : > { %1166 = vmatprep.mubr.bf16.mxu1 %v2481_v12  ;;  %v2487_v24 = vld [vmem:[%s2682_s13 + $0x2c] ss:$20 sps:$4 sm:$0xff]   ;;  %v2486_v26 = vld [vmem:[%s3180_s1 + $0xb0] sm:$0xff]   ;;  %v2503_v37 = vld [vmem:[%s3180_s1 + $0xd8] sm:$0xff]  }
  0x15   : > { %2156 = vmatpush3.bf16.msra.mxu0 %v2465_v5  ;;  %2445 = vmatpush3.bf16.msra.mxu1 %v2465_v5  ;;  %v2489_v25 = vld [vmem:[%s2682_s13 + $0x20c] ss:$20 sps:$4 sm:$0xff]   ;;  %v2497_v32 = vld [vmem:[%s2682_s13 + $0x54] ss:$20 sps:$4 sm:$0xff]   ;;  %v2501_v36 = vld [vmem:[%s2682_s13 + $0x50] ss:$20 sps:$4 sm:$0xff]  }
  0x16   : > { %2157 = vmatprep.subr.bf16.mxu0 %v2466_v6  ;;  %2438 = vmatprep.subr.bf16.mxu1 %v2466_v6  ;;  %v2494_v30 = vld [vmem:[%s3180_s1 + $0xa8] sm:$0xff]   ;;  %v2495_v31 = vld [vmem:[%s3180_s1 + $0xe0] sm:$0xff]   ;;  %v2516_v35 = vld [vmem:[%s3180_s1 + $0x110] sm:$0xff]  }
  0x17   : > { %v2499_v33 = vld [vmem:[%s2682_s13 + $0x234] ss:$20 sps:$4 sm:$0xff]   ;;  %v2496_v34 = vld [vmem:[%s3180_s1 + $0xa0] sm:$0xff]   ;;  %v2504_v39 = vld [vmem:[%s3180_s1 + $0x98] sm:$0xff]  }
  0x18   : > { %v2502_v38 = vld [vmem:[%s2682_s13 + $0x230] ss:$20 sps:$4 sm:$0xff]   ;;  %v2511_v44 = vld [vmem:[%s2682_s13 + $0x78] ss:$20 sps:$4 sm:$0xff]   ;;  %v2520_v53 = vld [vmem:[%s2682_s13 + $0x8] ss:$20 sps:$4 sm:$0xff]  }
  0x19   : > { %2158 = vmatpush3.bf16.msra.mxu0 %v2467_v7  ;;  %2446 = vmatpush3.bf16.msra.mxu1 %v2467_v7  ;;  %v2505_v40 = vld [vmem:[%s3180_s1 + $0xd0] sm:$0xff]   ;;  %v2512_v45 = vld [vmem:[%s2682_s13 + $0x258] ss:$20 sps:$4 sm:$0xff]   ;;  %v2515_v49 = vld [vmem:[%s3180_s1 + $0xc0] sm:$0xff]  }
  0x1a   : > { %2159 = vmatprep.subr.bf16.mxu0 %v2468_v8  ;;  %2439 = vmatprep.subr.bf16.mxu1 %v2468_v8  ;;  %v2507_v41 = vld [vmem:[%s2682_s13 + $0x7c] ss:$20 sps:$4 sm:$0xff]   ;;  %v2513_v46 = vld [vmem:[%s3180_s1 + $0xc8] sm:$0xff]   ;;  %v2518_v50 = vld [vmem:[%s2682_s13 + $0xa4] ss:$20 sps:$4 sm:$0xff]  }
  0x1b   : > { %v2509_v42 = vld [vmem:[%s2682_s13 + $0x25c] ss:$20 sps:$4 sm:$0xff]   ;;  %v2536_v47 = vld [vmem:[%s3180_s1 + $0x108] sm:$0xff]   ;;  %v2517_v52 = vld [vmem:[%s3180_s1 + $0x80] sm:$0xff]  }
  0x1c   : > { %v2506_v43 = vld [vmem:[%s3180_s1 + $0x90] sm:$0xff]   ;;  %v2514_v48 = vld [vmem:[%s3180_s1 + $0x88] sm:$0xff]   ;;  %v2555_v56 = vld [vmem:[%s3180_s1 + $0x100] sm:$0xff]  }
  0x1d   : > { %2160 = vmatpush3.bf16.msra.mxu0 %v2469_v9  ;;  %2447 = vmatpush3.bf16.msra.mxu1 %v2469_v9  ;;  %v2522_v51 = vld [vmem:[%s2682_s13 + $0xc] ss:$20 sps:$4 sm:$0xff]   ;;  %v2526_v57 = vld [vmem:[%s2682_s13 + $0x34] ss:$20 sps:$4 sm:$0xff]   ;;  %v2529_v59 = vld [vmem:[%s2682_s13 + $0x30] ss:$20 sps:$4 sm:$0xff]  }
  0x1e   : > { %2161 = vmatprep.subr.bf16.mxu0 %v2470_v10  ;;  %2440 = vmatprep.subr.bf16.mxu1 %v2470_v10  ;;  %v2523_v54 = vld [vmem:[%s2682_s13 + $0xa0] ss:$20 sps:$4 sm:$0xff]   ;;  %v2528_v58 = vld [vmem:[%s2682_s13 + $0xc8] ss:$20 sps:$4 sm:$0xff]   ;;  %v2534_v62 = vld [vmem:[%s2682_s13 + $0xf0] ss:$20 sps:$4 sm:$0xff]  }
  0x1f   : > { %v2524_v55 = vld [vmem:[%s2682_s13 + $0xcc] ss:$20 sps:$4 sm:$0xff]   ;;  %v2530_v60 = vld [vmem:[%s2682_s13 + $0xf4] ss:$20 sps:$4 sm:$0xff]   ;;  %v2532_v61 = vld [vmem:[%s2682_s13 + $0x5c] ss:$20 sps:$4 sm:$0xff]  }
  0x20   : > { %v2535_v63 = vld [vmem:[%s2682_s13 + $0x58] ss:$20 sps:$4 sm:$0xff]   ;;  %v2537_v0 = vld [vmem:[%s2682_s13 + $0x11c] ss:$20 sps:$4 sm:$0xff]   ;;  %v2542_v3 = vld [vmem:[%s2682_s13 + $0x80] ss:$20 sps:$4 sm:$0xff]  }
  0x21   : > { %2162 = vmatpush3.bf16.msra.mxu0 %v2471_v13  ;;  %2448 = vmatpush3.bf16.msra.mxu1 %v2471_v13  ;;  %v2539_v1 = vld [vmem:[%s2682_s13 + $0x84] ss:$20 sps:$4 sm:$0xff]   ;;  %v2545_v5 = vld [vmem:[%s2682_s13 + $0xac] ss:$20 sps:$4 sm:$0xff]   ;;  %v2548_v7 = vld [vmem:[%s2682_s13 + $0xa8] ss:$20 sps:$4 sm:$0xff]  }
  0x22   : > { %2163 = vmatprep.subr.bf16.mxu0 %v2472_v14  ;;  %2441 = vmatprep.subr.bf16.mxu1 %v2472_v14  ;;  %v2541_v2 = vld [vmem:[%s2682_s13 + $0x118] ss:$20 sps:$4 sm:$0xff]   ;;  %v2547_v6 = vld [vmem:[%s2682_s13 + $0x140] ss:$20 sps:$4 sm:$0xff]   ;;  %v2553_v10 = vld [vmem:[%s2682_s13 + $0x168] ss:$20 sps:$4 sm:$0xff]  }
  0x23   : > { %v2543_v4 = vld [vmem:[%s2682_s13 + $0x144] ss:$20 sps:$4 sm:$0xff]   ;;  %v2549_v8 = vld [vmem:[%s2682_s13 + $0x16c] ss:$20 sps:$4 sm:$0xff]   ;;  %v2551_v9 = vld [vmem:[%s2682_s13 + $0xd4] ss:$20 sps:$4 sm:$0xff]  }
  0x24   : > { %v2554_v11 = vld [vmem:[%s2682_s13 + $0xd0] ss:$20 sps:$4 sm:$0xff]   ;;  %v2556_v12 = vld [vmem:[%s2682_s13 + $0x194] ss:$20 sps:$4 sm:$0xff]  }
  0x25   : > { %2164 = vmatpush3.bf16.msra.mxu0 %v2473_v15  ;;  %2449 = vmatpush3.bf16.msra.mxu1 %v2473_v15  ;;  %v2558_v13 = vld [vmem:[%s2682_s13 + $0xfc] ss:$20 sps:$4 sm:$0xff]   ;;  %v2561_v15 = vld [vmem:[%s2682_s13 + $0xf8] ss:$20 sps:$4 sm:$0xff]  }
  0x26   : > { %2165 = vmatprep.subr.bf16.mxu0 %v2474_v16  ;;  %2442 = vmatprep.subr.bf16.mxu1 %v2474_v16  ;;  %v2560_v14 = vld [vmem:[%s2682_s13 + $0x190] ss:$20 sps:$4 sm:$0xff]  }
  0x27   : > { %v2562_v16 = vld [vmem:[%s2682_s13 + $0x1bc] ss:$20 sps:$4 sm:$0xff]  }
  0x29   : > { %2166 = vmatpush3.bf16.msra.mxu0 %v2475_v17  ;;  %2450 = vmatpush3.bf16.msra.mxu1 %v2475_v17  ;;  %v2564_v17 = vld [vmem:[%s2682_s13 + $0x124] ss:$20 sps:$4 sm:$0xff]  }
  0x2a   : > { %2263 = vmatprep.subr.bf16.mxu1 %v2482_v18  ;;  %2395 = vmatprep.subr.bf16.mxu0 %v2485_v19  ;;  %v2566_v18 = vld [vmem:[%s2682_s13 + $0x1b8] ss:$20 sps:$4 sm:$0xff]  }
  0x2c   : > { %1071 = vmatmul.mubr.bf16.vlgmr.msra.gmra.mxu0 %v2476_v20  ;;  %1167 = vmatmul.mubr.bf16.vlgmr.msra.gmra.mxu1 %v2479_v21  ;;  %v2568_v20 = vld [vmem:[%s2682_s13 + $0x14c] ss:$20 sps:$4 sm:$0xff]   ;;  %v2570_v21 = vld [vmem:[%s2682_s13 + $0x10] ss:$20 sps:$4 sm:$0xff]  }
  0x2d   : > { %2264 = vmatpush3.bf16.msra.mxu1 %v2483_v22  ;;  %2396 = vmatpush3.bf16.msra.mxu0 %v2485_v19  ;;  %v2567_v19 = vld [vmem:[%s2682_s13 + $0x120] ss:$20 sps:$4 sm:$0xff]   ;;  %v2571_v22 = vld [vmem:[%s2682_s13 + $0x148] ss:$20 sps:$4 sm:$0xff]  }
  0x2e   : > { %2265 = vmatprep.subr.bf16.mxu1 %v2484_v23  ;;  %1078 = vmatprep.mubr.bf16.mxu0 %v2487_v24  ;;  %v2572_v23 = vld [vmem:[%s2682_s13 + $0x38] ss:$20 sps:$4 sm:$0xff]   ;;  %v2573_v24 = vld [vmem:[%s2682_s13 + $0x174] ss:$20 sps:$4 sm:$0xff]  }
  0x2f   : > { %1174 = vmatprep.mubr.bf16.mxu1 %v2489_v25  ;;  %2397 = vmatprep.subr.bf16.mxu0 %v2516_v35  ;;  %v2575_v25 = vld [vmem:[%s2682_s13 + $0x60] ss:$20 sps:$4 sm:$0xff]  }
  0x31   : > { %2266 = vmatpush3.bf16.msra.mxu1 %v2486_v26  ;;  %2398 = vmatpush3.bf16.msra.mxu0 %v2516_v35  ;;  %v2576_v26 = vld [vmem:[%s2682_s13 + $0x170] ss:$20 sps:$4 sm:$0xff]   ;;  %v2587_v35 = vld [vmem:[%s2682_s13 + $0x128] ss:$20 sps:$4 sm:$0xff]  }
  0x32   : > { %2267 = vmatprep.subr.bf16.mxu1 %v2493_v28  ;;  %2399 = vmatprep.subr.bf16.mxu0 %v2536_v47  ;;  %v2578_v28 = vld [vmem:[%s2682_s13 + $0x19c] ss:$20 sps:$4 sm:$0xff]  }
  0x34   : > { %1079 = vmatmul.mubr.bf16.gmra.mxu0 %v2491_v27  ;;  %1175 = vmatmul.mubr.bf16.gmra.mxu1 %v2492_v29  ;;  %v2577_v27 = vld [vmem:[%s2682_s13 + $0x88] ss:$20 sps:$4 sm:$0xff]   ;;  %v2580_v29 = vld [vmem:[%s2682_s13 + $0xb0] ss:$20 sps:$4 sm:$0xff]  }
  0x35   : > { %2268 = vmatpush3.bf16.msra.mxu1 %v2494_v30  ;;  %1086 = vmatprep.mubr.bf16.mxu0 %v2497_v32  ;;  %v2581_v30 = vld [vmem:[%s2682_s13 + $0x198] ss:$20 sps:$4 sm:$0xff]  }
  0x36   : > { %2269 = vmatprep.subr.bf16.mxu1 %v2495_v31  ;;  %1182 = vmatprep.mubr.bf16.mxu1 %v2499_v33  ;;  %v2582_v31 = vld [vmem:[%s2682_s13 + $0xd8] ss:$20 sps:$4 sm:$0xff]   ;;  %v2585_v33 = vld [vmem:[%s2682_s13 + $0x100] ss:$20 sps:$4 sm:$0xff]  }
  0x37   : > { %2400 = vmatpush3.bf16.msra.mxu0 %v2536_v47  ;;  %v2583_v32 = vld [vmem:[%s2682_s13 + $0x1c4] ss:$20 sps:$4 sm:$0xff]  }
  0x38   : > { %2401 = vmatprep.subr.bf16.mxu0 %v2555_v56  ;;  %v2602_v47 = vld [vmem:[%s2682_s13 + $0x218] ss:$20 sps:$4 sm:$0xff]  }
  0x39   : > { %2270 = vmatpush3.bf16.msra.mxu1 %v2496_v34  ;;  %v2586_v34 = vld [vmem:[%s2682_s13 + $0x1c0] ss:$20 sps:$4 sm:$0xff]  }
  0x3a   : > { %2271 = vmatprep.subr.bf16.mxu1 %v2503_v37  ;;  %v2590_v37 = vld [vmem:[%s2682_s13 + $0x150] ss:$20 sps:$4 sm:$0xff]  }
  0x3b   : > { %2402 = vmatpush3.bf16.msra.mxu0 %v2555_v56 }
  0x3c   : > { %1087 = vmatmul.mubr.bf16.gmra.mxu0 %v2501_v36  ;;  %1183 = vmatmul.mubr.bf16.gmra.mxu1 %v2502_v38  ;;  %v2588_v36 = vld [vmem:[%s2682_s13 + $0x1ec] ss:$20 sps:$4 sm:$0xff]   ;;  %v2591_v38 = vld [vmem:[%s2682_s13 + $0x1e8] ss:$20 sps:$4 sm:$0xff]  }
  0x3d   : > { %2272 = vmatpush3.bf16.msra.mxu1 %v2504_v39  ;;  %1094 = vmatprep.mubr.bf16.mxu0 %v2507_v41  ;;  %v2592_v39 = vld [vmem:[%s2682_s13 + $0x178] ss:$20 sps:$4 sm:$0xff]   ;;  %v2595_v41 = vld [vmem:[%s2682_s13 + $0x1a0] ss:$20 sps:$4 sm:$0xff]  }
  0x3e   : > { %2273 = vmatprep.subr.bf16.mxu1 %v2505_v40  ;;  %1190 = vmatprep.mubr.bf16.mxu1 %v2509_v42  ;;  %v2593_v40 = vld [vmem:[%s2682_s13 + $0x214] ss:$20 sps:$4 sm:$0xff]   ;;  %v2596_v42 = vld [vmem:[%s2682_s13 + $0x210] ss:$20 sps:$4 sm:$0xff]  }
  0x41   : > { %2274 = vmatpush3.bf16.msra.mxu1 %v2506_v43  ;;  %v2597_v43 = vld [vmem:[%s2682_s13 + $0x1c8] ss:$20 sps:$4 sm:$0xff]  }
  0x42   : > { %2275 = vmatprep.subr.bf16.mxu1 %v2513_v46  ;;  %v2601_v46 = vld [vmem:[%s2682_s13 + $0x238] ss:$20 sps:$4 sm:$0xff]  }
  0x44   : > { %1095 = vmatmul.mubr.bf16.gmra.mxu0 %v2511_v44  ;;  %1191 = vmatmul.mubr.bf16.gmra.mxu1 %v2512_v45  ;;  %v2598_v44 = vld [vmem:[%s2682_s13 + $0x23c] ss:$20 sps:$4 sm:$0xff]  }
  0x45   : > { %2276 = vmatpush3.bf16.msra.mxu1 %v2514_v48  ;;  %1102 = vmatprep.mubr.bf16.mxu0 %v2518_v50  ;;  %v2600_v45 = vld [vmem:[%s2682_s13 + $0x1f0] ss:$20 sps:$4 sm:$0xff]   ;;  %v2606_v50 = vld [vmem:[%s2682_s13 + $0x260] ss:$20 sps:$4 sm:$0xff]  }
  0x46   : > { %2277 = vmatprep.subr.bf16.mxu1 %v2515_v49  ;;  %1231 = vmatprep.mubr.bf16.mxu1 %v2522_v51  ;;  %v2603_v48 = vld [vmem:[%s2682_s13 + $0x264] ss:$20 sps:$4 sm:$0xff]   ;;  %v2605_v49 = vld [vmem:[%s2682_s13 + $0x240] ss:$20 sps:$4 sm:$0xff]   ;;  %v2607_v51 = vld [vmem:[%s2682_s13 + $0x268] ss:$20 sps:$4 sm:$0xff]  }
  0x49   : > { %2278 = vmatpush3.bf16.msra.mxu1 %v2517_v52 }
  0x4c   : > { %1103 = vmatmul.mubr.bf16.gmra.mxu0 %v2523_v54  ;;  %1232 = vmatmul.mubr.bf16.vlgmr.msra.gmra.mxu1 %v2520_v53 }
  0x4d   : > { %1110 = vmatprep.mubr.bf16.mxu0 %v2524_v55  ;;  %1239 = vmatprep.mubr.bf16.mxu1 %v2526_v57 }
  0x54   : > { %1111 = vmatmul.mubr.bf16.gmra.mxu0 %v2528_v58  ;;  %1240 = vmatmul.mubr.bf16.gmra.mxu1 %v2529_v59 }
  0x55   : > { %1118 = vmatprep.mubr.bf16.mxu0 %v2530_v60  ;;  %1247 = vmatprep.mubr.bf16.mxu1 %v2532_v61 }
  0x5c   : > { %1119 = vmatmul.mubr.bf16.gmra.mxu0 %v2534_v62  ;;  %1248 = vmatmul.mubr.bf16.gmra.mxu1 %v2535_v63 }
  0x5d   : > { %1126 = vmatprep.mubr.bf16.mxu0 %v2537_v0  ;;  %1255 = vmatprep.mubr.bf16.mxu1 %v2539_v1 }
  0x64   : > { %1127 = vmatmul.mubr.bf16.gmra.mxu0 %v2541_v2  ;;  %1256 = vmatmul.mubr.bf16.gmra.mxu1 %v2542_v3 }
  0x65   : > { %1134 = vmatprep.mubr.bf16.mxu0 %v2543_v4  ;;  %1263 = vmatprep.mubr.bf16.mxu1 %v2545_v5 }
  0x6c   : > { %1135 = vmatmul.mubr.bf16.gmra.mxu0 %v2547_v6  ;;  %1264 = vmatmul.mubr.bf16.gmra.mxu1 %v2548_v7 }
  0x6d   : > { %1142 = vmatprep.mubr.bf16.mxu0 %v2549_v8  ;;  %1271 = vmatprep.mubr.bf16.mxu1 %v2551_v9 }
  0x74   : > { %1143 = vmatmul.mubr.bf16.gmra.mxu0 %v2553_v10  ;;  %1272 = vmatmul.mubr.bf16.gmra.mxu1 %v2554_v11 }
  0x75   : > { %1150 = vmatprep.mubr.bf16.mxu0 %v2556_v12  ;;  %1279 = vmatprep.mubr.bf16.mxu1 %v2558_v13 }
  0x7c   : > { %1151 = vmatmul.mubr.bf16.gmra.mxu0 %v2560_v14  ;;  %1280 = vmatmul.mubr.bf16.gmra.mxu1 %v2561_v15 }
  0x7d   : > { %1158 = vmatprep.mubr.bf16.mxu0 %v2562_v16  ;;  %1287 = vmatprep.mubr.bf16.mxu1 %v2564_v17 }
  0x84   : > { %1159 = vmatmul.mubr.bf16.gmra.mxu0 %v2566_v18  ;;  %1288 = vmatmul.mubr.bf16.gmra.mxu1 %v2567_v19 }
  0x85   : > { %1295 = vmatprep.mubr.bf16.mxu1 %v2568_v20  ;;  %2403 = vmatprep.mubr.msk.bf16.mxu0 %vm989_vm0, %v2570_v21 }
  0x8c   : > { %1296 = vmatmul.mubr.bf16.gmra.mxu1 %v2571_v22  ;;  %2404 = vmatmul.mubr.msk.bf16.vlgmr.msra.gmra.mxu0 %vm989_vm0, %v2572_v23 }
  0x8d   : > { %1303 = vmatprep.mubr.bf16.mxu1 %v2573_v24  ;;  %2407 = vmatprep.mubr.msk.bf16.mxu0 %vm989_vm0, %v2575_v25 }
  0x94   : > { %1304 = vmatmul.mubr.bf16.gmra.mxu1 %v2576_v26  ;;  %2408 = vmatmul.mubr.msk.bf16.gmra.mxu0 %vm989_vm0, %v2577_v27 }
  0x95   : > { %1311 = vmatprep.mubr.bf16.mxu1 %v2578_v28  ;;  %2411 = vmatprep.mubr.msk.bf16.mxu0 %vm989_vm0, %v2580_v29 }
  0x9c   : > { %1312 = vmatmul.mubr.bf16.gmra.mxu1 %v2581_v30  ;;  %2412 = vmatmul.mubr.msk.bf16.gmra.mxu0 %vm989_vm0, %v2582_v31 }
  0x9d   : > { %1319 = vmatprep.mubr.bf16.mxu1 %v2583_v32  ;;  %2415 = vmatprep.mubr.msk.bf16.mxu0 %vm989_vm0, %v2585_v33 }
  0xa4   : > { %1320 = vmatmul.mubr.bf16.gmra.mxu1 %v2586_v34  ;;  %2416 = vmatmul.mubr.msk.bf16.gmra.mxu0 %vm989_vm0, %v2587_v35 }
  0xa5   : > { %1327 = vmatprep.mubr.bf16.mxu1 %v2588_v36  ;;  %2419 = vmatprep.mubr.msk.bf16.mxu0 %vm989_vm0, %v2590_v37 }
  0xac   : > { %1328 = vmatmul.mubr.bf16.gmra.mxu1 %v2591_v38  ;;  %2420 = vmatmul.mubr.msk.bf16.gmra.mxu0 %vm989_vm0, %v2592_v39 }
  0xad   : > { %1335 = vmatprep.mubr.bf16.mxu1 %v2593_v40  ;;  %2423 = vmatprep.mubr.msk.bf16.mxu0 %vm989_vm0, %v2595_v41 }
  0xb4   : > { %1336 = vmatmul.mubr.bf16.gmra.mxu1 %v2596_v42  ;;  %2424 = vmatmul.mubr.msk.bf16.gmra.mxu0 %vm989_vm0, %v2597_v43 }
  0xb5   : > { %1343 = vmatprep.mubr.bf16.mxu1 %v2598_v44  ;;  %2427 = vmatprep.mubr.msk.bf16.mxu0 %vm989_vm0, %v2600_v45 }
  0xbc   : > { %1344 = vmatmul.mubr.bf16.gmra.mxu1 %v2601_v46  ;;  %2428 = vmatmul.mubr.msk.bf16.gmra.mxu0 %vm989_vm0, %v2602_v47 }
  0xbd   : > { %1351 = vmatprep.mubr.bf16.mxu1 %v2603_v48  ;;  %2431 = vmatprep.mubr.msk.bf16.mxu0 %vm989_vm0, %v2605_v49 }
  0xc4   : > { %1352 = vmatmul.mubr.bf16.gmra.mxu1 %v2606_v50  ;;  %2432 = vmatmul.mubr.msk.bf16.gmra.mxu0 %vm989_vm0, %v2607_v51 }
  0xec   : > { %v2167_v52 = vpop.f32.mrf.mxu0  ;;  %v2239_v53 = vpop.f32.mrf.mxu1 }
  0xee   : > { %v2168_v54 = vpop.f32.mrf.mxu0  ;;  %v2240_v55 = vpop.f32.mrf.mxu1 }
  0xef   : > { %v2169_v56 = vadd.f32 %v2168_v54, %v2167_v52  ;;  %v2861_v57 = vadd.f32 %v2240_v55, %v2239_v53 }
  0xf0   : > { %v2170_v58 = vpop.f32.mrf.mxu0  ;;  %v2242_v59 = vpop.f32.mrf.mxu1 }
  0xf1   : > { %3184 = vst [vmem:[#allocation2_spill] sm:$0xff] %v2861_v57 }
  0xf2   : > { %v2171_v60 = vpop.f32.mrf.mxu0  ;;  %v2243_v61 = vpop.f32.mrf.mxu1 }
  0xf3   : > { %v2863_v62 = vadd.f32 %v2171_v60, %v2170_v58  ;;  %v2865_v63 = vadd.f32 %v2243_v61, %v2242_v59 }
  0xf4   : > { %v2173_v0 = vpop.f32.mrf.mxu0  ;;  %v2245_v1 = vpop.f32.mrf.mxu1 }
  0xf5   : > { %3185 = vst [vmem:[#allocation3_spill] sm:$0xff] %v2865_v63 }
  0xf6   : > { %v2174_v2 = vpop.f32.mrf.mxu0  ;;  %v2246_v3 = vpop.f32.mrf.mxu1 }
  0xf7   : > { %v2867_v4 = vadd.f32 %v2174_v2, %v2173_v0  ;;  %v2869_v5 = vadd.f32 %v2246_v3, %v2245_v1 }
  0xf8   : > { %v2176_v6 = vpop.f32.mrf.mxu0  ;;  %v2248_v7 = vpop.f32.mrf.mxu1 }
  0xf9   : > { %3186 = vst [vmem:[#allocation4_spill] sm:$0xff] %v2869_v5 }
  0xfa   : > { %v2177_v8 = vpop.f32.mrf.mxu0  ;;  %v2249_v9 = vpop.f32.mrf.mxu1 }
  0xfb   : > { %v2871_v10 = vadd.f32 %v2177_v8, %v2176_v6  ;;  %v2873_v11 = vadd.f32 %v2249_v9, %v2248_v7 }
  0xfc   : > { %v2179_v12 = vpop.f32.mrf.mxu0  ;;  %v2251_v13 = vpop.f32.mrf.mxu1 }
  0xfd   : > { %3187 = vst [vmem:[#allocation5_spill] sm:$0xff] %v2873_v11 }
  0xfe   : > { %v2180_v14 = vpop.f32.mrf.mxu0  ;;  %v2252_v15 = vpop.f32.mrf.mxu1 }
  0xff   : > { %v2875_v16 = vadd.f32 %v2180_v14, %v2179_v12  ;;  %v2877_v17 = vadd.f32 %v2252_v15, %v2251_v13 }
 0x100   : > { %v2182_v18 = vpop.f32.mrf.mxu0  ;;  %v2254_v19 = vpop.f32.mrf.mxu1 }
 0x101   : > { %3188 = vst [vmem:[#allocation6_spill] sm:$0xff] %v2877_v17 }
 0x102   : > { %v2183_v20 = vpop.f32.mrf.mxu0  ;;  %v2255_v21 = vpop.f32.mrf.mxu1 }
 0x103   : > { %v2879_v22 = vadd.f32 %v2183_v20, %v2182_v18  ;;  %v2881_v23 = vadd.f32 %v2255_v21, %v2254_v19 }
 0x104   : > { %v2185_v24 = vpop.f32.mrf.mxu0  ;;  %v2257_v25 = vpop.f32.mrf.mxu1 }
 0x105   : > { %3189 = vst [vmem:[#allocation7_spill] sm:$0xff] %v2881_v23 }
 0x106   : > { %v2186_v26 = vpop.f32.mrf.mxu0  ;;  %v2258_v27 = vpop.f32.mrf.mxu1 }
 0x107   : > { %v2883_v28 = vadd.f32 %v2186_v26, %v2185_v24  ;;  %v2885_v29 = vadd.f32 %v2258_v27, %v2257_v25 }
 0x108   : > { %v2188_v30 = vpop.f32.mrf.mxu0  ;;  %v2260_v31 = vpop.f32.mrf.mxu1 }
 0x109   : > { %3190 = vst [vmem:[#allocation8_spill] sm:$0xff] %v2885_v29 }
 0x10a   : > { %v2189_v32 = vpop.f32.mrf.mxu0  ;;  %v2261_v33 = vpop.f32.mrf.mxu1 }
 0x10b   : > { %v2887_v34 = vadd.f32 %v2189_v32, %v2188_v30  ;;  %v2889_v35 = vadd.f32 %v2261_v33, %v2260_v31 }
 0x10c   : > { %v2191_v36 = vpop.f32.mrf.mxu0  ;;  %v2279_v37 = vpop.f32.mrf.mxu1 }
 0x10d   : > { %3191 = vst [vmem:[#allocation9_spill] sm:$0xff] %v2889_v35 }
 0x10e   : > { %v2192_v38 = vpop.f32.mrf.mxu0  ;;  %v2280_v39 = vpop.f32.mrf.mxu1 }
 0x10f   : > { %v2891_v40 = vadd.f32 %v2192_v38, %v2191_v36  ;;  %v2281_v41 = vadd.f32 %v2280_v39, %v2279_v37 }
 0x110   : > { %v2194_v42 = vpop.f32.mrf.mxu0  ;;  %v2893_v43 = vpop.f32.mrf.mxu1 }
 0x111   : > { %v2895_v44 = vadd.f32 %v2281_v41, %v2169_v56 }
 0x112   : > { %v2195_v45 = vpop.f32.mrf.mxu0  ;;  %v2897_v46 = vpop.f32.mrf.mxu1 }
 0x113   : > { %v2899_v47 = vadd.f32 %v2195_v45, %v2194_v42 }
 0x114   : > { %v2197_v48 = vpop.f32.mrf.mxu0  ;;  %v2285_v49 = vpop.f32.mrf.mxu1 }
 0x116   : > { %v2198_v50 = vpop.f32.mrf.mxu0  ;;  %v2286_v51 = vpop.f32.mrf.mxu1 }
 0x117   : > { %v2901_v52 = vadd.f32 %v2198_v50, %v2197_v48  ;;  %v2287_v17 = vadd.f32 %v2286_v51, %v2285_v49  ;;  %v2284_v51 = vadd.f32 %v2897_v46, %v2893_v43 }
 0x118   : > { %v2200_v53 = vpop.f32.mrf.mxu0  ;;  %v2288_v54 = vpop.f32.mrf.mxu1 }
 0x11a   : > { %v2201_v55 = vpop.f32.mrf.mxu0  ;;  %v2289_v58 = vpop.f32.mrf.mxu1 }
 0x11b   : > { %v2903_v59 = vadd.f32 %v2201_v55, %v2200_v53 }
 0x11c   : > { %v2203_v60 = vpop.f32.mrf.mxu0  ;;  %v2905_v56 = vpop.f32.mrf.mxu1 }
 0x11e   : > { %v2204_v61 = vpop.f32.mrf.mxu0  ;;  %v2907_v0 = vpop.f32.mrf.mxu1 }
 0x11f   : > { %v2909_v1 = vadd.f32 %v2204_v61, %v2203_v60  ;;  %v2293_v43 = vadd.f32 %v2907_v0, %v2905_v56 }
 0x120   : > { %v2206_v2 = vpop.f32.mrf.mxu0  ;;  %v2911_v3 = vpop.f32.mrf.mxu1 }
 0x122   : > { %v2207_v6 = vpop.f32.mrf.mxu0  ;;  %v2913_v7 = vpop.f32.mrf.mxu1 }
 0x123   : > { %v2915_v8 = vadd.f32 %v2207_v6, %v2206_v2  ;;  %v2296_v56 = vadd.f32 %v2913_v7, %v2911_v3 }
 0x124   : > { %v2917_v9 = vpop.f32.mrf.mxu0  ;;  %v2297_v12 = vpop.f32.mrf.mxu1 }
 0x126   : > { %v2919_v13 = vpop.f32.mrf.mxu0  ;;  %v2298_v14 = vpop.f32.mrf.mxu1 }
 0x128   : > { %v2921_v15 = vpop.f32.mrf.mxu0  ;;  %v2300_v18 = vpop.f32.mrf.mxu1 }
 0x12a   : > { %v2923_v19 = vpop.f32.mrf.mxu0  ;;  %v2301_v20 = vpop.f32.mrf.mxu1 }
 0x12c   : > { %v2215_v21 = vpop.f32.mrf.mxu0  ;;  %v2925_v24 = vpop.f32.mrf.mxu1 }
 0x12e   : > { %v2216_v25 = vpop.f32.mrf.mxu0  ;;  %v2927_v26 = vpop.f32.mrf.mxu1 }
 0x12f   : > { %v2929_v27 = vadd.f32 %v2216_v25, %v2215_v21 }
 0x130   : > { %v2931_v30 = vpop.f32.mrf.mxu0  ;;  %v2933_v31 = vpop.f32.mrf.mxu1 }
 0x131   : > { %3192 = vst [vmem:[#allocation10_spill] sm:$0xff] %v2929_v27  ;;  %3193 = vst [vmem:[#allocation11_spill] sm:$0xff] %v2931_v30 }
 0x132   : > { %v2935_v32 = vpop.f32.mrf.mxu0  ;;  %v2937_v33 = vpop.f32.mrf.mxu1 }
 0x133   : > { %3194 = vst [vmem:[#allocation12_spill] sm:$0xff] %v2935_v32 }
 0x134   : > { %v2939_v36 = vpop.f32.mrf.mxu0  ;;  %v2309_v37 = vpop.f32.mrf.mxu1 }
 0x136   : > { %v2941_v38 = vpop.f32.mrf.mxu0  ;;  %v2310_v39 = vpop.f32.mrf.mxu1 }
 0x138   : > { %v2943_v41 = vpop.f32.mrf.mxu0  ;;  %v2945_v42 = vpop.f32.mrf.mxu1 }
 0x13a   : > { %v2947_v45 = vpop.f32.mrf.mxu0  ;;  %v2949_v48 = vpop.f32.mrf.mxu1 }
 0x13c   : > { %v2951_v50 = vpop.f32.mrf.mxu0  ;;  %v2953_v53 = vpop.f32.mrf.mxu1 }
 0x13d   : > { %3195 = vst [vmem:[#allocation13_spill] sm:$0xff] %v2951_v50 }
 0x13e   : > { %v2955_v55 = vpop.f32.mrf.mxu0  ;;  %v2957_v60 = vpop.f32.mrf.mxu1 }
 0x13f   : > { %3196 = vst [vmem:[#allocation14_spill] sm:$0xff] %v2955_v55 }
 0x140   : > { %v2959_v61 = vpop.f32.mrf.mxu0  ;;  %v2961_v2 = vpop.f32.mrf.mxu1 }
 0x141   : > { %3197 = vst [vmem:[#allocation15_spill] sm:$0xff] %v2959_v61  ;;  %v1242_v61 = vadd.f32 %v2287_v17, %v2867_v4 }
 0x142   : > { %v2963_v6 = vpop.f32.mrf.mxu0  ;;  %v2965_v21 = vpop.f32.mrf.mxu1 }
 0x143   : > { %3198 = vst [vmem:[#allocation16_spill] sm:$0xff] %v2963_v6  ;;  %v2290_v6 = vadd.f32 %v2289_v58, %v2288_v54  ;;  %v3001_v58 = vld [vmem:[%s3182_s3] ss:$0 sm:$0xff] }
 0x144   : > { %v2967_v25 = vpop.f32.mrf.mxu0  ;;  %v2969_v35 = vpop.f32.mrf.mxu1 }
 0x145   : > { %3199 = vst [vmem:[#allocation17_spill] sm:$0xff] %v2967_v25  ;;  %v2299_v25 = vadd.f32 %v2298_v14, %v2297_v12  ;;  %v1245_v17 = vadd.f32 %v2290_v6, %v2871_v10  ;;  %v2302_v12 = vadd.f32 %v2301_v20, %v2300_v18  ;;  %v2311_v20 = vadd.f32 %v2310_v39, %v2309_v37 }
 0x146   : > { %v2971_v23 = vpop.f32.mrf.mxu0  ;;  %v2973_v29 = vpop.f32.mrf.mxu1  ;;  %v2305_v37 = vadd.f32 %v2927_v26, %v2925_v24 }
 0x147   : > { %3200 = vst [vmem:[#allocation18_spill] sm:$0xff] %v2971_v23  ;;  %v2989_v23 = vld [vmem:[%s3181_s2] ss:$0 sm:$0xff]  ;;  %v1274_v26 = vadd.f32 %v2311_v20, %v2901_v52 }
 0x148   : > { %v2975_v63 = vpop.f32.mrf.mxu0  ;;  %v2977_v11 = vpop.f32.mrf.mxu1 }
 0x149   : > { %3201 = vst [vmem:[#allocation19_spill] sm:$0xff] %v2975_v63 }
 0x14a   : > { %v2979_v57 = vpop.f32.mrf.mxu0  ;;  %v2981_v5 = vpop.f32.mrf.mxu1 }
 0x14b   : > { %3202 = vst [vmem:[#allocation20_spill] sm:$0xff] %v2979_v57 }
 0x14c   : > { %v2984_v55 = vpop.f32.mrf.mxu1  ;;  %v2405_v50 = vpop.f32.mrf.mxu0 }
 0x14d   : > { %v1403_v49 = vadd.f32 %v2405_v50, %v1242_v61 }
 0x14e   : > { %v2993_v63 = vpop.f32.mrf.mxu1  ;;  %v1394_v57 = vpop.f32.mrf.mxu0 }
 0x14f   : > { %v1530_v54 = vmul.f32 %v2989_v23, %v1403_v49  ;;  %v1395_v4 = vadd.f32 %v1394_v57, %v2895_v44  ;;  %v1237_v57 = vadd.f32 %v2284_v51, %v2863_v62  ;;  %v1258_v49 = vadd.f32 %v2299_v25, %v2883_v28 }
 0x150   : > { %v3003_v27 = vpop.f32.mrf.mxu1  ;;  %v2406_v50 = vpop.f32.mrf.mxu0  ;;  %v1250_v62 = vadd.f32 %v2293_v43, %v2875_v16  ;;  %v1261_v25 = vadd.f32 %v2302_v12, %v2887_v34  ;;  %v1253_v43 = vadd.f32 %v2296_v56, %v2879_v22 }
 0x151   : > { %3203 = vst [vmem:[#allocation21_spill] sm:$0xff] %v3003_v27  ;;  %v1406_v46 = vadd.f32 %v2406_v50, %v1245_v17  ;;  %v1528_v14 = vmul.f32 %v2989_v23, %v1395_v4  ;;  %v1569_v44 = vadd.f32 %v3001_v58, %v1530_v54 }
 0x152   : > { %v3008_v61 = vpop.f32.mrf.mxu1  ;;  %v1397_v10 = vpop.f32.mrf.mxu0 }
 0x153   : > { %v1531_v6 = vmul.f32 %v2989_v23, %v1406_v46  ;;  %v1398_v32 = vadd.f32 %v1397_v10, %v1237_v57  ;;  %v1567_v51 = vadd.f32 %v3001_v58, %v1528_v14  ;;  %v1601_v17 = vmax.f32 %v1569_v44, 0.0 }
 0x154   : > { %v3014_v30 = vpop.f32.mrf.mxu1  ;;  %v2409_v27 = vpop.f32.mrf.mxu0  ;;  %v2314_v46 = vadd.f32 %v2949_v48, %v2945_v42  ;;  %v2308_v48 = vadd.f32 %v2937_v33, %v2933_v31 }
 0x155   : > { %v1570_v0 = vadd.f32 %v3001_v58, %v1531_v6  ;;  %v1419_v18 = vadd.f32 %v2409_v27, %v1258_v49  ;;  %v1529_v54 = vmul.f32 %v2989_v23, %v1398_v32  ;;  %v1599_v12 = vmax.f32 %v1567_v51, 0.0 }
 0x156   : > { %v3023_v4 = vpop.f32.mrf.mxu1  ;;  %v1410_v28 = vpop.f32.mrf.mxu0  ;;  %v2323_v51 = vadd.f32 %v2973_v29, %v2969_v35 }
 0x157   : > { %v1602_v50 = vmax.f32 %v1570_v0, 0.0  ;;  %v1534_v3 = vmul.f32 %v2989_v23, %v1419_v18  ;;  %v1411_v7 = vadd.f32 %v1410_v28, %v1250_v62  ;;  %v1568_v16 = vadd.f32 %v3001_v58, %v1529_v54 }
 0x158   : > { %v3033_v27 = vpop.f32.mrf.mxu1  ;;  %v2410_v32 = vpop.f32.mrf.mxu0  ;;  %v1266_v62 = vadd.f32 %v2305_v37, %v2891_v40  ;;  %v2211_v40 = vadd.f32 %v2919_v13, %v2917_v9  ;;  %v2326_v37 = vadd.f32 %v2981_v5, %v2977_v11 }
 0x159   : > { %v2064_v34 = vpack.c.bf16 %v1602_v50, %v1601_v17  ;;  %v1422_v39 = vadd.f32 %v2410_v32, %v1261_v25  ;;  %v1600_v14 = vmax.f32 %v1568_v16, 0.0  ;;  %v1532_v57 = vmul.f32 %v2989_v23, %v1411_v7 }
 0x15a   : > { %v3041_v10 = vpop.f32.mrf.mxu1  ;;  %v1413_v44 = vpop.f32.mrf.mxu0  ;;  %v1573_v6 = vadd.f32 %v3001_v58, %v1534_v3  ;;  %v1277_v25 = vadd.f32 %v2314_v46, %v2903_v59  ;;  %v2317_v7 = vadd.f32 %v2957_v60, %v2953_v53  ;;  %v1269_v59 = vadd.f32 %v2308_v48, %v2899_v47 }
 0x15b   : > { %2136 = vst [vmem:[%s3030_s29 + $0x8] sm:$0xff] %v2064_v34   ;;  %v1535_v24 = vmul.f32 %v2989_v23, %v1422_v39  ;;  %v2059_v49 = vpack.c.bf16 %v1600_v14, %v1599_v12  ;;  %v1414_v22 = vadd.f32 %v1413_v44, %v1253_v43  ;;  %v1571_v54 = vadd.f32 %v3001_v58, %v1532_v57 }
 0x15c   : > { %v3047_v56 = vpop.f32.mrf.mxu1  ;;  %v2413_v42 = vpop.f32.mrf.mxu0  ;;  %v1605_v17 = vmax.f32 %v1573_v6, 0.0  ;;  %v1290_v60 = vadd.f32 %v2323_v51, %v2211_v40  ;;  %v2214_v47 = vadd.f32 %v2923_v19, %v2921_v15  ;;  %v2320_v57 = vadd.f32 %v2965_v21, %v2961_v2 }
 0x15d   : > { %v1574_v0 = vadd.f32 %v3001_v58, %v1535_v24  ;;  %v1435_v18 = vadd.f32 %v2413_v42, %v1274_v26  ;;  %2060 = vst [vmem:[%s3030_s29] sm:$0xff] %v2059_v49   ;;  %v1533_v52 = vmul.f32 %v2989_v23, %v1414_v22  ;;  %v1603_v34 = vmax.f32 %v1571_v54, 0.0 }
 0x15e   : > { %v3058_v20 = vpop.f32.mrf.mxu1  ;;  %v1426_v28 = vpop.f32.mrf.mxu0  ;;  %v1282_v24 = vadd.f32 %v2317_v7, %v2909_v1  ;;  %v2335_v26 = vadd.f32 %v3023_v4, %v3014_v30  ;;  %v1293_v42 = vadd.f32 %v2326_v37, %v2214_v47  ;;  %v2223_v1 = vadd.f32 %v2941_v38, %v2939_v36  ;;  %v3205_v7 = vld [vmem:[#allocation11_spill] sm:$0xff] }
 0x15f   : > { %v1606_v31 = vmax.f32 %v1574_v0, 0.0  ;;  %v1538_v33 = vmul.f32 %v2989_v23, %v1435_v18  ;;  %v1427_v50 = vadd.f32 %v1426_v28, %v1266_v62  ;;  %v1572_v29 = vadd.f32 %v3001_v58, %v1533_v52 }
 0x160   : > { %v3065_v35 = vpop.f32.mrf.mxu1  ;;  %v2414_v3 = vpop.f32.mrf.mxu0  ;;  %v2329_v62 = vadd.f32 %v2993_v63, %v2984_v55  ;;  %v1285_v52 = vadd.f32 %v2320_v57, %v2915_v8  ;;  %v2338_v28 = vadd.f32 %v3041_v10, %v3033_v27  ;;  %v1306_v63 = vadd.f32 %v2335_v26, %v2223_v1  ;;  %v3204_v8 = vld [vmem:[#allocation21_spill] sm:$0xff] }
 0x161   : > { %v2074_v16 = vpack.c.bf16 %v1606_v31, %v1605_v17  ;;  %v1438_v32 = vadd.f32 %v2414_v3, %v1277_v25  ;;  %v1604_v39 = vmax.f32 %v1572_v29, 0.0  ;;  %v1536_v43 = vmul.f32 %v2989_v23, %v1427_v50  ;;  %v3210_v1 = vld [vmem:[#allocation13_spill] sm:$0xff] }
 0x162   : > { %v3073_v9 = vpop.f32.mrf.mxu1  ;;  %v1429_v13 = vpop.f32.mrf.mxu0  ;;  %v1577_v46 = vadd.f32 %v3001_v58, %v1538_v33  ;;  %v2226_v55 = vadd.f32 %v2947_v45, %v2943_v41  ;;  %v2332_v40 = vadd.f32 %v3008_v61, %v3204_v8  ;;  %v2341_v26 = vadd.f32 %v3058_v20, %v3047_v56  ;;  %v3212_v56 = vld [vmem:[#allocation15_spill] sm:$0xff]  ;;  %v3213_v20 = vld [vmem:[#allocation16_spill] sm:$0xff] }
 0x163   : > { %2138 = vst [vmem:[%s3030_s29 + $0x18] sm:$0xff] %v2074_v16   ;;  %v1539_v53 = vmul.f32 %v2989_v23, %v1438_v32  ;;  %v2069_v12 = vpack.c.bf16 %v1604_v39, %v1603_v34  ;;  %v1430_v14 = vadd.f32 %v1429_v13, %v1269_v59  ;;  %v1575_v49 = vadd.f32 %v3001_v58, %v1536_v43  ;;  %v3206_v16 = vld [vmem:[#allocation12_spill] sm:$0xff]  ;;  %v3207_v34 = vld [vmem:[#allocation10_spill] sm:$0xff] }
 0x164   : > { %v2345_v5 = vpop.f32.mrf.mxu1  ;;  %v2417_v11 = vpop.f32.mrf.mxu0  ;;  %v1609_v48 = vmax.f32 %v1577_v46, 0.0  ;;  %v2220_v32 = vadd.f32 %v3206_v16, %v3205_v7  ;;  %v1298_v39 = vadd.f32 %v2329_v62, %v3207_v34  ;;  %v1309_v46 = vadd.f32 %v2338_v28, %v2226_v55 }
 0x165   : > { %v1578_v44 = vadd.f32 %v3001_v58, %v1539_v53  ;;  %v1451_v6 = vadd.f32 %v2417_v11, %v1290_v60  ;;  %2137 = vst [vmem:[%s3030_s29 + $0x10] sm:$0xff] %v2069_v12   ;;  %v1537_v15 = vmul.f32 %v2989_v23, %v1430_v14  ;;  %v1607_v25 = vmax.f32 %v1575_v49, 0.0  ;;  %v3208_v14 = vld [vmem:[#allocation17_spill] sm:$0xff]  ;;  %v3209_v11 = vld [vmem:[#allocation18_spill] sm:$0xff] }
 0x166   : > { %v2346_v19 = vpop.f32.mrf.mxu1  ;;  %v1442_v22 = vpop.f32.mrf.mxu0  ;;  %v2235_v57 = vadd.f32 %v3209_v11, %v3208_v14  ;;  %v3216_v11 = vld [vmem:[#allocation4_spill] sm:$0xff] }
 0x167   : > { %v1610_v0 = vmax.f32 %v1578_v44, 0.0  ;;  %v1542_v2 = vmul.f32 %v2989_v23, %v1451_v6  ;;  %v1443_v21 = vadd.f32 %v1442_v22, %v1282_v24  ;;  %v1576_v18 = vadd.f32 %v3001_v58, %v1537_v15 }
 0x168   : > { %v2348_v30 = vpop.f32.mrf.mxu1  ;;  %v2418_v4 = vpop.f32.mrf.mxu0  ;;  %v2347_v43 = vadd.f32 %v2346_v19, %v2345_v5  ;;  %v1301_v24 = vadd.f32 %v2332_v40, %v2220_v32 }
 0x169   : > { %v2084_v51 = vpack.c.bf16 %v1610_v0, %v1609_v48  ;;  %v1454_v54 = vadd.f32 %v2418_v4, %v1293_v42  ;;  %v1608_v17 = vmax.f32 %v1576_v18, 0.0  ;;  %v1540_v31 = vmul.f32 %v2989_v23, %v1443_v21  ;;  %v3211_v18 = vld [vmem:[#allocation14_spill] sm:$0xff] }
 0x16a   : > { %v2349_v33 = vpop.f32.mrf.mxu1  ;;  %v1445_v36 = vpop.f32.mrf.mxu0  ;;  %v1581_v38 = vadd.f32 %v3001_v58, %v1542_v2  ;;  %v2229_v4 = vadd.f32 %v3211_v18, %v3210_v1 }
 0x16b   : > { %2140 = vst [vmem:[%s3030_s29 + $0x28] sm:$0xff] %v2084_v51   ;;  %v1543_v50 = vmul.f32 %v2989_v23, %v1454_v54  ;;  %v2079_v27 = vpack.c.bf16 %v1608_v17, %v1607_v25  ;;  %v1446_v10 = vadd.f32 %v1445_v36, %v1285_v52  ;;  %v1579_v13 = vadd.f32 %v3001_v58, %v1540_v31  ;;  %v3214_v54 = vld [vmem:[#allocation19_spill] sm:$0xff]  ;;  %v3215_v52 = vld [vmem:[#allocation20_spill] sm:$0xff] }
 0x16c   : > { %v2351_v29 = vpop.f32.mrf.mxu1  ;;  %v2421_v3 = vpop.f32.mrf.mxu0  ;;  %v1613_v53 = vmax.f32 %v1581_v38, 0.0  ;;  %v2350_v15 = vadd.f32 %v2349_v33, %v2348_v30  ;;  %v1322_v51 = vadd.f32 %v2347_v43, %v2235_v57  ;;  %v2232_v30 = vadd.f32 %v3213_v20, %v3212_v56 }
 0x16d   : > { %v1582_v59 = vadd.f32 %v3001_v58, %v1543_v50  ;;  %v1467_v37 = vadd.f32 %v2421_v3, %v1306_v63  ;;  %2139 = vst [vmem:[%s3030_s29 + $0x20] sm:$0xff] %v2079_v27   ;;  %v1541_v41 = vmul.f32 %v2989_v23, %v1446_v10  ;;  %v1611_v22 = vmax.f32 %v1579_v13, 0.0 }
 0x16e   : > { %v2352_v45 = vpop.f32.mrf.mxu1  ;;  %v1458_v61 = vpop.f32.mrf.mxu0  ;;  %v2238_v28 = vadd.f32 %v3215_v52, %v3214_v54  ;;  %v2344_v36 = vadd.f32 %v3073_v9, %v3065_v35  ;;  %v1314_v63 = vadd.f32 %v2341_v26, %v2229_v4 }
 0x16f   : > { %v1614_v60 = vmax.f32 %v1582_v59, 0.0  ;;  %v1546_v47 = vmul.f32 %v2989_v23, %v1467_v37  ;;  %v1459_v12 = vadd.f32 %v1458_v61, %v1298_v39  ;;  %v1580_v44 = vadd.f32 %v3001_v58, %v1541_v41 }
 0x170   : > { %v2354_v6 = vpop.f32.mrf.mxu1  ;;  %v2422_v5 = vpop.f32.mrf.mxu0  ;;  %v1325_v3 = vadd.f32 %v2350_v15, %v2238_v28  ;;  %v2353_v34 = vadd.f32 %v2352_v45, %v2351_v29  ;;  %v1317_v13 = vadd.f32 %v2344_v36, %v2232_v30 }
 0x171   : > { %v2094_v49 = vpack.c.bf16 %v1614_v60, %v1613_v53  ;;  %v1470_v19 = vadd.f32 %v2422_v5, %v1309_v46  ;;  %v1612_v42 = vmax.f32 %v1580_v44, 0.0  ;;  %v1585_v48 = vadd.f32 %v3001_v58, %v1546_v47 }
 0x172   : > { %v1544_v0 = vmul.f32 %v2989_v23, %v1459_v12  ;;  %v2355_v2 = vpop.f32.mrf.mxu1  ;;  %v1461_v21 = vpop.f32.mrf.mxu0 }
 0x173   : > { %2142 = vst [vmem:[%s3030_s29 + $0x38] sm:$0xff] %v2094_v49   ;;  %v1547_v62 = vmul.f32 %v2989_v23, %v1470_v19  ;;  %v2089_v25 = vpack.c.bf16 %v1612_v42, %v1611_v22  ;;  %v1462_v17 = vadd.f32 %v1461_v21, %v1301_v24  ;;  %v1617_v55 = vmax.f32 %v1585_v48, 0.0  ;;  %v3217_v49 = vld [vmem:[#allocation2_spill] sm:$0xff] }
 0x174   : > { %v2357_v31 = vpop.f32.mrf.mxu1  ;;  %v2425_v33 = vpop.f32.mrf.mxu0  ;;  %v1583_v8 = vadd.f32 %v3001_v58, %v1544_v0  ;;  %v1330_v15 = vadd.f32 %v2353_v34, %v3217_v49  ;;  %v2356_v19 = vadd.f32 %v2355_v2, %v2354_v6 }
 0x175   : > { %v1586_v38 = vadd.f32 %v3001_v58, %v1547_v62  ;;  %v1483_v50 = vadd.f32 %v2425_v33, %v1322_v51  ;;  %2141 = vst [vmem:[%s3030_s29 + $0x30] sm:$0xff] %v2089_v25   ;;  %v1545_v40 = vmul.f32 %v2989_v23, %v1462_v17  ;;  %v3218_v62 = vld [vmem:[#allocation5_spill] sm:$0xff] }
 0x176   : > { %v2358_v27 = vpop.f32.mrf.mxu1  ;;  %v1474_v10 = vpop.f32.mrf.mxu0  ;;  %v1615_v41 = vmax.f32 %v1583_v8, 0.0 }
 0x177   : > { %v1618_v7 = vmax.f32 %v1586_v38, 0.0  ;;  %v1550_v16 = vmul.f32 %v2989_v23, %v1483_v50  ;;  %v2359_v32 = vadd.f32 %v2358_v27, %v2357_v31  ;;  %v1475_v59 = vadd.f32 %v1474_v10, %v1314_v63  ;;  %v3219_v31 = vld [vmem:[#allocation3_spill] sm:$0xff] }
 0x178   : > { %v1584_v35 = vadd.f32 %v3001_v58, %v1545_v40  ;;  %v2360_v9 = vpop.f32.mrf.mxu1  ;;  %v2426_v37 = vpop.f32.mrf.mxu0  ;;  %v1333_v33 = vadd.f32 %v2356_v19, %v3219_v31 }
 0x179   : > { %v2104_v39 = vpack.c.bf16 %v1618_v7, %v1617_v55  ;;  %v1486_v43 = vadd.f32 %v2426_v37, %v1325_v3  ;;  %v1589_v46 = vadd.f32 %v3001_v58, %v1550_v16  ;;  %v1548_v53 = vmul.f32 %v2989_v23, %v1475_v59  ;;  %v3220_v3 = vld [vmem:[#allocation6_spill] sm:$0xff] }
 0x17a   : > { %v1616_v61 = vmax.f32 %v1584_v35, 0.0  ;;  %v2361_v60 = vpop.f32.mrf.mxu1  ;;  %v1477_v47 = vpop.f32.mrf.mxu0  ;;  %v1338_v57 = vadd.f32 %v2359_v32, %v3216_v11 }
 0x17b   : > { %2144 = vst [vmem:[%s3030_s29 + $0x48] sm:$0xff] %v2104_v39   ;;  %v1551_v12 = vmul.f32 %v2989_v23, %v1486_v43  ;;  %v2362_v14 = vadd.f32 %v2361_v60, %v2360_v9  ;;  %v1478_v29 = vadd.f32 %v1477_v47, %v1317_v13  ;;  %v1621_v22 = vmax.f32 %v1589_v46, 0.0  ;;  %v3221_v46 = vld [vmem:[#allocation8_spill] sm:$0xff]  ;;  %v3222_v47 = vld [vmem:[#allocation7_spill] sm:$0xff] }
 0x17c   : > { %v2099_v44 = vpack.c.bf16 %v1616_v61, %v1615_v41  ;;  %v2363_v45 = vpop.f32.mrf.mxu1  ;;  %v2429_v5 = vpop.f32.mrf.mxu0  ;;  %v1587_v42 = vadd.f32 %v3001_v58, %v1548_v53 }
 0x17d   : > { %v1590_v24 = vadd.f32 %v3001_v58, %v1551_v12  ;;  %v1499_v26 = vadd.f32 %v2429_v5, %v1338_v57  ;;  %v1549_v48 = vmul.f32 %v2989_v23, %v1478_v29  ;;  %v1341_v51 = vadd.f32 %v2362_v14, %v3218_v62 }
 0x17e   : > { %2143 = vst [vmem:[%s3030_s29 + $0x40] sm:$0xff] %v2099_v44   ;;  %v2364_v0 = vpop.f32.mrf.mxu1  ;;  %v1490_v21 = vpop.f32.mrf.mxu0  ;;  %v1619_v52 = vmax.f32 %v1587_v42, 0.0 }
 0x17f   : > { %v1622_v1 = vmax.f32 %v1590_v24, 0.0  ;;  %v1554_v18 = vmul.f32 %v2989_v23, %v1499_v26  ;;  %v1491_v4 = vadd.f32 %v1490_v21, %v1330_v15  ;;  %v1588_v56 = vadd.f32 %v3001_v58, %v1549_v48  ;;  %v3223_v15 = vld [vmem:[#allocation9_spill] sm:$0xff] }
 0x180   : > { %v2366_v20 = vpop.f32.mrf.mxu1  ;;  %v2430_v30 = vpop.f32.mrf.mxu0  ;;  %v2365_v2 = vadd.f32 %v2364_v0, %v2363_v45 }
 0x181   : > { %v2114_v6 = vpack.c.bf16 %v1622_v1, %v1621_v22  ;;  %v1502_v54 = vadd.f32 %v2430_v30, %v1341_v51  ;;  %v1620_v28 = vmax.f32 %v1588_v56, 0.0  ;;  %v1552_v25 = vmul.f32 %v2989_v23, %v1491_v4 }
 0x182   : > { %v2367_v17 = vpop.f32.mrf.mxu1  ;;  %v1493_v36 = vpop.f32.mrf.mxu0  ;;  %v1593_v38 = vadd.f32 %v3001_v58, %v1554_v18  ;;  %v1346_v7 = vadd.f32 %v2365_v2, %v3220_v3 }
 0x183   : > { %2146 = vst [vmem:[%s3030_s29 + $0x58] sm:$0xff] %v2114_v6   ;;  %v1555_v50 = vmul.f32 %v2989_v23, %v1502_v54  ;;  %v2109_v63 = vpack.c.bf16 %v1620_v28, %v1619_v52  ;;  %v1494_v55 = vadd.f32 %v1493_v36, %v1333_v33  ;;  %v2368_v10 = vadd.f32 %v2367_v17, %v2366_v20 }
 0x184   : > { %v2369_v8 = vpop.f32.mrf.mxu1  ;;  %v2433_v40 = vpop.f32.mrf.mxu0  ;;  %v1591_v16 = vadd.f32 %v3001_v58, %v1552_v25  ;;  %v1625_v9 = vmax.f32 %v1593_v38, 0.0 }
 0x185   : > { %v1594_v27 = vadd.f32 %v3001_v58, %v1555_v50  ;;  %2145 = vst [vmem:[%s3030_s29 + $0x50] sm:$0xff] %v2109_v63   ;;  %v1553_v32 = vmul.f32 %v2989_v23, %v1494_v55  ;;  %v1349_v12 = vadd.f32 %v2368_v10, %v3222_v47 }
 0x186   : > { %v2370_v59 = vpop.f32.mrf.mxu1  ;;  %v1506_v35 = vpop.f32.mrf.mxu0  ;;  %v1623_v14 = vmax.f32 %v1591_v16, 0.0 }
 0x187   : > { %v1626_v37 = vmax.f32 %v1594_v27, 0.0  ;;  %v2371_v34 = vadd.f32 %v2370_v59, %v2369_v8  ;;  %v1507_v39 = vadd.f32 %v1506_v35, %v1346_v7  ;;  %v1592_v43 = vadd.f32 %v3001_v58, %v1553_v32 }
 0x188   : > { %v2372_v13 = vpop.f32.mrf.mxu1  ;;  %v2434_v41 = vpop.f32.mrf.mxu0 }
 0x189   : > { %v2124_v61 = vpack.c.bf16 %v1626_v37, %v1625_v9  ;;  %v1354_v53 = vadd.f32 %v2371_v34, %v3221_v46  ;;  %v1556_v60 = vmul.f32 %v2989_v23, %v1507_v39  ;;  %v1624_v11 = vmax.f32 %v1592_v43, 0.0 }
 0x18a   : > { %v2373_v57 = vpop.f32.mrf.mxu1  ;;  %v1509_v44 = vpop.f32.mrf.mxu0 }
 0x18b   : > { %2148 = vst [vmem:[%s3030_s29 + $0x68] sm:$0xff] %v2124_v61   ;;  %v1515_v29 = vadd.f32 %v2433_v40, %v1354_v53  ;;  %v2374_v45 = vadd.f32 %v2373_v57, %v2372_v13  ;;  %v1510_v5 = vadd.f32 %v1509_v44, %v1349_v12  ;;  %v2119_v24 = vpack.c.bf16 %v1624_v11, %v1623_v14 }
 0x18c   : > { %v1595_v49 = vadd.f32 %v3001_v58, %v1556_v60 }
 0x18d   : > { %v1558_v26 = vmul.f32 %v2989_v23, %v1515_v29  ;;  %v1357_v19 = vadd.f32 %v2374_v45, %v3223_v15  ;;  %v1557_v22 = vmul.f32 %v2989_v23, %v1510_v5  ;;  %2147 = vst [vmem:[%s3030_s29 + $0x60] sm:$0xff] %v2119_v24  }
 0x18e   : > { %v1627_v21 = vmax.f32 %v1595_v49, 0.0 }
 0x18f   : > { %v1518_v42 = vadd.f32 %v2434_v41, %v1357_v19  ;;  %v1596_v48 = vadd.f32 %v3001_v58, %v1557_v22  ;;  %v1597_v0 = vadd.f32 %v3001_v58, %v1558_v26 }
 0x191   : > { %v1559_v1 = vmul.f32 %v2989_v23, %v1518_v42  ;;  %v1628_v18 = vmax.f32 %v1596_v48, 0.0  ;;  %v1629_v51 = vmax.f32 %v1597_v0, 0.0 }
 0x193   : > { %v1598_v4 = vadd.f32 %v3001_v58, %v1559_v1  ;;  %v2129_v62 = vpack.c.bf16 %v1628_v18, %v1627_v21 }
 0x195   : > { %v1630_v56 = vmax.f32 %v1598_v4, 0.0  ;;  %2149 = vst [vmem:[%s3030_s29 + $0x70] sm:$0xff] %v2129_v62  }
 0x197   : > { %v2134_v20 = vpack.c.bf16 %v1630_v56, %v1629_v51 }
 0x199   : > { %2150 = vst [vmem:[%s3030_s29 + $0x78] sm:$0xff] %v2134_v20  }
 0x19a PF: > { %s14_s15 = sadd.s32 1, %s2614_s15  }
 0x19b   : > { %p11_p4 = scmp.ge.s32.totalorder %s14_s15, 4  }
 0x19d   :  { %13 = sbr.rel (!%p11_p4) target bundleno = 1 (0x1), region = 66 }

// kernel: _lambda_.12
= control target key start
LH: loop header
LB: loop body
LE: loop exit
PB: predicated region body
PF: predicated region fallthrough
CT: control target
= control target key end

     0   :  { %s302_s6 = smov 0   ;;  %s331_s0 = inlined_call_operand.vmem [shape: bf16[16,2,8,128], index: 0, kind: input, shape index: {}]   ;;  %s332_s1 = inlined_call_operand.vmem [shape: bf16[16,8,64], index: 1, kind: output, shape index: {}]  }
   0x1 LB: > { %s253_s7 = sadd.s32 4294967295, %s289_s6   ;;  %p257_p0 = scmp.ge.s32.totalorder %s289_s6, 1  ;;  %s289_s6 = sphi %s302_s6, %s11_s6  }
   0x2   : > { %p89_p1 = scmp.lt.s32.totalorder %s289_s6, 3 }
   0x4   : > { %p90_p2 = pnand %p257_p0, %p89_p1 }
   0x5   : > { %s258_s8 = sshll.u32 (!%p90_p2), %s253_s7, 3  ;;  %s291_s13 = smov (!%p90_p2), 64  }
   0x6   : > { %93 = sbr.rel (%p90_p2) target bundleno = 148 (0x94), region = 24  ;;  %p111_p3 = scmp.lt.s32.totalorder (!%p90_p2), %s258_s8, 15 }
   0xb   : > { %s334_s8 = smov (!%p111_p3, %s258_s8), 15  ;;  %vm188_vm0 = vcmask 519168  }
   0xc   : > { %s273_s9 = sshll.u32 %s334_s8, 3  ;;  %s262_s14 = sshll.u32 %s334_s8, 2 }
   0xd   : > { %s115_s12 = scalar_lea.vmem %s331_s0, %s273_s9  ;;  %s121_s17 = scalar_lea.vmem %s332_s1, %s262_s14 }
   0xe   : > { %v125_v0 = vld [vmem:[%s115_s12 + $0x10] sm:$0xf]  ;;  %v265_v1 = vld [vmem:[%s115_s12 + $0x14] sm:$0xf]  ;;  %v123_v2 = vld [vmem:[%s115_s12] sm:$0xf] }
   0xf   : > { %v142_v3 = vmax.bf16 %v265_v1, %v125_v0  ;;  %v263_v4 = vld [vmem:[%s115_s12 + $0x4] sm:$0xf]  ;;  %v126_v5 = vld [vmem:[%s115_s12 + $0x18] sm:$0xf]  ;;  %v266_v6 = vld [vmem:[%s115_s12 + $0x1c] sm:$0xf] }
  0x10   : > { %v140_v7 = vmax.bf16 %v263_v4, %v123_v2  ;;  %v124_v8 = vld [vmem:[%s115_s12 + $0x8] sm:$0xf]  ;;  %v264_v9 = vld [vmem:[%s115_s12 + $0xc] sm:$0xf]  ;;  %v143_v10 = vmax.bf16 %v266_v6, %v126_v5  ;;  %v127_v14 = vld [vmem:[%s115_s12 + $0x20] sm:$0xf] }
  0x11   : > { %160 = vrot.lane.b32.xlu1 %v142_v3, %s291_s13  ;;  %v141_v11 = vmax.bf16 %v264_v9, %v124_v8  ;;  %v128_v12 = vld [vmem:[%s115_s12 + $0x28] sm:$0xf]  ;;  %v268_v13 = vld [vmem:[%s115_s12 + $0x2c] sm:$0xf]  ;;  %v267_v15 = vld [vmem:[%s115_s12 + $0x24] sm:$0xf] }
  0x12   : > { %156 = vrot.lane.b32.xlu0 %v140_v7, %s291_s13  ;;  %v145_v16 = vmax.bf16 %v268_v13, %v128_v12  ;;  %v144_v17 = vmax.bf16 %v267_v15, %v127_v14  ;;  %v130_v18 = vld [vmem:[%s115_s12 + $0x38] sm:$0xf]  ;;  %v270_v19 = vld [vmem:[%s115_s12 + $0x3c] sm:$0xf]  ;;  %v129_v20 = vld [vmem:[%s115_s12 + $0x30] sm:$0xf] }
  0x13   : > { %v269_v21 = vld [vmem:[%s115_s12 + $0x34] sm:$0xf]  ;;  %v147_v22 = vmax.bf16 %v270_v19, %v130_v18 }
  0x14   : > { %v146_v23 = vmax.bf16 %v269_v21, %v129_v20 }
  0x15   : > { %162 = vrot.lane.b32.xlu1 %v143_v10, %s291_s13 }
  0x16   : > { %158 = vrot.lane.b32.xlu0 %v141_v11, %s291_s13 }
  0x19   : > { %166 = vrot.lane.b32.xlu1 %v145_v16, %s291_s13 }
  0x1a   : > { %164 = vrot.lane.b32.xlu0 %v144_v17, %s291_s13 }
  0x1d   : > { %170 = vrot.lane.b32.xlu1 %v147_v22, %s291_s13 }
  0x1e   : > { %168 = vrot.lane.b32.xlu0 %v146_v23, %s291_s13 }
  0x83   : > { %v161_v24 = vpop.permute.xlu1 %160 }
  0x84   : > { %v182_v25 = vmax.bf16 %v161_v24, %v142_v3  ;;  %v157_v26 = vpop.permute.xlu0 %156 }
  0x85   : > { %v180_v27 = vmax.bf16 %v157_v26, %v140_v7 }
  0x86   : > { %191 = vst.msk [vmem:[%s121_s17 + $0x8] sm:$0xf] %vm188_vm0, %v182_v25 }
  0x87   : > { %189 = vst.msk [vmem:[%s121_s17] sm:$0xf] %vm188_vm0, %v180_v27  ;;  %v163_v28 = vpop.permute.xlu1 %162 }
  0x88   : > { %v183_v29 = vmax.bf16 %v163_v28, %v143_v10  ;;  %v159_v30 = vpop.permute.xlu0 %158 }
  0x89   : > { %v181_v31 = vmax.bf16 %v159_v30, %v141_v11 }
  0x8a   : > { %192 = vst.msk [vmem:[%s121_s17 + $0xc] sm:$0xf] %vm188_vm0, %v183_v29 }
  0x8b   : > { %190 = vst.msk [vmem:[%s121_s17 + $0x4] sm:$0xf] %vm188_vm0, %v181_v31  ;;  %v167_v32 = vpop.permute.xlu1 %166 }
  0x8c   : > { %v185_v33 = vmax.bf16 %v167_v32, %v145_v16  ;;  %v165_v34 = vpop.permute.xlu0 %164 }
  0x8d   : > { %v184_v35 = vmax.bf16 %v165_v34, %v144_v17 }
  0x8e   : > { %194 = vst.msk [vmem:[%s121_s17 + $0x14] sm:$0xf] %vm188_vm0, %v185_v33 }
  0x8f   : > { %193 = vst.msk [vmem:[%s121_s17 + $0x10] sm:$0xf] %vm188_vm0, %v184_v35  ;;  %v171_v36 = vpop.permute.xlu1 %170 }
  0x90   : > { %v187_v37 = vmax.bf16 %v171_v36, %v147_v22  ;;  %v169_v38 = vpop.permute.xlu0 %168 }
  0x91   : > { %v186_v39 = vmax.bf16 %v169_v38, %v146_v23 }
  0x92   : > { %196 = vst.msk [vmem:[%s121_s17 + $0x1c] sm:$0xf] %vm188_vm0, %v187_v37 }
  0x93   : > { %195 = vst.msk [vmem:[%s121_s17 + $0x18] sm:$0xf] %vm188_vm0, %v186_v39 }
  0x94 PF: > { %s11_s6 = sadd.s32 1, %s289_s6  }
  0x95   : > { %p8_p4 = scmp.ge.s32.totalorder %s11_s6, 4  }
  0x97   :  { %10 = sbr.rel (!%p8_p4) target bundleno = 1 (0x1), region = 55 }

// kernel: _lambda_.13
= control target key start
LH: loop header
LB: loop body
LE: loop exit
PB: predicated region body
PF: predicated region fallthrough
CT: control target
= control target key end

     0   :  { %s14265_s1 = inlined_call_operand.vmem [shape: bf16[4096,512], index: 1, kind: input, shape index: {}]   ;;  %s14266_s0 = inlined_call_operand.vmem [shape: bf16[8,4096], index: 0, kind: input, shape index: {}]   ;;  %s14267_s2 = inlined_call_operand.vmem [shape: f32[1,512], index: 2, kind: input, shape index: {}]   ;;  %s14268_s3 = inlined_call_operand.vmem [shape: bf16[512,128], index: 3, kind: input, shape index: {}]   ;;  %s14269_s4 = inlined_call_operand.vmem [shape: f32[1,128], index: 4, kind: input, shape index: {}]   ;;  %s14270_s5 = inlined_call_operand.vmem [shape: f32[8,128], index: 5, kind: output, shape index: {}]  }
   0x1   :  { %v9116_v0 = vld [vmem:[%s14265_s1 + $0xe4] ss:$16 sps:$4 sm:$0xff]   ;;  %v9120_v2 = vld [vmem:[%s14265_s1 + $0xe0] ss:$16 sps:$4 sm:$0xff]   ;;  %v22_v48 = vld [vmem:[%s14266_s0 + $0x8] sm:$0xff] }
   0x2   :  { %v9118_v1 = vld [vmem:[%s14265_s1 + $0x2e4] ss:$16 sps:$4 sm:$0xff]   ;;  %6315 = vmatprep.subr.bf16.mxu0 %v9116_v0  ;;  %v9121_v3 = vld [vmem:[%s14265_s1 + $0x2e0] ss:$16 sps:$4 sm:$0xff]   ;;  %v10899_v51 = vcombine.high %v22_v48, %v22_v48 }
   0x3   :  { %6356 = vmatprep.subr.bf16.mxu1 %v9118_v1  ;;  %v9122_v4 = vld [vmem:[%s14265_s1 + $0xc4] ss:$16 sps:$4 sm:$0xff]   ;;  %6316 = vmatpush1.bf16.msra.mxu0 %v9120_v2  ;;  %v9126_v6 = vld [vmem:[%s14265_s1 + $0xc0] ss:$16 sps:$4 sm:$0xff]  }
   0x4   :  { %6357 = vmatpush1.bf16.msra.mxu1 %v9121_v3  ;;  %v9124_v5 = vld [vmem:[%s14265_s1 + $0x2c4] ss:$16 sps:$4 sm:$0xff]   ;;  %6317 = vmatprep.subr.bf16.mxu0 %v9122_v4  ;;  %v9127_v7 = vld [vmem:[%s14265_s1 + $0x2c0] ss:$16 sps:$4 sm:$0xff]  }
   0x5   :  { %6358 = vmatprep.subr.bf16.mxu1 %v9124_v5  ;;  %v9128_v8 = vld [vmem:[%s14265_s1 + $0xa4] ss:$16 sps:$4 sm:$0xff]   ;;  %v9132_v10 = vld [vmem:[%s14265_s1 + $0xa0] ss:$16 sps:$4 sm:$0xff]   ;;  %6388 = vmatprep.mubr.bf16.mxu1 %v10899_v51 }
   0x6   :  { %v9130_v9 = vld [vmem:[%s14265_s1 + $0x2a4] ss:$16 sps:$4 sm:$0xff]   ;;  %v9133_v11 = vld [vmem:[%s14265_s1 + $0x2a0] ss:$16 sps:$4 sm:$0xff]  }
   0x7   :  { %6318 = vmatpush1.bf16.msra.mxu0 %v9126_v6  ;;  %v9134_v12 = vld [vmem:[%s14265_s1 + $0x84] ss:$16 sps:$4 sm:$0xff]   ;;  %v9138_v14 = vld [vmem:[%s14265_s1 + $0x80] ss:$16 sps:$4 sm:$0xff]  }
   0x8   :  { %6359 = vmatpush1.bf16.msra.mxu1 %v9127_v7  ;;  %6319 = vmatprep.subr.bf16.mxu0 %v9128_v8  ;;  %v9136_v13 = vld [vmem:[%s14265_s1 + $0x284] ss:$16 sps:$4 sm:$0xff]   ;;  %v9139_v15 = vld [vmem:[%s14265_s1 + $0x280] ss:$16 sps:$4 sm:$0xff]   ;;  %v10959_v7 = vcombine.low %v22_v48, %v22_v48 }
   0x9   :  { %6360 = vmatprep.subr.bf16.mxu1 %v9130_v9  ;;  %v9140_v16 = vld [vmem:[%s14265_s1 + $0x64] ss:$16 sps:$4 sm:$0xff]   ;;  %v9144_v18 = vld [vmem:[%s14265_s1 + $0x60] ss:$16 sps:$4 sm:$0xff]  }
   0xa   :  { %v9142_v17 = vld [vmem:[%s14265_s1 + $0x264] ss:$16 sps:$4 sm:$0xff]   ;;  %v9145_v19 = vld [vmem:[%s14265_s1 + $0x260] ss:$16 sps:$4 sm:$0xff]  }
   0xb   :  { %6320 = vmatpush1.bf16.msra.mxu0 %v9132_v10  ;;  %v9146_v20 = vld [vmem:[%s14265_s1 + $0x44] ss:$16 sps:$4 sm:$0xff]   ;;  %v9150_v22 = vld [vmem:[%s14265_s1 + $0x40] ss:$16 sps:$4 sm:$0xff]  }
   0xc   :  { %6361 = vmatpush1.bf16.msra.mxu1 %v9133_v11  ;;  %6321 = vmatprep.subr.bf16.mxu0 %v9134_v12  ;;  %v9148_v21 = vld [vmem:[%s14265_s1 + $0x244] ss:$16 sps:$4 sm:$0xff]   ;;  %v9151_v23 = vld [vmem:[%s14265_s1 + $0x240] ss:$16 sps:$4 sm:$0xff]  }
   0xd   :  { %6362 = vmatprep.subr.bf16.mxu1 %v9136_v13  ;;  %v9152_v24 = vld [vmem:[%s14265_s1 + $0x24] ss:$16 sps:$4 sm:$0xff]   ;;  %v9156_v26 = vld [vmem:[%s14265_s1 + $0x20] ss:$16 sps:$4 sm:$0xff]  }
   0xe   :  { %v9154_v25 = vld [vmem:[%s14265_s1 + $0x224] ss:$16 sps:$4 sm:$0xff]   ;;  %v9157_v27 = vld [vmem:[%s14265_s1 + $0x220] ss:$16 sps:$4 sm:$0xff]  }
   0xf   :  { %6322 = vmatpush1.bf16.msra.mxu0 %v9138_v14  ;;  %v9158_v28 = vld [vmem:[%s14265_s1 + $0x4] ss:$16 sps:$4 sm:$0xff]   ;;  %v9162_v30 = vld [vmem:[%s14265_s1] ss:$16 sps:$4 sm:$0xff]  }
  0x10   :  { %6363 = vmatpush1.bf16.msra.mxu1 %v9139_v15  ;;  %6323 = vmatprep.subr.bf16.mxu0 %v9140_v16  ;;  %v9160_v29 = vld [vmem:[%s14265_s1 + $0x204] ss:$16 sps:$4 sm:$0xff]   ;;  %v9163_v31 = vld [vmem:[%s14265_s1 + $0x200] ss:$16 sps:$4 sm:$0xff]  }
  0x11   :  { %6364 = vmatprep.subr.bf16.mxu1 %v9142_v17  ;;  %v9164_v32 = vld [vmem:[%s14265_s1 + $0x1e4] ss:$16 sps:$4 sm:$0xff]   ;;  %v9168_v34 = vld [vmem:[%s14265_s1 + $0x1e0] ss:$16 sps:$4 sm:$0xff]  }
  0x12   :  { %v9166_v33 = vld [vmem:[%s14265_s1 + $0x3e4] ss:$16 sps:$4 sm:$0xff]   ;;  %v9169_v35 = vld [vmem:[%s14265_s1 + $0x3e0] ss:$16 sps:$4 sm:$0xff]  }
  0x13   :  { %6324 = vmatpush1.bf16.msra.mxu0 %v9144_v18  ;;  %v9170_v36 = vld [vmem:[%s14265_s1 + $0x1c4] ss:$16 sps:$4 sm:$0xff]   ;;  %v9174_v38 = vld [vmem:[%s14265_s1 + $0x1c0] ss:$16 sps:$4 sm:$0xff]  }
  0x14   :  { %6365 = vmatpush1.bf16.msra.mxu1 %v9145_v19  ;;  %6325 = vmatprep.subr.bf16.mxu0 %v9146_v20  ;;  %v9172_v37 = vld [vmem:[%s14265_s1 + $0x3c4] ss:$16 sps:$4 sm:$0xff]   ;;  %v9175_v39 = vld [vmem:[%s14265_s1 + $0x3c0] ss:$16 sps:$4 sm:$0xff]  }
  0x15   :  { %6366 = vmatprep.subr.bf16.mxu1 %v9148_v21  ;;  %v9176_v40 = vld [vmem:[%s14265_s1 + $0x1a4] ss:$16 sps:$4 sm:$0xff]   ;;  %v9180_v42 = vld [vmem:[%s14265_s1 + $0x1a0] ss:$16 sps:$4 sm:$0xff]  }
  0x16   :  { %v9178_v41 = vld [vmem:[%s14265_s1 + $0x3a4] ss:$16 sps:$4 sm:$0xff]   ;;  %v9181_v43 = vld [vmem:[%s14265_s1 + $0x3a0] ss:$16 sps:$4 sm:$0xff]  }
  0x17   :  { %6326 = vmatpush1.bf16.msra.mxu0 %v9150_v22  ;;  %v9182_v44 = vld [vmem:[%s14265_s1 + $0x184] ss:$16 sps:$4 sm:$0xff]   ;;  %v9186_v49 = vld [vmem:[%s14265_s1 + $0x180] ss:$16 sps:$4 sm:$0xff]  }
  0x18   :  { %6367 = vmatpush1.bf16.msra.mxu1 %v9151_v23  ;;  %6327 = vmatprep.subr.bf16.mxu0 %v9152_v24  ;;  %v9184_v45 = vld [vmem:[%s14265_s1 + $0x384] ss:$16 sps:$4 sm:$0xff]   ;;  %v9187_v50 = vld [vmem:[%s14265_s1 + $0x380] ss:$16 sps:$4 sm:$0xff]  }
  0x19   :  { %6368 = vmatprep.subr.bf16.mxu1 %v9154_v25  ;;  %v21_v46 = vld [vmem:[%s14266_s0] sm:$0xff] }
  0x1a   :  { %v10888_v47 = vcombine.high %v21_v46, %v21_v46  ;;  %v9188_v52 = vld [vmem:[%s14265_s1 + $0x164] ss:$16 sps:$4 sm:$0xff]   ;;  %v9192_v54 = vld [vmem:[%s14265_s1 + $0x160] ss:$16 sps:$4 sm:$0xff]   ;;  %v10957_v6 = vcombine.low %v21_v46, %v21_v46 }
  0x1b   :  { %6328 = vmatpush1.bf16.msra.mxu0 %v9156_v26  ;;  %v9190_v53 = vld [vmem:[%s14265_s1 + $0x364] ss:$16 sps:$4 sm:$0xff]   ;;  %v9193_v55 = vld [vmem:[%s14265_s1 + $0x360] ss:$16 sps:$4 sm:$0xff]  }
  0x1c   :  { %6369 = vmatpush1.bf16.msra.mxu1 %v9157_v27  ;;  %6329 = vmatprep.subr.bf16.mxu0 %v9158_v28  ;;  %v9194_v56 = vld [vmem:[%s14265_s1 + $0x144] ss:$16 sps:$4 sm:$0xff]   ;;  %v9198_v58 = vld [vmem:[%s14265_s1 + $0x140] ss:$16 sps:$4 sm:$0xff]  }
  0x1d   :  { %6370 = vmatprep.subr.bf16.mxu1 %v9160_v29  ;;  %6347 = vmatprep.mubr.bf16.mxu0 %v10888_v47  ;;  %v9196_v57 = vld [vmem:[%s14265_s1 + $0x344] ss:$16 sps:$4 sm:$0xff]   ;;  %v9199_v59 = vld [vmem:[%s14265_s1 + $0x340] ss:$16 sps:$4 sm:$0xff]  }
  0x1e   :  { %v9200_v60 = vld [vmem:[%s14265_s1 + $0x124] ss:$16 sps:$4 sm:$0xff]   ;;  %v9204_v62 = vld [vmem:[%s14265_s1 + $0x120] ss:$16 sps:$4 sm:$0xff]  }
  0x1f   :  { %6330 = vmatpush1.bf16.msra.mxu0 %v9162_v30  ;;  %v9202_v61 = vld [vmem:[%s14265_s1 + $0x324] ss:$16 sps:$4 sm:$0xff]   ;;  %v9205_v63 = vld [vmem:[%s14265_s1 + $0x320] ss:$16 sps:$4 sm:$0xff]  }
  0x20   :  { %6371 = vmatpush1.bf16.msra.mxu1 %v9163_v31  ;;  %6331 = vmatprep.subr.bf16.mxu0 %v9164_v32  ;;  %v9206_v0 = vld [vmem:[%s14265_s1 + $0x104] ss:$16 sps:$4 sm:$0xff]   ;;  %v9210_v2 = vld [vmem:[%s14265_s1 + $0x100] ss:$16 sps:$4 sm:$0xff]  }
  0x21   :  { %6372 = vmatprep.subr.bf16.mxu1 %v9166_v33  ;;  %v9208_v1 = vld [vmem:[%s14265_s1 + $0x304] ss:$16 sps:$4 sm:$0xff]   ;;  %v9211_v3 = vld [vmem:[%s14265_s1 + $0x300] ss:$16 sps:$4 sm:$0xff]   ;;  %v11043_v33 = vld [vmem:[%s14266_s0 + $0x18] sm:$0xff] }
  0x22   :  { %v9218_v4 = vld [vmem:[%s14265_s1 + $0x4e4] ss:$16 sps:$4 sm:$0xff]   ;;  %v9216_v8 = vld [vmem:[%s14265_s1 + $0x4e0] ss:$16 sps:$4 sm:$0xff]  }
  0x23   :  { %6332 = vmatpush2.bf16.msra.mxu0 %v9168_v34  ;;  %v9221_v5 = vld [vmem:[%s14265_s1 + $0x6e4] ss:$16 sps:$4 sm:$0xff]   ;;  %v9219_v9 = vld [vmem:[%s14265_s1 + $0x6e0] ss:$16 sps:$4 sm:$0xff]  }
  0x24   :  { %6373 = vmatpush2.bf16.msra.mxu1 %v9169_v35  ;;  %6333 = vmatprep.subr.bf16.mxu0 %v9170_v36  ;;  %v9224_v10 = vld [vmem:[%s14265_s1 + $0x4c4] ss:$16 sps:$4 sm:$0xff]   ;;  %v9222_v12 = vld [vmem:[%s14265_s1 + $0x4c0] ss:$16 sps:$4 sm:$0xff]  }
  0x25   :  { %6374 = vmatprep.subr.bf16.mxu1 %v9172_v37  ;;  %v9227_v11 = vld [vmem:[%s14265_s1 + $0x6c4] ss:$16 sps:$4 sm:$0xff]   ;;  %v9225_v13 = vld [vmem:[%s14265_s1 + $0x6c0] ss:$16 sps:$4 sm:$0xff]   ;;  %v11057_v37 = vcombine.high %v11043_v33, %v11043_v33 }
  0x26   :  { %v9230_v14 = vld [vmem:[%s14265_s1 + $0x4a4] ss:$16 sps:$4 sm:$0xff]   ;;  %v9228_v16 = vld [vmem:[%s14265_s1 + $0x4a0] ss:$16 sps:$4 sm:$0xff]  }
  0x27   :  { %6334 = vmatpush2.bf16.msra.mxu0 %v9174_v38  ;;  %v9233_v15 = vld [vmem:[%s14265_s1 + $0x6a4] ss:$16 sps:$4 sm:$0xff]   ;;  %v9231_v17 = vld [vmem:[%s14265_s1 + $0x6a0] ss:$16 sps:$4 sm:$0xff]  }
  0x28   :  { %6375 = vmatpush2.bf16.msra.mxu1 %v9175_v39  ;;  %6335 = vmatprep.subr.bf16.mxu0 %v9176_v40  ;;  %v9236_v18 = vld [vmem:[%s14265_s1 + $0x484] ss:$16 sps:$4 sm:$0xff]   ;;  %v9234_v20 = vld [vmem:[%s14265_s1 + $0x480] ss:$16 sps:$4 sm:$0xff]  }
  0x29   :  { %6376 = vmatprep.subr.bf16.mxu1 %v9178_v41  ;;  %v9239_v19 = vld [vmem:[%s14265_s1 + $0x684] ss:$16 sps:$4 sm:$0xff]   ;;  %v9237_v21 = vld [vmem:[%s14265_s1 + $0x680] ss:$16 sps:$4 sm:$0xff]  }
  0x2a   :  { %v9242_v22 = vld [vmem:[%s14265_s1 + $0x464] ss:$16 sps:$4 sm:$0xff]   ;;  %v9240_v24 = vld [vmem:[%s14265_s1 + $0x460] ss:$16 sps:$4 sm:$0xff]  }
  0x2b   :  { %6336 = vmatpush2.bf16.msra.mxu0 %v9180_v42  ;;  %v9245_v23 = vld [vmem:[%s14265_s1 + $0x664] ss:$16 sps:$4 sm:$0xff]   ;;  %v9243_v25 = vld [vmem:[%s14265_s1 + $0x660] ss:$16 sps:$4 sm:$0xff]  }
  0x2c   :  { %6377 = vmatpush2.bf16.msra.mxu1 %v9181_v43  ;;  %6337 = vmatprep.subr.bf16.mxu0 %v9182_v44  ;;  %v9248_v26 = vld [vmem:[%s14265_s1 + $0x444] ss:$16 sps:$4 sm:$0xff]   ;;  %v9246_v28 = vld [vmem:[%s14265_s1 + $0x440] ss:$16 sps:$4 sm:$0xff]  }
  0x2d   :  { %6378 = vmatprep.subr.bf16.mxu1 %v9184_v45  ;;  %v9251_v27 = vld [vmem:[%s14265_s1 + $0x644] ss:$16 sps:$4 sm:$0xff]   ;;  %v9249_v29 = vld [vmem:[%s14265_s1 + $0x640] ss:$16 sps:$4 sm:$0xff]  }
  0x2e   :  { %v9254_v30 = vld [vmem:[%s14265_s1 + $0x424] ss:$16 sps:$4 sm:$0xff]   ;;  %v9252_v34 = vld [vmem:[%s14265_s1 + $0x420] ss:$16 sps:$4 sm:$0xff]  }
  0x2f   :  { %6338 = vmatpush2.bf16.msra.mxu0 %v9186_v49  ;;  %v9257_v31 = vld [vmem:[%s14265_s1 + $0x624] ss:$16 sps:$4 sm:$0xff]   ;;  %v9255_v35 = vld [vmem:[%s14265_s1 + $0x620] ss:$16 sps:$4 sm:$0xff]  }
  0x30   :  { %6379 = vmatpush2.bf16.msra.mxu1 %v9187_v50  ;;  %6339 = vmatprep.subr.bf16.mxu0 %v9188_v52  ;;  %v11038_v32 = vld [vmem:[%s14266_s0 + $0x10] sm:$0xff] }
  0x31   :  { %6380 = vmatprep.subr.bf16.mxu1 %v9190_v53  ;;  %v11053_v36 = vcombine.high %v11038_v32, %v11038_v32  ;;  %v9260_v38 = vld [vmem:[%s14265_s1 + $0x404] ss:$16 sps:$4 sm:$0xff]   ;;  %v9258_v40 = vld [vmem:[%s14265_s1 + $0x400] ss:$16 sps:$4 sm:$0xff]  }
  0x32   :  { %v9263_v39 = vld [vmem:[%s14265_s1 + $0x604] ss:$16 sps:$4 sm:$0xff]   ;;  %v9261_v41 = vld [vmem:[%s14265_s1 + $0x600] ss:$16 sps:$4 sm:$0xff]  }
  0x33   :  { %6340 = vmatpush2.bf16.msra.mxu0 %v9192_v54  ;;  %v9266_v42 = vld [vmem:[%s14265_s1 + $0x5e4] ss:$16 sps:$4 sm:$0xff]   ;;  %v9264_v44 = vld [vmem:[%s14265_s1 + $0x5e0] ss:$16 sps:$4 sm:$0xff]  }
  0x34   :  { %6381 = vmatpush2.bf16.msra.mxu1 %v9193_v55  ;;  %6341 = vmatprep.subr.bf16.mxu0 %v9194_v56  ;;  %v9269_v43 = vld [vmem:[%s14265_s1 + $0x7e4] ss:$16 sps:$4 sm:$0xff]   ;;  %v9267_v45 = vld [vmem:[%s14265_s1 + $0x7e0] ss:$16 sps:$4 sm:$0xff]  }
  0x35   :  { %6382 = vmatprep.subr.bf16.mxu1 %v9196_v57  ;;  %v9272_v46 = vld [vmem:[%s14265_s1 + $0x5c4] ss:$16 sps:$4 sm:$0xff]   ;;  %v9270_v49 = vld [vmem:[%s14265_s1 + $0x5c0] ss:$16 sps:$4 sm:$0xff]  }
  0x36   :  { %v9275_v48 = vld [vmem:[%s14265_s1 + $0x7c4] ss:$16 sps:$4 sm:$0xff]   ;;  %v9273_v50 = vld [vmem:[%s14265_s1 + $0x7c0] ss:$16 sps:$4 sm:$0xff]  }
  0x37   :  { %6342 = vmatpush2.bf16.msra.mxu0 %v9198_v58  ;;  %v9278_v52 = vld [vmem:[%s14265_s1 + $0x5a4] ss:$16 sps:$4 sm:$0xff]   ;;  %v9276_v54 = vld [vmem:[%s14265_s1 + $0x5a0] ss:$16 sps:$4 sm:$0xff]  }
  0x38   :  { %6383 = vmatpush2.bf16.msra.mxu1 %v9199_v59  ;;  %6343 = vmatprep.subr.bf16.mxu0 %v9200_v60  ;;  %v9281_v53 = vld [vmem:[%s14265_s1 + $0x7a4] ss:$16 sps:$4 sm:$0xff]   ;;  %v9279_v55 = vld [vmem:[%s14265_s1 + $0x7a0] ss:$16 sps:$4 sm:$0xff]  }
  0x39   :  { %6384 = vmatprep.subr.bf16.mxu1 %v9202_v61  ;;  %v9284_v56 = vld [vmem:[%s14265_s1 + $0x584] ss:$16 sps:$4 sm:$0xff]   ;;  %v9282_v58 = vld [vmem:[%s14265_s1 + $0x580] ss:$16 sps:$4 sm:$0xff]  }
  0x3a   :  { %v9287_v57 = vld [vmem:[%s14265_s1 + $0x784] ss:$16 sps:$4 sm:$0xff]   ;;  %v9285_v59 = vld [vmem:[%s14265_s1 + $0x780] ss:$16 sps:$4 sm:$0xff]  }
  0x3b   :  { %6344 = vmatpush2.bf16.msra.mxu0 %v9204_v62  ;;  %v9290_v60 = vld [vmem:[%s14265_s1 + $0x564] ss:$16 sps:$4 sm:$0xff]   ;;  %v9288_v62 = vld [vmem:[%s14265_s1 + $0x560] ss:$16 sps:$4 sm:$0xff]  }
  0x3c   :  { %6385 = vmatpush2.bf16.msra.mxu1 %v9205_v63  ;;  %6345 = vmatprep.subr.bf16.mxu0 %v9206_v0  ;;  %v9293_v61 = vld [vmem:[%s14265_s1 + $0x764] ss:$16 sps:$4 sm:$0xff]   ;;  %v9291_v63 = vld [vmem:[%s14265_s1 + $0x760] ss:$16 sps:$4 sm:$0xff]  }
  0x3d   :  { %6386 = vmatprep.subr.bf16.mxu1 %v9208_v1  ;;  %v9296_v0 = vld [vmem:[%s14265_s1 + $0x544] ss:$16 sps:$4 sm:$0xff]  }
  0x3e   :  { %v9299_v1 = vld [vmem:[%s14265_s1 + $0x744] ss:$16 sps:$4 sm:$0xff]  }
  0x3f   :  { %6346 = vmatpush2.bf16.msra.mxu0 %v9210_v2  ;;  %v9294_v2 = vld [vmem:[%s14265_s1 + $0x540] ss:$16 sps:$4 sm:$0xff]  }
  0x40   :  { %6387 = vmatpush2.bf16.msra.mxu1 %v9211_v3  ;;  %6397 = vmatprep.subr.bf16.mxu0 %v9218_v4  ;;  %v9297_v3 = vld [vmem:[%s14265_s1 + $0x740] ss:$16 sps:$4 sm:$0xff]   ;;  %v9302_v4 = vld [vmem:[%s14265_s1 + $0x524] ss:$16 sps:$4 sm:$0xff]  }
  0x41   :  { %6438 = vmatprep.subr.bf16.mxu1 %v9221_v5  ;;  %v9305_v5 = vld [vmem:[%s14265_s1 + $0x724] ss:$16 sps:$4 sm:$0xff]  }
  0x42   :  { %6348 = vmatmul.mubr.bf16.vlgmr.msra.gmra.mxu0 %v10957_v6 }
  0x43   :  { %6389 = vmatmul.mubr.bf16.vlgmr.msra.gmra.mxu1 %v10959_v7  ;;  %6398 = vmatpush1.bf16.msra.mxu0 %v9216_v8  ;;  %v9300_v8 = vld [vmem:[%s14265_s1 + $0x520] ss:$16 sps:$4 sm:$0xff]  }
  0x44   :  { %6439 = vmatpush1.bf16.msra.mxu1 %v9219_v9  ;;  %6399 = vmatprep.subr.bf16.mxu0 %v9224_v10  ;;  %v9303_v9 = vld [vmem:[%s14265_s1 + $0x720] ss:$16 sps:$4 sm:$0xff]   ;;  %v9308_v10 = vld [vmem:[%s14265_s1 + $0x504] ss:$16 sps:$4 sm:$0xff]  }
  0x45   :  { %6440 = vmatprep.subr.bf16.mxu1 %v9227_v11  ;;  %6429 = vmatprep.mubr.bf16.mxu0 %v11053_v36  ;;  %v9311_v11 = vld [vmem:[%s14265_s1 + $0x704] ss:$16 sps:$4 sm:$0xff]  }
  0x46   :  { %6470 = vmatprep.mubr.bf16.mxu1 %v11057_v37 }
  0x47   :  { %6400 = vmatpush1.bf16.msra.mxu0 %v9222_v12  ;;  %v9306_v12 = vld [vmem:[%s14265_s1 + $0x500] ss:$16 sps:$4 sm:$0xff]  }
  0x48   :  { %6441 = vmatpush1.bf16.msra.mxu1 %v9225_v13  ;;  %6401 = vmatprep.subr.bf16.mxu0 %v9230_v14  ;;  %v9309_v13 = vld [vmem:[%s14265_s1 + $0x700] ss:$16 sps:$4 sm:$0xff]   ;;  %v9318_v14 = vld [vmem:[%s14265_s1 + $0x8e4] ss:$16 sps:$4 sm:$0xff]  }
  0x49   :  { %6442 = vmatprep.subr.bf16.mxu1 %v9233_v15  ;;  %v9321_v15 = vld [vmem:[%s14265_s1 + $0xae4] ss:$16 sps:$4 sm:$0xff]  }
  0x4b   :  { %6402 = vmatpush1.bf16.msra.mxu0 %v9228_v16  ;;  %v11177_v16 = vcombine.low %v11038_v32, %v11038_v32  ;;  %v9336_v32 = vld [vmem:[%s14265_s1 + $0x884] ss:$16 sps:$4 sm:$0xff]  }
  0x4c   :  { %6443 = vmatpush1.bf16.msra.mxu1 %v9231_v17  ;;  %6403 = vmatprep.subr.bf16.mxu0 %v9236_v18  ;;  %v11181_v17 = vcombine.low %v11043_v33, %v11043_v33  ;;  %v9316_v18 = vld [vmem:[%s14265_s1 + $0x8e0] ss:$16 sps:$4 sm:$0xff]   ;;  %v9339_v33 = vld [vmem:[%s14265_s1 + $0xa84] ss:$16 sps:$4 sm:$0xff]  }
  0x4d   :  { %6444 = vmatprep.subr.bf16.mxu1 %v9239_v19  ;;  %v9319_v19 = vld [vmem:[%s14265_s1 + $0xae0] ss:$16 sps:$4 sm:$0xff]  }
  0x4f   :  { %6404 = vmatpush1.bf16.msra.mxu0 %v9234_v20  ;;  %v9324_v20 = vld [vmem:[%s14265_s1 + $0x8c4] ss:$16 sps:$4 sm:$0xff]  }
  0x50   :  { %6445 = vmatpush1.bf16.msra.mxu1 %v9237_v21  ;;  %6405 = vmatprep.subr.bf16.mxu0 %v9242_v22  ;;  %v9327_v21 = vld [vmem:[%s14265_s1 + $0xac4] ss:$16 sps:$4 sm:$0xff]  }
  0x51   :  { %6446 = vmatprep.subr.bf16.mxu1 %v9245_v23  ;;  %v11198_v22 = vld [vmem:[%s14266_s0 + $0x20] sm:$0xff]  ;;  %v11203_v23 = vld [vmem:[%s14266_s0 + $0x28] sm:$0xff] }
  0x53   :  { %6406 = vmatpush1.bf16.msra.mxu0 %v9240_v24  ;;  %v11207_v24 = vcombine.high %v11198_v22, %v11198_v22 }
  0x54   :  { %6447 = vmatpush1.bf16.msra.mxu1 %v9243_v25  ;;  %6407 = vmatprep.subr.bf16.mxu0 %v9248_v26  ;;  %v11211_v25 = vcombine.high %v11203_v23, %v11203_v23  ;;  %v9322_v26 = vld [vmem:[%s14265_s1 + $0x8c0] ss:$16 sps:$4 sm:$0xff]  }
  0x55   :  { %6448 = vmatprep.subr.bf16.mxu1 %v9251_v27  ;;  %v9325_v27 = vld [vmem:[%s14265_s1 + $0xac0] ss:$16 sps:$4 sm:$0xff]  }
  0x57   :  { %6408 = vmatpush1.bf16.msra.mxu0 %v9246_v28  ;;  %v9330_v28 = vld [vmem:[%s14265_s1 + $0x8a4] ss:$16 sps:$4 sm:$0xff]  }
  0x58   :  { %6449 = vmatpush1.bf16.msra.mxu1 %v9249_v29  ;;  %6409 = vmatprep.subr.bf16.mxu0 %v9254_v30  ;;  %v9333_v29 = vld [vmem:[%s14265_s1 + $0xaa4] ss:$16 sps:$4 sm:$0xff]   ;;  %v9328_v30 = vld [vmem:[%s14265_s1 + $0x8a0] ss:$16 sps:$4 sm:$0xff]  }
  0x59   :  { %6450 = vmatprep.subr.bf16.mxu1 %v9257_v31  ;;  %v9331_v31 = vld [vmem:[%s14265_s1 + $0xaa0] ss:$16 sps:$4 sm:$0xff]  }
  0x5b   :  { %6410 = vmatpush1.bf16.msra.mxu0 %v9252_v34  ;;  %v9334_v34 = vld [vmem:[%s14265_s1 + $0x880] ss:$16 sps:$4 sm:$0xff]  }
  0x5c   :  { %6451 = vmatpush1.bf16.msra.mxu1 %v9255_v35  ;;  %6411 = vmatprep.subr.bf16.mxu0 %v9260_v38  ;;  %v9337_v35 = vld [vmem:[%s14265_s1 + $0xa80] ss:$16 sps:$4 sm:$0xff]   ;;  %v9342_v38 = vld [vmem:[%s14265_s1 + $0x864] ss:$16 sps:$4 sm:$0xff]  }
  0x5d   :  { %6452 = vmatprep.subr.bf16.mxu1 %v9263_v39  ;;  %v9345_v39 = vld [vmem:[%s14265_s1 + $0xa64] ss:$16 sps:$4 sm:$0xff]  }
  0x5f   :  { %6412 = vmatpush1.bf16.msra.mxu0 %v9258_v40  ;;  %v9340_v40 = vld [vmem:[%s14265_s1 + $0x860] ss:$16 sps:$4 sm:$0xff]  }
  0x60   :  { %6453 = vmatpush1.bf16.msra.mxu1 %v9261_v41  ;;  %6413 = vmatprep.subr.bf16.mxu0 %v9266_v42  ;;  %v9343_v41 = vld [vmem:[%s14265_s1 + $0xa60] ss:$16 sps:$4 sm:$0xff]   ;;  %v9348_v42 = vld [vmem:[%s14265_s1 + $0x844] ss:$16 sps:$4 sm:$0xff]  }
  0x61   :  { %6454 = vmatprep.subr.bf16.mxu1 %v9269_v43  ;;  %v9351_v43 = vld [vmem:[%s14265_s1 + $0xa44] ss:$16 sps:$4 sm:$0xff]  }
  0x63   :  { %6414 = vmatpush2.bf16.msra.mxu0 %v9264_v44  ;;  %v9346_v44 = vld [vmem:[%s14265_s1 + $0x840] ss:$16 sps:$4 sm:$0xff]  }
  0x64   :  { %6455 = vmatpush2.bf16.msra.mxu1 %v9267_v45  ;;  %6415 = vmatprep.subr.bf16.mxu0 %v9272_v46  ;;  %v9349_v45 = vld [vmem:[%s14265_s1 + $0xa40] ss:$16 sps:$4 sm:$0xff]   ;;  %v9354_v46 = vld [vmem:[%s14265_s1 + $0x824] ss:$16 sps:$4 sm:$0xff]  }
  0x65   :  { %6456 = vmatprep.subr.bf16.mxu1 %v9275_v48  ;;  %v9357_v48 = vld [vmem:[%s14265_s1 + $0xa24] ss:$16 sps:$4 sm:$0xff]  }
  0x67   :  { %6416 = vmatpush2.bf16.msra.mxu0 %v9270_v49  ;;  %v9352_v49 = vld [vmem:[%s14265_s1 + $0x820] ss:$16 sps:$4 sm:$0xff]  }
  0x68   :  { %6457 = vmatpush2.bf16.msra.mxu1 %v9273_v50  ;;  %6417 = vmatprep.subr.bf16.mxu0 %v9278_v52  ;;  %v9355_v50 = vld [vmem:[%s14265_s1 + $0xa20] ss:$16 sps:$4 sm:$0xff]   ;;  %v9360_v52 = vld [vmem:[%s14265_s1 + $0x804] ss:$16 sps:$4 sm:$0xff]  }
  0x69   :  { %6458 = vmatprep.subr.bf16.mxu1 %v9281_v53  ;;  %v9363_v53 = vld [vmem:[%s14265_s1 + $0xa04] ss:$16 sps:$4 sm:$0xff]  }
  0x6b   :  { %6418 = vmatpush2.bf16.msra.mxu0 %v9276_v54  ;;  %v9358_v54 = vld [vmem:[%s14265_s1 + $0x800] ss:$16 sps:$4 sm:$0xff]  }
  0x6c   :  { %6459 = vmatpush2.bf16.msra.mxu1 %v9279_v55  ;;  %6419 = vmatprep.subr.bf16.mxu0 %v9284_v56  ;;  %v9361_v55 = vld [vmem:[%s14265_s1 + $0xa00] ss:$16 sps:$4 sm:$0xff]   ;;  %v9366_v56 = vld [vmem:[%s14265_s1 + $0x9e4] ss:$16 sps:$4 sm:$0xff]  }
  0x6d   :  { %6460 = vmatprep.subr.bf16.mxu1 %v9287_v57  ;;  %v9369_v57 = vld [vmem:[%s14265_s1 + $0xbe4] ss:$16 sps:$4 sm:$0xff]  }
  0x6f   :  { %6420 = vmatpush2.bf16.msra.mxu0 %v9282_v58  ;;  %v9364_v58 = vld [vmem:[%s14265_s1 + $0x9e0] ss:$16 sps:$4 sm:$0xff]  }
  0x70   :  { %6461 = vmatpush2.bf16.msra.mxu1 %v9285_v59  ;;  %6421 = vmatprep.subr.bf16.mxu0 %v9290_v60  ;;  %v9367_v59 = vld [vmem:[%s14265_s1 + $0xbe0] ss:$16 sps:$4 sm:$0xff]   ;;  %v9372_v60 = vld [vmem:[%s14265_s1 + $0x9c4] ss:$16 sps:$4 sm:$0xff]  }
  0x71   :  { %6462 = vmatprep.subr.bf16.mxu1 %v9293_v61  ;;  %v9375_v61 = vld [vmem:[%s14265_s1 + $0xbc4] ss:$16 sps:$4 sm:$0xff]  }
  0x73   :  { %6422 = vmatpush2.bf16.msra.mxu0 %v9288_v62  ;;  %v9370_v62 = vld [vmem:[%s14265_s1 + $0x9c0] ss:$16 sps:$4 sm:$0xff]  }
  0x74   :  { %6463 = vmatpush2.bf16.msra.mxu1 %v9291_v63  ;;  %6423 = vmatprep.subr.bf16.mxu0 %v9296_v0  ;;  %v9373_v63 = vld [vmem:[%s14265_s1 + $0xbc0] ss:$16 sps:$4 sm:$0xff]   ;;  %v9378_v0 = vld [vmem:[%s14265_s1 + $0x9a4] ss:$16 sps:$4 sm:$0xff]  }
  0x75   :  { %6464 = vmatprep.subr.bf16.mxu1 %v9299_v1  ;;  %v9381_v1 = vld [vmem:[%s14265_s1 + $0xba4] ss:$16 sps:$4 sm:$0xff]  }
  0x77   :  { %6424 = vmatpush2.bf16.msra.mxu0 %v9294_v2  ;;  %v9376_v2 = vld [vmem:[%s14265_s1 + $0x9a0] ss:$16 sps:$4 sm:$0xff]  }
  0x78   :  { %6465 = vmatpush2.bf16.msra.mxu1 %v9297_v3  ;;  %6425 = vmatprep.subr.bf16.mxu0 %v9302_v4  ;;  %v9379_v3 = vld [vmem:[%s14265_s1 + $0xba0] ss:$16 sps:$4 sm:$0xff]   ;;  %v9384_v4 = vld [vmem:[%s14265_s1 + $0x984] ss:$16 sps:$4 sm:$0xff]  }
  0x79   :  { %6466 = vmatprep.subr.bf16.mxu1 %v9305_v5  ;;  %v9387_v5 = vld [vmem:[%s14265_s1 + $0xb84] ss:$16 sps:$4 sm:$0xff]  }
  0x7b   :  { %6426 = vmatpush2.bf16.msra.mxu0 %v9300_v8  ;;  %v9382_v8 = vld [vmem:[%s14265_s1 + $0x980] ss:$16 sps:$4 sm:$0xff]  }
  0x7c   :  { %6467 = vmatpush2.bf16.msra.mxu1 %v9303_v9  ;;  %6427 = vmatprep.subr.bf16.mxu0 %v9308_v10  ;;  %v9385_v9 = vld [vmem:[%s14265_s1 + $0xb80] ss:$16 sps:$4 sm:$0xff]   ;;  %v9390_v10 = vld [vmem:[%s14265_s1 + $0x964] ss:$16 sps:$4 sm:$0xff]  }
  0x7d   :  { %6468 = vmatprep.subr.bf16.mxu1 %v9311_v11  ;;  %v9393_v11 = vld [vmem:[%s14265_s1 + $0xb64] ss:$16 sps:$4 sm:$0xff]  }
  0x7f   :  { %6428 = vmatpush2.bf16.msra.mxu0 %v9306_v12  ;;  %v9388_v12 = vld [vmem:[%s14265_s1 + $0x960] ss:$16 sps:$4 sm:$0xff]  }
  0x80   :  { %6469 = vmatpush2.bf16.msra.mxu1 %v9309_v13  ;;  %6479 = vmatprep.subr.bf16.mxu0 %v9318_v14  ;;  %v9391_v13 = vld [vmem:[%s14265_s1 + $0xb60] ss:$16 sps:$4 sm:$0xff]   ;;  %v9396_v14 = vld [vmem:[%s14265_s1 + $0x944] ss:$16 sps:$4 sm:$0xff]  }
  0x81   :  { %6520 = vmatprep.subr.bf16.mxu1 %v9321_v15  ;;  %v9399_v15 = vld [vmem:[%s14265_s1 + $0xb44] ss:$16 sps:$4 sm:$0xff]  }
  0x82   :  { %6430 = vmatmul.mubr.bf16.vlgmr.msra.gmra.mxu0 %v11177_v16 }
  0x83   :  { %6471 = vmatmul.mubr.bf16.vlgmr.msra.gmra.mxu1 %v11181_v17  ;;  %6480 = vmatpush1.bf16.msra.mxu0 %v9316_v18  ;;  %v9394_v18 = vld [vmem:[%s14265_s1 + $0x940] ss:$16 sps:$4 sm:$0xff]  }
  0x84   :  { %6521 = vmatpush1.bf16.msra.mxu1 %v9319_v19  ;;  %6481 = vmatprep.subr.bf16.mxu0 %v9324_v20  ;;  %v9397_v19 = vld [vmem:[%s14265_s1 + $0xb40] ss:$16 sps:$4 sm:$0xff]   ;;  %v9402_v20 = vld [vmem:[%s14265_s1 + $0x924] ss:$16 sps:$4 sm:$0xff]  }
  0x85   :  { %6522 = vmatprep.subr.bf16.mxu1 %v9327_v21  ;;  %6511 = vmatprep.mubr.bf16.mxu0 %v11207_v24  ;;  %v9405_v21 = vld [vmem:[%s14265_s1 + $0xb24] ss:$16 sps:$4 sm:$0xff]  }
  0x86   :  { %6552 = vmatprep.mubr.bf16.mxu1 %v11211_v25 }
  0x87   :  { %6482 = vmatpush1.bf16.msra.mxu0 %v9322_v26  ;;  %v9400_v26 = vld [vmem:[%s14265_s1 + $0x920] ss:$16 sps:$4 sm:$0xff]  }
  0x88   :  { %6523 = vmatpush1.bf16.msra.mxu1 %v9325_v27  ;;  %6483 = vmatprep.subr.bf16.mxu0 %v9330_v28  ;;  %v9403_v27 = vld [vmem:[%s14265_s1 + $0xb20] ss:$16 sps:$4 sm:$0xff]   ;;  %v9408_v28 = vld [vmem:[%s14265_s1 + $0x904] ss:$16 sps:$4 sm:$0xff]  }
  0x89   :  { %6524 = vmatprep.subr.bf16.mxu1 %v9333_v29  ;;  %v9411_v29 = vld [vmem:[%s14265_s1 + $0xb04] ss:$16 sps:$4 sm:$0xff]  }
  0x8b   :  { %6484 = vmatpush1.bf16.msra.mxu0 %v9328_v30  ;;  %v9406_v30 = vld [vmem:[%s14265_s1 + $0x900] ss:$16 sps:$4 sm:$0xff]  }
  0x8c   :  { %6525 = vmatpush1.bf16.msra.mxu1 %v9331_v31  ;;  %6485 = vmatprep.subr.bf16.mxu0 %v9336_v32  ;;  %v9409_v31 = vld [vmem:[%s14265_s1 + $0xb00] ss:$16 sps:$4 sm:$0xff]   ;;  %v9418_v32 = vld [vmem:[%s14265_s1 + $0xce4] ss:$16 sps:$4 sm:$0xff]  }
  0x8d   :  { %6526 = vmatprep.subr.bf16.mxu1 %v9339_v33  ;;  %v9421_v33 = vld [vmem:[%s14265_s1 + $0xee4] ss:$16 sps:$4 sm:$0xff]  }
  0x8f   :  { %6486 = vmatpush1.bf16.msra.mxu0 %v9334_v34  ;;  %v9416_v34 = vld [vmem:[%s14265_s1 + $0xce0] ss:$16 sps:$4 sm:$0xff]  }
  0x90   :  { %6527 = vmatpush1.bf16.msra.mxu1 %v9337_v35  ;;  %6487 = vmatprep.subr.bf16.mxu0 %v9342_v38  ;;  %v11403_v35 = vld [vmem:[%s14266_s0 + $0x30] sm:$0xff]  ;;  %v11407_v38 = vcombine.low %v11198_v22, %v11198_v22 }
  0x91   :  { %6528 = vmatprep.subr.bf16.mxu1 %v9345_v39  ;;  %v11411_v39 = vcombine.low %v11203_v23, %v11203_v23  ;;  %v9424_v22 = vld [vmem:[%s14265_s1 + $0xcc4] ss:$16 sps:$4 sm:$0xff]  }
  0x92   :  { %v9427_v23 = vld [vmem:[%s14265_s1 + $0xec4] ss:$16 sps:$4 sm:$0xff]  }
  0x93   :  { %6488 = vmatpush1.bf16.msra.mxu0 %v9340_v40  ;;  %v11416_v40 = vld [vmem:[%s14266_s0 + $0x38] sm:$0xff] }
  0x94   :  { %6529 = vmatpush1.bf16.msra.mxu1 %v9343_v41  ;;  %6489 = vmatprep.subr.bf16.mxu0 %v9348_v42  ;;  %v9419_v41 = vld [vmem:[%s14265_s1 + $0xee0] ss:$16 sps:$4 sm:$0xff]   ;;  %v11429_v42 = vcombine.high %v11403_v35, %v11403_v35 }
  0x95   :  { %6530 = vmatprep.subr.bf16.mxu1 %v9351_v43  ;;  %v11433_v43 = vcombine.high %v11416_v40, %v11416_v40 }
  0x97   :  { %6490 = vmatpush1.bf16.msra.mxu0 %v9346_v44  ;;  %v9422_v44 = vld [vmem:[%s14265_s1 + $0xcc0] ss:$16 sps:$4 sm:$0xff]  }
  0x98   :  { %6531 = vmatpush1.bf16.msra.mxu1 %v9349_v45  ;;  %6491 = vmatprep.subr.bf16.mxu0 %v9354_v46  ;;  %v9425_v45 = vld [vmem:[%s14265_s1 + $0xec0] ss:$16 sps:$4 sm:$0xff]   ;;  %v9430_v46 = vld [vmem:[%s14265_s1 + $0xca4] ss:$16 sps:$4 sm:$0xff]  }
  0x99   :  { %6532 = vmatprep.subr.bf16.mxu1 %v9357_v48  ;;  %v9433_v48 = vld [vmem:[%s14265_s1 + $0xea4] ss:$16 sps:$4 sm:$0xff]  }
  0x9b   :  { %6492 = vmatpush1.bf16.msra.mxu0 %v9352_v49  ;;  %v9428_v49 = vld [vmem:[%s14265_s1 + $0xca0] ss:$16 sps:$4 sm:$0xff]  }
  0x9c   :  { %6533 = vmatpush1.bf16.msra.mxu1 %v9355_v50  ;;  %6493 = vmatprep.subr.bf16.mxu0 %v9360_v52  ;;  %v9431_v50 = vld [vmem:[%s14265_s1 + $0xea0] ss:$16 sps:$4 sm:$0xff]   ;;  %v9436_v52 = vld [vmem:[%s14265_s1 + $0xc84] ss:$16 sps:$4 sm:$0xff]  }
  0x9d   :  { %6534 = vmatprep.subr.bf16.mxu1 %v9363_v53  ;;  %v9439_v53 = vld [vmem:[%s14265_s1 + $0xe84] ss:$16 sps:$4 sm:$0xff]  }
  0x9f   :  { %6494 = vmatpush1.bf16.msra.mxu0 %v9358_v54  ;;  %v9434_v54 = vld [vmem:[%s14265_s1 + $0xc80] ss:$16 sps:$4 sm:$0xff]  }
  0xa0   :  { %6535 = vmatpush1.bf16.msra.mxu1 %v9361_v55  ;;  %6495 = vmatprep.subr.bf16.mxu0 %v9366_v56  ;;  %v9437_v55 = vld [vmem:[%s14265_s1 + $0xe80] ss:$16 sps:$4 sm:$0xff]   ;;  %v9442_v56 = vld [vmem:[%s14265_s1 + $0xc64] ss:$16 sps:$4 sm:$0xff]  }
  0xa1   :  { %6536 = vmatprep.subr.bf16.mxu1 %v9369_v57  ;;  %v9445_v57 = vld [vmem:[%s14265_s1 + $0xe64] ss:$16 sps:$4 sm:$0xff]  }
  0xa3   :  { %6496 = vmatpush2.bf16.msra.mxu0 %v9364_v58  ;;  %v9440_v58 = vld [vmem:[%s14265_s1 + $0xc60] ss:$16 sps:$4 sm:$0xff]  }
  0xa4   :  { %6537 = vmatpush2.bf16.msra.mxu1 %v9367_v59  ;;  %6497 = vmatprep.subr.bf16.mxu0 %v9372_v60  ;;  %v9443_v59 = vld [vmem:[%s14265_s1 + $0xe60] ss:$16 sps:$4 sm:$0xff]   ;;  %v9448_v60 = vld [vmem:[%s14265_s1 + $0xc44] ss:$16 sps:$4 sm:$0xff]  }
  0xa5   :  { %6538 = vmatprep.subr.bf16.mxu1 %v9375_v61  ;;  %v9451_v61 = vld [vmem:[%s14265_s1 + $0xe44] ss:$16 sps:$4 sm:$0xff]  }
  0xa7   :  { %6498 = vmatpush2.bf16.msra.mxu0 %v9370_v62  ;;  %v9446_v62 = vld [vmem:[%s14265_s1 + $0xc40] ss:$16 sps:$4 sm:$0xff]  }
  0xa8   :  { %6539 = vmatpush2.bf16.msra.mxu1 %v9373_v63  ;;  %6499 = vmatprep.subr.bf16.mxu0 %v9378_v0  ;;  %v9449_v63 = vld [vmem:[%s14265_s1 + $0xe40] ss:$16 sps:$4 sm:$0xff]   ;;  %v9454_v0 = vld [vmem:[%s14265_s1 + $0xc24] ss:$16 sps:$4 sm:$0xff]  }
  0xa9   :  { %6540 = vmatprep.subr.bf16.mxu1 %v9381_v1  ;;  %v9457_v1 = vld [vmem:[%s14265_s1 + $0xe24] ss:$16 sps:$4 sm:$0xff]  }
  0xab   :  { %6500 = vmatpush2.bf16.msra.mxu0 %v9376_v2  ;;  %v9452_v2 = vld [vmem:[%s14265_s1 + $0xc20] ss:$16 sps:$4 sm:$0xff]  }
  0xac   :  { %6541 = vmatpush2.bf16.msra.mxu1 %v9379_v3  ;;  %6501 = vmatprep.subr.bf16.mxu0 %v9384_v4  ;;  %v9455_v3 = vld [vmem:[%s14265_s1 + $0xe20] ss:$16 sps:$4 sm:$0xff]   ;;  %v9460_v4 = vld [vmem:[%s14265_s1 + $0xc04] ss:$16 sps:$4 sm:$0xff]  }
  0xad   :  { %6542 = vmatprep.subr.bf16.mxu1 %v9387_v5  ;;  %v9463_v5 = vld [vmem:[%s14265_s1 + $0xe04] ss:$16 sps:$4 sm:$0xff]  }
  0xaf   :  { %6502 = vmatpush2.bf16.msra.mxu0 %v9382_v8  ;;  %v9458_v8 = vld [vmem:[%s14265_s1 + $0xc00] ss:$16 sps:$4 sm:$0xff]  }
  0xb0   :  { %6543 = vmatpush2.bf16.msra.mxu1 %v9385_v9  ;;  %6503 = vmatprep.subr.bf16.mxu0 %v9390_v10  ;;  %v9461_v9 = vld [vmem:[%s14265_s1 + $0xe00] ss:$16 sps:$4 sm:$0xff]   ;;  %v9466_v10 = vld [vmem:[%s14265_s1 + $0xde4] ss:$16 sps:$4 sm:$0xff]  }
  0xb1   :  { %6544 = vmatprep.subr.bf16.mxu1 %v9393_v11  ;;  %v9469_v11 = vld [vmem:[%s14265_s1 + $0xfe4] ss:$16 sps:$4 sm:$0xff]  }
  0xb3   :  { %6504 = vmatpush2.bf16.msra.mxu0 %v9388_v12  ;;  %v9464_v12 = vld [vmem:[%s14265_s1 + $0xde0] ss:$16 sps:$4 sm:$0xff]  }
  0xb4   :  { %6545 = vmatpush2.bf16.msra.mxu1 %v9391_v13  ;;  %6505 = vmatprep.subr.bf16.mxu0 %v9396_v14  ;;  %v9467_v13 = vld [vmem:[%s14265_s1 + $0xfe0] ss:$16 sps:$4 sm:$0xff]   ;;  %v9472_v14 = vld [vmem:[%s14265_s1 + $0xdc4] ss:$16 sps:$4 sm:$0xff]  }
  0xb5   :  { %6546 = vmatprep.subr.bf16.mxu1 %v9399_v15  ;;  %v9475_v15 = vld [vmem:[%s14265_s1 + $0xfc4] ss:$16 sps:$4 sm:$0xff]  }
  0xb7   :  { %6506 = vmatpush2.bf16.msra.mxu0 %v9394_v18  ;;  %v9470_v18 = vld [vmem:[%s14265_s1 + $0xdc0] ss:$16 sps:$4 sm:$0xff]  }
  0xb8   :  { %6547 = vmatpush2.bf16.msra.mxu1 %v9397_v19  ;;  %6507 = vmatprep.subr.bf16.mxu0 %v9402_v20  ;;  %v9473_v19 = vld [vmem:[%s14265_s1 + $0xfc0] ss:$16 sps:$4 sm:$0xff]   ;;  %v9478_v20 = vld [vmem:[%s14265_s1 + $0xda4] ss:$16 sps:$4 sm:$0xff]  }
  0xb9   :  { %6548 = vmatprep.subr.bf16.mxu1 %v9405_v21  ;;  %v9481_v21 = vld [vmem:[%s14265_s1 + $0xfa4] ss:$16 sps:$4 sm:$0xff]  }
  0xbb   :  { %6508 = vmatpush2.bf16.msra.mxu0 %v9400_v26  ;;  %v9476_v26 = vld [vmem:[%s14265_s1 + $0xda0] ss:$16 sps:$4 sm:$0xff]  }
  0xbc   :  { %6549 = vmatpush2.bf16.msra.mxu1 %v9403_v27  ;;  %6509 = vmatprep.subr.bf16.mxu0 %v9408_v28  ;;  %v9479_v27 = vld [vmem:[%s14265_s1 + $0xfa0] ss:$16 sps:$4 sm:$0xff]   ;;  %v9484_v28 = vld [vmem:[%s14265_s1 + $0xd84] ss:$16 sps:$4 sm:$0xff]  }
  0xbd   :  { %6550 = vmatprep.subr.bf16.mxu1 %v9411_v29  ;;  %v9487_v29 = vld [vmem:[%s14265_s1 + $0xf84] ss:$16 sps:$4 sm:$0xff]  }
  0xbf   :  { %6510 = vmatpush2.bf16.msra.mxu0 %v9406_v30  ;;  %v9482_v30 = vld [vmem:[%s14265_s1 + $0xd80] ss:$16 sps:$4 sm:$0xff]  }
  0xc0   :  { %6551 = vmatpush2.bf16.msra.mxu1 %v9409_v31  ;;  %6561 = vmatprep.subr.bf16.mxu0 %v9418_v32  ;;  %v9485_v31 = vld [vmem:[%s14265_s1 + $0xf80] ss:$16 sps:$4 sm:$0xff]   ;;  %v9490_v32 = vld [vmem:[%s14265_s1 + $0xd64] ss:$16 sps:$4 sm:$0xff]  }
  0xc1   :  { %6602 = vmatprep.subr.bf16.mxu1 %v9421_v33  ;;  %v9493_v33 = vld [vmem:[%s14265_s1 + $0xf64] ss:$16 sps:$4 sm:$0xff]  }
  0xc2   :  { %6512 = vmatmul.mubr.bf16.vlgmr.msra.gmra.mxu0 %v11407_v38 }
  0xc3   :  { %6553 = vmatmul.mubr.bf16.vlgmr.msra.gmra.mxu1 %v11411_v39  ;;  %6562 = vmatpush1.bf16.msra.mxu0 %v9416_v34  ;;  %v9488_v34 = vld [vmem:[%s14265_s1 + $0xd60] ss:$16 sps:$4 sm:$0xff]  }
  0xc4   :  { %6603 = vmatpush1.bf16.msra.mxu1 %v9419_v41  ;;  %6563 = vmatprep.subr.bf16.mxu0 %v9424_v22  ;;  %v9491_v41 = vld [vmem:[%s14265_s1 + $0xf60] ss:$16 sps:$4 sm:$0xff]   ;;  %v9496_v22 = vld [vmem:[%s14265_s1 + $0xd44] ss:$16 sps:$4 sm:$0xff]  }
  0xc5   :  { %6604 = vmatprep.subr.bf16.mxu1 %v9427_v23  ;;  %6593 = vmatprep.mubr.bf16.mxu0 %v11429_v42  ;;  %v9499_v23 = vld [vmem:[%s14265_s1 + $0xf44] ss:$16 sps:$4 sm:$0xff]  }
  0xc6   :  { %6634 = vmatprep.mubr.bf16.mxu1 %v11433_v43 }
  0xc7   :  { %6564 = vmatpush1.bf16.msra.mxu0 %v9422_v44  ;;  %v9494_v44 = vld [vmem:[%s14265_s1 + $0xd40] ss:$16 sps:$4 sm:$0xff]  }
  0xc8   :  { %6605 = vmatpush1.bf16.msra.mxu1 %v9425_v45  ;;  %6565 = vmatprep.subr.bf16.mxu0 %v9430_v46  ;;  %v9497_v45 = vld [vmem:[%s14265_s1 + $0xf40] ss:$16 sps:$4 sm:$0xff]   ;;  %v9502_v46 = vld [vmem:[%s14265_s1 + $0xd24] ss:$16 sps:$4 sm:$0xff]  }
  0xc9   :  { %6606 = vmatprep.subr.bf16.mxu1 %v9433_v48  ;;  %v1063_v48 = vlaneseq }
  0xcb   :  { %6566 = vmatpush1.bf16.msra.mxu0 %v9428_v49  ;;  %v9505_v49 = vld [vmem:[%s14265_s1 + $0xf24] ss:$16 sps:$4 sm:$0xff]  }
  0xcc   :  { %6607 = vmatpush1.bf16.msra.mxu1 %v9431_v50  ;;  %6567 = vmatprep.subr.bf16.mxu0 %v9436_v52  ;;  %v9500_v50 = vld [vmem:[%s14265_s1 + $0xd20] ss:$16 sps:$4 sm:$0xff]  }
  0xcd   :  { %6608 = vmatprep.subr.bf16.mxu1 %v9439_v53  ;;  %v9503_v52 = vld [vmem:[%s14265_s1 + $0xf20] ss:$16 sps:$4 sm:$0xff]   ;;  %v9508_v53 = vld [vmem:[%s14265_s1 + $0xd04] ss:$16 sps:$4 sm:$0xff]  }
  0xcf   :  { %6568 = vmatpush1.bf16.msra.mxu0 %v9434_v54  ;;  %v11604_v54 = vshrl.u32 %v1063_v48, 7  ;;  %v9540_v48 = vld [vmem:[%s14265_s1 + $0x1060] ss:$16 sps:$4 sm:$0xff]  }
  0xd0   :  { %6609 = vmatpush1.bf16.msra.mxu1 %v9437_v55  ;;  %6569 = vmatprep.subr.bf16.mxu0 %v9442_v56  ;;  %v9511_v55 = vld [vmem:[%s14265_s1 + $0xf04] ss:$16 sps:$4 sm:$0xff]   ;;  %v9506_v56 = vld [vmem:[%s14265_s1 + $0xd00] ss:$16 sps:$4 sm:$0xff]  }
  0xd1   :  { %6610 = vmatprep.subr.bf16.mxu1 %v9445_v57  ;;  %v9509_v57 = vld [vmem:[%s14265_s1 + $0xf00] ss:$16 sps:$4 sm:$0xff]  }
  0xd3   :  { %6570 = vmatpush1.bf16.msra.mxu0 %v9440_v58  ;;  %v1061_v58 = vld [vmem:[%s14267_s2] sm:$0xf] }
  0xd4   :  { %6611 = vmatpush1.bf16.msra.mxu1 %v9443_v59  ;;  %6571 = vmatprep.subr.bf16.mxu0 %v9448_v60  ;;  %v1065_v59 = vsub.s32 0, %v11604_v54  ;;  %v9518_v60 = vld [vmem:[%s14265_s1 + $0x10e4] ss:$16 sps:$4 sm:$0xff]  }
  0xd5   :  { %6612 = vmatprep.subr.bf16.mxu1 %v9451_v61  ;;  %v9521_v61 = vld [vmem:[%s14265_s1 + $0x12e4] ss:$16 sps:$4 sm:$0xff]  }
  0xd7   :  { %6572 = vmatpush1.bf16.msra.mxu0 %v9446_v62  ;;  %v9516_v62 = vld [vmem:[%s14265_s1 + $0x10e0] ss:$16 sps:$4 sm:$0xff]  }
  0xd8   :  { %6613 = vmatpush1.bf16.msra.mxu1 %v9449_v63  ;;  %6573 = vmatprep.subr.bf16.mxu0 %v9454_v0  ;;  %v1069_v63 = vsub.s32 1, %v11604_v54  ;;  %v11631_v0 = vcombine.low %v11403_v35, %v11403_v35  ;;  %v9519_v35 = vld [vmem:[%s14265_s1 + $0x12e0] ss:$16 sps:$4 sm:$0xff]  }
  0xd9   :  { %6614 = vmatprep.subr.bf16.mxu1 %v9457_v1  ;;  %v11635_v1 = vcombine.low %v11416_v40, %v11416_v40  ;;  %v9524_v40 = vld [vmem:[%s14265_s1 + $0x10c4] ss:$16 sps:$4 sm:$0xff]  }
  0xdb   :  { %6574 = vmatpush1.bf16.msra.mxu0 %v9452_v2  ;;  %v11640_v2 = vld [vmem:[%s14266_s0 + $0x40] sm:$0xff] }
  0xdc   :  { %6615 = vmatpush1.bf16.msra.mxu1 %v9455_v3  ;;  %6575 = vmatprep.subr.bf16.mxu0 %v9460_v4  ;;  %v11645_v3 = vld [vmem:[%s14266_s0 + $0x48] sm:$0xff]  ;;  %v1066_v4 = vrot.slane %v1061_v58, %v1065_v59  ;;  %v9555_v59 = vld [vmem:[%s14265_s1 + $0x1220] ss:$16 sps:$4 sm:$0xff]  }
  0xdd   :  { %6616 = vmatprep.subr.bf16.mxu1 %v9463_v5  ;;  %v9527_v5 = vld [vmem:[%s14265_s1 + $0x12c4] ss:$16 sps:$4 sm:$0xff]  }
  0xdf   :  { %6576 = vmatpush1.bf16.msra.mxu0 %v9458_v8  ;;  %v1070_v8 = vrot.slane %v1061_v58, %v1069_v63  ;;  %v9552_v58 = vld [vmem:[%s14265_s1 + $0x1020] ss:$16 sps:$4 sm:$0xff]  }
  0xe0   :  { %6617 = vmatpush1.bf16.msra.mxu1 %v9461_v9  ;;  %6577 = vmatprep.subr.bf16.mxu0 %v9466_v10  ;;  %v11658_v9 = vcombine.high %v11640_v2, %v11640_v2  ;;  %v11662_v10 = vcombine.high %v11645_v3, %v11645_v3  ;;  %v9561_v63 = vld [vmem:[%s14265_s1 + $0x1200] ss:$16 sps:$4 sm:$0xff]  }
  0xe1   :  { %6618 = vmatprep.subr.bf16.mxu1 %v9469_v11 }
  0xe3   :  { %6578 = vmatpush2.bf16.msra.mxu0 %v9464_v12 }
  0xe4   :  { %6619 = vmatpush2.bf16.msra.mxu1 %v9467_v13  ;;  %6579 = vmatprep.subr.bf16.mxu0 %v9472_v14  ;;  %v9522_v13 = vld [vmem:[%s14265_s1 + $0x10c0] ss:$16 sps:$4 sm:$0xff]  }
  0xe5   :  { %6620 = vmatprep.subr.bf16.mxu1 %v9475_v15  ;;  %v9525_v15 = vld [vmem:[%s14265_s1 + $0x12c0] ss:$16 sps:$4 sm:$0xff]  }
  0xe7   :  { %6580 = vmatpush2.bf16.msra.mxu0 %v9470_v18 }
  0xe8   :  { %6621 = vmatpush2.bf16.msra.mxu1 %v9473_v19  ;;  %6581 = vmatprep.subr.bf16.mxu0 %v9478_v20  ;;  %v9530_v20 = vld [vmem:[%s14265_s1 + $0x10a4] ss:$16 sps:$4 sm:$0xff]  }
  0xe9   :  { %6622 = vmatprep.subr.bf16.mxu1 %v9481_v21  ;;  %v9533_v21 = vld [vmem:[%s14265_s1 + $0x12a4] ss:$16 sps:$4 sm:$0xff]  }
  0xeb   :  { %6582 = vmatpush2.bf16.msra.mxu0 %v9476_v26 }
  0xec   :  { %6623 = vmatpush2.bf16.msra.mxu1 %v9479_v27  ;;  %6583 = vmatprep.subr.bf16.mxu0 %v9484_v28 }
  0xed   :  { %6624 = vmatprep.subr.bf16.mxu1 %v9487_v29 }
  0xef   :  { %6584 = vmatpush2.bf16.msra.mxu0 %v9482_v30  ;;  %v9528_v30 = vld [vmem:[%s14265_s1 + $0x10a0] ss:$16 sps:$4 sm:$0xff]  }
  0xf0   :  { %6625 = vmatpush2.bf16.msra.mxu1 %v9485_v31  ;;  %6585 = vmatprep.subr.bf16.mxu0 %v9490_v32  ;;  %v9531_v32 = vld [vmem:[%s14265_s1 + $0x12a0] ss:$16 sps:$4 sm:$0xff]  }
  0xf1   :  { %6626 = vmatprep.subr.bf16.mxu1 %v9493_v33 }
  0xf3   :  { %6586 = vmatpush2.bf16.msra.mxu0 %v9488_v34 }
  0xf4   :  { %6627 = vmatpush2.bf16.msra.mxu1 %v9491_v41  ;;  %6587 = vmatprep.subr.bf16.mxu0 %v9496_v22  ;;  %v9536_v41 = vld [vmem:[%s14265_s1 + $0x1084] ss:$16 sps:$4 sm:$0xff]  }
  0xf5   :  { %6628 = vmatprep.subr.bf16.mxu1 %v9499_v23  ;;  %v9539_v22 = vld [vmem:[%s14265_s1 + $0x1284] ss:$16 sps:$4 sm:$0xff]   ;;  %v9534_v23 = vld [vmem:[%s14265_s1 + $0x1080] ss:$16 sps:$4 sm:$0xff]  }
  0xf7   :  { %6588 = vmatpush2.bf16.msra.mxu0 %v9494_v44  ;;  %v9537_v44 = vld [vmem:[%s14265_s1 + $0x1280] ss:$16 sps:$4 sm:$0xff]  }
  0xf8   :  { %6629 = vmatpush2.bf16.msra.mxu1 %v9497_v45  ;;  %6589 = vmatprep.subr.bf16.mxu0 %v9502_v46  ;;  %v9542_v45 = vld [vmem:[%s14265_s1 + $0x1064] ss:$16 sps:$4 sm:$0xff]  }
  0xf9   :  { %6630 = vmatprep.subr.bf16.mxu1 %v9505_v49  ;;  %v9545_v46 = vld [vmem:[%s14265_s1 + $0x1264] ss:$16 sps:$4 sm:$0xff]   ;;  %v9543_v49 = vld [vmem:[%s14265_s1 + $0x1260] ss:$16 sps:$4 sm:$0xff]  }
  0xfb   :  { %6590 = vmatpush2.bf16.msra.mxu0 %v9500_v50  ;;  %v9548_v50 = vld [vmem:[%s14265_s1 + $0x1044] ss:$16 sps:$4 sm:$0xff]  }
  0xfc   :  { %6631 = vmatpush2.bf16.msra.mxu1 %v9503_v52  ;;  %6591 = vmatprep.subr.bf16.mxu0 %v9508_v53  ;;  %v9551_v52 = vld [vmem:[%s14265_s1 + $0x1244] ss:$16 sps:$4 sm:$0xff]   ;;  %v9546_v53 = vld [vmem:[%s14265_s1 + $0x1040] ss:$16 sps:$4 sm:$0xff]  }
  0xfd   :  { %6632 = vmatprep.subr.bf16.mxu1 %v9511_v55  ;;  %v9549_v55 = vld [vmem:[%s14265_s1 + $0x1240] ss:$16 sps:$4 sm:$0xff]  }
  0xff   :  { %6592 = vmatpush2.bf16.msra.mxu0 %v9506_v56  ;;  %v9554_v56 = vld [vmem:[%s14265_s1 + $0x1024] ss:$16 sps:$4 sm:$0xff]  }
 0x100   :  { %6633 = vmatpush2.bf16.msra.mxu1 %v9509_v57  ;;  %6643 = vmatprep.subr.bf16.mxu0 %v9518_v60  ;;  %v9557_v57 = vld [vmem:[%s14265_s1 + $0x1224] ss:$16 sps:$4 sm:$0xff]  }
 0x101   :  { %6684 = vmatprep.subr.bf16.mxu1 %v9521_v61  ;;  %v9560_v60 = vld [vmem:[%s14265_s1 + $0x1004] ss:$16 sps:$4 sm:$0xff]  }
 0x102   :  { %v6349_v11 = vpop.f32.mrf.mxu0  ;;  %6594 = vmatmul.mubr.bf16.vlgmr.msra.gmra.mxu0 %v11631_v0  ;;  %v9563_v61 = vld [vmem:[%s14265_s1 + $0x1204] ss:$16 sps:$4 sm:$0xff]  }
 0x103   :  { %v6390_v12 = vpop.f32.mrf.mxu1  ;;  %6635 = vmatmul.mubr.bf16.vlgmr.msra.gmra.mxu1 %v11635_v1  ;;  %v6350_v14 = vadd.f32 %v6349_v11, %v1066_v4  ;;  %6644 = vmatpush1.bf16.msra.mxu0 %v9516_v62  ;;  %v9558_v62 = vld [vmem:[%s14265_s1 + $0x1000] ss:$16 sps:$4 sm:$0xff]   ;;  %v9566_v4 = vld [vmem:[%s14265_s1 + $0x11e4] ss:$16 sps:$4 sm:$0xff]  }
 0x104   :  { %6685 = vmatpush1.bf16.msra.mxu1 %v9519_v35  ;;  %v6351_v18 = vpop.f32.mrf.mxu0  ;;  %6645 = vmatprep.subr.bf16.mxu0 %v9524_v40  ;;  %v9569_v35 = vld [vmem:[%s14265_s1 + $0x13e4] ss:$16 sps:$4 sm:$0xff]   ;;  %v9564_v40 = vld [vmem:[%s14265_s1 + $0x11e0] ss:$16 sps:$4 sm:$0xff]  }
 0x105   :  { %v6392_v19 = vpop.f32.mrf.mxu1  ;;  %6686 = vmatprep.subr.bf16.mxu1 %v9527_v5  ;;  %v11678_v26 = vadd.f32 %v6390_v12, %v6350_v14  ;;  %v6352_v27 = vadd.f32 %v6351_v18, %v1070_v8  ;;  %6675 = vmatprep.mubr.bf16.mxu0 %v11658_v9  ;;  %v9567_v5 = vld [vmem:[%s14265_s1 + $0x13e0] ss:$16 sps:$4 sm:$0xff]   ;;  %v9572_v8 = vld [vmem:[%s14265_s1 + $0x11c4] ss:$16 sps:$4 sm:$0xff]  }
 0x106   :  { %6716 = vmatprep.mubr.bf16.mxu1 %v11662_v10  ;;  %v6353_v28 = vpop.f32.mrf.mxu0  ;;  %v9575_v11 = vld [vmem:[%s14265_s1 + $0x13c4] ss:$16 sps:$4 sm:$0xff]   ;;  %v9570_v12 = vld [vmem:[%s14265_s1 + $0x11c0] ss:$16 sps:$4 sm:$0xff]  }
 0x107   :  { %v6394_v29 = vpop.f32.mrf.mxu1  ;;  %v11685_v31 = vadd.f32 %v6392_v19, %v6352_v27  ;;  %6646 = vmatpush1.bf16.msra.mxu0 %v9522_v13  ;;  %v9573_v13 = vld [vmem:[%s14265_s1 + $0x13c0] ss:$16 sps:$4 sm:$0xff]   ;;  %v9578_v14 = vld [vmem:[%s14265_s1 + $0x11a4] ss:$16 sps:$4 sm:$0xff]  }
 0x108   :  { %6687 = vmatpush1.bf16.msra.mxu1 %v9525_v15  ;;  %v6354_v33 = vpop.f32.mrf.mxu0  ;;  %6647 = vmatprep.subr.bf16.mxu0 %v9530_v20  ;;  %v9581_v15 = vld [vmem:[%s14265_s1 + $0x13a4] ss:$16 sps:$4 sm:$0xff]   ;;  %v9576_v18 = vld [vmem:[%s14265_s1 + $0x11a0] ss:$16 sps:$4 sm:$0xff]  }
 0x109   :  { %v6395_v34 = vpop.f32.mrf.mxu1  ;;  %6688 = vmatprep.subr.bf16.mxu1 %v9533_v21  ;;  %v9579_v19 = vld [vmem:[%s14265_s1 + $0x13a0] ss:$16 sps:$4 sm:$0xff]   ;;  %v9584_v20 = vld [vmem:[%s14265_s1 + $0x1184] ss:$16 sps:$4 sm:$0xff]  }
 0x10a   :  { %v9587_v21 = vld [vmem:[%s14265_s1 + $0x1384] ss:$16 sps:$4 sm:$0xff]   ;;  %v9582_v27 = vld [vmem:[%s14265_s1 + $0x1180] ss:$16 sps:$4 sm:$0xff]  }
 0x10b   :  { %6648 = vmatpush1.bf16.msra.mxu0 %v9528_v30  ;;  %v9585_v28 = vld [vmem:[%s14265_s1 + $0x1380] ss:$16 sps:$4 sm:$0xff]   ;;  %v9590_v29 = vld [vmem:[%s14265_s1 + $0x1164] ss:$16 sps:$4 sm:$0xff]  }
 0x10c   :  { %6689 = vmatpush1.bf16.msra.mxu1 %v9531_v32  ;;  %6649 = vmatprep.subr.bf16.mxu0 %v9536_v41  ;;  %v9593_v30 = vld [vmem:[%s14265_s1 + $0x1364] ss:$16 sps:$4 sm:$0xff]   ;;  %v9588_v32 = vld [vmem:[%s14265_s1 + $0x1160] ss:$16 sps:$4 sm:$0xff]  }
 0x10d   :  { %6690 = vmatprep.subr.bf16.mxu1 %v9539_v22  ;;  %v9591_v33 = vld [vmem:[%s14265_s1 + $0x1360] ss:$16 sps:$4 sm:$0xff]   ;;  %v9596_v34 = vld [vmem:[%s14265_s1 + $0x1144] ss:$16 sps:$4 sm:$0xff]  }
 0x10e   :  { %v9599_v41 = vld [vmem:[%s14265_s1 + $0x1344] ss:$16 sps:$4 sm:$0xff]   ;;  %v9594_v22 = vld [vmem:[%s14265_s1 + $0x1140] ss:$16 sps:$4 sm:$0xff]  }
 0x10f   :  { %6650 = vmatpush1.bf16.msra.mxu0 %v9534_v23  ;;  %v9597_v23 = vld [vmem:[%s14265_s1 + $0x1340] ss:$16 sps:$4 sm:$0xff]  }
 0x110   :  { %6691 = vmatpush1.bf16.msra.mxu1 %v9537_v44  ;;  %6651 = vmatprep.subr.bf16.mxu0 %v9542_v45  ;;  %v9602_v44 = vld [vmem:[%s14265_s1 + $0x1124] ss:$16 sps:$4 sm:$0xff]  }
 0x111   :  { %6692 = vmatprep.subr.bf16.mxu1 %v9545_v46  ;;  %v9605_v45 = vld [vmem:[%s14265_s1 + $0x1324] ss:$16 sps:$4 sm:$0xff]   ;;  %v9600_v46 = vld [vmem:[%s14265_s1 + $0x1120] ss:$16 sps:$4 sm:$0xff]  }
 0x113   :  { %6652 = vmatpush1.bf16.msra.mxu0 %v9540_v48  ;;  %v9603_v48 = vld [vmem:[%s14265_s1 + $0x1320] ss:$16 sps:$4 sm:$0xff]  }
 0x114   :  { %6693 = vmatpush1.bf16.msra.mxu1 %v9543_v49  ;;  %6653 = vmatprep.subr.bf16.mxu0 %v9548_v50  ;;  %v9608_v49 = vld [vmem:[%s14265_s1 + $0x1104] ss:$16 sps:$4 sm:$0xff]  }
 0x115   :  { %6694 = vmatprep.subr.bf16.mxu1 %v9551_v52  ;;  %v9611_v50 = vld [vmem:[%s14265_s1 + $0x1304] ss:$16 sps:$4 sm:$0xff]   ;;  %v9606_v52 = vld [vmem:[%s14265_s1 + $0x1100] ss:$16 sps:$4 sm:$0xff]  }
 0x117   :  { %6654 = vmatpush1.bf16.msra.mxu0 %v9546_v53  ;;  %v9609_v53 = vld [vmem:[%s14265_s1 + $0x1300] ss:$16 sps:$4 sm:$0xff]  }
 0x118   :  { %6695 = vmatpush1.bf16.msra.mxu1 %v9549_v55  ;;  %6655 = vmatprep.subr.bf16.mxu0 %v9554_v56  ;;  %v9618_v55 = vld [vmem:[%s14265_s1 + $0x14e4] ss:$16 sps:$4 sm:$0xff]  }
 0x119   :  { %6696 = vmatprep.subr.bf16.mxu1 %v9557_v57  ;;  %v9621_v56 = vld [vmem:[%s14265_s1 + $0x16e4] ss:$16 sps:$4 sm:$0xff]   ;;  %v9616_v57 = vld [vmem:[%s14265_s1 + $0x14e0] ss:$16 sps:$4 sm:$0xff]  }
 0x11b   :  { %6656 = vmatpush1.bf16.msra.mxu0 %v9552_v58  ;;  %v9619_v58 = vld [vmem:[%s14265_s1 + $0x16e0] ss:$16 sps:$4 sm:$0xff]  }
 0x11c   :  { %6697 = vmatpush1.bf16.msra.mxu1 %v9555_v59  ;;  %6657 = vmatprep.subr.bf16.mxu0 %v9560_v60  ;;  %v11860_v59 = vcombine.low %v11640_v2, %v11640_v2  ;;  %v11864_v60 = vcombine.low %v11645_v3, %v11645_v3  ;;  %v9624_v2 = vld [vmem:[%s14265_s1 + $0x14c4] ss:$16 sps:$4 sm:$0xff]  }
 0x11d   :  { %6698 = vmatprep.subr.bf16.mxu1 %v9563_v61  ;;  %v11869_v61 = vld [vmem:[%s14266_s0 + $0x50] sm:$0xff] }
 0x11e   :  { %v9627_v3 = vld [vmem:[%s14265_s1 + $0x16c4] ss:$16 sps:$4 sm:$0xff]  }
 0x11f   :  { %6658 = vmatpush1.bf16.msra.mxu0 %v9558_v62  ;;  %v11874_v62 = vld [vmem:[%s14266_s0 + $0x58] sm:$0xff] }
 0x120   :  { %6699 = vmatpush1.bf16.msra.mxu1 %v9561_v63  ;;  %6659 = vmatprep.subr.bf16.mxu0 %v9566_v4  ;;  %v9622_v63 = vld [vmem:[%s14265_s1 + $0x14c0] ss:$16 sps:$4 sm:$0xff]  }
 0x121   :  { %6700 = vmatprep.subr.bf16.mxu1 %v9569_v35  ;;  %v9625_v4 = vld [vmem:[%s14265_s1 + $0x16c0] ss:$16 sps:$4 sm:$0xff]   ;;  %v11890_v35 = vcombine.high %v11869_v61, %v11869_v61 }
 0x123   :  { %6660 = vmatpush2.bf16.msra.mxu0 %v9564_v40  ;;  %v11894_v40 = vcombine.high %v11874_v62, %v11874_v62 }
 0x124   :  { %6701 = vmatpush2.bf16.msra.mxu1 %v9567_v5  ;;  %6661 = vmatprep.subr.bf16.mxu0 %v9572_v8 }
 0x125   :  { %6702 = vmatprep.subr.bf16.mxu1 %v9575_v11 }
 0x127   :  { %6662 = vmatpush2.bf16.msra.mxu0 %v9570_v12 }
 0x128   :  { %6703 = vmatpush2.bf16.msra.mxu1 %v9573_v13  ;;  %6663 = vmatprep.subr.bf16.mxu0 %v9578_v14  ;;  %v9630_v14 = vld [vmem:[%s14265_s1 + $0x14a4] ss:$16 sps:$4 sm:$0xff]  }
 0x129   :  { %6704 = vmatprep.subr.bf16.mxu1 %v9581_v15  ;;  %v9633_v15 = vld [vmem:[%s14265_s1 + $0x16a4] ss:$16 sps:$4 sm:$0xff]  }
 0x12b   :  { %6664 = vmatpush2.bf16.msra.mxu0 %v9576_v18 }
 0x12c   :  { %6705 = vmatpush2.bf16.msra.mxu1 %v9579_v19  ;;  %6665 = vmatprep.subr.bf16.mxu0 %v9584_v20  ;;  %v9631_v20 = vld [vmem:[%s14265_s1 + $0x16a0] ss:$16 sps:$4 sm:$0xff]  }
 0x12d   :  { %6706 = vmatprep.subr.bf16.mxu1 %v9587_v21 }
 0x12f   :  { %6666 = vmatpush2.bf16.msra.mxu0 %v9582_v27 }
 0x130   :  { %6707 = vmatpush2.bf16.msra.mxu1 %v9585_v28  ;;  %6667 = vmatprep.subr.bf16.mxu0 %v9590_v29 }
 0x131   :  { %6708 = vmatprep.subr.bf16.mxu1 %v9593_v30  ;;  %v9636_v30 = vld [vmem:[%s14265_s1 + $0x1484] ss:$16 sps:$4 sm:$0xff]  }
 0x133   :  { %6668 = vmatpush2.bf16.msra.mxu0 %v9588_v32  ;;  %v9639_v32 = vld [vmem:[%s14265_s1 + $0x1684] ss:$16 sps:$4 sm:$0xff]  }
 0x134   :  { %6709 = vmatpush2.bf16.msra.mxu1 %v9591_v33  ;;  %6669 = vmatprep.subr.bf16.mxu0 %v9596_v34  ;;  %v9634_v33 = vld [vmem:[%s14265_s1 + $0x1480] ss:$16 sps:$4 sm:$0xff]  }
 0x135   :  { %6710 = vmatprep.subr.bf16.mxu1 %v9599_v41  ;;  %v9637_v34 = vld [vmem:[%s14265_s1 + $0x1680] ss:$16 sps:$4 sm:$0xff]   ;;  %v9642_v41 = vld [vmem:[%s14265_s1 + $0x1464] ss:$16 sps:$4 sm:$0xff]  }
 0x137   :  { %6670 = vmatpush2.bf16.msra.mxu0 %v9594_v22  ;;  %v9645_v22 = vld [vmem:[%s14265_s1 + $0x1664] ss:$16 sps:$4 sm:$0xff]  }
 0x138   :  { %6711 = vmatpush2.bf16.msra.mxu1 %v9597_v23  ;;  %6671 = vmatprep.subr.bf16.mxu0 %v9602_v44  ;;  %v9640_v23 = vld [vmem:[%s14265_s1 + $0x1460] ss:$16 sps:$4 sm:$0xff]  }
 0x139   :  { %6712 = vmatprep.subr.bf16.mxu1 %v9605_v45  ;;  %v9643_v44 = vld [vmem:[%s14265_s1 + $0x1660] ss:$16 sps:$4 sm:$0xff]   ;;  %v9648_v45 = vld [vmem:[%s14265_s1 + $0x1444] ss:$16 sps:$4 sm:$0xff]  }
 0x13b   :  { %6672 = vmatpush2.bf16.msra.mxu0 %v9600_v46  ;;  %v9651_v46 = vld [vmem:[%s14265_s1 + $0x1644] ss:$16 sps:$4 sm:$0xff]  }
 0x13c   :  { %6713 = vmatpush2.bf16.msra.mxu1 %v9603_v48  ;;  %6673 = vmatprep.subr.bf16.mxu0 %v9608_v49  ;;  %v9646_v48 = vld [vmem:[%s14265_s1 + $0x1440] ss:$16 sps:$4 sm:$0xff]  }
 0x13d   :  { %6714 = vmatprep.subr.bf16.mxu1 %v9611_v50  ;;  %v9649_v49 = vld [vmem:[%s14265_s1 + $0x1640] ss:$16 sps:$4 sm:$0xff]   ;;  %v9654_v50 = vld [vmem:[%s14265_s1 + $0x1424] ss:$16 sps:$4 sm:$0xff]  }
 0x13f   :  { %6674 = vmatpush2.bf16.msra.mxu0 %v9606_v52  ;;  %v9657_v52 = vld [vmem:[%s14265_s1 + $0x1624] ss:$16 sps:$4 sm:$0xff]  }
 0x140   :  { %6715 = vmatpush2.bf16.msra.mxu1 %v9609_v53  ;;  %6725 = vmatprep.subr.bf16.mxu0 %v9618_v55  ;;  %v9652_v53 = vld [vmem:[%s14265_s1 + $0x1420] ss:$16 sps:$4 sm:$0xff]  }
 0x141   :  { %6766 = vmatprep.subr.bf16.mxu1 %v9621_v56  ;;  %v9655_v55 = vld [vmem:[%s14265_s1 + $0x1620] ss:$16 sps:$4 sm:$0xff]   ;;  %v9660_v56 = vld [vmem:[%s14265_s1 + $0x1404] ss:$16 sps:$4 sm:$0xff]  }
 0x142   :  { %v6431_v5 = vpop.f32.mrf.mxu0  ;;  %6676 = vmatmul.mubr.bf16.vlgmr.msra.gmra.mxu0 %v11860_v59 }
 0x143   :  { %v6472_v8 = vpop.f32.mrf.mxu1  ;;  %6717 = vmatmul.mubr.bf16.vlgmr.msra.gmra.mxu1 %v11864_v60  ;;  %v6432_v11 = vadd.f32 %v6431_v5, %v11678_v26  ;;  %6726 = vmatpush1.bf16.msra.mxu0 %v9616_v57  ;;  %v9628_v26 = vld [vmem:[%s14265_s1 + $0x14a0] ss:$16 sps:$4 sm:$0xff]   ;;  %v9663_v57 = vld [vmem:[%s14265_s1 + $0x1604] ss:$16 sps:$4 sm:$0xff]  }
 0x144   :  { %6767 = vmatpush1.bf16.msra.mxu1 %v9619_v58  ;;  %v6433_v12 = vpop.f32.mrf.mxu0  ;;  %6727 = vmatprep.subr.bf16.mxu0 %v9624_v2  ;;  %v9658_v58 = vld [vmem:[%s14265_s1 + $0x1400] ss:$16 sps:$4 sm:$0xff]  }
 0x145   :  { %v6474_v13 = vpop.f32.mrf.mxu1  ;;  %6768 = vmatprep.subr.bf16.mxu1 %v9627_v3  ;;  %v11905_v18 = vadd.f32 %v6472_v8, %v6432_v11  ;;  %v6434_v19 = vadd.f32 %v6433_v12, %v11685_v31  ;;  %6757 = vmatprep.mubr.bf16.mxu0 %v11890_v35  ;;  %v9661_v2 = vld [vmem:[%s14265_s1 + $0x1600] ss:$16 sps:$4 sm:$0xff]   ;;  %v9666_v3 = vld [vmem:[%s14265_s1 + $0x15e4] ss:$16 sps:$4 sm:$0xff]  }
 0x146   :  { %6798 = vmatprep.mubr.bf16.mxu1 %v11894_v40  ;;  %v6435_v21 = vpop.f32.mrf.mxu0  ;;  %v9667_v5 = vld [vmem:[%s14265_s1 + $0x17e0] ss:$16 sps:$4 sm:$0xff]   ;;  %v9672_v8 = vld [vmem:[%s14265_s1 + $0x15c4] ss:$16 sps:$4 sm:$0xff]  }
 0x147   :  { %v6476_v27 = vpop.f32.mrf.mxu1  ;;  %v11916_v28 = vadd.f32 %v6474_v13, %v6434_v19  ;;  %6728 = vmatpush1.bf16.msra.mxu0 %v9622_v63  ;;  %v9669_v63 = vld [vmem:[%s14265_s1 + $0x17e4] ss:$16 sps:$4 sm:$0xff]   ;;  %v9670_v12 = vld [vmem:[%s14265_s1 + $0x15c0] ss:$16 sps:$4 sm:$0xff]  }
 0x148   :  { %6769 = vmatpush1.bf16.msra.mxu1 %v9625_v4  ;;  %v6436_v29 = vpop.f32.mrf.mxu0  ;;  %6729 = vmatprep.subr.bf16.mxu0 %v9630_v14  ;;  %v9664_v4 = vld [vmem:[%s14265_s1 + $0x15e0] ss:$16 sps:$4 sm:$0xff]   ;;  %v9675_v11 = vld [vmem:[%s14265_s1 + $0x17c4] ss:$16 sps:$4 sm:$0xff]  }
 0x149   :  { %v6477_v31 = vpop.f32.mrf.mxu1  ;;  %6770 = vmatprep.subr.bf16.mxu1 %v9633_v15  ;;  %v9673_v13 = vld [vmem:[%s14265_s1 + $0x17c0] ss:$16 sps:$4 sm:$0xff]   ;;  %v9678_v14 = vld [vmem:[%s14265_s1 + $0x15a4] ss:$16 sps:$4 sm:$0xff]  }
 0x14a   :  { %v9681_v15 = vld [vmem:[%s14265_s1 + $0x17a4] ss:$16 sps:$4 sm:$0xff]   ;;  %v9676_v19 = vld [vmem:[%s14265_s1 + $0x15a0] ss:$16 sps:$4 sm:$0xff]  }
 0x14b   :  { %6730 = vmatpush1.bf16.msra.mxu0 %v9628_v26  ;;  %v9679_v26 = vld [vmem:[%s14265_s1 + $0x17a0] ss:$16 sps:$4 sm:$0xff]   ;;  %v9687_v21 = vld [vmem:[%s14265_s1 + $0x1784] ss:$16 sps:$4 sm:$0xff]  }
 0x14c   :  { %6771 = vmatpush1.bf16.msra.mxu1 %v9631_v20  ;;  %6731 = vmatprep.subr.bf16.mxu0 %v9636_v30  ;;  %v9684_v20 = vld [vmem:[%s14265_s1 + $0x1584] ss:$16 sps:$4 sm:$0xff]   ;;  %v9682_v27 = vld [vmem:[%s14265_s1 + $0x1580] ss:$16 sps:$4 sm:$0xff]  }
 0x14d   :  { %6772 = vmatprep.subr.bf16.mxu1 %v9639_v32  ;;  %v9685_v29 = vld [vmem:[%s14265_s1 + $0x1780] ss:$16 sps:$4 sm:$0xff]   ;;  %v9690_v31 = vld [vmem:[%s14265_s1 + $0x1564] ss:$16 sps:$4 sm:$0xff]  }
 0x14e   :  { %v9693_v30 = vld [vmem:[%s14265_s1 + $0x1764] ss:$16 sps:$4 sm:$0xff]   ;;  %v9688_v32 = vld [vmem:[%s14265_s1 + $0x1560] ss:$16 sps:$4 sm:$0xff]  }
 0x14f   :  { %6732 = vmatpush1.bf16.msra.mxu0 %v9634_v33  ;;  %v9691_v33 = vld [vmem:[%s14265_s1 + $0x1760] ss:$16 sps:$4 sm:$0xff]  }
 0x150   :  { %6773 = vmatpush1.bf16.msra.mxu1 %v9637_v34  ;;  %6733 = vmatprep.subr.bf16.mxu0 %v9642_v41  ;;  %v9696_v34 = vld [vmem:[%s14265_s1 + $0x1544] ss:$16 sps:$4 sm:$0xff]  }
 0x151   :  { %6774 = vmatprep.subr.bf16.mxu1 %v9645_v22  ;;  %v9699_v41 = vld [vmem:[%s14265_s1 + $0x1744] ss:$16 sps:$4 sm:$0xff]   ;;  %v9694_v22 = vld [vmem:[%s14265_s1 + $0x1540] ss:$16 sps:$4 sm:$0xff]  }
 0x153   :  { %6734 = vmatpush1.bf16.msra.mxu0 %v9640_v23  ;;  %v9697_v23 = vld [vmem:[%s14265_s1 + $0x1740] ss:$16 sps:$4 sm:$0xff]  }
 0x154   :  { %6775 = vmatpush1.bf16.msra.mxu1 %v9643_v44  ;;  %6735 = vmatprep.subr.bf16.mxu0 %v9648_v45  ;;  %v9702_v44 = vld [vmem:[%s14265_s1 + $0x1524] ss:$16 sps:$4 sm:$0xff]  }
 0x155   :  { %6776 = vmatprep.subr.bf16.mxu1 %v9651_v46  ;;  %v9705_v45 = vld [vmem:[%s14265_s1 + $0x1724] ss:$16 sps:$4 sm:$0xff]   ;;  %v9700_v46 = vld [vmem:[%s14265_s1 + $0x1520] ss:$16 sps:$4 sm:$0xff]  }
 0x157   :  { %6736 = vmatpush1.bf16.msra.mxu0 %v9646_v48  ;;  %v9703_v48 = vld [vmem:[%s14265_s1 + $0x1720] ss:$16 sps:$4 sm:$0xff]  }
 0x158   :  { %6777 = vmatpush1.bf16.msra.mxu1 %v9649_v49  ;;  %6737 = vmatprep.subr.bf16.mxu0 %v9654_v50  ;;  %v9708_v49 = vld [vmem:[%s14265_s1 + $0x1504] ss:$16 sps:$4 sm:$0xff]  }
 0x159   :  { %6778 = vmatprep.subr.bf16.mxu1 %v9657_v52  ;;  %v9711_v50 = vld [vmem:[%s14265_s1 + $0x1704] ss:$16 sps:$4 sm:$0xff]   ;;  %v9706_v52 = vld [vmem:[%s14265_s1 + $0x1500] ss:$16 sps:$4 sm:$0xff]  }
 0x15b   :  { %6738 = vmatpush1.bf16.msra.mxu0 %v9652_v53  ;;  %v9709_v53 = vld [vmem:[%s14265_s1 + $0x1700] ss:$16 sps:$4 sm:$0xff]  }
 0x15c   :  { %6779 = vmatpush1.bf16.msra.mxu1 %v9655_v55  ;;  %6739 = vmatprep.subr.bf16.mxu0 %v9660_v56  ;;  %v9718_v55 = vld [vmem:[%s14265_s1 + $0x18e4] ss:$16 sps:$4 sm:$0xff]  }
 0x15d   :  { %6780 = vmatprep.subr.bf16.mxu1 %v9663_v57  ;;  %v9721_v56 = vld [vmem:[%s14265_s1 + $0x1ae4] ss:$16 sps:$4 sm:$0xff]   ;;  %v9716_v57 = vld [vmem:[%s14265_s1 + $0x18e0] ss:$16 sps:$4 sm:$0xff]  }
 0x15f   :  { %6740 = vmatpush1.bf16.msra.mxu0 %v9658_v58  ;;  %v9719_v58 = vld [vmem:[%s14265_s1 + $0x1ae0] ss:$16 sps:$4 sm:$0xff]  }
 0x160   :  { %6781 = vmatpush1.bf16.msra.mxu1 %v9661_v2  ;;  %6741 = vmatprep.subr.bf16.mxu0 %v9666_v3  ;;  %v12088_v2 = vcombine.low %v11869_v61, %v11869_v61  ;;  %v12092_v3 = vcombine.low %v11874_v62, %v11874_v62  ;;  %v9724_v61 = vld [vmem:[%s14265_s1 + $0x18c4] ss:$16 sps:$4 sm:$0xff]  }
 0x161   :  { %6782 = vmatprep.subr.bf16.mxu1 %v9669_v63  ;;  %v12097_v63 = vld [vmem:[%s14266_s0 + $0x60] sm:$0xff] }
 0x162   :  { %v9727_v62 = vld [vmem:[%s14265_s1 + $0x1ac4] ss:$16 sps:$4 sm:$0xff]  }
 0x163   :  { %6742 = vmatpush2.bf16.msra.mxu0 %v9664_v4  ;;  %v12102_v4 = vld [vmem:[%s14266_s0 + $0x68] sm:$0xff] }
 0x164   :  { %6783 = vmatpush2.bf16.msra.mxu1 %v9667_v5  ;;  %6743 = vmatprep.subr.bf16.mxu0 %v9672_v8  ;;  %v9722_v5 = vld [vmem:[%s14265_s1 + $0x18c0] ss:$16 sps:$4 sm:$0xff]  }
 0x165   :  { %6784 = vmatprep.subr.bf16.mxu1 %v9675_v11  ;;  %v9725_v8 = vld [vmem:[%s14265_s1 + $0x1ac0] ss:$16 sps:$4 sm:$0xff]   ;;  %v12118_v11 = vcombine.high %v12097_v63, %v12097_v63 }
 0x167   :  { %6744 = vmatpush2.bf16.msra.mxu0 %v9670_v12  ;;  %v12122_v12 = vcombine.high %v12102_v4, %v12102_v4 }
 0x168   :  { %6785 = vmatpush2.bf16.msra.mxu1 %v9673_v13  ;;  %6745 = vmatprep.subr.bf16.mxu0 %v9678_v14 }
 0x169   :  { %6786 = vmatprep.subr.bf16.mxu1 %v9681_v15 }
 0x16b   :  { %6746 = vmatpush2.bf16.msra.mxu0 %v9676_v19 }
 0x16c   :  { %6787 = vmatpush2.bf16.msra.mxu1 %v9679_v26  ;;  %6747 = vmatprep.subr.bf16.mxu0 %v9684_v20  ;;  %v9730_v20 = vld [vmem:[%s14265_s1 + $0x18a4] ss:$16 sps:$4 sm:$0xff]  }
 0x16d   :  { %6788 = vmatprep.subr.bf16.mxu1 %v9687_v21  ;;  %v9733_v21 = vld [vmem:[%s14265_s1 + $0x1aa4] ss:$16 sps:$4 sm:$0xff]  }
 0x16f   :  { %6748 = vmatpush2.bf16.msra.mxu0 %v9682_v27 }
 0x170   :  { %6789 = vmatpush2.bf16.msra.mxu1 %v9685_v29  ;;  %6749 = vmatprep.subr.bf16.mxu0 %v9690_v31  ;;  %v9731_v31 = vld [vmem:[%s14265_s1 + $0x1aa0] ss:$16 sps:$4 sm:$0xff]  }
 0x171   :  { %6790 = vmatprep.subr.bf16.mxu1 %v9693_v30 }
 0x173   :  { %6750 = vmatpush2.bf16.msra.mxu0 %v9688_v32 }
 0x174   :  { %6791 = vmatpush2.bf16.msra.mxu1 %v9691_v33  ;;  %6751 = vmatprep.subr.bf16.mxu0 %v9696_v34 }
 0x175   :  { %6792 = vmatprep.subr.bf16.mxu1 %v9699_v41  ;;  %v9736_v41 = vld [vmem:[%s14265_s1 + $0x1884] ss:$16 sps:$4 sm:$0xff]  }
 0x177   :  { %6752 = vmatpush2.bf16.msra.mxu0 %v9694_v22  ;;  %v9739_v22 = vld [vmem:[%s14265_s1 + $0x1a84] ss:$16 sps:$4 sm:$0xff]  }
 0x178   :  { %6793 = vmatpush2.bf16.msra.mxu1 %v9697_v23  ;;  %6753 = vmatprep.subr.bf16.mxu0 %v9702_v44  ;;  %v9734_v23 = vld [vmem:[%s14265_s1 + $0x1880] ss:$16 sps:$4 sm:$0xff]  }
 0x179   :  { %6794 = vmatprep.subr.bf16.mxu1 %v9705_v45  ;;  %v9737_v44 = vld [vmem:[%s14265_s1 + $0x1a80] ss:$16 sps:$4 sm:$0xff]   ;;  %v9742_v45 = vld [vmem:[%s14265_s1 + $0x1864] ss:$16 sps:$4 sm:$0xff]  }
 0x17b   :  { %6754 = vmatpush2.bf16.msra.mxu0 %v9700_v46  ;;  %v9745_v46 = vld [vmem:[%s14265_s1 + $0x1a64] ss:$16 sps:$4 sm:$0xff]  }
 0x17c   :  { %6795 = vmatpush2.bf16.msra.mxu1 %v9703_v48  ;;  %6755 = vmatprep.subr.bf16.mxu0 %v9708_v49  ;;  %v9740_v48 = vld [vmem:[%s14265_s1 + $0x1860] ss:$16 sps:$4 sm:$0xff]  }
 0x17d   :  { %6796 = vmatprep.subr.bf16.mxu1 %v9711_v50  ;;  %v9743_v49 = vld [vmem:[%s14265_s1 + $0x1a60] ss:$16 sps:$4 sm:$0xff]   ;;  %v9748_v50 = vld [vmem:[%s14265_s1 + $0x1844] ss:$16 sps:$4 sm:$0xff]  }
 0x17f   :  { %6756 = vmatpush2.bf16.msra.mxu0 %v9706_v52  ;;  %v9751_v52 = vld [vmem:[%s14265_s1 + $0x1a44] ss:$16 sps:$4 sm:$0xff]  }
 0x180   :  { %6797 = vmatpush2.bf16.msra.mxu1 %v9709_v53  ;;  %6807 = vmatprep.subr.bf16.mxu0 %v9718_v55  ;;  %v9746_v53 = vld [vmem:[%s14265_s1 + $0x1840] ss:$16 sps:$4 sm:$0xff]  }
 0x181   :  { %6848 = vmatprep.subr.bf16.mxu1 %v9721_v56  ;;  %v9749_v55 = vld [vmem:[%s14265_s1 + $0x1a40] ss:$16 sps:$4 sm:$0xff]   ;;  %v9754_v56 = vld [vmem:[%s14265_s1 + $0x1824] ss:$16 sps:$4 sm:$0xff]  }
 0x182   :  { %v6513_v13 = vpop.f32.mrf.mxu0  ;;  %6758 = vmatmul.mubr.bf16.vlgmr.msra.gmra.mxu0 %v12088_v2 }
 0x183   :  { %v6554_v14 = vpop.f32.mrf.mxu1  ;;  %6799 = vmatmul.mubr.bf16.vlgmr.msra.gmra.mxu1 %v12092_v3  ;;  %v6514_v15 = vadd.f32 %v6513_v13, %v11905_v18  ;;  %6808 = vmatpush1.bf16.msra.mxu0 %v9716_v57  ;;  %v9728_v18 = vld [vmem:[%s14265_s1 + $0x18a0] ss:$16 sps:$4 sm:$0xff]   ;;  %v9757_v57 = vld [vmem:[%s14265_s1 + $0x1a24] ss:$16 sps:$4 sm:$0xff]  }
 0x184   :  { %6849 = vmatpush1.bf16.msra.mxu1 %v9719_v58  ;;  %v6515_v19 = vpop.f32.mrf.mxu0  ;;  %6809 = vmatprep.subr.bf16.mxu0 %v9724_v61  ;;  %v9752_v58 = vld [vmem:[%s14265_s1 + $0x1820] ss:$16 sps:$4 sm:$0xff]  }
 0x185   :  { %v6556_v26 = vpop.f32.mrf.mxu1  ;;  %6850 = vmatprep.subr.bf16.mxu1 %v9727_v62  ;;  %v12133_v27 = vadd.f32 %v6554_v14, %v6514_v15  ;;  %v6516_v29 = vadd.f32 %v6515_v19, %v11916_v28  ;;  %6839 = vmatprep.mubr.bf16.mxu0 %v12118_v11  ;;  %v9755_v61 = vld [vmem:[%s14265_s1 + $0x1a20] ss:$16 sps:$4 sm:$0xff]   ;;  %v9760_v62 = vld [vmem:[%s14265_s1 + $0x1804] ss:$16 sps:$4 sm:$0xff]  }
 0x186   :  { %6880 = vmatprep.mubr.bf16.mxu1 %v12122_v12  ;;  %v6517_v30 = vpop.f32.mrf.mxu0  ;;  %v9761_v13 = vld [vmem:[%s14265_s1 + $0x1a00] ss:$16 sps:$4 sm:$0xff]   ;;  %v9766_v14 = vld [vmem:[%s14265_s1 + $0x19e4] ss:$16 sps:$4 sm:$0xff]  }
 0x187   :  { %v6558_v32 = vpop.f32.mrf.mxu1  ;;  %v12144_v33 = vadd.f32 %v6556_v26, %v6516_v29  ;;  %6810 = vmatpush1.bf16.msra.mxu0 %v9722_v5  ;;  %v9763_v5 = vld [vmem:[%s14265_s1 + $0x1a04] ss:$16 sps:$4 sm:$0xff]   ;;  %v9764_v19 = vld [vmem:[%s14265_s1 + $0x19e0] ss:$16 sps:$4 sm:$0xff]  }
 0x188   :  { %6851 = vmatpush1.bf16.msra.mxu1 %v9725_v8  ;;  %v6518_v34 = vpop.f32.mrf.mxu0  ;;  %6811 = vmatprep.subr.bf16.mxu0 %v9730_v20  ;;  %v9758_v8 = vld [vmem:[%s14265_s1 + $0x1800] ss:$16 sps:$4 sm:$0xff]   ;;  %v9769_v15 = vld [vmem:[%s14265_s1 + $0x1be4] ss:$16 sps:$4 sm:$0xff]  }
 0x189   :  { %v6559_v28 = vpop.f32.mrf.mxu1  ;;  %6852 = vmatprep.subr.bf16.mxu1 %v9733_v21  ;;  %v9767_v26 = vld [vmem:[%s14265_s1 + $0x1be0] ss:$16 sps:$4 sm:$0xff]   ;;  %v9772_v20 = vld [vmem:[%s14265_s1 + $0x19c4] ss:$16 sps:$4 sm:$0xff]  }
 0x18a   :  { %v9775_v21 = vld [vmem:[%s14265_s1 + $0x1bc4] ss:$16 sps:$4 sm:$0xff]   ;;  %v9770_v29 = vld [vmem:[%s14265_s1 + $0x19c0] ss:$16 sps:$4 sm:$0xff]  }
 0x18b   :  { %6812 = vmatpush1.bf16.msra.mxu0 %v9728_v18  ;;  %v9773_v18 = vld [vmem:[%s14265_s1 + $0x1bc0] ss:$16 sps:$4 sm:$0xff]   ;;  %v9781_v30 = vld [vmem:[%s14265_s1 + $0x1ba4] ss:$16 sps:$4 sm:$0xff]  }
 0x18c   :  { %6853 = vmatpush1.bf16.msra.mxu1 %v9731_v31  ;;  %6813 = vmatprep.subr.bf16.mxu0 %v9736_v41  ;;  %v9778_v31 = vld [vmem:[%s14265_s1 + $0x19a4] ss:$16 sps:$4 sm:$0xff]   ;;  %v9776_v32 = vld [vmem:[%s14265_s1 + $0x19a0] ss:$16 sps:$4 sm:$0xff]  }
 0x18d   :  { %6854 = vmatprep.subr.bf16.mxu1 %v9739_v22  ;;  %v9779_v34 = vld [vmem:[%s14265_s1 + $0x1ba0] ss:$16 sps:$4 sm:$0xff]   ;;  %v9784_v28 = vld [vmem:[%s14265_s1 + $0x1984] ss:$16 sps:$4 sm:$0xff]  }
 0x18e   :  { %v9787_v41 = vld [vmem:[%s14265_s1 + $0x1b84] ss:$16 sps:$4 sm:$0xff]   ;;  %v9782_v22 = vld [vmem:[%s14265_s1 + $0x1980] ss:$16 sps:$4 sm:$0xff]  }
 0x18f   :  { %6814 = vmatpush1.bf16.msra.mxu0 %v9734_v23  ;;  %v9785_v23 = vld [vmem:[%s14265_s1 + $0x1b80] ss:$16 sps:$4 sm:$0xff]  }
 0x190   :  { %6855 = vmatpush1.bf16.msra.mxu1 %v9737_v44  ;;  %6815 = vmatprep.subr.bf16.mxu0 %v9742_v45  ;;  %v9790_v44 = vld [vmem:[%s14265_s1 + $0x1964] ss:$16 sps:$4 sm:$0xff]  }
 0x191   :  { %6856 = vmatprep.subr.bf16.mxu1 %v9745_v46  ;;  %v9793_v45 = vld [vmem:[%s14265_s1 + $0x1b64] ss:$16 sps:$4 sm:$0xff]   ;;  %v9788_v46 = vld [vmem:[%s14265_s1 + $0x1960] ss:$16 sps:$4 sm:$0xff]  }
 0x193   :  { %6816 = vmatpush1.bf16.msra.mxu0 %v9740_v48  ;;  %v9791_v48 = vld [vmem:[%s14265_s1 + $0x1b60] ss:$16 sps:$4 sm:$0xff]  }
 0x194   :  { %6857 = vmatpush1.bf16.msra.mxu1 %v9743_v49  ;;  %6817 = vmatprep.subr.bf16.mxu0 %v9748_v50  ;;  %v9796_v49 = vld [vmem:[%s14265_s1 + $0x1944] ss:$16 sps:$4 sm:$0xff]  }
 0x195   :  { %6858 = vmatprep.subr.bf16.mxu1 %v9751_v52  ;;  %v9799_v50 = vld [vmem:[%s14265_s1 + $0x1b44] ss:$16 sps:$4 sm:$0xff]   ;;  %v9794_v52 = vld [vmem:[%s14265_s1 + $0x1940] ss:$16 sps:$4 sm:$0xff]  }
 0x197   :  { %6818 = vmatpush1.bf16.msra.mxu0 %v9746_v53  ;;  %v9797_v53 = vld [vmem:[%s14265_s1 + $0x1b40] ss:$16 sps:$4 sm:$0xff]  }
 0x198   :  { %6859 = vmatpush1.bf16.msra.mxu1 %v9749_v55  ;;  %6819 = vmatprep.subr.bf16.mxu0 %v9754_v56  ;;  %v9802_v55 = vld [vmem:[%s14265_s1 + $0x1924] ss:$16 sps:$4 sm:$0xff]  }
 0x199   :  { %6860 = vmatprep.subr.bf16.mxu1 %v9757_v57  ;;  %v9805_v56 = vld [vmem:[%s14265_s1 + $0x1b24] ss:$16 sps:$4 sm:$0xff]   ;;  %v9800_v57 = vld [vmem:[%s14265_s1 + $0x1920] ss:$16 sps:$4 sm:$0xff]  }
 0x19b   :  { %6820 = vmatpush1.bf16.msra.mxu0 %v9752_v58  ;;  %v9803_v58 = vld [vmem:[%s14265_s1 + $0x1b20] ss:$16 sps:$4 sm:$0xff]  }
 0x19c   :  { %6861 = vmatpush1.bf16.msra.mxu1 %v9755_v61  ;;  %6821 = vmatprep.subr.bf16.mxu0 %v9760_v62  ;;  %v9808_v61 = vld [vmem:[%s14265_s1 + $0x1904] ss:$16 sps:$4 sm:$0xff]  }
 0x19d   :  { %6862 = vmatprep.subr.bf16.mxu1 %v9763_v5  ;;  %v9811_v62 = vld [vmem:[%s14265_s1 + $0x1b04] ss:$16 sps:$4 sm:$0xff]   ;;  %v9806_v5 = vld [vmem:[%s14265_s1 + $0x1900] ss:$16 sps:$4 sm:$0xff]  }
 0x19f   :  { %6822 = vmatpush1.bf16.msra.mxu0 %v9758_v8  ;;  %v9809_v8 = vld [vmem:[%s14265_s1 + $0x1b00] ss:$16 sps:$4 sm:$0xff]  }
 0x1a0   :  { %6863 = vmatpush1.bf16.msra.mxu1 %v9761_v13  ;;  %6823 = vmatprep.subr.bf16.mxu0 %v9766_v14  ;;  %v9818_v13 = vld [vmem:[%s14265_s1 + $0x1ce4] ss:$16 sps:$4 sm:$0xff]  }
 0x1a1   :  { %6864 = vmatprep.subr.bf16.mxu1 %v9769_v15  ;;  %v9821_v14 = vld [vmem:[%s14265_s1 + $0x1ee4] ss:$16 sps:$4 sm:$0xff]  }
 0x1a2   :  { %v12311_v15 = vld [vmem:[%s14266_s0 + $0x70] sm:$0xff] }
 0x1a3   :  { %6824 = vmatpush2.bf16.msra.mxu0 %v9764_v19  ;;  %v12316_v19 = vld [vmem:[%s14266_s0 + $0x78] sm:$0xff] }
 0x1a4   :  { %6865 = vmatpush2.bf16.msra.mxu1 %v9767_v26  ;;  %6825 = vmatprep.subr.bf16.mxu0 %v9772_v20  ;;  %v9816_v26 = vld [vmem:[%s14265_s1 + $0x1ce0] ss:$16 sps:$4 sm:$0xff]  }
 0x1a5   :  { %6866 = vmatprep.subr.bf16.mxu1 %v9775_v21  ;;  %v9819_v20 = vld [vmem:[%s14265_s1 + $0x1ee0] ss:$16 sps:$4 sm:$0xff]   ;;  %v12326_v21 = vcombine.low %v12097_v63, %v12097_v63 }
 0x1a6   :  { %v9822_v63 = vld [vmem:[%s14265_s1 + $0x1cc0] ss:$16 sps:$4 sm:$0xff]  }
 0x1a7   :  { %6826 = vmatpush2.bf16.msra.mxu0 %v9770_v29  ;;  %v12330_v29 = vcombine.low %v12102_v4, %v12102_v4  ;;  %v9825_v4 = vld [vmem:[%s14265_s1 + $0x1ec0] ss:$16 sps:$4 sm:$0xff]  }
 0x1a8   :  { %6867 = vmatpush2.bf16.msra.mxu1 %v9773_v18  ;;  %6827 = vmatprep.subr.bf16.mxu0 %v9778_v31  ;;  %v9824_v18 = vld [vmem:[%s14265_s1 + $0x1cc4] ss:$16 sps:$4 sm:$0xff]  }
 0x1a9   :  { %6868 = vmatprep.subr.bf16.mxu1 %v9781_v30  ;;  %v9827_v31 = vld [vmem:[%s14265_s1 + $0x1ec4] ss:$16 sps:$4 sm:$0xff]   ;;  %v12346_v30 = vcombine.high %v12311_v15, %v12311_v15 }
 0x1ab   :  { %6828 = vmatpush2.bf16.msra.mxu0 %v9776_v32  ;;  %v12350_v32 = vcombine.high %v12316_v19, %v12316_v19 }
 0x1ac   :  { %6869 = vmatpush2.bf16.msra.mxu1 %v9779_v34  ;;  %6829 = vmatprep.subr.bf16.mxu0 %v9784_v28 }
 0x1ad   :  { %6870 = vmatprep.subr.bf16.mxu1 %v9787_v41 }
 0x1af   :  { %6830 = vmatpush2.bf16.msra.mxu0 %v9782_v22 }
 0x1b0   :  { %6871 = vmatpush2.bf16.msra.mxu1 %v9785_v23  ;;  %6831 = vmatprep.subr.bf16.mxu0 %v9790_v44  ;;  %v9830_v44 = vld [vmem:[%s14265_s1 + $0x1ca4] ss:$16 sps:$4 sm:$0xff]  }
 0x1b1   :  { %6872 = vmatprep.subr.bf16.mxu1 %v9793_v45  ;;  %v9833_v45 = vld [vmem:[%s14265_s1 + $0x1ea4] ss:$16 sps:$4 sm:$0xff]  }
 0x1b3   :  { %6832 = vmatpush2.bf16.msra.mxu0 %v9788_v46 }
 0x1b4   :  { %6873 = vmatpush2.bf16.msra.mxu1 %v9791_v48  ;;  %6833 = vmatprep.subr.bf16.mxu0 %v9796_v49  ;;  %v9831_v49 = vld [vmem:[%s14265_s1 + $0x1ea0] ss:$16 sps:$4 sm:$0xff]  }
 0x1b5   :  { %6874 = vmatprep.subr.bf16.mxu1 %v9799_v50 }
 0x1b7   :  { %6834 = vmatpush2.bf16.msra.mxu0 %v9794_v52 }
 0x1b8   :  { %6875 = vmatpush2.bf16.msra.mxu1 %v9797_v53  ;;  %6835 = vmatprep.subr.bf16.mxu0 %v9802_v55 }
 0x1b9   :  { %6876 = vmatprep.subr.bf16.mxu1 %v9805_v56  ;;  %v9836_v56 = vld [vmem:[%s14265_s1 + $0x1c84] ss:$16 sps:$4 sm:$0xff]  }
 0x1bb   :  { %6836 = vmatpush2.bf16.msra.mxu0 %v9800_v57  ;;  %v9839_v57 = vld [vmem:[%s14265_s1 + $0x1e84] ss:$16 sps:$4 sm:$0xff]  }
 0x1bc   :  { %6877 = vmatpush2.bf16.msra.mxu1 %v9803_v58  ;;  %6837 = vmatprep.subr.bf16.mxu0 %v9808_v61  ;;  %v9834_v58 = vld [vmem:[%s14265_s1 + $0x1c80] ss:$16 sps:$4 sm:$0xff]  }
 0x1bd   :  { %6878 = vmatprep.subr.bf16.mxu1 %v9811_v62  ;;  %v9837_v61 = vld [vmem:[%s14265_s1 + $0x1e80] ss:$16 sps:$4 sm:$0xff]   ;;  %v9842_v62 = vld [vmem:[%s14265_s1 + $0x1c64] ss:$16 sps:$4 sm:$0xff]  }
 0x1bf   :  { %6838 = vmatpush2.bf16.msra.mxu0 %v9806_v5  ;;  %v9845_v5 = vld [vmem:[%s14265_s1 + $0x1e64] ss:$16 sps:$4 sm:$0xff]  }
 0x1c0   :  { %6879 = vmatpush2.bf16.msra.mxu1 %v9809_v8  ;;  %6889 = vmatprep.subr.bf16.mxu0 %v9818_v13  ;;  %v9840_v8 = vld [vmem:[%s14265_s1 + $0x1c60] ss:$16 sps:$4 sm:$0xff]  }
 0x1c1   :  { %6930 = vmatprep.subr.bf16.mxu1 %v9821_v14  ;;  %v9843_v13 = vld [vmem:[%s14265_s1 + $0x1e60] ss:$16 sps:$4 sm:$0xff]   ;;  %v9848_v14 = vld [vmem:[%s14265_s1 + $0x1c44] ss:$16 sps:$4 sm:$0xff]  }
 0x1c2   :  { %v6595_v34 = vpop.f32.mrf.mxu0  ;;  %6840 = vmatmul.mubr.bf16.vlgmr.msra.gmra.mxu0 %v12326_v21 }
 0x1c3   :  { %v6636_v28 = vpop.f32.mrf.mxu1  ;;  %6881 = vmatmul.mubr.bf16.vlgmr.msra.gmra.mxu1 %v12330_v29  ;;  %v6596_v41 = vadd.f32 %v6595_v34, %v12133_v27  ;;  %6890 = vmatpush1.bf16.msra.mxu0 %v9816_v26  ;;  %v9828_v27 = vld [vmem:[%s14265_s1 + $0x1ca0] ss:$16 sps:$4 sm:$0xff]   ;;  %v9851_v26 = vld [vmem:[%s14265_s1 + $0x1e44] ss:$16 sps:$4 sm:$0xff]  }
 0x1c4   :  { %6931 = vmatpush1.bf16.msra.mxu1 %v9819_v20  ;;  %v6597_v22 = vpop.f32.mrf.mxu0  ;;  %6891 = vmatprep.subr.bf16.mxu0 %v9824_v18  ;;  %v9846_v20 = vld [vmem:[%s14265_s1 + $0x1c40] ss:$16 sps:$4 sm:$0xff]  }
 0x1c5   :  { %v6638_v23 = vpop.f32.mrf.mxu1  ;;  %6932 = vmatprep.subr.bf16.mxu1 %v9827_v31  ;;  %v12361_v46 = vadd.f32 %v6636_v28, %v6596_v41  ;;  %v6598_v48 = vadd.f32 %v6597_v22, %v12144_v33  ;;  %6921 = vmatprep.mubr.bf16.mxu0 %v12346_v30  ;;  %v9849_v18 = vld [vmem:[%s14265_s1 + $0x1e40] ss:$16 sps:$4 sm:$0xff]   ;;  %v9854_v31 = vld [vmem:[%s14265_s1 + $0x1c24] ss:$16 sps:$4 sm:$0xff]  }
 0x1c6   :  { %6962 = vmatprep.mubr.bf16.mxu1 %v12350_v32  ;;  %v6599_v50 = vpop.f32.mrf.mxu0  ;;  %v9855_v34 = vld [vmem:[%s14265_s1 + $0x1e20] ss:$16 sps:$4 sm:$0xff]   ;;  %v9860_v28 = vld [vmem:[%s14265_s1 + $0x1c04] ss:$16 sps:$4 sm:$0xff]  }
 0x1c7   :  { %v6640_v52 = vpop.f32.mrf.mxu1  ;;  %v12372_v53 = vadd.f32 %v6638_v23, %v6598_v48  ;;  %6892 = vmatpush1.bf16.msra.mxu0 %v9822_v63  ;;  %v9857_v63 = vld [vmem:[%s14265_s1 + $0x1e24] ss:$16 sps:$4 sm:$0xff]   ;;  %v9858_v22 = vld [vmem:[%s14265_s1 + $0x1c00] ss:$16 sps:$4 sm:$0xff]  }
 0x1c8   :  { %6933 = vmatpush1.bf16.msra.mxu1 %v9825_v4  ;;  %v6600_v55 = vpop.f32.mrf.mxu0  ;;  %6893 = vmatprep.subr.bf16.mxu0 %v9830_v44  ;;  %v9852_v4 = vld [vmem:[%s14265_s1 + $0x1c20] ss:$16 sps:$4 sm:$0xff]   ;;  %v9863_v41 = vld [vmem:[%s14265_s1 + $0x1e04] ss:$16 sps:$4 sm:$0xff]  }
 0x1c9   :  { %v6641_v33 = vpop.f32.mrf.mxu1  ;;  %6934 = vmatprep.subr.bf16.mxu1 %v9833_v45  ;;  %v9861_v23 = vld [vmem:[%s14265_s1 + $0x1e00] ss:$16 sps:$4 sm:$0xff]   ;;  %v9866_v44 = vld [vmem:[%s14265_s1 + $0x1de4] ss:$16 sps:$4 sm:$0xff]  }
 0x1ca   :  { %v9869_v45 = vld [vmem:[%s14265_s1 + $0x1fe4] ss:$16 sps:$4 sm:$0xff]   ;;  %v9864_v48 = vld [vmem:[%s14265_s1 + $0x1de0] ss:$16 sps:$4 sm:$0xff]  }
 0x1cb   :  { %6894 = vmatpush1.bf16.msra.mxu0 %v9828_v27  ;;  %v9867_v27 = vld [vmem:[%s14265_s1 + $0x1fe0] ss:$16 sps:$4 sm:$0xff]   ;;  %v9875_v50 = vld [vmem:[%s14265_s1 + $0x1fc4] ss:$16 sps:$4 sm:$0xff]  }
 0x1cc   :  { %6935 = vmatpush1.bf16.msra.mxu1 %v9831_v49  ;;  %6895 = vmatprep.subr.bf16.mxu0 %v9836_v56  ;;  %v9872_v49 = vld [vmem:[%s14265_s1 + $0x1dc4] ss:$16 sps:$4 sm:$0xff]   ;;  %v9870_v52 = vld [vmem:[%s14265_s1 + $0x1dc0] ss:$16 sps:$4 sm:$0xff]  }
 0x1cd   :  { %6936 = vmatprep.subr.bf16.mxu1 %v9839_v57  ;;  %v9873_v55 = vld [vmem:[%s14265_s1 + $0x1fc0] ss:$16 sps:$4 sm:$0xff]   ;;  %v9878_v33 = vld [vmem:[%s14265_s1 + $0x1da4] ss:$16 sps:$4 sm:$0xff]  }
 0x1ce   :  { %v9881_v56 = vld [vmem:[%s14265_s1 + $0x1fa4] ss:$16 sps:$4 sm:$0xff]   ;;  %v9876_v57 = vld [vmem:[%s14265_s1 + $0x1da0] ss:$16 sps:$4 sm:$0xff]  }
 0x1cf   :  { %6896 = vmatpush1.bf16.msra.mxu0 %v9834_v58  ;;  %v9879_v58 = vld [vmem:[%s14265_s1 + $0x1fa0] ss:$16 sps:$4 sm:$0xff]  }
 0x1d0   :  { %6937 = vmatpush1.bf16.msra.mxu1 %v9837_v61  ;;  %6897 = vmatprep.subr.bf16.mxu0 %v9842_v62  ;;  %v9884_v61 = vld [vmem:[%s14265_s1 + $0x1d84] ss:$16 sps:$4 sm:$0xff]  }
 0x1d1   :  { %6938 = vmatprep.subr.bf16.mxu1 %v9845_v5  ;;  %v9887_v62 = vld [vmem:[%s14265_s1 + $0x1f84] ss:$16 sps:$4 sm:$0xff]   ;;  %v9882_v5 = vld [vmem:[%s14265_s1 + $0x1d80] ss:$16 sps:$4 sm:$0xff]  }
 0x1d3   :  { %6898 = vmatpush1.bf16.msra.mxu0 %v9840_v8  ;;  %v9885_v8 = vld [vmem:[%s14265_s1 + $0x1f80] ss:$16 sps:$4 sm:$0xff]  }
 0x1d4   :  { %6939 = vmatpush1.bf16.msra.mxu1 %v9843_v13  ;;  %6899 = vmatprep.subr.bf16.mxu0 %v9848_v14  ;;  %v9890_v13 = vld [vmem:[%s14265_s1 + $0x1d64] ss:$16 sps:$4 sm:$0xff]  }
 0x1d5   :  { %6940 = vmatprep.subr.bf16.mxu1 %v9851_v26  ;;  %v9893_v14 = vld [vmem:[%s14265_s1 + $0x1f64] ss:$16 sps:$4 sm:$0xff]   ;;  %v9888_v26 = vld [vmem:[%s14265_s1 + $0x1d60] ss:$16 sps:$4 sm:$0xff]  }
 0x1d7   :  { %6900 = vmatpush1.bf16.msra.mxu0 %v9846_v20  ;;  %v9891_v20 = vld [vmem:[%s14265_s1 + $0x1f60] ss:$16 sps:$4 sm:$0xff]  }
 0x1d8   :  { %6941 = vmatpush1.bf16.msra.mxu1 %v9849_v18  ;;  %6901 = vmatprep.subr.bf16.mxu0 %v9854_v31  ;;  %v9896_v18 = vld [vmem:[%s14265_s1 + $0x1d44] ss:$16 sps:$4 sm:$0xff]  }
 0x1d9   :  { %6942 = vmatprep.subr.bf16.mxu1 %v9857_v63  ;;  %v9899_v31 = vld [vmem:[%s14265_s1 + $0x1f44] ss:$16 sps:$4 sm:$0xff]   ;;  %v9894_v63 = vld [vmem:[%s14265_s1 + $0x1d40] ss:$16 sps:$4 sm:$0xff]  }
 0x1db   :  { %6902 = vmatpush1.bf16.msra.mxu0 %v9852_v4  ;;  %v9897_v4 = vld [vmem:[%s14265_s1 + $0x1f40] ss:$16 sps:$4 sm:$0xff]  }
 0x1dc   :  { %6943 = vmatpush1.bf16.msra.mxu1 %v9855_v34  ;;  %6903 = vmatprep.subr.bf16.mxu0 %v9860_v28  ;;  %v9902_v34 = vld [vmem:[%s14265_s1 + $0x1d24] ss:$16 sps:$4 sm:$0xff]  }
 0x1dd   :  { %6944 = vmatprep.subr.bf16.mxu1 %v9863_v41  ;;  %v9905_v28 = vld [vmem:[%s14265_s1 + $0x1f24] ss:$16 sps:$4 sm:$0xff]   ;;  %v9900_v41 = vld [vmem:[%s14265_s1 + $0x1d20] ss:$16 sps:$4 sm:$0xff]  }
 0x1df   :  { %6904 = vmatpush1.bf16.msra.mxu0 %v9858_v22  ;;  %v9903_v22 = vld [vmem:[%s14265_s1 + $0x1f20] ss:$16 sps:$4 sm:$0xff]  }
 0x1e0   :  { %6945 = vmatpush1.bf16.msra.mxu1 %v9861_v23  ;;  %6905 = vmatprep.subr.bf16.mxu0 %v9866_v44  ;;  %v9908_v23 = vld [vmem:[%s14265_s1 + $0x1d04] ss:$16 sps:$4 sm:$0xff]  }
 0x1e1   :  { %6946 = vmatprep.subr.bf16.mxu1 %v9869_v45  ;;  %v9911_v44 = vld [vmem:[%s14265_s1 + $0x1f04] ss:$16 sps:$4 sm:$0xff]   ;;  %v9906_v45 = vld [vmem:[%s14265_s1 + $0x1d00] ss:$16 sps:$4 sm:$0xff]  }
 0x1e3   :  { %6906 = vmatpush2.bf16.msra.mxu0 %v9864_v48  ;;  %v9909_v48 = vld [vmem:[%s14265_s1 + $0x1f00] ss:$16 sps:$4 sm:$0xff]  }
 0x1e4   :  { %6947 = vmatpush2.bf16.msra.mxu1 %v9867_v27  ;;  %6907 = vmatprep.subr.bf16.mxu0 %v9872_v49  ;;  %v9918_v27 = vld [vmem:[%s14265_s1 + $0xec] ss:$16 sps:$4 sm:$0xff]  }
 0x1e5   :  { %6948 = vmatprep.subr.bf16.mxu1 %v9875_v50  ;;  %v9921_v49 = vld [vmem:[%s14265_s1 + $0x2ec] ss:$16 sps:$4 sm:$0xff]   ;;  %v9916_v50 = vld [vmem:[%s14265_s1 + $0xe8] ss:$16 sps:$4 sm:$0xff]  }
 0x1e7   :  { %6908 = vmatpush2.bf16.msra.mxu0 %v9870_v52  ;;  %v9919_v52 = vld [vmem:[%s14265_s1 + $0x2e8] ss:$16 sps:$4 sm:$0xff]  }
 0x1e8   :  { %6949 = vmatpush2.bf16.msra.mxu1 %v9873_v55  ;;  %6909 = vmatprep.subr.bf16.mxu0 %v9878_v33  ;;  %v12544_v55 = vcombine.low %v12311_v15, %v12311_v15  ;;  %v12548_v33 = vcombine.low %v12316_v19, %v12316_v19  ;;  %v9922_v15 = vld [vmem:[%s14265_s1 + $0xc8] ss:$16 sps:$4 sm:$0xff]  }
 0x1e9   :  { %6950 = vmatprep.subr.bf16.mxu1 %v9881_v56  ;;  %v9924_v56 = vld [vmem:[%s14265_s1 + $0xcc] ss:$16 sps:$4 sm:$0xff]   ;;  %v9925_v19 = vld [vmem:[%s14265_s1 + $0x2c8] ss:$16 sps:$4 sm:$0xff]  }
 0x1eb   :  { %6910 = vmatpush2.bf16.msra.mxu0 %v9876_v57  ;;  %v9927_v57 = vld [vmem:[%s14265_s1 + $0x2cc] ss:$16 sps:$4 sm:$0xff]  }
 0x1ec   :  { %6951 = vmatpush2.bf16.msra.mxu1 %v9879_v58  ;;  %6911 = vmatprep.subr.bf16.mxu0 %v9884_v61 }
 0x1ed   :  { %6952 = vmatprep.subr.bf16.mxu1 %v9887_v62 }
 0x1ef   :  { %6912 = vmatpush2.bf16.msra.mxu0 %v9882_v5 }
 0x1f0   :  { %6953 = vmatpush2.bf16.msra.mxu1 %v9885_v8  ;;  %6913 = vmatprep.subr.bf16.mxu0 %v9890_v13  ;;  %v9930_v13 = vld [vmem:[%s14265_s1 + $0xac] ss:$16 sps:$4 sm:$0xff]  }
 0x1f1   :  { %6954 = vmatprep.subr.bf16.mxu1 %v9893_v14  ;;  %v9933_v14 = vld [vmem:[%s14265_s1 + $0x2ac] ss:$16 sps:$4 sm:$0xff]  }
 0x1f3   :  { %6914 = vmatpush2.bf16.msra.mxu0 %v9888_v26 }
 0x1f4   :  { %6955 = vmatpush2.bf16.msra.mxu1 %v9891_v20  ;;  %6915 = vmatprep.subr.bf16.mxu0 %v9896_v18  ;;  %v9931_v18 = vld [vmem:[%s14265_s1 + $0x2a8] ss:$16 sps:$4 sm:$0xff]  }
 0x1f5   :  { %6956 = vmatprep.subr.bf16.mxu1 %v9899_v31 }
 0x1f7   :  { %6916 = vmatpush2.bf16.msra.mxu0 %v9894_v63 }
 0x1f8   :  { %6957 = vmatpush2.bf16.msra.mxu1 %v9897_v4  ;;  %6917 = vmatprep.subr.bf16.mxu0 %v9902_v34 }
 0x1f9   :  { %6958 = vmatprep.subr.bf16.mxu1 %v9905_v28  ;;  %v9936_v28 = vld [vmem:[%s14265_s1 + $0x8c] ss:$16 sps:$4 sm:$0xff]  }
 0x1fb   :  { %6918 = vmatpush2.bf16.msra.mxu0 %v9900_v41  ;;  %v9937_v41 = vld [vmem:[%s14265_s1 + $0x288] ss:$16 sps:$4 sm:$0xff]  }
 0x1fc   :  { %6959 = vmatpush2.bf16.msra.mxu1 %v9903_v22  ;;  %6919 = vmatprep.subr.bf16.mxu0 %v9908_v23  ;;  %v9942_v22 = vld [vmem:[%s14265_s1 + $0x6c] ss:$16 sps:$4 sm:$0xff]  }
 0x1fd   :  { %6960 = vmatprep.subr.bf16.mxu1 %v9911_v44  ;;  %v9945_v23 = vld [vmem:[%s14265_s1 + $0x26c] ss:$16 sps:$4 sm:$0xff]   ;;  %v9940_v44 = vld [vmem:[%s14265_s1 + $0x68] ss:$16 sps:$4 sm:$0xff]  }
 0x1ff   :  { %6920 = vmatpush2.bf16.msra.mxu0 %v9906_v45  ;;  %v9943_v45 = vld [vmem:[%s14265_s1 + $0x268] ss:$16 sps:$4 sm:$0xff]  }
 0x200   :  { %6961 = vmatpush2.bf16.msra.mxu1 %v9909_v48  ;;  %6971 = vmatprep.subr.bf16.mxu0 %v9918_v27  ;;  %v9948_v48 = vld [vmem:[%s14265_s1 + $0x4c] ss:$16 sps:$4 sm:$0xff]  }
 0x201   :  { %7012 = vmatprep.subr.bf16.mxu1 %v9921_v49  ;;  %v9951_v27 = vld [vmem:[%s14265_s1 + $0x24c] ss:$16 sps:$4 sm:$0xff]   ;;  %v9946_v49 = vld [vmem:[%s14265_s1 + $0x48] ss:$16 sps:$4 sm:$0xff]  }
 0x202   :  { %v6677_v58 = vpop.f32.mrf.mxu0  ;;  %6922 = vmatmul.mubr.bf16.vlgmr.msra.gmra.mxu0 %v12544_v55 }
 0x203   :  { %v6718_v61 = vpop.f32.mrf.mxu1  ;;  %6963 = vmatmul.mubr.bf16.vlgmr.msra.gmra.mxu1 %v12548_v33  ;;  %v6678_v62 = vadd.f32 %v6677_v58, %v12361_v46  ;;  %6972 = vmatpush1.bf16.msra.mxu0 %v9916_v50  ;;  %v9928_v46 = vld [vmem:[%s14265_s1 + $0xa8] ss:$16 sps:$4 sm:$0xff]   ;;  %v9963_v58 = vld [vmem:[%s14265_s1 + $0x20c] ss:$16 sps:$4 sm:$0xff]  }
 0x204   :  { %7013 = vmatpush1.bf16.msra.mxu1 %v9919_v52  ;;  %v6679_v5 = vpop.f32.mrf.mxu0  ;;  %6973 = vmatprep.subr.bf16.mxu0 %v9924_v56  ;;  %v9949_v50 = vld [vmem:[%s14265_s1 + $0x248] ss:$16 sps:$4 sm:$0xff]   ;;  %v9954_v52 = vld [vmem:[%s14265_s1 + $0x2c] ss:$16 sps:$4 sm:$0xff]  }
 0x205   :  { %v6720_v8 = vpop.f32.mrf.mxu1  ;;  %7014 = vmatprep.subr.bf16.mxu1 %v9927_v57  ;;  %v12571_v26 = vadd.f32 %v6718_v61, %v6678_v62  ;;  %v6680_v20 = vadd.f32 %v6679_v5, %v12372_v53  ;;  %7003 = vmatprep.mubr.bf16.mxu0 %v10888_v47  ;;  %v9939_v47 = vld [vmem:[%s14265_s1 + $0x28c] ss:$16 sps:$4 sm:$0xff]   ;;  %v9952_v57 = vld [vmem:[%s14265_s1 + $0x28] ss:$16 sps:$4 sm:$0xff]  }
 0x206   :  { %7044 = vmatprep.mubr.bf16.mxu1 %v10899_v51  ;;  %v6681_v31 = vpop.f32.mrf.mxu0  ;;  %v9934_v51 = vld [vmem:[%s14265_s1 + $0x88] ss:$16 sps:$4 sm:$0xff]   ;;  %v9957_v56 = vld [vmem:[%s14265_s1 + $0x22c] ss:$16 sps:$4 sm:$0xff]  }
 0x207   :  { %v6722_v63 = vpop.f32.mrf.mxu1  ;;  %v12582_v4 = vadd.f32 %v6720_v8, %v6680_v20  ;;  %6974 = vmatpush1.bf16.msra.mxu0 %v9922_v15  ;;  %v9955_v15 = vld [vmem:[%s14265_s1 + $0x228] ss:$16 sps:$4 sm:$0xff]   ;;  %v9966_v5 = vld [vmem:[%s14265_s1 + $0x1ec] ss:$16 sps:$4 sm:$0xff]  }
 0x208   :  { %7015 = vmatpush1.bf16.msra.mxu1 %v9925_v19  ;;  %v6682_v34 = vpop.f32.mrf.mxu0  ;;  %6975 = vmatprep.subr.bf16.mxu0 %v9930_v13  ;;  %v9960_v19 = vld [vmem:[%s14265_s1 + $0xc] ss:$16 sps:$4 sm:$0xff]   ;;  %v9958_v61 = vld [vmem:[%s14265_s1 + $0x8] ss:$16 sps:$4 sm:$0xff]  }
 0x209   :  { %v6723_v53 = vpop.f32.mrf.mxu1  ;;  %7016 = vmatprep.subr.bf16.mxu1 %v9933_v14  ;;  %v9961_v62 = vld [vmem:[%s14265_s1 + $0x208] ss:$16 sps:$4 sm:$0xff]   ;;  %v9969_v8 = vld [vmem:[%s14265_s1 + $0x3ec] ss:$16 sps:$4 sm:$0xff]  }
 0x20a   :  { %v9964_v13 = vld [vmem:[%s14265_s1 + $0x1e8] ss:$16 sps:$4 sm:$0xff]   ;;  %v9972_v20 = vld [vmem:[%s14265_s1 + $0x1cc] ss:$16 sps:$4 sm:$0xff]  }
 0x20b   :  { %6976 = vmatpush1.bf16.msra.mxu0 %v9928_v46  ;;  %v9967_v14 = vld [vmem:[%s14265_s1 + $0x3e8] ss:$16 sps:$4 sm:$0xff]   ;;  %v9975_v46 = vld [vmem:[%s14265_s1 + $0x3cc] ss:$16 sps:$4 sm:$0xff]  }
 0x20c   :  { %7017 = vmatpush1.bf16.msra.mxu1 %v9931_v18  ;;  %6977 = vmatprep.subr.bf16.mxu0 %v9936_v28  ;;  %v9970_v18 = vld [vmem:[%s14265_s1 + $0x1c8] ss:$16 sps:$4 sm:$0xff]   ;;  %v9978_v63 = vld [vmem:[%s14265_s1 + $0x1ac] ss:$16 sps:$4 sm:$0xff]  }
 0x20d   :  { %7018 = vmatprep.subr.bf16.mxu1 %v9939_v47  ;;  %v9973_v31 = vld [vmem:[%s14265_s1 + $0x3c8] ss:$16 sps:$4 sm:$0xff]   ;;  %v9981_v34 = vld [vmem:[%s14265_s1 + $0x3ac] ss:$16 sps:$4 sm:$0xff]  }
 0x20e   :  { %v9976_v53 = vld [vmem:[%s14265_s1 + $0x1a8] ss:$16 sps:$4 sm:$0xff]   ;;  %v9984_v47 = vld [vmem:[%s14265_s1 + $0x18c] ss:$16 sps:$4 sm:$0xff]  }
 0x20f   :  { %6978 = vmatpush1.bf16.msra.mxu0 %v9934_v51  ;;  %v9979_v28 = vld [vmem:[%s14265_s1 + $0x3a8] ss:$16 sps:$4 sm:$0xff]   ;;  %v9987_v51 = vld [vmem:[%s14265_s1 + $0x38c] ss:$16 sps:$4 sm:$0xff]  }
 0x210   :  { %7019 = vmatpush1.bf16.msra.mxu1 %v9937_v41  ;;  %6979 = vmatprep.subr.bf16.mxu0 %v9942_v22  ;;  %v9982_v41 = vld [vmem:[%s14265_s1 + $0x188] ss:$16 sps:$4 sm:$0xff]  }
 0x211   :  { %7020 = vmatprep.subr.bf16.mxu1 %v9945_v23  ;;  %v9985_v22 = vld [vmem:[%s14265_s1 + $0x388] ss:$16 sps:$4 sm:$0xff]   ;;  %v9990_v23 = vld [vmem:[%s14265_s1 + $0x16c] ss:$16 sps:$4 sm:$0xff]  }
 0x213   :  { %6980 = vmatpush1.bf16.msra.mxu0 %v9940_v44  ;;  %v9993_v44 = vld [vmem:[%s14265_s1 + $0x36c] ss:$16 sps:$4 sm:$0xff]  }
 0x214   :  { %7021 = vmatpush1.bf16.msra.mxu1 %v9943_v45  ;;  %6981 = vmatprep.subr.bf16.mxu0 %v9948_v48  ;;  %v9988_v45 = vld [vmem:[%s14265_s1 + $0x168] ss:$16 sps:$4 sm:$0xff]  }
 0x215   :  { %7022 = vmatprep.subr.bf16.mxu1 %v9951_v27  ;;  %v9991_v48 = vld [vmem:[%s14265_s1 + $0x368] ss:$16 sps:$4 sm:$0xff]   ;;  %v9996_v27 = vld [vmem:[%s14265_s1 + $0x14c] ss:$16 sps:$4 sm:$0xff]  }
 0x217   :  { %6982 = vmatpush1.bf16.msra.mxu0 %v9946_v49  ;;  %v9999_v49 = vld [vmem:[%s14265_s1 + $0x34c] ss:$16 sps:$4 sm:$0xff]  }
 0x218   :  { %7023 = vmatpush1.bf16.msra.mxu1 %v9949_v50  ;;  %6983 = vmatprep.subr.bf16.mxu0 %v9954_v52  ;;  %v9994_v50 = vld [vmem:[%s14265_s1 + $0x148] ss:$16 sps:$4 sm:$0xff]  }
 0x219   :  { %7024 = vmatprep.subr.bf16.mxu1 %v9957_v56  ;;  %v9997_v52 = vld [vmem:[%s14265_s1 + $0x348] ss:$16 sps:$4 sm:$0xff]   ;;  %v10002_v56 = vld [vmem:[%s14265_s1 + $0x12c] ss:$16 sps:$4 sm:$0xff]  }
 0x21b   :  { %6984 = vmatpush1.bf16.msra.mxu0 %v9952_v57  ;;  %v10005_v57 = vld [vmem:[%s14265_s1 + $0x32c] ss:$16 sps:$4 sm:$0xff]  }
 0x21c   :  { %7025 = vmatpush1.bf16.msra.mxu1 %v9955_v15  ;;  %6985 = vmatprep.subr.bf16.mxu0 %v9960_v19  ;;  %v10000_v15 = vld [vmem:[%s14265_s1 + $0x128] ss:$16 sps:$4 sm:$0xff]  }
 0x21d   :  { %7026 = vmatprep.subr.bf16.mxu1 %v9963_v58  ;;  %v10003_v19 = vld [vmem:[%s14265_s1 + $0x328] ss:$16 sps:$4 sm:$0xff]   ;;  %v10008_v58 = vld [vmem:[%s14265_s1 + $0x10c] ss:$16 sps:$4 sm:$0xff]  }
 0x21f   :  { %6986 = vmatpush1.bf16.msra.mxu0 %v9958_v61  ;;  %v10011_v61 = vld [vmem:[%s14265_s1 + $0x30c] ss:$16 sps:$4 sm:$0xff]  }
 0x220   :  { %7027 = vmatpush1.bf16.msra.mxu1 %v9961_v62  ;;  %6987 = vmatprep.subr.bf16.mxu0 %v9966_v5  ;;  %v10006_v62 = vld [vmem:[%s14265_s1 + $0x108] ss:$16 sps:$4 sm:$0xff]  }
 0x221   :  { %7028 = vmatprep.subr.bf16.mxu1 %v9969_v8  ;;  %v10009_v5 = vld [vmem:[%s14265_s1 + $0x308] ss:$16 sps:$4 sm:$0xff]   ;;  %v10014_v8 = vld [vmem:[%s14265_s1 + $0x4ec] ss:$16 sps:$4 sm:$0xff]  }
 0x223   :  { %6988 = vmatpush2.bf16.msra.mxu0 %v9964_v13  ;;  %v10017_v13 = vld [vmem:[%s14265_s1 + $0x6ec] ss:$16 sps:$4 sm:$0xff]  }
 0x224   :  { %7029 = vmatpush2.bf16.msra.mxu1 %v9967_v14  ;;  %6989 = vmatprep.subr.bf16.mxu0 %v9972_v20  ;;  %v10012_v14 = vld [vmem:[%s14265_s1 + $0x4e8] ss:$16 sps:$4 sm:$0xff]  }
 0x225   :  { %7030 = vmatprep.subr.bf16.mxu1 %v9975_v46  ;;  %v10015_v20 = vld [vmem:[%s14265_s1 + $0x6e8] ss:$16 sps:$4 sm:$0xff]   ;;  %v10020_v46 = vld [vmem:[%s14265_s1 + $0x4cc] ss:$16 sps:$4 sm:$0xff]  }
 0x227   :  { %6990 = vmatpush2.bf16.msra.mxu0 %v9970_v18  ;;  %v10023_v18 = vld [vmem:[%s14265_s1 + $0x6cc] ss:$16 sps:$4 sm:$0xff]  }
 0x228   :  { %7031 = vmatpush2.bf16.msra.mxu1 %v9973_v31  ;;  %6991 = vmatprep.subr.bf16.mxu0 %v9978_v63  ;;  %v10018_v31 = vld [vmem:[%s14265_s1 + $0x4c8] ss:$16 sps:$4 sm:$0xff]  }
 0x229   :  { %7032 = vmatprep.subr.bf16.mxu1 %v9981_v34  ;;  %v10021_v63 = vld [vmem:[%s14265_s1 + $0x6c8] ss:$16 sps:$4 sm:$0xff]  }
 0x22b   :  { %6992 = vmatpush2.bf16.msra.mxu0 %v9976_v53 }
 0x22c   :  { %7033 = vmatpush2.bf16.msra.mxu1 %v9979_v28  ;;  %6993 = vmatprep.subr.bf16.mxu0 %v9984_v47 }
 0x22d   :  { %7034 = vmatprep.subr.bf16.mxu1 %v9987_v51 }
 0x22f   :  { %6994 = vmatpush2.bf16.msra.mxu0 %v9982_v41  ;;  %v10026_v41 = vld [vmem:[%s14265_s1 + $0x4ac] ss:$16 sps:$4 sm:$0xff]  }
 0x230   :  { %7035 = vmatpush2.bf16.msra.mxu1 %v9985_v22  ;;  %6995 = vmatprep.subr.bf16.mxu0 %v9990_v23  ;;  %v10029_v22 = vld [vmem:[%s14265_s1 + $0x6ac] ss:$16 sps:$4 sm:$0xff]  }
 0x231   :  { %7036 = vmatprep.subr.bf16.mxu1 %v9993_v44 }
 0x233   :  { %6996 = vmatpush2.bf16.msra.mxu0 %v9988_v45  ;;  %v10024_v45 = vld [vmem:[%s14265_s1 + $0x4a8] ss:$16 sps:$4 sm:$0xff]  }
 0x234   :  { %7037 = vmatpush2.bf16.msra.mxu1 %v9991_v48  ;;  %6997 = vmatprep.subr.bf16.mxu0 %v9996_v27  ;;  %v10027_v48 = vld [vmem:[%s14265_s1 + $0x6a8] ss:$16 sps:$4 sm:$0xff]  }
 0x235   :  { %7038 = vmatprep.subr.bf16.mxu1 %v9999_v49  ;;  %v10030_v49 = vld [vmem:[%s14265_s1 + $0x488] ss:$16 sps:$4 sm:$0xff]  }
 0x237   :  { %6998 = vmatpush2.bf16.msra.mxu0 %v9994_v50  ;;  %v10033_v50 = vld [vmem:[%s14265_s1 + $0x688] ss:$16 sps:$4 sm:$0xff]  }
 0x238   :  { %7039 = vmatpush2.bf16.msra.mxu1 %v9997_v52  ;;  %6999 = vmatprep.subr.bf16.mxu0 %v10002_v56  ;;  %v10038_v52 = vld [vmem:[%s14265_s1 + $0x46c] ss:$16 sps:$4 sm:$0xff]  }
 0x239   :  { %7040 = vmatprep.subr.bf16.mxu1 %v10005_v57  ;;  %v10041_v56 = vld [vmem:[%s14265_s1 + $0x66c] ss:$16 sps:$4 sm:$0xff]   ;;  %v10036_v57 = vld [vmem:[%s14265_s1 + $0x468] ss:$16 sps:$4 sm:$0xff]  }
 0x23b   :  { %7000 = vmatpush2.bf16.msra.mxu0 %v10000_v15  ;;  %v10039_v15 = vld [vmem:[%s14265_s1 + $0x668] ss:$16 sps:$4 sm:$0xff]  }
 0x23c   :  { %7041 = vmatpush2.bf16.msra.mxu1 %v10003_v19  ;;  %7001 = vmatprep.subr.bf16.mxu0 %v10008_v58  ;;  %v10044_v19 = vld [vmem:[%s14265_s1 + $0x44c] ss:$16 sps:$4 sm:$0xff]  }
 0x23d   :  { %7042 = vmatprep.subr.bf16.mxu1 %v10011_v61  ;;  %v10047_v58 = vld [vmem:[%s14265_s1 + $0x64c] ss:$16 sps:$4 sm:$0xff]   ;;  %v10042_v61 = vld [vmem:[%s14265_s1 + $0x448] ss:$16 sps:$4 sm:$0xff]  }
 0x23f   :  { %7002 = vmatpush2.bf16.msra.mxu0 %v10006_v62  ;;  %v10045_v62 = vld [vmem:[%s14265_s1 + $0x648] ss:$16 sps:$4 sm:$0xff]  }
 0x240   :  { %7043 = vmatpush2.bf16.msra.mxu1 %v10009_v5  ;;  %7053 = vmatprep.subr.bf16.mxu0 %v10014_v8  ;;  %v10050_v5 = vld [vmem:[%s14265_s1 + $0x42c] ss:$16 sps:$4 sm:$0xff]  }
 0x241   :  { %7094 = vmatprep.subr.bf16.mxu1 %v10017_v13  ;;  %v10053_v8 = vld [vmem:[%s14265_s1 + $0x62c] ss:$16 sps:$4 sm:$0xff]   ;;  %v10048_v13 = vld [vmem:[%s14265_s1 + $0x428] ss:$16 sps:$4 sm:$0xff]  }
 0x242   :  { %v6759_v34 = vpop.f32.mrf.mxu0  ;;  %7004 = vmatmul.mubr.bf16.vlgmr.msra.gmra.mxu0 %v10957_v6 }
 0x243   :  { %v6800_v53 = vpop.f32.mrf.mxu1  ;;  %7045 = vmatmul.mubr.bf16.vlgmr.msra.gmra.mxu1 %v10959_v7  ;;  %v6760_v28 = vadd.f32 %v6759_v34, %v12571_v26  ;;  %7054 = vmatpush1.bf16.msra.mxu0 %v10012_v14  ;;  %v10051_v14 = vld [vmem:[%s14265_s1 + $0x628] ss:$16 sps:$4 sm:$0xff]   ;;  %v10065_v34 = vld [vmem:[%s14265_s1 + $0x7ec] ss:$16 sps:$4 sm:$0xff]  }
 0x244   :  { %7095 = vmatpush1.bf16.msra.mxu1 %v10015_v20  ;;  %v6761_v47 = vpop.f32.mrf.mxu0  ;;  %7055 = vmatprep.subr.bf16.mxu0 %v10020_v46  ;;  %v10056_v20 = vld [vmem:[%s14265_s1 + $0x40c] ss:$16 sps:$4 sm:$0xff]  }
 0x245   :  { %v6802_v51 = vpop.f32.mrf.mxu1  ;;  %7096 = vmatprep.subr.bf16.mxu1 %v10023_v18  ;;  %v12773_v23 = vadd.f32 %v6800_v53, %v6760_v28  ;;  %v6762_v6 = vadd.f32 %v6761_v47, %v12582_v4  ;;  %7085 = vmatprep.mubr.bf16.mxu0 %v11053_v36  ;;  %v10032_v36 = vld [vmem:[%s14265_s1 + $0x48c] ss:$16 sps:$4 sm:$0xff]   ;;  %v10054_v18 = vld [vmem:[%s14265_s1 + $0x408] ss:$16 sps:$4 sm:$0xff]  }
 0x246   :  { %7126 = vmatprep.mubr.bf16.mxu1 %v11057_v37  ;;  %v6763_v7 = vpop.f32.mrf.mxu0  ;;  %v10035_v37 = vld [vmem:[%s14265_s1 + $0x68c] ss:$16 sps:$4 sm:$0xff]   ;;  %v10060_v53 = vld [vmem:[%s14265_s1 + $0x5e8] ss:$16 sps:$4 sm:$0xff]  }
 0x247   :  { %v6804_v26 = vpop.f32.mrf.mxu1  ;;  %v12778_v44 = vadd.f32 %v6802_v51, %v6762_v6  ;;  %7056 = vmatpush1.bf16.msra.mxu0 %v10018_v31  ;;  %v10059_v46 = vld [vmem:[%s14265_s1 + $0x60c] ss:$16 sps:$4 sm:$0xff]   ;;  %v10057_v31 = vld [vmem:[%s14265_s1 + $0x608] ss:$16 sps:$4 sm:$0xff]  }
 0x248   :  { %7097 = vmatpush1.bf16.msra.mxu1 %v10021_v63  ;;  %v6764_v27 = vpop.f32.mrf.mxu0  ;;  %7057 = vmatprep.subr.bf16.mxu0 %v10026_v41  ;;  %v10062_v63 = vld [vmem:[%s14265_s1 + $0x5ec] ss:$16 sps:$4 sm:$0xff]   ;;  %v10063_v28 = vld [vmem:[%s14265_s1 + $0x7e8] ss:$16 sps:$4 sm:$0xff]  }
 0x249   :  { %v6805_v4 = vpop.f32.mrf.mxu1  ;;  %7098 = vmatprep.subr.bf16.mxu1 %v10029_v22  ;;  %v10068_v47 = vld [vmem:[%s14265_s1 + $0x5cc] ss:$16 sps:$4 sm:$0xff]   ;;  %v10066_v41 = vld [vmem:[%s14265_s1 + $0x5c8] ss:$16 sps:$4 sm:$0xff]  }
 0x24a   :  { %v10071_v51 = vld [vmem:[%s14265_s1 + $0x7cc] ss:$16 sps:$4 sm:$0xff]   ;;  %v10069_v22 = vld [vmem:[%s14265_s1 + $0x7c8] ss:$16 sps:$4 sm:$0xff]  }
 0x24b   :  { %7058 = vmatpush1.bf16.msra.mxu0 %v10024_v45  ;;  %v10074_v6 = vld [vmem:[%s14265_s1 + $0x5ac] ss:$16 sps:$4 sm:$0xff]   ;;  %v10072_v26 = vld [vmem:[%s14265_s1 + $0x5a8] ss:$16 sps:$4 sm:$0xff]  }
 0x24c   :  { %7099 = vmatpush1.bf16.msra.mxu1 %v10027_v48  ;;  %7059 = vmatprep.subr.bf16.mxu0 %v10032_v36  ;;  %v10077_v7 = vld [vmem:[%s14265_s1 + $0x7ac] ss:$16 sps:$4 sm:$0xff]   ;;  %v10075_v45 = vld [vmem:[%s14265_s1 + $0x7a8] ss:$16 sps:$4 sm:$0xff]  }
 0x24d   :  { %7100 = vmatprep.subr.bf16.mxu1 %v10035_v37  ;;  %v10080_v48 = vld [vmem:[%s14265_s1 + $0x58c] ss:$16 sps:$4 sm:$0xff]   ;;  %v10078_v4 = vld [vmem:[%s14265_s1 + $0x588] ss:$16 sps:$4 sm:$0xff]  }
 0x24e   :  { %v10083_v27 = vld [vmem:[%s14265_s1 + $0x78c] ss:$16 sps:$4 sm:$0xff]   ;;  %v10081_v36 = vld [vmem:[%s14265_s1 + $0x788] ss:$16 sps:$4 sm:$0xff]  }
 0x24f   :  { %7060 = vmatpush1.bf16.msra.mxu0 %v10030_v49  ;;  %v10086_v37 = vld [vmem:[%s14265_s1 + $0x56c] ss:$16 sps:$4 sm:$0xff]  }
 0x250   :  { %7101 = vmatpush1.bf16.msra.mxu1 %v10033_v50  ;;  %7061 = vmatprep.subr.bf16.mxu0 %v10038_v52  ;;  %v10089_v49 = vld [vmem:[%s14265_s1 + $0x76c] ss:$16 sps:$4 sm:$0xff]   ;;  %v10084_v50 = vld [vmem:[%s14265_s1 + $0x568] ss:$16 sps:$4 sm:$0xff]  }
 0x251   :  { %7102 = vmatprep.subr.bf16.mxu1 %v10041_v56  ;;  %v10087_v52 = vld [vmem:[%s14265_s1 + $0x768] ss:$16 sps:$4 sm:$0xff]   ;;  %v10092_v56 = vld [vmem:[%s14265_s1 + $0x54c] ss:$16 sps:$4 sm:$0xff]  }
 0x253   :  { %7062 = vmatpush1.bf16.msra.mxu0 %v10036_v57  ;;  %v10095_v57 = vld [vmem:[%s14265_s1 + $0x74c] ss:$16 sps:$4 sm:$0xff]  }
 0x254   :  { %7103 = vmatpush1.bf16.msra.mxu1 %v10039_v15  ;;  %7063 = vmatprep.subr.bf16.mxu0 %v10044_v19  ;;  %v10090_v15 = vld [vmem:[%s14265_s1 + $0x548] ss:$16 sps:$4 sm:$0xff]  }
 0x255   :  { %7104 = vmatprep.subr.bf16.mxu1 %v10047_v58  ;;  %v10093_v19 = vld [vmem:[%s14265_s1 + $0x748] ss:$16 sps:$4 sm:$0xff]   ;;  %v10098_v58 = vld [vmem:[%s14265_s1 + $0x52c] ss:$16 sps:$4 sm:$0xff]  }
 0x257   :  { %7064 = vmatpush1.bf16.msra.mxu0 %v10042_v61  ;;  %v10101_v61 = vld [vmem:[%s14265_s1 + $0x72c] ss:$16 sps:$4 sm:$0xff]  }
 0x258   :  { %7105 = vmatpush1.bf16.msra.mxu1 %v10045_v62  ;;  %7065 = vmatprep.subr.bf16.mxu0 %v10050_v5  ;;  %v10096_v62 = vld [vmem:[%s14265_s1 + $0x528] ss:$16 sps:$4 sm:$0xff]  }
 0x259   :  { %7106 = vmatprep.subr.bf16.mxu1 %v10053_v8  ;;  %v10099_v5 = vld [vmem:[%s14265_s1 + $0x728] ss:$16 sps:$4 sm:$0xff]   ;;  %v10104_v8 = vld [vmem:[%s14265_s1 + $0x50c] ss:$16 sps:$4 sm:$0xff]  }
 0x25b   :  { %7066 = vmatpush1.bf16.msra.mxu0 %v10048_v13  ;;  %v10107_v13 = vld [vmem:[%s14265_s1 + $0x70c] ss:$16 sps:$4 sm:$0xff]  }
 0x25c   :  { %7107 = vmatpush1.bf16.msra.mxu1 %v10051_v14  ;;  %7067 = vmatprep.subr.bf16.mxu0 %v10056_v20  ;;  %v10102_v14 = vld [vmem:[%s14265_s1 + $0x508] ss:$16 sps:$4 sm:$0xff]  }
 0x25d   :  { %7108 = vmatprep.subr.bf16.mxu1 %v10059_v46  ;;  %v10105_v20 = vld [vmem:[%s14265_s1 + $0x708] ss:$16 sps:$4 sm:$0xff]   ;;  %v10110_v46 = vld [vmem:[%s14265_s1 + $0x8ec] ss:$16 sps:$4 sm:$0xff]  }
 0x25f   :  { %7068 = vmatpush1.bf16.msra.mxu0 %v10054_v18  ;;  %v10113_v18 = vld [vmem:[%s14265_s1 + $0xaec] ss:$16 sps:$4 sm:$0xff]  }
 0x260   :  { %7109 = vmatpush1.bf16.msra.mxu1 %v10057_v31  ;;  %7069 = vmatprep.subr.bf16.mxu0 %v10062_v63  ;;  %v10108_v31 = vld [vmem:[%s14265_s1 + $0x8e8] ss:$16 sps:$4 sm:$0xff]  }
 0x261   :  { %7110 = vmatprep.subr.bf16.mxu1 %v10065_v34  ;;  %v10111_v63 = vld [vmem:[%s14265_s1 + $0xae8] ss:$16 sps:$4 sm:$0xff]   ;;  %v10116_v34 = vld [vmem:[%s14265_s1 + $0x8cc] ss:$16 sps:$4 sm:$0xff]  }
 0x263   :  { %7070 = vmatpush2.bf16.msra.mxu0 %v10060_v53  ;;  %v10119_v53 = vld [vmem:[%s14265_s1 + $0xacc] ss:$16 sps:$4 sm:$0xff]  }
 0x264   :  { %7111 = vmatpush2.bf16.msra.mxu1 %v10063_v28  ;;  %7071 = vmatprep.subr.bf16.mxu0 %v10068_v47 }
 0x265   :  { %7112 = vmatprep.subr.bf16.mxu1 %v10071_v51 }
 0x267   :  { %7072 = vmatpush2.bf16.msra.mxu0 %v10066_v41  ;;  %v10114_v41 = vld [vmem:[%s14265_s1 + $0x8c8] ss:$16 sps:$4 sm:$0xff]  }
 0x268   :  { %7113 = vmatpush2.bf16.msra.mxu1 %v10069_v22  ;;  %7073 = vmatprep.subr.bf16.mxu0 %v10074_v6  ;;  %v10117_v22 = vld [vmem:[%s14265_s1 + $0xac8] ss:$16 sps:$4 sm:$0xff]  }
 0x269   :  { %7114 = vmatprep.subr.bf16.mxu1 %v10077_v7 }
 0x26b   :  { %7074 = vmatpush2.bf16.msra.mxu0 %v10072_v26 }
 0x26c   :  { %7115 = vmatpush2.bf16.msra.mxu1 %v10075_v45  ;;  %7075 = vmatprep.subr.bf16.mxu0 %v10080_v48 }
 0x26d   :  { %7116 = vmatprep.subr.bf16.mxu1 %v10083_v27 }
 0x26f   :  { %7076 = vmatpush2.bf16.msra.mxu0 %v10078_v4  ;;  %v10120_v4 = vld [vmem:[%s14265_s1 + $0x8a8] ss:$16 sps:$4 sm:$0xff]  }
 0x270   :  { %7117 = vmatpush2.bf16.msra.mxu1 %v10081_v36  ;;  %7077 = vmatprep.subr.bf16.mxu0 %v10086_v37  ;;  %v10123_v36 = vld [vmem:[%s14265_s1 + $0xaa8] ss:$16 sps:$4 sm:$0xff]  }
 0x271   :  { %7118 = vmatprep.subr.bf16.mxu1 %v10089_v49  ;;  %v10126_v49 = vld [vmem:[%s14265_s1 + $0x888] ss:$16 sps:$4 sm:$0xff]  }
 0x273   :  { %7078 = vmatpush2.bf16.msra.mxu0 %v10084_v50  ;;  %v10129_v50 = vld [vmem:[%s14265_s1 + $0xa88] ss:$16 sps:$4 sm:$0xff]  }
 0x274   :  { %7119 = vmatpush2.bf16.msra.mxu1 %v10087_v52  ;;  %7079 = vmatprep.subr.bf16.mxu0 %v10092_v56  ;;  %v10134_v52 = vld [vmem:[%s14265_s1 + $0x86c] ss:$16 sps:$4 sm:$0xff]  }
 0x275   :  { %7120 = vmatprep.subr.bf16.mxu1 %v10095_v57  ;;  %v10137_v56 = vld [vmem:[%s14265_s1 + $0xa6c] ss:$16 sps:$4 sm:$0xff]   ;;  %v10132_v57 = vld [vmem:[%s14265_s1 + $0x868] ss:$16 sps:$4 sm:$0xff]  }
 0x277   :  { %7080 = vmatpush2.bf16.msra.mxu0 %v10090_v15  ;;  %v10135_v15 = vld [vmem:[%s14265_s1 + $0xa68] ss:$16 sps:$4 sm:$0xff]  }
 0x278   :  { %7121 = vmatpush2.bf16.msra.mxu1 %v10093_v19  ;;  %7081 = vmatprep.subr.bf16.mxu0 %v10098_v58  ;;  %v10140_v19 = vld [vmem:[%s14265_s1 + $0x84c] ss:$16 sps:$4 sm:$0xff]  }
 0x279   :  { %7122 = vmatprep.subr.bf16.mxu1 %v10101_v61  ;;  %v10143_v58 = vld [vmem:[%s14265_s1 + $0xa4c] ss:$16 sps:$4 sm:$0xff]   ;;  %v10138_v61 = vld [vmem:[%s14265_s1 + $0x848] ss:$16 sps:$4 sm:$0xff]  }
 0x27b   :  { %7082 = vmatpush2.bf16.msra.mxu0 %v10096_v62  ;;  %v10141_v62 = vld [vmem:[%s14265_s1 + $0xa48] ss:$16 sps:$4 sm:$0xff]  }
 0x27c   :  { %7123 = vmatpush2.bf16.msra.mxu1 %v10099_v5  ;;  %7083 = vmatprep.subr.bf16.mxu0 %v10104_v8  ;;  %v10146_v5 = vld [vmem:[%s14265_s1 + $0x82c] ss:$16 sps:$4 sm:$0xff]  }
 0x27d   :  { %7124 = vmatprep.subr.bf16.mxu1 %v10107_v13  ;;  %v10149_v8 = vld [vmem:[%s14265_s1 + $0xa2c] ss:$16 sps:$4 sm:$0xff]   ;;  %v10144_v13 = vld [vmem:[%s14265_s1 + $0x828] ss:$16 sps:$4 sm:$0xff]  }
 0x27f   :  { %7084 = vmatpush2.bf16.msra.mxu0 %v10102_v14  ;;  %v10147_v14 = vld [vmem:[%s14265_s1 + $0xa28] ss:$16 sps:$4 sm:$0xff]  }
 0x280   :  { %7125 = vmatpush2.bf16.msra.mxu1 %v10105_v20  ;;  %7135 = vmatprep.subr.bf16.mxu0 %v10110_v46  ;;  %v10152_v20 = vld [vmem:[%s14265_s1 + $0x80c] ss:$16 sps:$4 sm:$0xff]  }
 0x281   :  { %7176 = vmatprep.subr.bf16.mxu1 %v10113_v18  ;;  %v10155_v46 = vld [vmem:[%s14265_s1 + $0xa0c] ss:$16 sps:$4 sm:$0xff]   ;;  %v10150_v18 = vld [vmem:[%s14265_s1 + $0x808] ss:$16 sps:$4 sm:$0xff]  }
 0x282   :  { %v6841_v28 = vpop.f32.mrf.mxu0  ;;  %7086 = vmatmul.mubr.bf16.vlgmr.msra.gmra.mxu0 %v11177_v16  ;;  %v10122_v16 = vld [vmem:[%s14265_s1 + $0x8ac] ss:$16 sps:$4 sm:$0xff]  }
 0x283   :  { %v6882_v47 = vpop.f32.mrf.mxu1  ;;  %7127 = vmatmul.mubr.bf16.vlgmr.msra.gmra.mxu1 %v11181_v17  ;;  %v6842_v51 = vadd.f32 %v6841_v28, %v12773_v23  ;;  %7136 = vmatpush1.bf16.msra.mxu0 %v10108_v31  ;;  %v10125_v17 = vld [vmem:[%s14265_s1 + $0xaac] ss:$16 sps:$4 sm:$0xff]   ;;  %v10153_v31 = vld [vmem:[%s14265_s1 + $0xa08] ss:$16 sps:$4 sm:$0xff]  }
 0x284   :  { %7177 = vmatpush1.bf16.msra.mxu1 %v10111_v63  ;;  %v6843_v6 = vpop.f32.mrf.mxu0  ;;  %7137 = vmatprep.subr.bf16.mxu0 %v10116_v34  ;;  %v10158_v63 = vld [vmem:[%s14265_s1 + $0x9ec] ss:$16 sps:$4 sm:$0xff]   ;;  %v10159_v28 = vld [vmem:[%s14265_s1 + $0xbe8] ss:$16 sps:$4 sm:$0xff]  }
 0x285   :  { %v6884_v7 = vpop.f32.mrf.mxu1  ;;  %7178 = vmatprep.subr.bf16.mxu1 %v10119_v53  ;;  %v12975_v23 = vadd.f32 %v6882_v47, %v6842_v51  ;;  %v6844_v26 = vadd.f32 %v6843_v6, %v12778_v44  ;;  %7167 = vmatprep.mubr.bf16.mxu0 %v11207_v24  ;;  %v10128_v24 = vld [vmem:[%s14265_s1 + $0x88c] ss:$16 sps:$4 sm:$0xff]   ;;  %v10156_v53 = vld [vmem:[%s14265_s1 + $0x9e8] ss:$16 sps:$4 sm:$0xff]  }
 0x286   :  { %7208 = vmatprep.mubr.bf16.mxu1 %v11211_v25  ;;  %v6845_v45 = vpop.f32.mrf.mxu0  ;;  %v10131_v25 = vld [vmem:[%s14265_s1 + $0xa8c] ss:$16 sps:$4 sm:$0xff]  }
 0x287   :  { %v6886_v48 = vpop.f32.mrf.mxu1  ;;  %v12980_v27 = vadd.f32 %v6884_v7, %v6844_v26  ;;  %7138 = vmatpush1.bf16.msra.mxu0 %v10114_v41  ;;  %v10161_v34 = vld [vmem:[%s14265_s1 + $0xbec] ss:$16 sps:$4 sm:$0xff]   ;;  %v10162_v41 = vld [vmem:[%s14265_s1 + $0x9c8] ss:$16 sps:$4 sm:$0xff]  }
 0x288   :  { %7179 = vmatpush1.bf16.msra.mxu1 %v10117_v22  ;;  %v6846_v37 = vpop.f32.mrf.mxu0  ;;  %7139 = vmatprep.subr.bf16.mxu0 %v10122_v16  ;;  %v10164_v47 = vld [vmem:[%s14265_s1 + $0x9cc] ss:$16 sps:$4 sm:$0xff]   ;;  %v10165_v22 = vld [vmem:[%s14265_s1 + $0xbc8] ss:$16 sps:$4 sm:$0xff]  }
 0x289   :  { %v6887_v44 = vpop.f32.mrf.mxu1  ;;  %7180 = vmatprep.subr.bf16.mxu1 %v10125_v17  ;;  %v10167_v51 = vld [vmem:[%s14265_s1 + $0xbcc] ss:$16 sps:$4 sm:$0xff]   ;;  %v10168_v16 = vld [vmem:[%s14265_s1 + $0x9a8] ss:$16 sps:$4 sm:$0xff]  }
 0x28a   :  { %v10170_v6 = vld [vmem:[%s14265_s1 + $0x9ac] ss:$16 sps:$4 sm:$0xff]   ;;  %v10171_v17 = vld [vmem:[%s14265_s1 + $0xba8] ss:$16 sps:$4 sm:$0xff]  }
 0x28b   :  { %7140 = vmatpush1.bf16.msra.mxu0 %v10120_v4  ;;  %v10173_v7 = vld [vmem:[%s14265_s1 + $0xbac] ss:$16 sps:$4 sm:$0xff]   ;;  %v10174_v48 = vld [vmem:[%s14265_s1 + $0x988] ss:$16 sps:$4 sm:$0xff]  }
 0x28c   :  { %7181 = vmatpush1.bf16.msra.mxu1 %v10123_v36  ;;  %7141 = vmatprep.subr.bf16.mxu0 %v10128_v24  ;;  %v10176_v26 = vld [vmem:[%s14265_s1 + $0x98c] ss:$16 sps:$4 sm:$0xff]   ;;  %v10177_v4 = vld [vmem:[%s14265_s1 + $0xb88] ss:$16 sps:$4 sm:$0xff]  }
 0x28d   :  { %7182 = vmatprep.subr.bf16.mxu1 %v10131_v25  ;;  %v10179_v45 = vld [vmem:[%s14265_s1 + $0xb8c] ss:$16 sps:$4 sm:$0xff]   ;;  %v10180_v44 = vld [vmem:[%s14265_s1 + $0x968] ss:$16 sps:$4 sm:$0xff]  }
 0x28e   :  { %v10182_v36 = vld [vmem:[%s14265_s1 + $0x96c] ss:$16 sps:$4 sm:$0xff]   ;;  %v10183_v24 = vld [vmem:[%s14265_s1 + $0xb68] ss:$16 sps:$4 sm:$0xff]  }
 0x28f   :  { %7142 = vmatpush1.bf16.msra.mxu0 %v10126_v49  ;;  %v10185_v37 = vld [vmem:[%s14265_s1 + $0xb6c] ss:$16 sps:$4 sm:$0xff]  }
 0x290   :  { %7183 = vmatpush1.bf16.msra.mxu1 %v10129_v50  ;;  %7143 = vmatprep.subr.bf16.mxu0 %v10134_v52  ;;  %v10188_v25 = vld [vmem:[%s14265_s1 + $0x94c] ss:$16 sps:$4 sm:$0xff]   ;;  %v10186_v50 = vld [vmem:[%s14265_s1 + $0x948] ss:$16 sps:$4 sm:$0xff]  }
 0x291   :  { %7184 = vmatprep.subr.bf16.mxu1 %v10137_v56  ;;  %v10191_v49 = vld [vmem:[%s14265_s1 + $0xb4c] ss:$16 sps:$4 sm:$0xff]   ;;  %v10189_v52 = vld [vmem:[%s14265_s1 + $0xb48] ss:$16 sps:$4 sm:$0xff]  }
 0x292   :  { %v10194_v56 = vld [vmem:[%s14265_s1 + $0x92c] ss:$16 sps:$4 sm:$0xff]  }
 0x293   :  { %7144 = vmatpush1.bf16.msra.mxu0 %v10132_v57  ;;  %v10197_v57 = vld [vmem:[%s14265_s1 + $0xb2c] ss:$16 sps:$4 sm:$0xff]  }
 0x294   :  { %7185 = vmatpush1.bf16.msra.mxu1 %v10135_v15  ;;  %7145 = vmatprep.subr.bf16.mxu0 %v10140_v19  ;;  %v10192_v15 = vld [vmem:[%s14265_s1 + $0x928] ss:$16 sps:$4 sm:$0xff]  }
 0x295   :  { %7186 = vmatprep.subr.bf16.mxu1 %v10143_v58  ;;  %v10195_v19 = vld [vmem:[%s14265_s1 + $0xb28] ss:$16 sps:$4 sm:$0xff]   ;;  %v10200_v58 = vld [vmem:[%s14265_s1 + $0x90c] ss:$16 sps:$4 sm:$0xff]  }
 0x297   :  { %7146 = vmatpush1.bf16.msra.mxu0 %v10138_v61  ;;  %v10203_v61 = vld [vmem:[%s14265_s1 + $0xb0c] ss:$16 sps:$4 sm:$0xff]  }
 0x298   :  { %7187 = vmatpush1.bf16.msra.mxu1 %v10141_v62  ;;  %7147 = vmatprep.subr.bf16.mxu0 %v10146_v5  ;;  %v10198_v62 = vld [vmem:[%s14265_s1 + $0x908] ss:$16 sps:$4 sm:$0xff]  }
 0x299   :  { %7188 = vmatprep.subr.bf16.mxu1 %v10149_v8  ;;  %v10201_v5 = vld [vmem:[%s14265_s1 + $0xb08] ss:$16 sps:$4 sm:$0xff]   ;;  %v10206_v8 = vld [vmem:[%s14265_s1 + $0xcec] ss:$16 sps:$4 sm:$0xff]  }
 0x29b   :  { %7148 = vmatpush1.bf16.msra.mxu0 %v10144_v13  ;;  %v10209_v13 = vld [vmem:[%s14265_s1 + $0xeec] ss:$16 sps:$4 sm:$0xff]  }
 0x29c   :  { %7189 = vmatpush1.bf16.msra.mxu1 %v10147_v14  ;;  %7149 = vmatprep.subr.bf16.mxu0 %v10152_v20  ;;  %v10204_v14 = vld [vmem:[%s14265_s1 + $0xce8] ss:$16 sps:$4 sm:$0xff]  }
 0x29d   :  { %7190 = vmatprep.subr.bf16.mxu1 %v10155_v46  ;;  %v10207_v20 = vld [vmem:[%s14265_s1 + $0xee8] ss:$16 sps:$4 sm:$0xff]   ;;  %v10212_v46 = vld [vmem:[%s14265_s1 + $0xccc] ss:$16 sps:$4 sm:$0xff]  }
 0x29f   :  { %7150 = vmatpush1.bf16.msra.mxu0 %v10150_v18  ;;  %v10215_v18 = vld [vmem:[%s14265_s1 + $0xecc] ss:$16 sps:$4 sm:$0xff]  }
 0x2a0   :  { %7191 = vmatpush1.bf16.msra.mxu1 %v10153_v31  ;;  %7151 = vmatprep.subr.bf16.mxu0 %v10158_v63 }
 0x2a1   :  { %7192 = vmatprep.subr.bf16.mxu1 %v10161_v34 }
 0x2a3   :  { %7152 = vmatpush2.bf16.msra.mxu0 %v10156_v53  ;;  %v10210_v53 = vld [vmem:[%s14265_s1 + $0xcc8] ss:$16 sps:$4 sm:$0xff]  }
 0x2a4   :  { %7193 = vmatpush2.bf16.msra.mxu1 %v10159_v28  ;;  %7153 = vmatprep.subr.bf16.mxu0 %v10164_v47  ;;  %v10213_v28 = vld [vmem:[%s14265_s1 + $0xec8] ss:$16 sps:$4 sm:$0xff]  }
 0x2a5   :  { %7194 = vmatprep.subr.bf16.mxu1 %v10167_v51 }
 0x2a7   :  { %7154 = vmatpush2.bf16.msra.mxu0 %v10162_v41 }
 0x2a8   :  { %7195 = vmatpush2.bf16.msra.mxu1 %v10165_v22  ;;  %7155 = vmatprep.subr.bf16.mxu0 %v10170_v6 }
 0x2a9   :  { %7196 = vmatprep.subr.bf16.mxu1 %v10173_v7 }
 0x2ab   :  { %7156 = vmatpush2.bf16.msra.mxu0 %v10168_v16  ;;  %v10216_v16 = vld [vmem:[%s14265_s1 + $0xca8] ss:$16 sps:$4 sm:$0xff]  }
 0x2ac   :  { %7197 = vmatpush2.bf16.msra.mxu1 %v10171_v17  ;;  %7157 = vmatprep.subr.bf16.mxu0 %v10176_v26  ;;  %v10219_v17 = vld [vmem:[%s14265_s1 + $0xea8] ss:$16 sps:$4 sm:$0xff]  }
 0x2ad   :  { %7198 = vmatprep.subr.bf16.mxu1 %v10179_v45  ;;  %v10222_v45 = vld [vmem:[%s14265_s1 + $0xc88] ss:$16 sps:$4 sm:$0xff]  }
 0x2af   :  { %7158 = vmatpush2.bf16.msra.mxu0 %v10174_v48  ;;  %v10225_v48 = vld [vmem:[%s14265_s1 + $0xe88] ss:$16 sps:$4 sm:$0xff]  }
 0x2b0   :  { %7199 = vmatpush2.bf16.msra.mxu1 %v10177_v4  ;;  %7159 = vmatprep.subr.bf16.mxu0 %v10182_v36  ;;  %v10230_v4 = vld [vmem:[%s14265_s1 + $0xc6c] ss:$16 sps:$4 sm:$0xff]  }
 0x2b1   :  { %7200 = vmatprep.subr.bf16.mxu1 %v10185_v37  ;;  %v10233_v36 = vld [vmem:[%s14265_s1 + $0xe6c] ss:$16 sps:$4 sm:$0xff]   ;;  %v10228_v37 = vld [vmem:[%s14265_s1 + $0xc68] ss:$16 sps:$4 sm:$0xff]  }
 0x2b3   :  { %7160 = vmatpush2.bf16.msra.mxu0 %v10180_v44  ;;  %v10231_v44 = vld [vmem:[%s14265_s1 + $0xe68] ss:$16 sps:$4 sm:$0xff]  }
 0x2b4   :  { %7201 = vmatpush2.bf16.msra.mxu1 %v10183_v24  ;;  %7161 = vmatprep.subr.bf16.mxu0 %v10188_v25  ;;  %v10236_v24 = vld [vmem:[%s14265_s1 + $0xc4c] ss:$16 sps:$4 sm:$0xff]  }
 0x2b5   :  { %7202 = vmatprep.subr.bf16.mxu1 %v10191_v49  ;;  %v10239_v25 = vld [vmem:[%s14265_s1 + $0xe4c] ss:$16 sps:$4 sm:$0xff]   ;;  %v10234_v49 = vld [vmem:[%s14265_s1 + $0xc48] ss:$16 sps:$4 sm:$0xff]  }
 0x2b7   :  { %7162 = vmatpush2.bf16.msra.mxu0 %v10186_v50  ;;  %v10237_v50 = vld [vmem:[%s14265_s1 + $0xe48] ss:$16 sps:$4 sm:$0xff]  }
 0x2b8   :  { %7203 = vmatpush2.bf16.msra.mxu1 %v10189_v52  ;;  %7163 = vmatprep.subr.bf16.mxu0 %v10194_v56  ;;  %v10242_v52 = vld [vmem:[%s14265_s1 + $0xc2c] ss:$16 sps:$4 sm:$0xff]  }
 0x2b9   :  { %7204 = vmatprep.subr.bf16.mxu1 %v10197_v57  ;;  %v10245_v56 = vld [vmem:[%s14265_s1 + $0xe2c] ss:$16 sps:$4 sm:$0xff]   ;;  %v10240_v57 = vld [vmem:[%s14265_s1 + $0xc28] ss:$16 sps:$4 sm:$0xff]  }
 0x2bb   :  { %7164 = vmatpush2.bf16.msra.mxu0 %v10192_v15  ;;  %v10243_v15 = vld [vmem:[%s14265_s1 + $0xe28] ss:$16 sps:$4 sm:$0xff]  }
 0x2bc   :  { %7205 = vmatpush2.bf16.msra.mxu1 %v10195_v19  ;;  %7165 = vmatprep.subr.bf16.mxu0 %v10200_v58  ;;  %v10248_v19 = vld [vmem:[%s14265_s1 + $0xc0c] ss:$16 sps:$4 sm:$0xff]  }
 0x2bd   :  { %7206 = vmatprep.subr.bf16.mxu1 %v10203_v61  ;;  %v10251_v58 = vld [vmem:[%s14265_s1 + $0xe0c] ss:$16 sps:$4 sm:$0xff]   ;;  %v10246_v61 = vld [vmem:[%s14265_s1 + $0xc08] ss:$16 sps:$4 sm:$0xff]  }
 0x2bf   :  { %7166 = vmatpush2.bf16.msra.mxu0 %v10198_v62  ;;  %v10249_v62 = vld [vmem:[%s14265_s1 + $0xe08] ss:$16 sps:$4 sm:$0xff]  }
 0x2c0   :  { %7207 = vmatpush2.bf16.msra.mxu1 %v10201_v5  ;;  %7217 = vmatprep.subr.bf16.mxu0 %v10206_v8  ;;  %v10254_v5 = vld [vmem:[%s14265_s1 + $0xdec] ss:$16 sps:$4 sm:$0xff]  }
 0x2c1   :  { %7258 = vmatprep.subr.bf16.mxu1 %v10209_v13  ;;  %v10257_v8 = vld [vmem:[%s14265_s1 + $0xfec] ss:$16 sps:$4 sm:$0xff]   ;;  %v10252_v13 = vld [vmem:[%s14265_s1 + $0xde8] ss:$16 sps:$4 sm:$0xff]  }
 0x2c2   :  { %v6923_v31 = vpop.f32.mrf.mxu0  ;;  %7168 = vmatmul.mubr.bf16.vlgmr.msra.gmra.mxu0 %v11407_v38  ;;  %v10218_v38 = vld [vmem:[%s14265_s1 + $0xcac] ss:$16 sps:$4 sm:$0xff]  }
 0x2c3   :  { %v6964_v63 = vpop.f32.mrf.mxu1  ;;  %7209 = vmatmul.mubr.bf16.vlgmr.msra.gmra.mxu1 %v11411_v39  ;;  %v6924_v34 = vadd.f32 %v6923_v31, %v12975_v23  ;;  %7218 = vmatpush1.bf16.msra.mxu0 %v10204_v14  ;;  %v10221_v39 = vld [vmem:[%s14265_s1 + $0xeac] ss:$16 sps:$4 sm:$0xff]   ;;  %v10255_v14 = vld [vmem:[%s14265_s1 + $0xfe8] ss:$16 sps:$4 sm:$0xff]  }
 0x2c4   :  { %7259 = vmatpush1.bf16.msra.mxu1 %v10207_v20  ;;  %v6925_v47 = vpop.f32.mrf.mxu0  ;;  %7219 = vmatprep.subr.bf16.mxu0 %v10212_v46  ;;  %v10260_v20 = vld [vmem:[%s14265_s1 + $0xdcc] ss:$16 sps:$4 sm:$0xff]   ;;  %v10261_v31 = vld [vmem:[%s14265_s1 + $0xfc8] ss:$16 sps:$4 sm:$0xff]  }
 0x2c5   :  { %v6966_v51 = vpop.f32.mrf.mxu1  ;;  %7260 = vmatprep.subr.bf16.mxu1 %v10215_v18  ;;  %v13177_v23 = vadd.f32 %v6964_v63, %v6924_v34  ;;  %v6926_v41 = vadd.f32 %v6925_v47, %v12980_v27  ;;  %7249 = vmatprep.mubr.bf16.mxu0 %v11429_v42  ;;  %v10224_v42 = vld [vmem:[%s14265_s1 + $0xc8c] ss:$16 sps:$4 sm:$0xff]   ;;  %v10258_v18 = vld [vmem:[%s14265_s1 + $0xdc8] ss:$16 sps:$4 sm:$0xff]  }
 0x2c6   :  { %7290 = vmatprep.mubr.bf16.mxu1 %v11433_v43  ;;  %v6927_v22 = vpop.f32.mrf.mxu0  ;;  %v10227_v43 = vld [vmem:[%s14265_s1 + $0xe8c] ss:$16 sps:$4 sm:$0xff]  }
 0x2c7   :  { %v6968_v6 = vpop.f32.mrf.mxu1  ;;  %v13182_v7 = vadd.f32 %v6966_v51, %v6926_v41  ;;  %7220 = vmatpush1.bf16.msra.mxu0 %v10210_v53  ;;  %v10263_v46 = vld [vmem:[%s14265_s1 + $0xfcc] ss:$16 sps:$4 sm:$0xff]   ;;  %v10264_v53 = vld [vmem:[%s14265_s1 + $0xda8] ss:$16 sps:$4 sm:$0xff]  }
 0x2c8   :  { %7261 = vmatpush1.bf16.msra.mxu1 %v10213_v28  ;;  %v6928_v26 = vpop.f32.mrf.mxu0  ;;  %7221 = vmatprep.subr.bf16.mxu0 %v10218_v38  ;;  %v10266_v63 = vld [vmem:[%s14265_s1 + $0xdac] ss:$16 sps:$4 sm:$0xff]   ;;  %v10267_v28 = vld [vmem:[%s14265_s1 + $0xfa8] ss:$16 sps:$4 sm:$0xff]  }
 0x2c9   :  { %v6969_v27 = vpop.f32.mrf.mxu1  ;;  %7262 = vmatprep.subr.bf16.mxu1 %v10221_v39  ;;  %v10269_v34 = vld [vmem:[%s14265_s1 + $0xfac] ss:$16 sps:$4 sm:$0xff]   ;;  %v10270_v38 = vld [vmem:[%s14265_s1 + $0xd88] ss:$16 sps:$4 sm:$0xff]  }
 0x2ca   :  { %v10272_v47 = vld [vmem:[%s14265_s1 + $0xd8c] ss:$16 sps:$4 sm:$0xff]   ;;  %v10273_v39 = vld [vmem:[%s14265_s1 + $0xf88] ss:$16 sps:$4 sm:$0xff]  }
 0x2cb   :  { %7222 = vmatpush1.bf16.msra.mxu0 %v10216_v16  ;;  %v10275_v51 = vld [vmem:[%s14265_s1 + $0xf8c] ss:$16 sps:$4 sm:$0xff]   ;;  %v10276_v6 = vld [vmem:[%s14265_s1 + $0xd68] ss:$16 sps:$4 sm:$0xff]  }
 0x2cc   :  { %7263 = vmatpush1.bf16.msra.mxu1 %v10219_v17  ;;  %7223 = vmatprep.subr.bf16.mxu0 %v10224_v42  ;;  %v10278_v41 = vld [vmem:[%s14265_s1 + $0xd6c] ss:$16 sps:$4 sm:$0xff]   ;;  %v10279_v16 = vld [vmem:[%s14265_s1 + $0xf68] ss:$16 sps:$4 sm:$0xff]  }
 0x2cd   :  { %7264 = vmatprep.subr.bf16.mxu1 %v10227_v43  ;;  %v10281_v22 = vld [vmem:[%s14265_s1 + $0xf6c] ss:$16 sps:$4 sm:$0xff]   ;;  %v10282_v27 = vld [vmem:[%s14265_s1 + $0xd48] ss:$16 sps:$4 sm:$0xff]  }
 0x2ce   :  { %v10284_v17 = vld [vmem:[%s14265_s1 + $0xd4c] ss:$16 sps:$4 sm:$0xff]   ;;  %v10285_v42 = vld [vmem:[%s14265_s1 + $0xf48] ss:$16 sps:$4 sm:$0xff]  }
 0x2cf   :  { %7224 = vmatpush1.bf16.msra.mxu0 %v10222_v45  ;;  %v10287_v26 = vld [vmem:[%s14265_s1 + $0xf4c] ss:$16 sps:$4 sm:$0xff]  }
 0x2d0   :  { %7265 = vmatpush1.bf16.msra.mxu1 %v10225_v48  ;;  %7225 = vmatprep.subr.bf16.mxu0 %v10230_v4  ;;  %v10290_v43 = vld [vmem:[%s14265_s1 + $0xd2c] ss:$16 sps:$4 sm:$0xff]   ;;  %v10288_v48 = vld [vmem:[%s14265_s1 + $0xd28] ss:$16 sps:$4 sm:$0xff]  }
 0x2d1   :  { %7266 = vmatprep.subr.bf16.mxu1 %v10233_v36  ;;  %v10293_v45 = vld [vmem:[%s14265_s1 + $0xf2c] ss:$16 sps:$4 sm:$0xff]   ;;  %v10291_v4 = vld [vmem:[%s14265_s1 + $0xf28] ss:$16 sps:$4 sm:$0xff]  }
 0x2d2   :  { %v10296_v36 = vld [vmem:[%s14265_s1 + $0xd0c] ss:$16 sps:$4 sm:$0xff]  }
 0x2d3   :  { %7226 = vmatpush1.bf16.msra.mxu0 %v10228_v37  ;;  %v10299_v37 = vld [vmem:[%s14265_s1 + $0xf0c] ss:$16 sps:$4 sm:$0xff]  }
 0x2d4   :  { %7267 = vmatpush1.bf16.msra.mxu1 %v10231_v44  ;;  %7227 = vmatprep.subr.bf16.mxu0 %v10236_v24  ;;  %v10294_v44 = vld [vmem:[%s14265_s1 + $0xd08] ss:$16 sps:$4 sm:$0xff]  }
 0x2d5   :  { %7268 = vmatprep.subr.bf16.mxu1 %v10239_v25  ;;  %v10297_v24 = vld [vmem:[%s14265_s1 + $0xf08] ss:$16 sps:$4 sm:$0xff]   ;;  %v1073_v25 = vsub.s32 2, %v11604_v54 }
 0x2d7   :  { %7228 = vmatpush1.bf16.msra.mxu0 %v10234_v49  ;;  %v10302_v49 = vld [vmem:[%s14265_s1 + $0x10ec] ss:$16 sps:$4 sm:$0xff]  }
 0x2d8   :  { %7269 = vmatpush1.bf16.msra.mxu1 %v10237_v50  ;;  %7229 = vmatprep.subr.bf16.mxu0 %v10242_v52  ;;  %v10305_v50 = vld [vmem:[%s14265_s1 + $0x12ec] ss:$16 sps:$4 sm:$0xff]   ;;  %v1077_v52 = vsub.s32 3, %v11604_v54 }
 0x2d9   :  { %7270 = vmatprep.subr.bf16.mxu1 %v10245_v56  ;;  %v10716_v56 = vld [vmem:[%s14267_s2] sm:$0xf]  ;;  %v10308_v54 = vld [vmem:[%s14265_s1 + $0x10cc] ss:$16 sps:$4 sm:$0xff]  }
 0x2db   :  { %7230 = vmatpush1.bf16.msra.mxu0 %v10240_v57  ;;  %v1074_v57 = vrot.slane %v10716_v56, %v1073_v25  ;;  %v10345_v25 = vld [vmem:[%s14265_s1 + $0x1208] ss:$16 sps:$4 sm:$0xff]  }
 0x2dc   :  { %7271 = vmatpush1.bf16.msra.mxu1 %v10243_v15  ;;  %7231 = vmatprep.subr.bf16.mxu0 %v10248_v19  ;;  %v10300_v15 = vld [vmem:[%s14265_s1 + $0x10e8] ss:$16 sps:$4 sm:$0xff]  }
 0x2dd   :  { %7272 = vmatprep.subr.bf16.mxu1 %v10251_v58  ;;  %v10303_v19 = vld [vmem:[%s14265_s1 + $0x12e8] ss:$16 sps:$4 sm:$0xff]   ;;  %v10311_v58 = vld [vmem:[%s14265_s1 + $0x12cc] ss:$16 sps:$4 sm:$0xff]  }
 0x2df   :  { %7232 = vmatpush1.bf16.msra.mxu0 %v10246_v61  ;;  %v1078_v61 = vrot.slane %v10716_v56, %v1077_v52  ;;  %v10348_v52 = vld [vmem:[%s14265_s1 + $0x11e8] ss:$16 sps:$4 sm:$0xff]  }
 0x2e0   :  { %7273 = vmatpush1.bf16.msra.mxu1 %v10249_v62  ;;  %7233 = vmatprep.subr.bf16.mxu0 %v10254_v5  ;;  %v10351_v56 = vld [vmem:[%s14265_s1 + $0x13e8] ss:$16 sps:$4 sm:$0xff]  }
 0x2e1   :  { %7274 = vmatprep.subr.bf16.mxu1 %v10257_v8 }
 0x2e3   :  { %7234 = vmatpush2.bf16.msra.mxu0 %v10252_v13  ;;  %v10306_v13 = vld [vmem:[%s14265_s1 + $0x10c8] ss:$16 sps:$4 sm:$0xff]  }
 0x2e4   :  { %7275 = vmatpush2.bf16.msra.mxu1 %v10255_v14  ;;  %7235 = vmatprep.subr.bf16.mxu0 %v10260_v20  ;;  %v10309_v14 = vld [vmem:[%s14265_s1 + $0x12c8] ss:$16 sps:$4 sm:$0xff]  }
 0x2e5   :  { %7276 = vmatprep.subr.bf16.mxu1 %v10263_v46 }
 0x2e7   :  { %7236 = vmatpush2.bf16.msra.mxu0 %v10258_v18 }
 0x2e8   :  { %7277 = vmatpush2.bf16.msra.mxu1 %v10261_v31  ;;  %7237 = vmatprep.subr.bf16.mxu0 %v10266_v63 }
 0x2e9   :  { %7278 = vmatprep.subr.bf16.mxu1 %v10269_v34 }
 0x2eb   :  { %7238 = vmatpush2.bf16.msra.mxu0 %v10264_v53 }
 0x2ec   :  { %7279 = vmatpush2.bf16.msra.mxu1 %v10267_v28  ;;  %7239 = vmatprep.subr.bf16.mxu0 %v10272_v47  ;;  %v10312_v28 = vld [vmem:[%s14265_s1 + $0x10a8] ss:$16 sps:$4 sm:$0xff]  }
 0x2ed   :  { %7280 = vmatprep.subr.bf16.mxu1 %v10275_v51  ;;  %v10315_v47 = vld [vmem:[%s14265_s1 + $0x12a8] ss:$16 sps:$4 sm:$0xff]  }
 0x2ef   :  { %7240 = vmatpush2.bf16.msra.mxu0 %v10270_v38 }
 0x2f0   :  { %7281 = vmatpush2.bf16.msra.mxu1 %v10273_v39  ;;  %7241 = vmatprep.subr.bf16.mxu0 %v10278_v41  ;;  %v10318_v39 = vld [vmem:[%s14265_s1 + $0x1088] ss:$16 sps:$4 sm:$0xff]  }
 0x2f1   :  { %7282 = vmatprep.subr.bf16.mxu1 %v10281_v22  ;;  %v10321_v41 = vld [vmem:[%s14265_s1 + $0x1288] ss:$16 sps:$4 sm:$0xff]   ;;  %v10326_v22 = vld [vmem:[%s14265_s1 + $0x106c] ss:$16 sps:$4 sm:$0xff]  }
 0x2f3   :  { %7242 = vmatpush2.bf16.msra.mxu0 %v10276_v6  ;;  %v10329_v6 = vld [vmem:[%s14265_s1 + $0x126c] ss:$16 sps:$4 sm:$0xff]  }
 0x2f4   :  { %7283 = vmatpush2.bf16.msra.mxu1 %v10279_v16  ;;  %7243 = vmatprep.subr.bf16.mxu0 %v10284_v17  ;;  %v10324_v16 = vld [vmem:[%s14265_s1 + $0x1068] ss:$16 sps:$4 sm:$0xff]  }
 0x2f5   :  { %7284 = vmatprep.subr.bf16.mxu1 %v10287_v26  ;;  %v10327_v17 = vld [vmem:[%s14265_s1 + $0x1268] ss:$16 sps:$4 sm:$0xff]   ;;  %v10332_v26 = vld [vmem:[%s14265_s1 + $0x104c] ss:$16 sps:$4 sm:$0xff]  }
 0x2f7   :  { %7244 = vmatpush2.bf16.msra.mxu0 %v10282_v27  ;;  %v10335_v27 = vld [vmem:[%s14265_s1 + $0x124c] ss:$16 sps:$4 sm:$0xff]  }
 0x2f8   :  { %7285 = vmatpush2.bf16.msra.mxu1 %v10285_v42  ;;  %7245 = vmatprep.subr.bf16.mxu0 %v10290_v43  ;;  %v10330_v42 = vld [vmem:[%s14265_s1 + $0x1048] ss:$16 sps:$4 sm:$0xff]  }
 0x2f9   :  { %7286 = vmatprep.subr.bf16.mxu1 %v10293_v45  ;;  %v10333_v43 = vld [vmem:[%s14265_s1 + $0x1248] ss:$16 sps:$4 sm:$0xff]   ;;  %v10338_v45 = vld [vmem:[%s14265_s1 + $0x102c] ss:$16 sps:$4 sm:$0xff]  }
 0x2fb   :  { %7246 = vmatpush2.bf16.msra.mxu0 %v10288_v48  ;;  %v10341_v48 = vld [vmem:[%s14265_s1 + $0x122c] ss:$16 sps:$4 sm:$0xff]  }
 0x2fc   :  { %7287 = vmatpush2.bf16.msra.mxu1 %v10291_v4  ;;  %7247 = vmatprep.subr.bf16.mxu0 %v10296_v36  ;;  %v10336_v4 = vld [vmem:[%s14265_s1 + $0x1028] ss:$16 sps:$4 sm:$0xff]  }
 0x2fd   :  { %7288 = vmatprep.subr.bf16.mxu1 %v10299_v37  ;;  %v10339_v36 = vld [vmem:[%s14265_s1 + $0x1228] ss:$16 sps:$4 sm:$0xff]   ;;  %v10344_v37 = vld [vmem:[%s14265_s1 + $0x100c] ss:$16 sps:$4 sm:$0xff]  }
 0x2ff   :  { %7248 = vmatpush2.bf16.msra.mxu0 %v10294_v44  ;;  %v10347_v44 = vld [vmem:[%s14265_s1 + $0x120c] ss:$16 sps:$4 sm:$0xff]  }
 0x300   :  { %7289 = vmatpush2.bf16.msra.mxu1 %v10297_v24  ;;  %7299 = vmatprep.subr.bf16.mxu0 %v10302_v49  ;;  %v10342_v24 = vld [vmem:[%s14265_s1 + $0x1008] ss:$16 sps:$4 sm:$0xff]   ;;  %v10350_v49 = vld [vmem:[%s14265_s1 + $0x11ec] ss:$16 sps:$4 sm:$0xff]  }
 0x301   :  { %7340 = vmatprep.subr.bf16.mxu1 %v10305_v50  ;;  %v10353_v50 = vld [vmem:[%s14265_s1 + $0x13ec] ss:$16 sps:$4 sm:$0xff]  }
 0x302   :  { %v7005_v62 = vpop.f32.mrf.mxu0  ;;  %7250 = vmatmul.mubr.bf16.vlgmr.msra.gmra.mxu0 %v11631_v0  ;;  %v10314_v0 = vld [vmem:[%s14265_s1 + $0x10ac] ss:$16 sps:$4 sm:$0xff]  }
 0x303   :  { %v7046_v5 = vpop.f32.mrf.mxu1  ;;  %7291 = vmatmul.mubr.bf16.vlgmr.msra.gmra.mxu1 %v11635_v1  ;;  %v7006_v8 = vadd.f32 %v7005_v62, %v1074_v57  ;;  %7300 = vmatpush1.bf16.msra.mxu0 %v10300_v15  ;;  %v10317_v1 = vld [vmem:[%s14265_s1 + $0x12ac] ss:$16 sps:$4 sm:$0xff]   ;;  %v10360_v62 = vld [vmem:[%s14265_s1 + $0x11a8] ss:$16 sps:$4 sm:$0xff]  }
 0x304   :  { %7341 = vmatpush1.bf16.msra.mxu1 %v10303_v19  ;;  %v7007_v20 = vpop.f32.mrf.mxu0  ;;  %7301 = vmatprep.subr.bf16.mxu0 %v10308_v54  ;;  %v10356_v57 = vld [vmem:[%s14265_s1 + $0x11cc] ss:$16 sps:$4 sm:$0xff]   ;;  %v10354_v19 = vld [vmem:[%s14265_s1 + $0x11c8] ss:$16 sps:$4 sm:$0xff]  }
 0x305   :  { %v7048_v46 = vpop.f32.mrf.mxu1  ;;  %7342 = vmatprep.subr.bf16.mxu1 %v10311_v58  ;;  %v13383_v18 = vadd.f32 %v7046_v5, %v7006_v8  ;;  %v7008_v31 = vadd.f32 %v7007_v20, %v1078_v61  ;;  %7331 = vmatprep.mubr.bf16.mxu0 %v11658_v9  ;;  %v10320_v9 = vld [vmem:[%s14265_s1 + $0x108c] ss:$16 sps:$4 sm:$0xff]   ;;  %v10357_v54 = vld [vmem:[%s14265_s1 + $0x13c8] ss:$16 sps:$4 sm:$0xff]  }
 0x306   :  { %7372 = vmatprep.mubr.bf16.mxu1 %v11662_v10  ;;  %v7009_v63 = vpop.f32.mrf.mxu0  ;;  %v10323_v10 = vld [vmem:[%s14265_s1 + $0x128c] ss:$16 sps:$4 sm:$0xff]   ;;  %v10363_v5 = vld [vmem:[%s14265_s1 + $0x13a8] ss:$16 sps:$4 sm:$0xff]  }
 0x307   :  { %v7050_v34 = vpop.f32.mrf.mxu1  ;;  %v13387_v53 = vadd.f32 %v7048_v46, %v7008_v31  ;;  %7302 = vmatpush1.bf16.msra.mxu0 %v10306_v13  ;;  %v10359_v15 = vld [vmem:[%s14265_s1 + $0x13cc] ss:$16 sps:$4 sm:$0xff]   ;;  %v10369_v20 = vld [vmem:[%s14265_s1 + $0x1388] ss:$16 sps:$4 sm:$0xff]  }
 0x308   :  { %7343 = vmatpush1.bf16.msra.mxu1 %v10309_v14  ;;  %v7010_v51 = vpop.f32.mrf.mxu0  ;;  %7303 = vmatprep.subr.bf16.mxu0 %v10314_v0  ;;  %v10362_v58 = vld [vmem:[%s14265_s1 + $0x11ac] ss:$16 sps:$4 sm:$0xff]   ;;  %v10366_v14 = vld [vmem:[%s14265_s1 + $0x1188] ss:$16 sps:$4 sm:$0xff]  }
 0x309   :  { %v7051_v38 = vpop.f32.mrf.mxu1  ;;  %7344 = vmatprep.subr.bf16.mxu1 %v10317_v1  ;;  %v10365_v61 = vld [vmem:[%s14265_s1 + $0x13ac] ss:$16 sps:$4 sm:$0xff]   ;;  %v10372_v1 = vld [vmem:[%s14265_s1 + $0x1168] ss:$16 sps:$4 sm:$0xff]  }
 0x30a   :  { %v10368_v8 = vld [vmem:[%s14265_s1 + $0x118c] ss:$16 sps:$4 sm:$0xff]   ;;  %v10375_v31 = vld [vmem:[%s14265_s1 + $0x1368] ss:$16 sps:$4 sm:$0xff]  }
 0x30b   :  { %7304 = vmatpush1.bf16.msra.mxu0 %v10312_v28  ;;  %v10371_v13 = vld [vmem:[%s14265_s1 + $0x138c] ss:$16 sps:$4 sm:$0xff]   ;;  %v10378_v28 = vld [vmem:[%s14265_s1 + $0x1148] ss:$16 sps:$4 sm:$0xff]  }
 0x30c   :  { %7345 = vmatpush1.bf16.msra.mxu1 %v10315_v47  ;;  %7305 = vmatprep.subr.bf16.mxu0 %v10320_v9  ;;  %v10374_v46 = vld [vmem:[%s14265_s1 + $0x116c] ss:$16 sps:$4 sm:$0xff]   ;;  %v10381_v47 = vld [vmem:[%s14265_s1 + $0x1348] ss:$16 sps:$4 sm:$0xff]  }
 0x30d   :  { %7346 = vmatprep.subr.bf16.mxu1 %v10323_v10  ;;  %v10377_v0 = vld [vmem:[%s14265_s1 + $0x136c] ss:$16 sps:$4 sm:$0xff]   ;;  %v10384_v9 = vld [vmem:[%s14265_s1 + $0x1128] ss:$16 sps:$4 sm:$0xff]  }
 0x30e   :  { %v10380_v63 = vld [vmem:[%s14265_s1 + $0x114c] ss:$16 sps:$4 sm:$0xff]   ;;  %v10387_v10 = vld [vmem:[%s14265_s1 + $0x1328] ss:$16 sps:$4 sm:$0xff]  }
 0x30f   :  { %7306 = vmatpush1.bf16.msra.mxu0 %v10318_v39  ;;  %v10383_v34 = vld [vmem:[%s14265_s1 + $0x134c] ss:$16 sps:$4 sm:$0xff]  }
 0x310   :  { %7347 = vmatpush1.bf16.msra.mxu1 %v10321_v41  ;;  %7307 = vmatprep.subr.bf16.mxu0 %v10326_v22  ;;  %v10386_v51 = vld [vmem:[%s14265_s1 + $0x112c] ss:$16 sps:$4 sm:$0xff]   ;;  %v10390_v22 = vld [vmem:[%s14265_s1 + $0x1108] ss:$16 sps:$4 sm:$0xff]  }
 0x311   :  { %7348 = vmatprep.subr.bf16.mxu1 %v10329_v6  ;;  %v10389_v38 = vld [vmem:[%s14265_s1 + $0x132c] ss:$16 sps:$4 sm:$0xff]   ;;  %v10393_v6 = vld [vmem:[%s14265_s1 + $0x1308] ss:$16 sps:$4 sm:$0xff]  }
 0x312   :  { %v10392_v39 = vld [vmem:[%s14265_s1 + $0x110c] ss:$16 sps:$4 sm:$0xff]  }
 0x313   :  { %7308 = vmatpush1.bf16.msra.mxu0 %v10324_v16  ;;  %v10395_v41 = vld [vmem:[%s14265_s1 + $0x130c] ss:$16 sps:$4 sm:$0xff]  }
 0x314   :  { %7349 = vmatpush1.bf16.msra.mxu1 %v10327_v17  ;;  %7309 = vmatprep.subr.bf16.mxu0 %v10332_v26  ;;  %v10398_v16 = vld [vmem:[%s14265_s1 + $0x14ec] ss:$16 sps:$4 sm:$0xff]   ;;  %v10396_v26 = vld [vmem:[%s14265_s1 + $0x14e8] ss:$16 sps:$4 sm:$0xff]  }
 0x315   :  { %7350 = vmatprep.subr.bf16.mxu1 %v10335_v27  ;;  %v10401_v17 = vld [vmem:[%s14265_s1 + $0x16ec] ss:$16 sps:$4 sm:$0xff]   ;;  %v10399_v27 = vld [vmem:[%s14265_s1 + $0x16e8] ss:$16 sps:$4 sm:$0xff]  }
 0x317   :  { %7310 = vmatpush1.bf16.msra.mxu0 %v10330_v42  ;;  %v10404_v42 = vld [vmem:[%s14265_s1 + $0x14cc] ss:$16 sps:$4 sm:$0xff]  }
 0x318   :  { %7351 = vmatpush1.bf16.msra.mxu1 %v10333_v43  ;;  %7311 = vmatprep.subr.bf16.mxu0 %v10338_v45  ;;  %v10407_v43 = vld [vmem:[%s14265_s1 + $0x16cc] ss:$16 sps:$4 sm:$0xff]  }
 0x319   :  { %7352 = vmatprep.subr.bf16.mxu1 %v10341_v48 }
 0x31b   :  { %7312 = vmatpush1.bf16.msra.mxu0 %v10336_v4 }
 0x31c   :  { %7353 = vmatpush1.bf16.msra.mxu1 %v10339_v36  ;;  %7313 = vmatprep.subr.bf16.mxu0 %v10344_v37  ;;  %v10402_v36 = vld [vmem:[%s14265_s1 + $0x14c8] ss:$16 sps:$4 sm:$0xff]  }
 0x31d   :  { %7354 = vmatprep.subr.bf16.mxu1 %v10347_v44  ;;  %v10405_v37 = vld [vmem:[%s14265_s1 + $0x16c8] ss:$16 sps:$4 sm:$0xff]  }
 0x31f   :  { %7314 = vmatpush1.bf16.msra.mxu0 %v10342_v24 }
 0x320   :  { %7355 = vmatpush1.bf16.msra.mxu1 %v10345_v25  ;;  %7315 = vmatprep.subr.bf16.mxu0 %v10350_v49 }
 0x321   :  { %7356 = vmatprep.subr.bf16.mxu1 %v10353_v50 }
 0x323   :  { %7316 = vmatpush2.bf16.msra.mxu0 %v10348_v52 }
 0x324   :  { %7357 = vmatpush2.bf16.msra.mxu1 %v10351_v56  ;;  %7317 = vmatprep.subr.bf16.mxu0 %v10356_v57  ;;  %v10408_v56 = vld [vmem:[%s14265_s1 + $0x14a8] ss:$16 sps:$4 sm:$0xff]  }
 0x325   :  { %7358 = vmatprep.subr.bf16.mxu1 %v10359_v15  ;;  %v10411_v57 = vld [vmem:[%s14265_s1 + $0x16a8] ss:$16 sps:$4 sm:$0xff]  }
 0x327   :  { %7318 = vmatpush2.bf16.msra.mxu0 %v10354_v19  ;;  %v10414_v19 = vld [vmem:[%s14265_s1 + $0x1488] ss:$16 sps:$4 sm:$0xff]  }
 0x328   :  { %7359 = vmatpush2.bf16.msra.mxu1 %v10357_v54  ;;  %7319 = vmatprep.subr.bf16.mxu0 %v10362_v58  ;;  %v10417_v54 = vld [vmem:[%s14265_s1 + $0x1688] ss:$16 sps:$4 sm:$0xff]   ;;  %v10422_v58 = vld [vmem:[%s14265_s1 + $0x146c] ss:$16 sps:$4 sm:$0xff]  }
 0x329   :  { %7360 = vmatprep.subr.bf16.mxu1 %v10365_v61  ;;  %v10425_v61 = vld [vmem:[%s14265_s1 + $0x166c] ss:$16 sps:$4 sm:$0xff]  }
 0x32b   :  { %7320 = vmatpush2.bf16.msra.mxu0 %v10360_v62  ;;  %v10420_v62 = vld [vmem:[%s14265_s1 + $0x1468] ss:$16 sps:$4 sm:$0xff]  }
 0x32c   :  { %7361 = vmatpush2.bf16.msra.mxu1 %v10363_v5  ;;  %7321 = vmatprep.subr.bf16.mxu0 %v10368_v8  ;;  %v10423_v5 = vld [vmem:[%s14265_s1 + $0x1668] ss:$16 sps:$4 sm:$0xff]   ;;  %v10428_v8 = vld [vmem:[%s14265_s1 + $0x144c] ss:$16 sps:$4 sm:$0xff]  }
 0x32d   :  { %7362 = vmatprep.subr.bf16.mxu1 %v10371_v13  ;;  %v10431_v13 = vld [vmem:[%s14265_s1 + $0x164c] ss:$16 sps:$4 sm:$0xff]  }
 0x32f   :  { %7322 = vmatpush2.bf16.msra.mxu0 %v10366_v14  ;;  %v10426_v14 = vld [vmem:[%s14265_s1 + $0x1448] ss:$16 sps:$4 sm:$0xff]  }
 0x330   :  { %7363 = vmatpush2.bf16.msra.mxu1 %v10369_v20  ;;  %7323 = vmatprep.subr.bf16.mxu0 %v10374_v46  ;;  %v10429_v20 = vld [vmem:[%s14265_s1 + $0x1648] ss:$16 sps:$4 sm:$0xff]   ;;  %v10434_v46 = vld [vmem:[%s14265_s1 + $0x142c] ss:$16 sps:$4 sm:$0xff]  }
 0x331   :  { %7364 = vmatprep.subr.bf16.mxu1 %v10377_v0  ;;  %v10437_v0 = vld [vmem:[%s14265_s1 + $0x162c] ss:$16 sps:$4 sm:$0xff]  }
 0x333   :  { %7324 = vmatpush2.bf16.msra.mxu0 %v10372_v1  ;;  %v10432_v1 = vld [vmem:[%s14265_s1 + $0x1428] ss:$16 sps:$4 sm:$0xff]  }
 0x334   :  { %7365 = vmatpush2.bf16.msra.mxu1 %v10375_v31  ;;  %7325 = vmatprep.subr.bf16.mxu0 %v10380_v63  ;;  %v10435_v31 = vld [vmem:[%s14265_s1 + $0x1628] ss:$16 sps:$4 sm:$0xff]   ;;  %v10440_v63 = vld [vmem:[%s14265_s1 + $0x140c] ss:$16 sps:$4 sm:$0xff]  }
 0x335   :  { %7366 = vmatprep.subr.bf16.mxu1 %v10383_v34  ;;  %v10443_v34 = vld [vmem:[%s14265_s1 + $0x160c] ss:$16 sps:$4 sm:$0xff]  }
 0x337   :  { %7326 = vmatpush2.bf16.msra.mxu0 %v10378_v28  ;;  %v10438_v28 = vld [vmem:[%s14265_s1 + $0x1408] ss:$16 sps:$4 sm:$0xff]  }
 0x338   :  { %7367 = vmatpush2.bf16.msra.mxu1 %v10381_v47  ;;  %7327 = vmatprep.subr.bf16.mxu0 %v10386_v51  ;;  %v10441_v47 = vld [vmem:[%s14265_s1 + $0x1608] ss:$16 sps:$4 sm:$0xff]   ;;  %v10446_v51 = vld [vmem:[%s14265_s1 + $0x15ec] ss:$16 sps:$4 sm:$0xff]  }
 0x339   :  { %7368 = vmatprep.subr.bf16.mxu1 %v10389_v38  ;;  %v10449_v38 = vld [vmem:[%s14265_s1 + $0x17ec] ss:$16 sps:$4 sm:$0xff]  }
 0x33b   :  { %7328 = vmatpush2.bf16.msra.mxu0 %v10384_v9  ;;  %v10444_v9 = vld [vmem:[%s14265_s1 + $0x15e8] ss:$16 sps:$4 sm:$0xff]  }
 0x33c   :  { %7369 = vmatpush2.bf16.msra.mxu1 %v10387_v10  ;;  %7329 = vmatprep.subr.bf16.mxu0 %v10392_v39  ;;  %v10447_v10 = vld [vmem:[%s14265_s1 + $0x17e8] ss:$16 sps:$4 sm:$0xff]   ;;  %v10452_v39 = vld [vmem:[%s14265_s1 + $0x15cc] ss:$16 sps:$4 sm:$0xff]  }
 0x33d   :  { %7370 = vmatprep.subr.bf16.mxu1 %v10395_v41  ;;  %v10455_v41 = vld [vmem:[%s14265_s1 + $0x17cc] ss:$16 sps:$4 sm:$0xff]  }
 0x33f   :  { %7330 = vmatpush2.bf16.msra.mxu0 %v10390_v22  ;;  %v10450_v22 = vld [vmem:[%s14265_s1 + $0x15c8] ss:$16 sps:$4 sm:$0xff]  }
 0x340   :  { %7371 = vmatpush2.bf16.msra.mxu1 %v10393_v6  ;;  %7381 = vmatprep.subr.bf16.mxu0 %v10398_v16  ;;  %v10453_v6 = vld [vmem:[%s14265_s1 + $0x17c8] ss:$16 sps:$4 sm:$0xff]   ;;  %v10458_v16 = vld [vmem:[%s14265_s1 + $0x15ac] ss:$16 sps:$4 sm:$0xff]  }
 0x341   :  { %7422 = vmatprep.subr.bf16.mxu1 %v10401_v17  ;;  %v10461_v17 = vld [vmem:[%s14265_s1 + $0x17ac] ss:$16 sps:$4 sm:$0xff]  }
 0x342   :  { %v7087_v45 = vpop.f32.mrf.mxu0  ;;  %7332 = vmatmul.mubr.bf16.vlgmr.msra.gmra.mxu0 %v11860_v59  ;;  %v10410_v59 = vld [vmem:[%s14265_s1 + $0x14ac] ss:$16 sps:$4 sm:$0xff]  }
 0x343   :  { %v7128_v48 = vpop.f32.mrf.mxu1  ;;  %7373 = vmatmul.mubr.bf16.vlgmr.msra.gmra.mxu1 %v11864_v60  ;;  %v7088_v4 = vadd.f32 %v7087_v45, %v13383_v18  ;;  %7382 = vmatpush1.bf16.msra.mxu0 %v10396_v26  ;;  %v10413_v60 = vld [vmem:[%s14265_s1 + $0x16ac] ss:$16 sps:$4 sm:$0xff]   ;;  %v10456_v26 = vld [vmem:[%s14265_s1 + $0x15a8] ss:$16 sps:$4 sm:$0xff]  }
 0x344   :  { %7423 = vmatpush1.bf16.msra.mxu1 %v10399_v27  ;;  %v7089_v44 = vpop.f32.mrf.mxu0  ;;  %7383 = vmatprep.subr.bf16.mxu0 %v10404_v42  ;;  %v10459_v27 = vld [vmem:[%s14265_s1 + $0x17a8] ss:$16 sps:$4 sm:$0xff]   ;;  %v10464_v42 = vld [vmem:[%s14265_s1 + $0x158c] ss:$16 sps:$4 sm:$0xff]  }
 0x345   :  { %v7130_v24 = vpop.f32.mrf.mxu1  ;;  %7424 = vmatprep.subr.bf16.mxu1 %v10407_v43  ;;  %v13584_v18 = vadd.f32 %v7128_v48, %v7088_v4  ;;  %v7090_v25 = vadd.f32 %v7089_v44, %v13387_v53  ;;  %7413 = vmatprep.mubr.bf16.mxu0 %v11890_v35  ;;  %v10416_v35 = vld [vmem:[%s14265_s1 + $0x148c] ss:$16 sps:$4 sm:$0xff]   ;;  %v10462_v45 = vld [vmem:[%s14265_s1 + $0x1588] ss:$16 sps:$4 sm:$0xff]  }
 0x346   :  { %7454 = vmatprep.mubr.bf16.mxu1 %v11894_v40  ;;  %v7091_v49 = vpop.f32.mrf.mxu0  ;;  %v10419_v40 = vld [vmem:[%s14265_s1 + $0x168c] ss:$16 sps:$4 sm:$0xff]   ;;  %v10465_v48 = vld [vmem:[%s14265_s1 + $0x1788] ss:$16 sps:$4 sm:$0xff]  }
 0x347   :  { %v7132_v50 = vpop.f32.mrf.mxu1  ;;  %v13589_v52 = vadd.f32 %v7130_v24, %v7090_v25  ;;  %7384 = vmatpush1.bf16.msra.mxu0 %v10402_v36  ;;  %v10467_v43 = vld [vmem:[%s14265_s1 + $0x178c] ss:$16 sps:$4 sm:$0xff]   ;;  %v10471_v44 = vld [vmem:[%s14265_s1 + $0x1768] ss:$16 sps:$4 sm:$0xff]  }
 0x348   :  { %7425 = vmatpush1.bf16.msra.mxu1 %v10405_v37  ;;  %v7092_v15 = vpop.f32.mrf.mxu0  ;;  %7385 = vmatprep.subr.bf16.mxu0 %v10410_v59  ;;  %v10470_v4 = vld [vmem:[%s14265_s1 + $0x156c] ss:$16 sps:$4 sm:$0xff]   ;;  %v10468_v37 = vld [vmem:[%s14265_s1 + $0x1568] ss:$16 sps:$4 sm:$0xff]  }
 0x349   :  { %v7133_v53 = vpop.f32.mrf.mxu1  ;;  %7426 = vmatprep.subr.bf16.mxu1 %v10413_v60  ;;  %v10473_v36 = vld [vmem:[%s14265_s1 + $0x176c] ss:$16 sps:$4 sm:$0xff]   ;;  %v10474_v60 = vld [vmem:[%s14265_s1 + $0x1548] ss:$16 sps:$4 sm:$0xff]  }
 0x34a   :  { %v10476_v24 = vld [vmem:[%s14265_s1 + $0x154c] ss:$16 sps:$4 sm:$0xff]   ;;  %v10477_v25 = vld [vmem:[%s14265_s1 + $0x1748] ss:$16 sps:$4 sm:$0xff]  }
 0x34b   :  { %7386 = vmatpush1.bf16.msra.mxu0 %v10408_v56  ;;  %v10479_v59 = vld [vmem:[%s14265_s1 + $0x174c] ss:$16 sps:$4 sm:$0xff]   ;;  %v10480_v56 = vld [vmem:[%s14265_s1 + $0x1528] ss:$16 sps:$4 sm:$0xff]  }
 0x34c   :  { %7427 = vmatpush1.bf16.msra.mxu1 %v10411_v57  ;;  %7387 = vmatprep.subr.bf16.mxu0 %v10416_v35  ;;  %v10482_v49 = vld [vmem:[%s14265_s1 + $0x152c] ss:$16 sps:$4 sm:$0xff]   ;;  %v10483_v57 = vld [vmem:[%s14265_s1 + $0x1728] ss:$16 sps:$4 sm:$0xff]  }
 0x34d   :  { %7428 = vmatprep.subr.bf16.mxu1 %v10419_v40  ;;  %v10485_v50 = vld [vmem:[%s14265_s1 + $0x172c] ss:$16 sps:$4 sm:$0xff]   ;;  %v10486_v35 = vld [vmem:[%s14265_s1 + $0x1508] ss:$16 sps:$4 sm:$0xff]  }
 0x34e   :  { %v10488_v15 = vld [vmem:[%s14265_s1 + $0x150c] ss:$16 sps:$4 sm:$0xff]   ;;  %v10489_v40 = vld [vmem:[%s14265_s1 + $0x1708] ss:$16 sps:$4 sm:$0xff]  }
 0x34f   :  { %7388 = vmatpush1.bf16.msra.mxu0 %v10414_v19  ;;  %v10491_v53 = vld [vmem:[%s14265_s1 + $0x170c] ss:$16 sps:$4 sm:$0xff]  }
 0x350   :  { %7429 = vmatpush1.bf16.msra.mxu1 %v10417_v54  ;;  %7389 = vmatprep.subr.bf16.mxu0 %v10422_v58  ;;  %v10494_v19 = vld [vmem:[%s14265_s1 + $0x18ec] ss:$16 sps:$4 sm:$0xff]   ;;  %v10492_v58 = vld [vmem:[%s14265_s1 + $0x18e8] ss:$16 sps:$4 sm:$0xff]  }
 0x351   :  { %7430 = vmatprep.subr.bf16.mxu1 %v10425_v61  ;;  %v10497_v54 = vld [vmem:[%s14265_s1 + $0x1aec] ss:$16 sps:$4 sm:$0xff]   ;;  %v10495_v61 = vld [vmem:[%s14265_s1 + $0x1ae8] ss:$16 sps:$4 sm:$0xff]  }
 0x353   :  { %7390 = vmatpush1.bf16.msra.mxu0 %v10420_v62  ;;  %v10500_v62 = vld [vmem:[%s14265_s1 + $0x18cc] ss:$16 sps:$4 sm:$0xff]  }
 0x354   :  { %7431 = vmatpush1.bf16.msra.mxu1 %v10423_v5  ;;  %7391 = vmatprep.subr.bf16.mxu0 %v10428_v8  ;;  %v10503_v5 = vld [vmem:[%s14265_s1 + $0x1acc] ss:$16 sps:$4 sm:$0xff]   ;;  %v10498_v8 = vld [vmem:[%s14265_s1 + $0x18c8] ss:$16 sps:$4 sm:$0xff]  }
 0x355   :  { %7432 = vmatprep.subr.bf16.mxu1 %v10431_v13  ;;  %v10501_v13 = vld [vmem:[%s14265_s1 + $0x1ac8] ss:$16 sps:$4 sm:$0xff]  }
 0x357   :  { %7392 = vmatpush1.bf16.msra.mxu0 %v10426_v14 }
 0x358   :  { %7433 = vmatpush1.bf16.msra.mxu1 %v10429_v20  ;;  %7393 = vmatprep.subr.bf16.mxu0 %v10434_v46  ;;  %v10506_v46 = vld [vmem:[%s14265_s1 + $0x18ac] ss:$16 sps:$4 sm:$0xff]  }
 0x359   :  { %7434 = vmatprep.subr.bf16.mxu1 %v10437_v0 }
 0x35b   :  { %7394 = vmatpush1.bf16.msra.mxu0 %v10432_v1 }
 0x35c   :  { %7435 = vmatpush1.bf16.msra.mxu1 %v10435_v31  ;;  %7395 = vmatprep.subr.bf16.mxu0 %v10440_v63  ;;  %v10509_v63 = vld [vmem:[%s14265_s1 + $0x1aac] ss:$16 sps:$4 sm:$0xff]  }
 0x35d   :  { %7436 = vmatprep.subr.bf16.mxu1 %v10443_v34 }
 0x35f   :  { %7396 = vmatpush1.bf16.msra.mxu0 %v10438_v28 }
 0x360   :  { %7437 = vmatpush1.bf16.msra.mxu1 %v10441_v47  ;;  %7397 = vmatprep.subr.bf16.mxu0 %v10446_v51 }
 0x361   :  { %7438 = vmatprep.subr.bf16.mxu1 %v10449_v38 }
 0x363   :  { %7398 = vmatpush2.bf16.msra.mxu0 %v10444_v9  ;;  %v10512_v9 = vld [vmem:[%s14265_s1 + $0x188c] ss:$16 sps:$4 sm:$0xff]  }
 0x364   :  { %7439 = vmatpush2.bf16.msra.mxu1 %v10447_v10  ;;  %7399 = vmatprep.subr.bf16.mxu0 %v10452_v39  ;;  %v10513_v10 = vld [vmem:[%s14265_s1 + $0x1a88] ss:$16 sps:$4 sm:$0xff]   ;;  %v10518_v39 = vld [vmem:[%s14265_s1 + $0x186c] ss:$16 sps:$4 sm:$0xff]  }
 0x365   :  { %7440 = vmatprep.subr.bf16.mxu1 %v10455_v41  ;;  %v10521_v41 = vld [vmem:[%s14265_s1 + $0x1a6c] ss:$16 sps:$4 sm:$0xff]  }
 0x367   :  { %7400 = vmatpush2.bf16.msra.mxu0 %v10450_v22  ;;  %v10516_v22 = vld [vmem:[%s14265_s1 + $0x1868] ss:$16 sps:$4 sm:$0xff]  }
 0x368   :  { %7441 = vmatpush2.bf16.msra.mxu1 %v10453_v6  ;;  %7401 = vmatprep.subr.bf16.mxu0 %v10458_v16  ;;  %v10519_v6 = vld [vmem:[%s14265_s1 + $0x1a68] ss:$16 sps:$4 sm:$0xff]   ;;  %v10524_v16 = vld [vmem:[%s14265_s1 + $0x184c] ss:$16 sps:$4 sm:$0xff]  }
 0x369   :  { %7442 = vmatprep.subr.bf16.mxu1 %v10461_v17  ;;  %v10527_v17 = vld [vmem:[%s14265_s1 + $0x1a4c] ss:$16 sps:$4 sm:$0xff]  }
 0x36b   :  { %7402 = vmatpush2.bf16.msra.mxu0 %v10456_v26  ;;  %v10522_v26 = vld [vmem:[%s14265_s1 + $0x1848] ss:$16 sps:$4 sm:$0xff]  }
 0x36c   :  { %7443 = vmatpush2.bf16.msra.mxu1 %v10459_v27  ;;  %7403 = vmatprep.subr.bf16.mxu0 %v10464_v42  ;;  %v10525_v27 = vld [vmem:[%s14265_s1 + $0x1a48] ss:$16 sps:$4 sm:$0xff]   ;;  %v10530_v42 = vld [vmem:[%s14265_s1 + $0x182c] ss:$16 sps:$4 sm:$0xff]  }
 0x36d   :  { %7444 = vmatprep.subr.bf16.mxu1 %v10467_v43  ;;  %v10533_v43 = vld [vmem:[%s14265_s1 + $0x1a2c] ss:$16 sps:$4 sm:$0xff]  }
 0x36f   :  { %7404 = vmatpush2.bf16.msra.mxu0 %v10462_v45  ;;  %v10528_v45 = vld [vmem:[%s14265_s1 + $0x1828] ss:$16 sps:$4 sm:$0xff]  }
 0x370   :  { %7445 = vmatpush2.bf16.msra.mxu1 %v10465_v48  ;;  %7405 = vmatprep.subr.bf16.mxu0 %v10470_v4  ;;  %v10531_v48 = vld [vmem:[%s14265_s1 + $0x1a28] ss:$16 sps:$4 sm:$0xff]   ;;  %v10536_v4 = vld [vmem:[%s14265_s1 + $0x180c] ss:$16 sps:$4 sm:$0xff]  }
 0x371   :  { %7446 = vmatprep.subr.bf16.mxu1 %v10473_v36  ;;  %v10539_v36 = vld [vmem:[%s14265_s1 + $0x1a0c] ss:$16 sps:$4 sm:$0xff]  }
 0x373   :  { %7406 = vmatpush2.bf16.msra.mxu0 %v10468_v37  ;;  %v10534_v37 = vld [vmem:[%s14265_s1 + $0x1808] ss:$16 sps:$4 sm:$0xff]  }
 0x374   :  { %7447 = vmatpush2.bf16.msra.mxu1 %v10471_v44  ;;  %7407 = vmatprep.subr.bf16.mxu0 %v10476_v24  ;;  %v10537_v44 = vld [vmem:[%s14265_s1 + $0x1a08] ss:$16 sps:$4 sm:$0xff]   ;;  %v10542_v24 = vld [vmem:[%s14265_s1 + $0x19ec] ss:$16 sps:$4 sm:$0xff]  }
 0x375   :  { %7448 = vmatprep.subr.bf16.mxu1 %v10479_v59  ;;  %v10545_v59 = vld [vmem:[%s14265_s1 + $0x1bec] ss:$16 sps:$4 sm:$0xff]  }
 0x377   :  { %7408 = vmatpush2.bf16.msra.mxu0 %v10474_v60  ;;  %v10540_v60 = vld [vmem:[%s14265_s1 + $0x19e8] ss:$16 sps:$4 sm:$0xff]  }
 0x378   :  { %7449 = vmatpush2.bf16.msra.mxu1 %v10477_v25  ;;  %7409 = vmatprep.subr.bf16.mxu0 %v10482_v49  ;;  %v10543_v25 = vld [vmem:[%s14265_s1 + $0x1be8] ss:$16 sps:$4 sm:$0xff]   ;;  %v10548_v49 = vld [vmem:[%s14265_s1 + $0x19cc] ss:$16 sps:$4 sm:$0xff]  }
 0x379   :  { %7450 = vmatprep.subr.bf16.mxu1 %v10485_v50  ;;  %v10551_v50 = vld [vmem:[%s14265_s1 + $0x1bcc] ss:$16 sps:$4 sm:$0xff]  }
 0x37b   :  { %7410 = vmatpush2.bf16.msra.mxu0 %v10480_v56  ;;  %v10546_v56 = vld [vmem:[%s14265_s1 + $0x19c8] ss:$16 sps:$4 sm:$0xff]  }
 0x37c   :  { %7451 = vmatpush2.bf16.msra.mxu1 %v10483_v57  ;;  %7411 = vmatprep.subr.bf16.mxu0 %v10488_v15  ;;  %v10549_v57 = vld [vmem:[%s14265_s1 + $0x1bc8] ss:$16 sps:$4 sm:$0xff]   ;;  %v10554_v15 = vld [vmem:[%s14265_s1 + $0x19ac] ss:$16 sps:$4 sm:$0xff]  }
 0x37d   :  { %7452 = vmatprep.subr.bf16.mxu1 %v10491_v53  ;;  %v10557_v53 = vld [vmem:[%s14265_s1 + $0x1bac] ss:$16 sps:$4 sm:$0xff]  }
 0x37f   :  { %7412 = vmatpush2.bf16.msra.mxu0 %v10486_v35  ;;  %v10552_v35 = vld [vmem:[%s14265_s1 + $0x19a8] ss:$16 sps:$4 sm:$0xff]  }
 0x380   :  { %7453 = vmatpush2.bf16.msra.mxu1 %v10489_v40  ;;  %7463 = vmatprep.subr.bf16.mxu0 %v10494_v19  ;;  %v10555_v40 = vld [vmem:[%s14265_s1 + $0x1ba8] ss:$16 sps:$4 sm:$0xff]   ;;  %v10560_v19 = vld [vmem:[%s14265_s1 + $0x198c] ss:$16 sps:$4 sm:$0xff]  }
 0x381   :  { %7504 = vmatprep.subr.bf16.mxu1 %v10497_v54  ;;  %v10563_v54 = vld [vmem:[%s14265_s1 + $0x1b8c] ss:$16 sps:$4 sm:$0xff]  }
 0x382   :  { %v7169_v14 = vpop.f32.mrf.mxu0  ;;  %7414 = vmatmul.mubr.bf16.vlgmr.msra.gmra.mxu0 %v12088_v2 }
 0x383   :  { %v7210_v20 = vpop.f32.mrf.mxu1  ;;  %7455 = vmatmul.mubr.bf16.vlgmr.msra.gmra.mxu1 %v12092_v3  ;;  %v7170_v0 = vadd.f32 %v7169_v14, %v13584_v18  ;;  %7464 = vmatpush1.bf16.msra.mxu0 %v10492_v58  ;;  %v10504_v3 = vld [vmem:[%s14265_s1 + $0x18a8] ss:$16 sps:$4 sm:$0xff]   ;;  %v10572_v14 = vld [vmem:[%s14265_s1 + $0x194c] ss:$16 sps:$4 sm:$0xff]  }
 0x384   :  { %7505 = vmatpush1.bf16.msra.mxu1 %v10495_v61  ;;  %v7171_v1 = vpop.f32.mrf.mxu0  ;;  %7465 = vmatprep.subr.bf16.mxu0 %v10500_v62  ;;  %v10507_v18 = vld [vmem:[%s14265_s1 + $0x1aa8] ss:$16 sps:$4 sm:$0xff]   ;;  %v10566_v62 = vld [vmem:[%s14265_s1 + $0x196c] ss:$16 sps:$4 sm:$0xff]  }
 0x385   :  { %v7212_v31 = vpop.f32.mrf.mxu1  ;;  %7506 = vmatprep.subr.bf16.mxu1 %v10503_v5  ;;  %v13786_v34 = vadd.f32 %v7210_v20, %v7170_v0  ;;  %v7172_v2 = vadd.f32 %v7171_v1, %v13589_v52  ;;  %7495 = vmatprep.mubr.bf16.mxu0 %v12118_v11  ;;  %v10515_v11 = vld [vmem:[%s14265_s1 + $0x1a8c] ss:$16 sps:$4 sm:$0xff]   ;;  %v10558_v58 = vld [vmem:[%s14265_s1 + $0x1988] ss:$16 sps:$4 sm:$0xff]  }
 0x386   :  { %7536 = vmatprep.mubr.bf16.mxu1 %v12122_v12  ;;  %v7173_v28 = vpop.f32.mrf.mxu0  ;;  %v10510_v12 = vld [vmem:[%s14265_s1 + $0x1888] ss:$16 sps:$4 sm:$0xff]   ;;  %v10569_v5 = vld [vmem:[%s14265_s1 + $0x1b6c] ss:$16 sps:$4 sm:$0xff]  }
 0x387   :  { %v7214_v47 = vpop.f32.mrf.mxu1  ;;  %v13797_v51 = vadd.f32 %v7212_v31, %v7172_v2  ;;  %7466 = vmatpush1.bf16.msra.mxu0 %v10498_v8  ;;  %v10561_v61 = vld [vmem:[%s14265_s1 + $0x1b88] ss:$16 sps:$4 sm:$0xff]   ;;  %v10575_v20 = vld [vmem:[%s14265_s1 + $0x1b4c] ss:$16 sps:$4 sm:$0xff]  }
 0x388   :  { %7507 = vmatpush1.bf16.msra.mxu1 %v10501_v13  ;;  %v7174_v38 = vpop.f32.mrf.mxu0  ;;  %7467 = vmatprep.subr.bf16.mxu0 %v10506_v46  ;;  %v10564_v8 = vld [vmem:[%s14265_s1 + $0x1968] ss:$16 sps:$4 sm:$0xff]   ;;  %v10578_v1 = vld [vmem:[%s14265_s1 + $0x192c] ss:$16 sps:$4 sm:$0xff]  }
 0x389   :  { %v7215_v52 = vpop.f32.mrf.mxu1  ;;  %7508 = vmatprep.subr.bf16.mxu1 %v10509_v63  ;;  %v10567_v13 = vld [vmem:[%s14265_s1 + $0x1b68] ss:$16 sps:$4 sm:$0xff]   ;;  %v10581_v31 = vld [vmem:[%s14265_s1 + $0x1b2c] ss:$16 sps:$4 sm:$0xff]  }
 0x38a   :  { %v10570_v46 = vld [vmem:[%s14265_s1 + $0x1948] ss:$16 sps:$4 sm:$0xff]   ;;  %v10590_v38 = vld [vmem:[%s14265_s1 + $0x1cec] ss:$16 sps:$4 sm:$0xff]  }
 0x38b   :  { %7468 = vmatpush1.bf16.msra.mxu0 %v10504_v3  ;;  %v10573_v0 = vld [vmem:[%s14265_s1 + $0x1b48] ss:$16 sps:$4 sm:$0xff]   ;;  %v10584_v3 = vld [vmem:[%s14265_s1 + $0x190c] ss:$16 sps:$4 sm:$0xff]  }
 0x38c   :  { %7509 = vmatpush1.bf16.msra.mxu1 %v10507_v18  ;;  %7469 = vmatprep.subr.bf16.mxu0 %v10512_v9  ;;  %v10576_v63 = vld [vmem:[%s14265_s1 + $0x1928] ss:$16 sps:$4 sm:$0xff]   ;;  %v10587_v18 = vld [vmem:[%s14265_s1 + $0x1b0c] ss:$16 sps:$4 sm:$0xff]  }
 0x38d   :  { %7510 = vmatprep.subr.bf16.mxu1 %v10515_v11  ;;  %v10579_v2 = vld [vmem:[%s14265_s1 + $0x1b28] ss:$16 sps:$4 sm:$0xff]   ;;  %v10593_v52 = vld [vmem:[%s14265_s1 + $0x1eec] ss:$16 sps:$4 sm:$0xff]  }
 0x38e   :  { %v10582_v28 = vld [vmem:[%s14265_s1 + $0x1908] ss:$16 sps:$4 sm:$0xff]  }
 0x38f   :  { %7470 = vmatpush1.bf16.msra.mxu0 %v10510_v12  ;;  %v10585_v47 = vld [vmem:[%s14265_s1 + $0x1b08] ss:$16 sps:$4 sm:$0xff]   ;;  %v10596_v12 = vld [vmem:[%s14265_s1 + $0x1ccc] ss:$16 sps:$4 sm:$0xff]  }
 0x390   :  { %7511 = vmatpush1.bf16.msra.mxu1 %v10513_v10  ;;  %7471 = vmatprep.subr.bf16.mxu0 %v10518_v39  ;;  %v10588_v9 = vld [vmem:[%s14265_s1 + $0x1ce8] ss:$16 sps:$4 sm:$0xff]   ;;  %v10599_v10 = vld [vmem:[%s14265_s1 + $0x1ecc] ss:$16 sps:$4 sm:$0xff]  }
 0x391   :  { %7512 = vmatprep.subr.bf16.mxu1 %v10521_v41  ;;  %v10591_v11 = vld [vmem:[%s14265_s1 + $0x1ee8] ss:$16 sps:$4 sm:$0xff]  }
 0x393   :  { %7472 = vmatpush1.bf16.msra.mxu0 %v10516_v22 }
 0x394   :  { %7513 = vmatpush1.bf16.msra.mxu1 %v10519_v6  ;;  %7473 = vmatprep.subr.bf16.mxu0 %v10524_v16  ;;  %v10594_v6 = vld [vmem:[%s14265_s1 + $0x1cc8] ss:$16 sps:$4 sm:$0xff]  }
 0x395   :  { %7514 = vmatprep.subr.bf16.mxu1 %v10527_v17  ;;  %v10597_v16 = vld [vmem:[%s14265_s1 + $0x1ec8] ss:$16 sps:$4 sm:$0xff]  }
 0x397   :  { %7474 = vmatpush1.bf16.msra.mxu0 %v10522_v26 }
 0x398   :  { %7515 = vmatpush1.bf16.msra.mxu1 %v10525_v27  ;;  %7475 = vmatprep.subr.bf16.mxu0 %v10530_v42 }
 0x399   :  { %7516 = vmatprep.subr.bf16.mxu1 %v10533_v43 }
 0x39b   :  { %7476 = vmatpush1.bf16.msra.mxu0 %v10528_v45 }
 0x39c   :  { %7517 = vmatpush1.bf16.msra.mxu1 %v10531_v48  ;;  %7477 = vmatprep.subr.bf16.mxu0 %v10536_v4  ;;  %v10600_v48 = vld [vmem:[%s14265_s1 + $0x1ca8] ss:$16 sps:$4 sm:$0xff]  }
 0x39d   :  { %7518 = vmatprep.subr.bf16.mxu1 %v10539_v36  ;;  %v10603_v4 = vld [vmem:[%s14265_s1 + $0x1ea8] ss:$16 sps:$4 sm:$0xff]  }
 0x39f   :  { %7478 = vmatpush1.bf16.msra.mxu0 %v10534_v37  ;;  %v10606_v37 = vld [vmem:[%s14265_s1 + $0x1c88] ss:$16 sps:$4 sm:$0xff]  }
 0x3a0   :  { %7519 = vmatpush1.bf16.msra.mxu1 %v10537_v44  ;;  %7479 = vmatprep.subr.bf16.mxu0 %v10542_v24  ;;  %v10609_v44 = vld [vmem:[%s14265_s1 + $0x1e88] ss:$16 sps:$4 sm:$0xff]   ;;  %v10614_v24 = vld [vmem:[%s14265_s1 + $0x1c6c] ss:$16 sps:$4 sm:$0xff]  }
 0x3a1   :  { %7520 = vmatprep.subr.bf16.mxu1 %v10545_v59  ;;  %v10617_v59 = vld [vmem:[%s14265_s1 + $0x1e6c] ss:$16 sps:$4 sm:$0xff]  }
 0x3a3   :  { %7480 = vmatpush2.bf16.msra.mxu0 %v10540_v60  ;;  %v10612_v60 = vld [vmem:[%s14265_s1 + $0x1c68] ss:$16 sps:$4 sm:$0xff]  }
 0x3a4   :  { %7521 = vmatpush2.bf16.msra.mxu1 %v10543_v25  ;;  %7481 = vmatprep.subr.bf16.mxu0 %v10548_v49  ;;  %v10615_v25 = vld [vmem:[%s14265_s1 + $0x1e68] ss:$16 sps:$4 sm:$0xff]   ;;  %v10620_v49 = vld [vmem:[%s14265_s1 + $0x1c4c] ss:$16 sps:$4 sm:$0xff]  }
 0x3a5   :  { %7522 = vmatprep.subr.bf16.mxu1 %v10551_v50  ;;  %v10623_v50 = vld [vmem:[%s14265_s1 + $0x1e4c] ss:$16 sps:$4 sm:$0xff]  }
 0x3a7   :  { %7482 = vmatpush2.bf16.msra.mxu0 %v10546_v56  ;;  %v10618_v56 = vld [vmem:[%s14265_s1 + $0x1c48] ss:$16 sps:$4 sm:$0xff]  }
 0x3a8   :  { %7523 = vmatpush2.bf16.msra.mxu1 %v10549_v57  ;;  %7483 = vmatprep.subr.bf16.mxu0 %v10554_v15  ;;  %v10621_v57 = vld [vmem:[%s14265_s1 + $0x1e48] ss:$16 sps:$4 sm:$0xff]   ;;  %v10626_v15 = vld [vmem:[%s14265_s1 + $0x1c2c] ss:$16 sps:$4 sm:$0xff]  }
 0x3a9   :  { %7524 = vmatprep.subr.bf16.mxu1 %v10557_v53  ;;  %v10629_v53 = vld [vmem:[%s14265_s1 + $0x1e2c] ss:$16 sps:$4 sm:$0xff]  }
 0x3ab   :  { %7484 = vmatpush2.bf16.msra.mxu0 %v10552_v35  ;;  %v10624_v35 = vld [vmem:[%s14265_s1 + $0x1c28] ss:$16 sps:$4 sm:$0xff]  }
 0x3ac   :  { %7525 = vmatpush2.bf16.msra.mxu1 %v10555_v40  ;;  %7485 = vmatprep.subr.bf16.mxu0 %v10560_v19  ;;  %v10627_v40 = vld [vmem:[%s14265_s1 + $0x1e28] ss:$16 sps:$4 sm:$0xff]   ;;  %v10632_v19 = vld [vmem:[%s14265_s1 + $0x1c0c] ss:$16 sps:$4 sm:$0xff]  }
 0x3ad   :  { %7526 = vmatprep.subr.bf16.mxu1 %v10563_v54  ;;  %v10635_v54 = vld [vmem:[%s14265_s1 + $0x1e0c] ss:$16 sps:$4 sm:$0xff]  }
 0x3af   :  { %7486 = vmatpush2.bf16.msra.mxu0 %v10558_v58  ;;  %v10630_v58 = vld [vmem:[%s14265_s1 + $0x1c08] ss:$16 sps:$4 sm:$0xff]  }
 0x3b0   :  { %7527 = vmatpush2.bf16.msra.mxu1 %v10561_v61  ;;  %7487 = vmatprep.subr.bf16.mxu0 %v10566_v62  ;;  %v10633_v61 = vld [vmem:[%s14265_s1 + $0x1e08] ss:$16 sps:$4 sm:$0xff]   ;;  %v10638_v62 = vld [vmem:[%s14265_s1 + $0x1dec] ss:$16 sps:$4 sm:$0xff]  }
 0x3b1   :  { %7528 = vmatprep.subr.bf16.mxu1 %v10569_v5  ;;  %v10641_v5 = vld [vmem:[%s14265_s1 + $0x1fec] ss:$16 sps:$4 sm:$0xff]  }
 0x3b3   :  { %7488 = vmatpush2.bf16.msra.mxu0 %v10564_v8  ;;  %v10636_v8 = vld [vmem:[%s14265_s1 + $0x1de8] ss:$16 sps:$4 sm:$0xff]  }
 0x3b4   :  { %7529 = vmatpush2.bf16.msra.mxu1 %v10567_v13  ;;  %7489 = vmatprep.subr.bf16.mxu0 %v10572_v14  ;;  %v10639_v13 = vld [vmem:[%s14265_s1 + $0x1fe8] ss:$16 sps:$4 sm:$0xff]   ;;  %v10644_v14 = vld [vmem:[%s14265_s1 + $0x1dcc] ss:$16 sps:$4 sm:$0xff]  }
 0x3b5   :  { %7530 = vmatprep.subr.bf16.mxu1 %v10575_v20  ;;  %v10647_v20 = vld [vmem:[%s14265_s1 + $0x1fcc] ss:$16 sps:$4 sm:$0xff]  }
 0x3b7   :  { %7490 = vmatpush2.bf16.msra.mxu0 %v10570_v46  ;;  %v10642_v46 = vld [vmem:[%s14265_s1 + $0x1dc8] ss:$16 sps:$4 sm:$0xff]  }
 0x3b8   :  { %7531 = vmatpush2.bf16.msra.mxu1 %v10573_v0  ;;  %7491 = vmatprep.subr.bf16.mxu0 %v10578_v1  ;;  %v10645_v0 = vld [vmem:[%s14265_s1 + $0x1fc8] ss:$16 sps:$4 sm:$0xff]   ;;  %v10650_v1 = vld [vmem:[%s14265_s1 + $0x1dac] ss:$16 sps:$4 sm:$0xff]  }
 0x3b9   :  { %7532 = vmatprep.subr.bf16.mxu1 %v10581_v31  ;;  %v10653_v31 = vld [vmem:[%s14265_s1 + $0x1fac] ss:$16 sps:$4 sm:$0xff]  }
 0x3bb   :  { %7492 = vmatpush2.bf16.msra.mxu0 %v10576_v63  ;;  %v10648_v63 = vld [vmem:[%s14265_s1 + $0x1da8] ss:$16 sps:$4 sm:$0xff]  }
 0x3bc   :  { %7533 = vmatpush2.bf16.msra.mxu1 %v10579_v2  ;;  %7493 = vmatprep.subr.bf16.mxu0 %v10584_v3  ;;  %v10651_v2 = vld [vmem:[%s14265_s1 + $0x1fa8] ss:$16 sps:$4 sm:$0xff]   ;;  %v10656_v3 = vld [vmem:[%s14265_s1 + $0x1d8c] ss:$16 sps:$4 sm:$0xff]  }
 0x3bd   :  { %7534 = vmatprep.subr.bf16.mxu1 %v10587_v18  ;;  %v10659_v18 = vld [vmem:[%s14265_s1 + $0x1f8c] ss:$16 sps:$4 sm:$0xff]  }
 0x3bf   :  { %7494 = vmatpush2.bf16.msra.mxu0 %v10582_v28  ;;  %v10654_v28 = vld [vmem:[%s14265_s1 + $0x1d88] ss:$16 sps:$4 sm:$0xff]  }
 0x3c0   :  { %7535 = vmatpush2.bf16.msra.mxu1 %v10585_v47  ;;  %7545 = vmatprep.subr.bf16.mxu0 %v10590_v38  ;;  %v10657_v47 = vld [vmem:[%s14265_s1 + $0x1f88] ss:$16 sps:$4 sm:$0xff]   ;;  %v10662_v38 = vld [vmem:[%s14265_s1 + $0x1d6c] ss:$16 sps:$4 sm:$0xff]  }
 0x3c1   :  { %7586 = vmatprep.subr.bf16.mxu1 %v10593_v52  ;;  %v10665_v52 = vld [vmem:[%s14265_s1 + $0x1f6c] ss:$16 sps:$4 sm:$0xff]  }
 0x3c2   :  { %v7251_v39 = vpop.f32.mrf.mxu0  ;;  %7496 = vmatmul.mubr.bf16.vlgmr.msra.gmra.mxu0 %v12326_v21  ;;  %v10602_v21 = vld [vmem:[%s14265_s1 + $0x1cac] ss:$16 sps:$4 sm:$0xff]  }
 0x3c3   :  { %v7292_v41 = vpop.f32.mrf.mxu1  ;;  %7537 = vmatmul.mubr.bf16.vlgmr.msra.gmra.mxu1 %v12330_v29  ;;  %v7252_v22 = vadd.f32 %v7251_v39, %v13786_v34  ;;  %7546 = vmatpush1.bf16.msra.mxu0 %v10588_v9  ;;  %v10605_v29 = vld [vmem:[%s14265_s1 + $0x1eac] ss:$16 sps:$4 sm:$0xff]   ;;  %v10660_v9 = vld [vmem:[%s14265_s1 + $0x1d68] ss:$16 sps:$4 sm:$0xff]  }
 0x3c4   :  { %7587 = vmatpush1.bf16.msra.mxu1 %v10591_v11  ;;  %v7253_v17 = vpop.f32.mrf.mxu0  ;;  %7547 = vmatprep.subr.bf16.mxu0 %v10596_v12  ;;  %v10663_v11 = vld [vmem:[%s14265_s1 + $0x1f68] ss:$16 sps:$4 sm:$0xff]   ;;  %v10668_v12 = vld [vmem:[%s14265_s1 + $0x1d4c] ss:$16 sps:$4 sm:$0xff]  }
 0x3c5   :  { %v7294_v26 = vpop.f32.mrf.mxu1  ;;  %7588 = vmatprep.subr.bf16.mxu1 %v10599_v10  ;;  %v13988_v34 = vadd.f32 %v7292_v41, %v7252_v22  ;;  %v7254_v27 = vadd.f32 %v7253_v17, %v13797_v51  ;;  %7577 = vmatprep.mubr.bf16.mxu0 %v12346_v30  ;;  %v10608_v30 = vld [vmem:[%s14265_s1 + $0x1c8c] ss:$16 sps:$4 sm:$0xff]   ;;  %v10666_v39 = vld [vmem:[%s14265_s1 + $0x1d48] ss:$16 sps:$4 sm:$0xff]  }
 0x3c6   :  { %7618 = vmatprep.mubr.bf16.mxu1 %v12350_v32  ;;  %v7255_v42 = vpop.f32.mrf.mxu0  ;;  %v10611_v32 = vld [vmem:[%s14265_s1 + $0x1e8c] ss:$16 sps:$4 sm:$0xff]   ;;  %v10669_v41 = vld [vmem:[%s14265_s1 + $0x1f48] ss:$16 sps:$4 sm:$0xff]  }
 0x3c7   :  { %v7296_v43 = vpop.f32.mrf.mxu1  ;;  %v13993_v45 = vadd.f32 %v7294_v26, %v7254_v27  ;;  %7548 = vmatpush1.bf16.msra.mxu0 %v10594_v6  ;;  %v10671_v10 = vld [vmem:[%s14265_s1 + $0x1f4c] ss:$16 sps:$4 sm:$0xff]   ;;  %v10675_v17 = vld [vmem:[%s14265_s1 + $0x1f28] ss:$16 sps:$4 sm:$0xff]  }
 0x3c8   :  { %7589 = vmatpush1.bf16.msra.mxu1 %v10597_v16  ;;  %v7256_v36 = vpop.f32.mrf.mxu0  ;;  %7549 = vmatprep.subr.bf16.mxu0 %v10602_v21  ;;  %v10674_v22 = vld [vmem:[%s14265_s1 + $0x1d2c] ss:$16 sps:$4 sm:$0xff]   ;;  %v10672_v16 = vld [vmem:[%s14265_s1 + $0x1d28] ss:$16 sps:$4 sm:$0xff]   ;;  %v7628_v43 = vmax.f32 %v13182_v7, 0.0 }
 0x3c9   :  { %v7297_v51 = vpop.f32.mrf.mxu1  ;;  %7590 = vmatprep.subr.bf16.mxu1 %v10605_v29  ;;  %v10677_v6 = vld [vmem:[%s14265_s1 + $0x1f2c] ss:$16 sps:$4 sm:$0xff]   ;;  %v10678_v29 = vld [vmem:[%s14265_s1 + $0x1d08] ss:$16 sps:$4 sm:$0xff]  }
 0x3ca   :  { %v10680_v26 = vld [vmem:[%s14265_s1 + $0x1d0c] ss:$16 sps:$4 sm:$0xff]   ;;  %v10681_v27 = vld [vmem:[%s14265_s1 + $0x1f08] ss:$16 sps:$4 sm:$0xff]   ;;  %v7632_v36 = vpack.c.bf16 %v7628_v43, %v7628_v43 }
 0x3cb   :  { %7550 = vmatpush1.bf16.msra.mxu0 %v10600_v48  ;;  %v10683_v21 = vld [vmem:[%s14265_s1 + $0x1f0c] ss:$16 sps:$4 sm:$0xff]  }
 0x3cc   :  { %7591 = vmatpush1.bf16.msra.mxu1 %v10603_v4  ;;  %7551 = vmatprep.subr.bf16.mxu0 %v10608_v30  ;;  %v10684_v42 = vld [vmem:[%s14268_s3 + $0x78] sm:$0xff]   ;;  %v10686_v4 = vld [vmem:[%s14268_s3 + $0x70] sm:$0xff]  }
 0x3cd   :  { %7592 = vmatprep.subr.bf16.mxu1 %v10611_v32  ;;  %v10685_v48 = vld [vmem:[%s14268_s3 + $0x38] sm:$0xff]   ;;  %v10687_v32 = vld [vmem:[%s14268_s3 + $0x30] sm:$0xff]  }
 0x3cf   :  { %7552 = vmatpush1.bf16.msra.mxu0 %v10606_v37 }
 0x3d0   :  { %7593 = vmatpush1.bf16.msra.mxu1 %v10609_v44  ;;  %7553 = vmatprep.subr.bf16.mxu0 %v10614_v24  ;;  %v10688_v24 = vld [vmem:[%s14268_s3 + $0x68] sm:$0xff]  }
 0x3d1   :  { %7594 = vmatprep.subr.bf16.mxu1 %v10617_v59 }
 0x3d3   :  { %7554 = vmatpush1.bf16.msra.mxu0 %v10612_v60 }
 0x3d4   :  { %7595 = vmatpush1.bf16.msra.mxu1 %v10615_v25  ;;  %7555 = vmatprep.subr.bf16.mxu0 %v10620_v49  ;;  %v10690_v49 = vld [vmem:[%s14268_s3 + $0x60] sm:$0xff]  }
 0x3d5   :  { %7596 = vmatprep.subr.bf16.mxu1 %v10623_v50 }
 0x3d7   :  { %7556 = vmatpush1.bf16.msra.mxu0 %v10618_v56 }
 0x3d8   :  { %7597 = vmatpush1.bf16.msra.mxu1 %v10621_v57  ;;  %7557 = vmatprep.subr.bf16.mxu0 %v10626_v15  ;;  %v10700_v57 = vld [vmem:[%s14268_s3 + $0xf8] sm:$0xff]   ;;  %v10702_v15 = vld [vmem:[%s14268_s3 + $0xf0] sm:$0xff]  }
 0x3d9   :  { %7598 = vmatprep.subr.bf16.mxu1 %v10629_v53  ;;  %v10691_v53 = vld [vmem:[%s14268_s3 + $0x20] sm:$0xff]  }
 0x3db   :  { %7558 = vmatpush1.bf16.msra.mxu0 %v10624_v35  ;;  %v10703_v35 = vld [vmem:[%s14268_s3 + $0xb0] sm:$0xff]  }
 0x3dc   :  { %7599 = vmatpush1.bf16.msra.mxu1 %v10627_v40  ;;  %7559 = vmatprep.subr.bf16.mxu0 %v10632_v19  ;;  %v10692_v40 = vld [vmem:[%s14268_s3 + $0x58] sm:$0xff]   ;;  %v10704_v19 = vld [vmem:[%s14268_s3 + $0xe8] sm:$0xff]  }
 0x3dd   :  { %7600 = vmatprep.subr.bf16.mxu1 %v10635_v54  ;;  %v10693_v54 = vld [vmem:[%s14268_s3 + $0x18] sm:$0xff]  }
 0x3df   :  { %7560 = vmatpush1.bf16.msra.mxu0 %v10630_v58  ;;  %v10705_v58 = vld [vmem:[%s14268_s3 + $0xa8] sm:$0xff]  }
 0x3e0   :  { %7601 = vmatpush1.bf16.msra.mxu1 %v10633_v61  ;;  %7561 = vmatprep.subr.bf16.mxu0 %v10638_v62  ;;  %v10694_v61 = vld [vmem:[%s14268_s3 + $0x50] sm:$0xff]   ;;  %v10706_v62 = vld [vmem:[%s14268_s3 + $0xe0] sm:$0xff]  }
 0x3e1   :  { %7602 = vmatprep.subr.bf16.mxu1 %v10641_v5  ;;  %v10695_v5 = vld [vmem:[%s14268_s3 + $0x10] sm:$0xff]  }
 0x3e3   :  { %7562 = vmatpush2.bf16.msra.mxu0 %v10636_v8  ;;  %v10707_v8 = vld [vmem:[%s14268_s3 + $0xa0] sm:$0xff]  }
 0x3e4   :  { %7603 = vmatpush2.bf16.msra.mxu1 %v10639_v13  ;;  %7563 = vmatprep.subr.bf16.mxu0 %v10644_v14  ;;  %v10696_v13 = vld [vmem:[%s14268_s3 + $0x48] sm:$0xff]   ;;  %v10708_v14 = vld [vmem:[%s14268_s3 + $0xd8] sm:$0xff]  }
 0x3e5   :  { %7604 = vmatprep.subr.bf16.mxu1 %v10647_v20  ;;  %v10697_v20 = vld [vmem:[%s14268_s3 + $0x8] sm:$0xff]  }
 0x3e7   :  { %7564 = vmatpush2.bf16.msra.mxu0 %v10642_v46  ;;  %v10709_v46 = vld [vmem:[%s14268_s3 + $0x98] sm:$0xff]  }
 0x3e8   :  { %7605 = vmatpush2.bf16.msra.mxu1 %v10645_v0  ;;  %7565 = vmatprep.subr.bf16.mxu0 %v10650_v1  ;;  %v10698_v0 = vld [vmem:[%s14268_s3 + $0x40] sm:$0xff]  }
 0x3e9   :  { %7606 = vmatprep.subr.bf16.mxu1 %v10653_v31  ;;  %v10699_v1 = vld [vmem:[%s14268_s3] sm:$0xff]   ;;  %v7627_v31 = vmax.f32 %v13177_v23, 0.0  ;;  %v10712_v23 = vld [vmem:[%s14268_s3 + $0xc8] sm:$0xff]  }
 0x3eb   :  { %7566 = vmatpush2.bf16.msra.mxu0 %v10648_v63  ;;  %v7631_v63 = vpack.c.bf16 %v7627_v31, %v7627_v31 }
 0x3ec   :  { %7607 = vmatpush2.bf16.msra.mxu1 %v10651_v2  ;;  %7567 = vmatprep.subr.bf16.mxu0 %v10656_v3  ;;  %v10710_v2 = vld [vmem:[%s14268_s3 + $0xd0] sm:$0xff]  }
 0x3ed   :  { %7608 = vmatprep.subr.bf16.mxu1 %v10659_v18  ;;  %v10711_v3 = vld [vmem:[%s14268_s3 + $0x90] sm:$0xff]  }
 0x3ef   :  { %7568 = vmatpush2.bf16.msra.mxu0 %v10654_v28 }
 0x3f0   :  { %7609 = vmatpush2.bf16.msra.mxu1 %v10657_v47  ;;  %7569 = vmatprep.subr.bf16.mxu0 %v10662_v38 }
 0x3f1   :  { %7610 = vmatprep.subr.bf16.mxu1 %v10665_v52 }
 0x3f3   :  { %7570 = vmatpush2.bf16.msra.mxu0 %v10660_v9 }
 0x3f4   :  { %7611 = vmatpush2.bf16.msra.mxu1 %v10663_v11  ;;  %7571 = vmatprep.subr.bf16.mxu0 %v10668_v12  ;;  %v10713_v12 = vld [vmem:[%s14268_s3 + $0x88] sm:$0xff]  }
 0x3f5   :  { %7612 = vmatprep.subr.bf16.mxu1 %v10671_v10 }
 0x3f7   :  { %7572 = vmatpush2.bf16.msra.mxu0 %v10666_v39 }
 0x3f8   :  { %7613 = vmatpush2.bf16.msra.mxu1 %v10669_v41  ;;  %7573 = vmatprep.subr.bf16.mxu0 %v10674_v22 }
 0x3f9   :  { %7614 = vmatprep.subr.bf16.mxu1 %v10677_v6 }
 0x3fb   :  { %7574 = vmatpush2.bf16.msra.mxu0 %v10672_v16  ;;  %v10714_v16 = vld [vmem:[%s14268_s3 + $0xc0] sm:$0xff]  }
 0x3fc   :  { %7615 = vmatpush2.bf16.msra.mxu1 %v10675_v17  ;;  %7575 = vmatprep.subr.bf16.mxu0 %v10680_v26  ;;  %v10715_v17 = vld [vmem:[%s14268_s3 + $0x80] sm:$0xff]  }
 0x3fd   :  { %7616 = vmatprep.subr.bf16.mxu1 %v10683_v21 }
 0x3ff   :  { %7576 = vmatpush2.bf16.msra.mxu0 %v10678_v29 }
 0x400   :  { %7617 = vmatpush2.bf16.msra.mxu1 %v10681_v27  ;;  %9072 = vmatprep.subr.bf16.mxu0 %v10684_v42 }
 0x401   :  { %9094 = vmatprep.subr.bf16.mxu1 %v10700_v57 }
 0x402   :  { %v7333_v51 = vpop.f32.mrf.mxu0  ;;  %7578 = vmatmul.mubr.bf16.vlgmr.msra.gmra.mxu0 %v12544_v55 }
 0x403   :  { %v7374_v30 = vpop.f32.mrf.mxu1  ;;  %7619 = vmatmul.mubr.bf16.vlgmr.msra.gmra.mxu1 %v12548_v33  ;;  %v7334_v7 = vadd.f32 %v7333_v51, %v13988_v34  ;;  %9073 = vmatpush3.bf16.msra.mxu0 %v10685_v48  ;;  %v10689_v34 = vld [vmem:[%s14268_s3 + $0x28] sm:$0xff]  }
 0x404   :  { %7930 = vmatprep.mubr.bf16.mxu0 %v7632_v36  ;;  %v7335_v37 = vpop.f32.mrf.mxu0  ;;  %9074 = vmatprep.subr.bf16.mxu0 %v10686_v4 }
 0x405   :  { %v7376_v44 = vpop.f32.mrf.mxu1  ;;  %v7375_v59 = vadd.f32 %v7374_v30, %v7334_v7  ;;  %v7336_v55 = vadd.f32 %v7335_v37, %v13993_v45  ;;  %v10701_v45 = vld [vmem:[%s14268_s3 + $0xb8] sm:$0xff]  }
 0x406   :  { %v7337_v60 = vpop.f32.mrf.mxu0  ;;  %9095 = vmatpush3.bf16.msra.mxu1 %v10701_v45 }
 0x407   :  { %v7378_v33 = vpop.f32.mrf.mxu1  ;;  %v7377_v25 = vadd.f32 %v7376_v44, %v7336_v55  ;;  %9075 = vmatpush3.bf16.msra.mxu0 %v10687_v32  ;;  %9096 = vmatprep.subr.bf16.mxu1 %v10702_v15 }
 0x408   :  { %v7338_v50 = vpop.f32.mrf.mxu0  ;;  %9076 = vmatprep.subr.bf16.mxu0 %v10688_v24 }
 0x409   :  { %v7379_v56 = vpop.f32.mrf.mxu1 }
 0x40a   :  { %9097 = vmatpush3.bf16.msra.mxu1 %v10703_v35 }
 0x40b   :  { %9077 = vmatpush3.bf16.msra.mxu0 %v10689_v34  ;;  %9098 = vmatprep.subr.bf16.mxu1 %v10704_v19 }
 0x40c   :  { %9078 = vmatprep.subr.bf16.mxu0 %v10690_v49 }
 0x40e   :  { %9099 = vmatpush3.bf16.msra.mxu1 %v10705_v58  ;;  %v9039_v58 = vld [vmem:[%s14269_s4] ss:$0 sm:$0xff] }
 0x40f   :  { %9079 = vmatpush3.bf16.msra.mxu0 %v10691_v53  ;;  %9100 = vmatprep.subr.bf16.mxu1 %v10706_v62 }
 0x410   :  { %9080 = vmatprep.subr.bf16.mxu0 %v10692_v40 }
 0x412   :  { %9101 = vmatpush3.bf16.msra.mxu1 %v10707_v8 }
 0x413   :  { %9081 = vmatpush3.bf16.msra.mxu0 %v10693_v54  ;;  %9102 = vmatprep.subr.bf16.mxu1 %v10708_v14 }
 0x414   :  { %9082 = vmatprep.subr.bf16.mxu0 %v10694_v61 }
 0x416   :  { %9103 = vmatpush3.bf16.msra.mxu1 %v10709_v46 }
 0x417   :  { %9083 = vmatpush3.bf16.msra.mxu0 %v10695_v5  ;;  %9104 = vmatprep.subr.bf16.mxu1 %v10710_v2 }
 0x418   :  { %9084 = vmatprep.subr.bf16.mxu0 %v10696_v13 }
 0x41a   :  { %9105 = vmatpush3.bf16.msra.mxu1 %v10711_v3 }
 0x41b   :  { %9085 = vmatpush3.bf16.msra.mxu0 %v10697_v20  ;;  %9106 = vmatprep.subr.bf16.mxu1 %v10712_v23 }
 0x41c   :  { %9086 = vmatprep.subr.bf16.mxu0 %v10698_v0 }
 0x41e   :  { %9107 = vmatpush3.bf16.msra.mxu1 %v10713_v12 }
 0x41f   :  { %9087 = vmatpush3.bf16.msra.mxu0 %v10699_v1  ;;  %9108 = vmatprep.subr.bf16.mxu1 %v10714_v16 }
 0x422   :  { %7931 = vmatmul.mubr.bf16.vlgmr.msra.gmra.mxu0 %v7631_v63  ;;  %9109 = vmatpush3.bf16.msra.mxu1 %v10715_v17 }
 0x442   :  { %v7415_v18 = vpop.f32.mrf.mxu0 }
 0x443   :  { %v7456_v28 = vpop.f32.mrf.mxu1  ;;  %v7416_v47 = vadd.f32 %v7415_v18, %v7375_v59 }
 0x444   :  { %v7417_v38 = vpop.f32.mrf.mxu0 }
 0x445   :  { %v7458_v52 = vpop.f32.mrf.mxu1  ;;  %v7457_v9 = vadd.f32 %v7456_v28, %v7416_v47  ;;  %v7418_v11 = vadd.f32 %v7417_v38, %v7377_v25 }
 0x446   :  { %v7419_v10 = vpop.f32.mrf.mxu0 }
 0x447   :  { %v7460_v39 = vpop.f32.mrf.mxu1  ;;  %v7459_v41 = vadd.f32 %v7458_v52, %v7418_v11 }
 0x448   :  { %v7420_v22 = vpop.f32.mrf.mxu0 }
 0x449   :  { %v7461_v6 = vpop.f32.mrf.mxu1 }
 0x482   :  { %v7497_v26 = vpop.f32.mrf.mxu0 }
 0x483   :  { %v7538_v21 = vpop.f32.mrf.mxu1  ;;  %v7498_v29 = vadd.f32 %v7497_v26, %v7457_v9 }
 0x484   :  { %v7499_v27 = vpop.f32.mrf.mxu0 }
 0x485   :  { %v7540_v42 = vpop.f32.mrf.mxu1  ;;  %v7539_v43 = vadd.f32 %v7538_v21, %v7498_v29  ;;  %v7500_v30 = vadd.f32 %v7499_v27, %v7459_v41 }
 0x486   :  { %v7501_v48 = vpop.f32.mrf.mxu0 }
 0x487   :  { %v7542_v4 = vpop.f32.mrf.mxu1  ;;  %v7541_v37 = vadd.f32 %v7540_v42, %v7500_v30 }
 0x488   :  { %v7502_v36 = vpop.f32.mrf.mxu0 }
 0x489   :  { %v7543_v51 = vpop.f32.mrf.mxu1 }
 0x4c2   :  { %v7579_v7 = vpop.f32.mrf.mxu0 }
 0x4c3   :  { %v7620_v32 = vpop.f32.mrf.mxu1  ;;  %v7580_v44 = vadd.f32 %v7579_v7, %v7539_v43 }
 0x4c4   :  { %v7581_v24 = vpop.f32.mrf.mxu0 }
 0x4c5   :  { %v7622_v59 = vpop.f32.mrf.mxu1  ;;  %v7621_v55 = vadd.f32 %v7620_v32, %v7580_v44  ;;  %v7582_v60 = vadd.f32 %v7581_v24, %v7541_v37 }
 0x4c6   :  { %v7583_v33 = vpop.f32.mrf.mxu0 }
 0x4c7   :  { %v7624_v25 = vpop.f32.mrf.mxu1  ;;  %v7623_v34 = vadd.f32 %v7622_v59, %v7582_v60  ;;  %v7629_v49 = vmax.f32 %v7621_v55, 0.0 }
 0x4c8   :  { %v7584_v50 = vpop.f32.mrf.mxu0 }
 0x4c9   :  { %v7625_v56 = vpop.f32.mrf.mxu1  ;;  %v7630_v57 = vmax.f32 %v7623_v34, 0.0  ;;  %v7633_v15 = vpack.c.bf16 %v7629_v49, %v7629_v49 }
 0x4cb   :  { %v7634_v45 = vpack.c.bf16 %v7630_v57, %v7630_v57 }
 0x4cd   :  { %7970 = vmatprep.mubr.bf16.mxu1 %v7634_v45 }
 0x4ce   :  { %7971 = vmatmul.mubr.bf16.vlgmr.msra.gmra.mxu1 %v7633_v15 }
 0x4e2   :  { %v9088_v53 = vpop.f32.mrf.mxu0 }
 0x4e4   :  { %v9089_v35 = vpop.f32.mrf.mxu0 }
 0x4e5   :  { %v9090_v40 = vadd.f32 %v9089_v35, %v9088_v53 }
 0x4e6   :  { %v9091_v19 = vpop.f32.mrf.mxu0 }
 0x4e7   :  { %v7933_v5 = vadd.f32 %v9090_v40, %v9039_v58 }
 0x4e8   :  { %v9092_v54 = vpop.f32.mrf.mxu0 }
 0x58e   :  { %v9110_v61 = vpop.f32.mrf.mxu1 }
 0x590   :  { %v9111_v62 = vpop.f32.mrf.mxu1 }
 0x591   :  { %v9112_v8 = vadd.f32 %v9111_v62, %v9110_v61 }
 0x592   :  { %v9113_v13 = vpop.f32.mrf.mxu1 }
 0x593   :  { %v7973_v14 = vadd.f32 %v9112_v8, %v7933_v5 }
 0x594   :  { %v9114_v20 = vpop.f32.mrf.mxu1 }
 0x595   :  { %7978 = vst [vmem:[%s14270_s5] sm:$0xff] %v7973_v14 }

</bundles_post_ra>
